<compile_context>
chip_gen: v5e
topology: v5e:2x2
jax: 0.10.0
libtpu: 0.0.40
codegen_flags: <defaults>
</compile_context>

<pallas_src>
import functools

import jax
import jax.numpy as jnp
from jax import lax
from jax.experimental import pallas as pl
from jax.experimental.pallas import tpu as pltpu


# ---------------------------------------------------------------------------
# Kernel
# ---------------------------------------------------------------------------
def _bottleneck_kernel(H, W, b_tile, pad_rows,
                       x_ref, w1_ref, b1_ref, w2_ref, b2_ref, w3_ref, b3_ref,
                       o_ref, hal_ref):
    M = H * W
    width = w1_ref.shape[1]
    P = pad_rows                       # 8-aligned interior offset, P >= W + 1

    # x-position of every flattened output row; masks the column-wrap rows of the
    # dX = +/-1 taps (the row-halo layout wraps x across image rows).
    xpos = lax.broadcasted_iota(jnp.int32, (M, 1), 0) % W
    left_ok = xpos >= 1                # input column x-1 exists
    right_ok = xpos <= W - 2           # input column x+1 exists

    # Zero ONLY the halo rows every step (interior fully overwritten per image;
    # not gated on program_id -> safe under megacore/parallel scheduling).
    hal_ref[0:P, :] = jnp.zeros((P, width), jnp.float32)
    hal_ref[P + M:, :] = jnp.zeros((hal_ref.shape[0] - P - M, width), jnp.float32)

    for b in range(b_tile):
        # ---- stage 1: 1x1 conv (BN1 scale folded into weights) + shift + ReLU ----
        # x is consumed directly as bf16; the f32 residual is NOT kept live here.
        t = jnp.dot(x_ref[b].astype(jnp.bfloat16), w1_ref[...],
                    preferred_element_type=jnp.float32)
        t = jnp.maximum(t + b1_ref[...], 0.0)                    # (M, width) f32

        # Stage-1 activation into the row-halo scratch (8-aligned interior write).
        hal_ref[P:P + M, :] = t

        # ---- stage 2: 3x3 conv as ONE im2col matmul (K = 9*width) ----
        pieces = []
        for k in range(9):
            dY, dX = k // 3 - 1, k % 3 - 1
            s = dY * W + dX
            piece = hal_ref[P + s:P + s + M, :]                  # contiguous row slice
            if dX == -1:
                piece = jnp.where(left_ok, piece, 0.0)
            elif dX == 1:
                piece = jnp.where(right_ok, piece, 0.0)
            pieces.append(piece)
        patch = jnp.concatenate(pieces, axis=-1).astype(jnp.bfloat16)  # (M, 9*width)
        u = jnp.dot(patch, w2_ref[...], preferred_element_type=jnp.float32)
        u = jnp.maximum(u + b2_ref[...], 0.0)                    # (M, width) f32

        # ---- stage 3: 1x1 conv + shift + identity residual (re-read) + ReLU ----
        v = jnp.dot(u.astype(jnp.bfloat16), w3_ref[...],
                    preferred_element_type=jnp.float32)
        v = v + b3_ref[...] + x_ref[b]                           # fresh f32 residual read
        o_ref[b] = jnp.maximum(v, 0.0).astype(o_ref.dtype)


# ---------------------------------------------------------------------------
# Wrappers
# ---------------------------------------------------------------------------
def bottleneck_forward_nhwc(x_nhwc, params, *, b_tile=None, out_dtype=jnp.float32):
    """Fused bottleneck forward on NHWC activations (stride=1, groups=1, dilation=1,
    downsample=None).  `out_dtype=jnp.bfloat16` halves output writeback if the
    consumer accepts it."""
    N, H, W, Cin = x_nhwc.shape
    w1, b1 = params["w1"], params["b1"]
    w2, b2 = params["w2"], params["b2"]
    w3, b3 = params["w3"], params["b3"]
    width = w1.shape[1]
    Cout = w3.shape[1]
    assert Cout == Cin, "identity residual requires inplanes == planes * expansion"
    M = H * W

    if b_tile is None:
        b_tile = 1
    assert N % b_tile == 0, "b_tile must divide N"

    pad_rows = ((W + 1 + 7) // 8) * 8            # aligned interior offset, >= W + 1
    hal_rows = pad_rows + M + (W + 1)

    out_isz = jnp.dtype(out_dtype).itemsize
    per_step = (2 * b_tile * M * Cin * 4                                   # x blocks (2 bufs)
                + 2 * b_tile * M * Cout * out_isz                          # out blocks
                + 2 * 2 * (Cin * width + 9 * width * width + width * Cout) # bf16 weights
                + 4 * 2 * (2 * width + Cout)                               # shifts
                + hal_rows * max(width, 128) * 4                           # halo scratch
                + M * 9 * width * 6)                                       # im2col transients
    # TODO(synk): row-band tiling (1-row halo, second parallel grid axis) for images
    #             whose per-step footprint would exceed v7x's 64 MiB VMEM.
    assert per_step < 40 * 1024 * 1024, "tile too large for VMEM; need row-band tiling"
    vmem_limit = int(min(48 * 1024 * 1024, max(32 * 1024 * 1024, 2 * per_step)))

    # Pure reshape (no HBM transpose round trip): rows = pixels, lanes = channels.
    x2d = x_nhwc.reshape(N, M, Cin)

    kernel = functools.partial(_bottleneck_kernel, H, W, b_tile, pad_rows)
    full = lambda shape: pl.BlockSpec(shape, lambda n, _s=shape: (0,) * len(_s))

    out2d = pl.pallas_call(
        kernel,
        out_shape=jax.ShapeDtypeStruct((N, M, Cout), out_dtype),
        grid=(N // b_tile,),
        in_specs=[
            pl.BlockSpec((b_tile, M, Cin), lambda n: (n, 0, 0)),   # x (b_tile images)
            full((Cin, width)), full((1, width)),                  # conv1*bn1 / shift1
            full((9 * width, width)), full((1, width)),            # conv2*bn2 / shift2
            full((width, Cout)), full((1, Cout)),                  # conv3*bn3 / shift3
        ],
        out_specs=pl.BlockSpec((b_tile, M, Cout), lambda n: (n, 0, 0)),
        scratch_shapes=[pltpu.VMEM((hal_rows, width), jnp.float32)],
        compiler_params=pltpu.CompilerParams(
            dimension_semantics=("parallel",),
            vmem_limit_bytes=vmem_limit),
    )(x2d, w1, b1, w2, b2, w3, b3)

    return out2d.reshape(N, H, W, Cout)


def bottleneck_forward_nchw(x_nchw, params, **kw):
    """Interface-compat wrapper for NCHW callers.  Inside a ResNet stack, keep the
    activations NHWC and call bottleneck_forward_nhwc directly so these layout
    transposes only happen once at the network boundary."""
    x = jnp.transpose(x_nchw, (0, 2, 3, 1))
    y = bottleneck_forward_nhwc(x, params, **kw)
    return jnp.transpose(y, (0, 3, 1, 2))


# ---------------------------------------------------------------------------
# Deterministic parameter construction (matches the PyTorch module's shapes)
# ---------------------------------------------------------------------------
def make_params(key, inplanes, planes, base_width=64, groups=1):
    expansion = 4
    width = int(planes * (base_width / 64.0)) * groups
    cout = planes * expansion
    ks = jax.random.split(key, 6)

    # PyTorch conv weights: (out_ch, in_ch[, kh, kw]), bias=False everywhere.
    w1_t = jax.random.normal(ks[0], (width, inplanes), jnp.float32) * 0.1      # conv1 1x1
    w2_t = jax.random.normal(ks[1], (width, width, 3, 3), jnp.float32) * 0.1   # conv2 3x3
    w3_t = jax.random.normal(ks[2], (cout, width), jnp.float32) * 0.1          # conv3 1x1

    def bn_raw(k, c):
        k1, k2, k3, k4 = jax.random.split(k, 4)
        gamma = jax.random.uniform(k1, (c,), jnp.float32, 0.5, 1.5)
        beta = jax.random.normal(k2, (c,), jnp.float32) * 0.1
        mean = jax.random.normal(k3, (c,), jnp.float32) * 0.1
        var = jax.random.uniform(k4, (c,), jnp.float32, 0.5, 1.5)
        return gamma, beta, mean, var

    bn1, bn2, bn3 = bn_raw(ks[3], width), bn_raw(ks[4], width), bn_raw(ks[5], cout)

    def fold(bn, eps=0.0):  # module builds FrozenBatchNorm2d(..., eps=0.0)
        g, b, m, v = bn
        s = g / jnp.sqrt(v + eps)
        return s, b - m * s

    s1, sh1 = fold(bn1)
    s2, sh2 = fold(bn2)
    s3, sh3 = fold(bn3)

    # BN scales folded into the conv weights IN F32, then cast once to bf16 (MXU inputs).
    w1f = (w1_t.T * s1[None, :]).astype(jnp.bfloat16)                         # (Cin, width)
    w2f = (jnp.transpose(w2_t, (2, 3, 1, 0)).reshape(9 * width, width)
           * s2[None, :]).astype(jnp.bfloat16)                                # (9*width, width)
    w3f = (w3_t.T * s3[None, :]).astype(jnp.bfloat16)                         # (width, cout)

    kernel_params = {
        "w1": w1f, "b1": sh1.reshape(1, -1),
        "w2": w2f, "b2": sh2.reshape(1, -1),
        "w3": w3f, "b3": sh3.reshape(1, -1),
    }
    torch_style = dict(w1=w1_t, w2=w2_t, w3=w3_t, bn1=bn1, bn2=bn2, bn3=bn3)
    return kernel_params, torch_style


# ---------------------------------------------------------------------------
# Independent pure-JAX reference (mirrors the PyTorch forward, NHWC, f32)
# ---------------------------------------------------------------------------
def ref_forward_nhwc(x, tp):
    dn = ("NHWC", "HWIO", "NHWC")

    def bn(y, p):
        g, b, m, v = p
        s = g / jnp.sqrt(v)            # eps = 0.0 (matches norm_layer(..., eps=0.0))
        return y * s + (b - m * s)

    w1 = tp["w1"].T[None, None]                         # (1,1,Cin,width)
    w2 = jnp.transpose(tp["w2"], (2, 3, 1, 0))          # (3,3,width,width)
    w3 = tp["w3"].T[None, None]                         # (1,1,width,Cout)

    o = lax.conv_general_dilated(x, w1, (1, 1), "VALID", dimension_numbers=dn)
    o = jax.nn.relu(bn(o, tp["bn1"]))
    o = lax.conv_general_dilated(o, w2, (1, 1), ((1, 1), (1, 1)), dimension_numbers=dn)
    o = jax.nn.relu(bn(o, tp["bn2"]))
    o = lax.conv_general_dilated(o, w3, (1, 1), "VALID", dimension_numbers=dn)
    o = bn(o, tp["bn3"]) + x                            # downsample is None -> identity
    return jax.nn.relu(o)


if __name__ == "__main__":
    # Small shapes consistent with the module: inplanes == planes * expansion so the
    # identity residual is valid with downsample=None, stride=1.  Cout=128 keeps the
    # kernel's output channel dim lane-dense.  Input built directly in NHWC.
    N, H, W = 2, 16, 16
    inplanes, planes = 128, 32        # width = 32, out channels = 128

    key = jax.random.PRNGKey(0)
    kp, kx = jax.random.split(key)
    params, torch_style = make_params(kp, inplanes, planes)
    x = jax.random.normal(kx, (N, H, W, inplanes), jnp.float32)

    out = jax.block_until_ready(bottleneck_forward_nhwc(x, params, b_tile=2))
    ref = jax.block_until_ready(ref_forward_nhwc(x, torch_style))

    assert out.shape == (N, H, W, planes * 4)
    # bf16 matmul inputs (with BN scales folded before the cast) + f32 accumulation
    # -> a few e-3 absolute error vs the f32 reference.
    err = float(jnp.max(jnp.abs(out - ref)))
    assert jnp.allclose(out, ref, rtol=3e-2, atol=3e-2), f"max abs err {err}"
    print("KERNEL_OK")
</pallas_src>

<mosaic_0001>
module attributes {stable_mosaic.version = 11 : i64} {
  func.func @_bottleneck_kernel(%arg0: i32, %arg1: memref<2x256x128xf32, #tpu.memory_space<vmem>>, %arg2: memref<128x32xbf16, #tpu.memory_space<vmem>>, %arg3: memref<1x32xf32, #tpu.memory_space<vmem>>, %arg4: memref<288x32xbf16, #tpu.memory_space<vmem>>, %arg5: memref<1x32xf32, #tpu.memory_space<vmem>>, %arg6: memref<32x128xbf16, #tpu.memory_space<vmem>>, %arg7: memref<1x128xf32, #tpu.memory_space<vmem>>, %arg8: memref<2x256x128xf32, #tpu.memory_space<vmem>>, %arg9: memref<297x32xf32, #tpu.memory_space<vmem>>) attributes {dimension_semantics = [#tpu.dimension_semantics<parallel>], iteration_bounds = array<i64: 1>, scalar_prefetch = 0 : i64, scratch_operands = 1 : i64, tpu.core_type = #tpu.core_type<tc>, window_params = [{transform_indices = @transform_0, window_bounds = array<i64: 2, 256, 128>}, {pipeline_mode = #tpu.pipeline_mode<synchronous>, transform_indices = @transform_1, window_bounds = array<i64: 128, 32>}, {pipeline_mode = #tpu.pipeline_mode<synchronous>, transform_indices = @transform_2, window_bounds = array<i64: 1, 32>}, {pipeline_mode = #tpu.pipeline_mode<synchronous>, transform_indices = @transform_3, window_bounds = array<i64: 288, 32>}, {pipeline_mode = #tpu.pipeline_mode<synchronous>, transform_indices = @transform_4, window_bounds = array<i64: 1, 32>}, {pipeline_mode = #tpu.pipeline_mode<synchronous>, transform_indices = @transform_5, window_bounds = array<i64: 32, 128>}, {pipeline_mode = #tpu.pipeline_mode<synchronous>, transform_indices = @transform_6, window_bounds = array<i64: 1, 128>}, {transform_indices = @transform_7, window_bounds = array<i64: 2, 256, 128>}]} {
    %0 = tpu.iota {dimensions = array<i32: 0>} : vector<256x1xi32>
    %c16_i32 = arith.constant 16 : i32
    %c0_i32 = arith.constant 0 : i32
    %1 = arith.cmpi eq, %c16_i32, %c0_i32 : i32
    %c1_i32 = arith.constant 1 : i32
    %2 = arith.select %1, %c1_i32, %c16_i32 : i32
    %3 = vector.broadcast %2 : i32 to vector<256x1xi32>
    %4 = arith.remsi %0, %3 : vector<256x1xi32>
    %c0_i32_0 = arith.constant 0 : i32
    %5 = vector.broadcast %c0_i32_0 : i32 to vector<256x1xi32>
    %6 = arith.cmpi ne, %4, %5 : vector<256x1xi32>
    %c0_i32_1 = arith.constant 0 : i32
    %7 = vector.broadcast %c0_i32_1 : i32 to vector<256x1xi32>
    %8 = arith.cmpi slt, %4, %7 : vector<256x1xi32>
    %c0_i32_2 = arith.constant 0 : i32
    %9 = arith.cmpi slt, %2, %c0_i32_2 : i32
    %10 = vector.broadcast %9 : i1 to vector<256x1xi1>
    %11 = vector.broadcast %10 : vector<256x1xi1> to vector<256x1xi1>
    %12 = arith.xori %8, %11 : vector<256x1xi1>
    %13 = arith.andi %12, %6 : vector<256x1xi1>
    %14 = vector.broadcast %2 : i32 to vector<256x1xi32>
    %15 = arith.addi %4, %14 : vector<256x1xi32>
    %16 = arith.select %13, %15, %4 : vector<256x1xi1>, vector<256x1xi32>
    %c1_i32_3 = arith.constant 1 : i32
    %17 = vector.broadcast %c1_i32_3 : i32 to vector<256x1xi32>
    %18 = arith.cmpi sge, %16, %17 : vector<256x1xi32>
    %c14_i32 = arith.constant 14 : i32
    %19 = vector.broadcast %c14_i32 : i32 to vector<256x1xi32>
    %20 = arith.cmpi sle, %16, %19 : vector<256x1xi32>
    %cst = arith.constant 0.000000e+00 : f32
    %21 = vector.broadcast %cst : f32 to vector<24x32xf32>
    %c0 = arith.constant 0 : index
    %c0_4 = arith.constant 0 : index
    %22 = vector.load %arg9[%c0, %c0_4] : memref<297x32xf32, #tpu.memory_space<vmem>>, vector<24x32xf32>
    tpu.vector_store %arg9[%c0, %c0_4], %21 {strides = array<i32>} : memref<297x32xf32, #tpu.memory_space<vmem>>, vector<24x32xf32>,
    %cst_5 = arith.constant 0.000000e+00 : f32
    %23 = vector.broadcast %cst_5 : f32 to vector<17x32xf32>
    %c280 = arith.constant 280 : index
    %c0_6 = arith.constant 0 : index
    %24 = vector.load %arg9[%c280, %c0_6] : memref<297x32xf32, #tpu.memory_space<vmem>>, vector<17x32xf32>
    tpu.vector_store %arg9[%c280, %c0_6], %23 {strides = array<i32>} : memref<297x32xf32, #tpu.memory_space<vmem>>, vector<17x32xf32>,
    %c0_7 = arith.constant 0 : index
    %c0_8 = arith.constant 0 : index
    %c0_9 = arith.constant 0 : index
    %25 = vector.load %arg1[%c0_7, %c0_8, %c0_9] : memref<2x256x128xf32, #tpu.memory_space<vmem>>, vector<1x256x128xf32>
    %26 = vector.shape_cast %25 : vector<1x256x128xf32> to vector<256x128xf32>
    %27 = arith.truncf %26 : vector<256x128xf32> to vector<256x128xbf16>
    %c0_10 = arith.constant 0 : index
    %c0_11 = arith.constant 0 : index
    %28 = vector.load %arg2[%c0_10, %c0_11] : memref<128x32xbf16, #tpu.memory_space<vmem>>, vector<128x32xbf16>
    %cst_12 = arith.constant dense<0.000000e+00> : vector<256x32xf32>
    %29 = tpu.matmul %27, %28, %cst_12 {dimension_numbers = #tpu.dot_dimension_numbers<[1], [0], [0], [1], [0, 0, 1, 1], [], []>} : vector<256x128xbf16>, vector<128x32xbf16>, vector<256x32xf32> -> vector<256x32xf32>
    %c0_13 = arith.constant 0 : index
    %c0_14 = arith.constant 0 : index
    %30 = vector.load %arg3[%c0_13, %c0_14] : memref<1x32xf32, #tpu.memory_space<vmem>>, vector<1x32xf32>
    %31 = vector.broadcast %30 : vector<1x32xf32> to vector<256x32xf32>
    %32 = arith.addf %29, %31 : vector<256x32xf32>
    %cst_15 = arith.constant 0.000000e+00 : f32
    %33 = vector.broadcast %cst_15 : f32 to vector<256x32xf32>
    %34 = arith.maximumf %32, %33 : vector<256x32xf32>
    %c24 = arith.constant 24 : index
    %c0_16 = arith.constant 0 : index
    %35 = vector.load %arg9[%c24, %c0_16] : memref<297x32xf32, #tpu.memory_space<vmem>>, vector<256x32xf32>
    tpu.vector_store %arg9[%c24, %c0_16], %34 {strides = array<i32>} : memref<297x32xf32, #tpu.memory_space<vmem>>, vector<256x32xf32>,
    %c7 = arith.constant 7 : index
    %c0_17 = arith.constant 0 : index
    %36 = vector.load %arg9[%c7, %c0_17] : memref<297x32xf32, #tpu.memory_space<vmem>>, vector<256x32xf32>
    %cst_18 = arith.constant 0.000000e+00 : f32
    %37 = vector.shape_cast %18 : vector<256x1xi1> to vector<256x1xi1>
    %38 = vector.broadcast %37 : vector<256x1xi1> to vector<256x32xi1>
    %39 = vector.broadcast %cst_18 : f32 to vector<256x32xf32>
    %40 = arith.select %38, %36, %39 : vector<256x32xi1>, vector<256x32xf32>
    %c8 = arith.constant 8 : index
    %c0_19 = arith.constant 0 : index
    %41 = vector.load %arg9[%c8, %c0_19] : memref<297x32xf32, #tpu.memory_space<vmem>>, vector<256x32xf32>
    %c9 = arith.constant 9 : index
    %c0_20 = arith.constant 0 : index
    %42 = vector.load %arg9[%c9, %c0_20] : memref<297x32xf32, #tpu.memory_space<vmem>>, vector<256x32xf32>
    %cst_21 = arith.constant 0.000000e+00 : f32
    %43 = vector.shape_cast %20 : vector<256x1xi1> to vector<256x1xi1>
    %44 = vector.broadcast %43 : vector<256x1xi1> to vector<256x32xi1>
    %45 = vector.broadcast %cst_21 : f32 to vector<256x32xf32>
    %46 = arith.select %44, %42, %45 : vector<256x32xi1>, vector<256x32xf32>
    %c23 = arith.constant 23 : index
    %c0_22 = arith.constant 0 : index
    %47 = vector.load %arg9[%c23, %c0_22] : memref<297x32xf32, #tpu.memory_space<vmem>>, vector<256x32xf32>
    %cst_23 = arith.constant 0.000000e+00 : f32
    %48 = vector.shape_cast %18 : vector<256x1xi1> to vector<256x1xi1>
    %49 = vector.broadcast %48 : vector<256x1xi1> to vector<256x32xi1>
    %50 = vector.broadcast %cst_23 : f32 to vector<256x32xf32>
    %51 = arith.select %49, %47, %50 : vector<256x32xi1>, vector<256x32xf32>
    %c24_24 = arith.constant 24 : index
    %c0_25 = arith.constant 0 : index
    %52 = vector.load %arg9[%c24_24, %c0_25] : memref<297x32xf32, #tpu.memory_space<vmem>>, vector<256x32xf32>
    %c25 = arith.constant 25 : index
    %c0_26 = arith.constant 0 : index
    %53 = vector.load %arg9[%c25, %c0_26] : memref<297x32xf32, #tpu.memory_space<vmem>>, vector<256x32xf32>
    %cst_27 = arith.constant 0.000000e+00 : f32
    %54 = vector.shape_cast %20 : vector<256x1xi1> to vector<256x1xi1>
    %55 = vector.broadcast %54 : vector<256x1xi1> to vector<256x32xi1>
    %56 = vector.broadcast %cst_27 : f32 to vector<256x32xf32>
    %57 = arith.select %55, %53, %56 : vector<256x32xi1>, vector<256x32xf32>
    %c39 = arith.constant 39 : index
    %c0_28 = arith.constant 0 : index
    %58 = vector.load %arg9[%c39, %c0_28] : memref<297x32xf32, #tpu.memory_space<vmem>>, vector<256x32xf32>
    %cst_29 = arith.constant 0.000000e+00 : f32
    %59 = vector.shape_cast %18 : vector<256x1xi1> to vector<256x1xi1>
    %60 = vector.broadcast %59 : vector<256x1xi1> to vector<256x32xi1>
    %61 = vector.broadcast %cst_29 : f32 to vector<256x32xf32>
    %62 = arith.select %60, %58, %61 : vector<256x32xi1>, vector<256x32xf32>
    %c40 = arith.constant 40 : index
    %c0_30 = arith.constant 0 : index
    %63 = vector.load %arg9[%c40, %c0_30] : memref<297x32xf32, #tpu.memory_space<vmem>>, vector<256x32xf32>
    %c41 = arith.constant 41 : index
    %c0_31 = arith.constant 0 : index
    %64 = vector.load %arg9[%c41, %c0_31] : memref<297x32xf32, #tpu.memory_space<vmem>>, vector<256x32xf32>
    %cst_32 = arith.constant 0.000000e+00 : f32
    %65 = vector.shape_cast %20 : vector<256x1xi1> to vector<256x1xi1>
    %66 = vector.broadcast %65 : vector<256x1xi1> to vector<256x32xi1>
    %67 = vector.broadcast %cst_32 : f32 to vector<256x32xf32>
    %68 = arith.select %66, %64, %67 : vector<256x32xi1>, vector<256x32xf32>
    %69 = tpu.concatenate %40, %41, %46, %51, %52, %57, %62, %63, %68 in 1 : vector<256x32xf32>, vector<256x32xf32>, vector<256x32xf32>, vector<256x32xf32>, vector<256x32xf32>, vector<256x32xf32>, vector<256x32xf32>, vector<256x32xf32>, vector<256x32xf32> -> vector<256x288xf32>
    %70 = arith.truncf %69 : vector<256x288xf32> to vector<256x288xbf16>
    %c0_33 = arith.constant 0 : index
    %c0_34 = arith.constant 0 : index
    %71 = vector.load %arg4[%c0_33, %c0_34] : memref<288x32xbf16, #tpu.memory_space<vmem>>, vector<288x32xbf16>
    %cst_35 = arith.constant dense<0.000000e+00> : vector<256x32xf32>
    %72 = tpu.matmul %70, %71, %cst_35 {dimension_numbers = #tpu.dot_dimension_numbers<[1], [0], [0], [1], [0, 0, 1, 1], [], []>} : vector<256x288xbf16>, vector<288x32xbf16>, vector<256x32xf32> -> vector<256x32xf32>
    %c0_36 = arith.constant 0 : index
    %c0_37 = arith.constant 0 : index
    %73 = vector.load %arg5[%c0_36, %c0_37] : memref<1x32xf32, #tpu.memory_space<vmem>>, vector<1x32xf32>
    %74 = vector.broadcast %73 : vector<1x32xf32> to vector<256x32xf32>
    %75 = arith.addf %72, %74 : vector<256x32xf32>
    %cst_38 = arith.constant 0.000000e+00 : f32
    %76 = vector.broadcast %cst_38 : f32 to vector<256x32xf32>
    %77 = arith.maximumf %75, %76 : vector<256x32xf32>
    %78 = arith.truncf %77 : vector<256x32xf32> to vector<256x32xbf16>
    %c0_39 = arith.constant 0 : index
    %c0_40 = arith.constant 0 : index
    %79 = vector.load %arg6[%c0_39, %c0_40] : memref<32x128xbf16, #tpu.memory_space<vmem>>, vector<32x128xbf16>
    %cst_41 = arith.constant dense<0.000000e+00> : vector<256x128xf32>
    %80 = tpu.matmul %78, %79, %cst_41 {dimension_numbers = #tpu.dot_dimension_numbers<[1], [0], [0], [1], [0, 0, 1, 1], [], []>} : vector<256x32xbf16>, vector<32x128xbf16>, vector<256x128xf32> -> vector<256x128xf32>
    %c0_42 = arith.constant 0 : index
    %c0_43 = arith.constant 0 : index
    %81 = vector.load %arg7[%c0_42, %c0_43] : memref<1x128xf32, #tpu.memory_space<vmem>>, vector<1x128xf32>
    %82 = vector.broadcast %81 : vector<1x128xf32> to vector<256x128xf32>
    %83 = arith.addf %80, %82 : vector<256x128xf32>
    %c0_44 = arith.constant 0 : index
    %c0_45 = arith.constant 0 : index
    %c0_46 = arith.constant 0 : index
    %84 = vector.load %arg1[%c0_44, %c0_45, %c0_46] : memref<2x256x128xf32, #tpu.memory_space<vmem>>, vector<1x256x128xf32>
    %85 = vector.shape_cast %84 : vector<1x256x128xf32> to vector<256x128xf32>
    %86 = arith.addf %83, %85 : vector<256x128xf32>
    %cst_47 = arith.constant 0.000000e+00 : f32
    %87 = vector.broadcast %cst_47 : f32 to vector<256x128xf32>
    %88 = arith.maximumf %86, %87 : vector<256x128xf32>
    %c0_48 = arith.constant 0 : index
    %c0_49 = arith.constant 0 : index
    %c0_50 = arith.constant 0 : index
    %89 = vector.load %arg8[%c0_48, %c0_49, %c0_50] : memref<2x256x128xf32, #tpu.memory_space<vmem>>, vector<1x256x128xf32>
    %90 = vector.shape_cast %89 : vector<1x256x128xf32> to vector<256x128xf32>
    %91 = vector.shape_cast %88 : vector<256x128xf32> to vector<1x256x128xf32>
    tpu.vector_store %arg8[%c0_48, %c0_49, %c0_50], %91 {strides = array<i32>} : memref<2x256x128xf32, #tpu.memory_space<vmem>>, vector<1x256x128xf32>,
    %c1 = arith.constant 1 : index
    %c0_51 = arith.constant 0 : index
    %c0_52 = arith.constant 0 : index
    %92 = vector.load %arg1[%c1, %c0_51, %c0_52] : memref<2x256x128xf32, #tpu.memory_space<vmem>>, vector<1x256x128xf32>
    %93 = vector.shape_cast %92 : vector<1x256x128xf32> to vector<256x128xf32>
    %94 = arith.truncf %93 : vector<256x128xf32> to vector<256x128xbf16>
    %c0_53 = arith.constant 0 : index
    %c0_54 = arith.constant 0 : index
    %95 = vector.load %arg2[%c0_53, %c0_54] : memref<128x32xbf16, #tpu.memory_space<vmem>>, vector<128x32xbf16>
    %cst_55 = arith.constant dense<0.000000e+00> : vector<256x32xf32>
    %96 = tpu.matmul %94, %95, %cst_55 {dimension_numbers = #tpu.dot_dimension_numbers<[1], [0], [0], [1], [0, 0, 1, 1], [], []>} : vector<256x128xbf16>, vector<128x32xbf16>, vector<256x32xf32> -> vector<256x32xf32>
    %c0_56 = arith.constant 0 : index
    %c0_57 = arith.constant 0 : index
    %97 = vector.load %arg3[%c0_56, %c0_57] : memref<1x32xf32, #tpu.memory_space<vmem>>, vector<1x32xf32>
    %98 = vector.broadcast %97 : vector<1x32xf32> to vector<256x32xf32>
    %99 = arith.addf %96, %98 : vector<256x32xf32>
    %cst_58 = arith.constant 0.000000e+00 : f32
    %100 = vector.broadcast %cst_58 : f32 to vector<256x32xf32>
    %101 = arith.maximumf %99, %100 : vector<256x32xf32>
    %c24_59 = arith.constant 24 : index
    %c0_60 = arith.constant 0 : index
    %102 = vector.load %arg9[%c24_59, %c0_60] : memref<297x32xf32, #tpu.memory_space<vmem>>, vector<256x32xf32>
    tpu.vector_store %arg9[%c24_59, %c0_60], %101 {strides = array<i32>} : memref<297x32xf32, #tpu.memory_space<vmem>>, vector<256x32xf32>,
    %c7_61 = arith.constant 7 : index
    %c0_62 = arith.constant 0 : index
    %103 = vector.load %arg9[%c7_61, %c0_62] : memref<297x32xf32, #tpu.memory_space<vmem>>, vector<256x32xf32>
    %cst_63 = arith.constant 0.000000e+00 : f32
    %104 = vector.shape_cast %18 : vector<256x1xi1> to vector<256x1xi1>
    %105 = vector.broadcast %104 : vector<256x1xi1> to vector<256x32xi1>
    %106 = vector.broadcast %cst_63 : f32 to vector<256x32xf32>
    %107 = arith.select %105, %103, %106 : vector<256x32xi1>, vector<256x32xf32>
    %c8_64 = arith.constant 8 : index
    %c0_65 = arith.constant 0 : index
    %108 = vector.load %arg9[%c8_64, %c0_65] : memref<297x32xf32, #tpu.memory_space<vmem>>, vector<256x32xf32>
    %c9_66 = arith.constant 9 : index
    %c0_67 = arith.constant 0 : index
    %109 = vector.load %arg9[%c9_66, %c0_67] : memref<297x32xf32, #tpu.memory_space<vmem>>, vector<256x32xf32>
    %cst_68 = arith.constant 0.000000e+00 : f32
    %110 = vector.shape_cast %20 : vector<256x1xi1> to vector<256x1xi1>
    %111 = vector.broadcast %110 : vector<256x1xi1> to vector<256x32xi1>
    %112 = vector.broadcast %cst_68 : f32 to vector<256x32xf32>
    %113 = arith.select %111, %109, %112 : vector<256x32xi1>, vector<256x32xf32>
    %c23_69 = arith.constant 23 : index
    %c0_70 = arith.constant 0 : index
    %114 = vector.load %arg9[%c23_69, %c0_70] : memref<297x32xf32, #tpu.memory_space<vmem>>, vector<256x32xf32>
    %cst_71 = arith.constant 0.000000e+00 : f32
    %115 = vector.shape_cast %18 : vector<256x1xi1> to vector<256x1xi1>
    %116 = vector.broadcast %115 : vector<256x1xi1> to vector<256x32xi1>
    %117 = vector.broadcast %cst_71 : f32 to vector<256x32xf32>
    %118 = arith.select %116, %114, %117 : vector<256x32xi1>, vector<256x32xf32>
    %c24_72 = arith.constant 24 : index
    %c0_73 = arith.constant 0 : index
    %119 = vector.load %arg9[%c24_72, %c0_73] : memref<297x32xf32, #tpu.memory_space<vmem>>, vector<256x32xf32>
    %c25_74 = arith.constant 25 : index
    %c0_75 = arith.constant 0 : index
    %120 = vector.load %arg9[%c25_74, %c0_75] : memref<297x32xf32, #tpu.memory_space<vmem>>, vector<256x32xf32>
    %cst_76 = arith.constant 0.000000e+00 : f32
    %121 = vector.shape_cast %20 : vector<256x1xi1> to vector<256x1xi1>
    %122 = vector.broadcast %121 : vector<256x1xi1> to vector<256x32xi1>
    %123 = vector.broadcast %cst_76 : f32 to vector<256x32xf32>
    %124 = arith.select %122, %120, %123 : vector<256x32xi1>, vector<256x32xf32>
    %c39_77 = arith.constant 39 : index
    %c0_78 = arith.constant 0 : index
    %125 = vector.load %arg9[%c39_77, %c0_78] : memref<297x32xf32, #tpu.memory_space<vmem>>, vector<256x32xf32>
    %cst_79 = arith.constant 0.000000e+00 : f32
    %126 = vector.shape_cast %18 : vector<256x1xi1> to vector<256x1xi1>
    %127 = vector.broadcast %126 : vector<256x1xi1> to vector<256x32xi1>
    %128 = vector.broadcast %cst_79 : f32 to vector<256x32xf32>
    %129 = arith.select %127, %125, %128 : vector<256x32xi1>, vector<256x32xf32>
    %c40_80 = arith.constant 40 : index
    %c0_81 = arith.constant 0 : index
    %130 = vector.load %arg9[%c40_80, %c0_81] : memref<297x32xf32, #tpu.memory_space<vmem>>, vector<256x32xf32>
    %c41_82 = arith.constant 41 : index
    %c0_83 = arith.constant 0 : index
    %131 = vector.load %arg9[%c41_82, %c0_83] : memref<297x32xf32, #tpu.memory_space<vmem>>, vector<256x32xf32>
    %cst_84 = arith.constant 0.000000e+00 : f32
    %132 = vector.shape_cast %20 : vector<256x1xi1> to vector<256x1xi1>
    %133 = vector.broadcast %132 : vector<256x1xi1> to vector<256x32xi1>
    %134 = vector.broadcast %cst_84 : f32 to vector<256x32xf32>
    %135 = arith.select %133, %131, %134 : vector<256x32xi1>, vector<256x32xf32>
    %136 = tpu.concatenate %107, %108, %113, %118, %119, %124, %129, %130, %135 in 1 : vector<256x32xf32>, vector<256x32xf32>, vector<256x32xf32>, vector<256x32xf32>, vector<256x32xf32>, vector<256x32xf32>, vector<256x32xf32>, vector<256x32xf32>, vector<256x32xf32> -> vector<256x288xf32>
    %137 = arith.truncf %136 : vector<256x288xf32> to vector<256x288xbf16>
    %c0_85 = arith.constant 0 : index
    %c0_86 = arith.constant 0 : index
    %138 = vector.load %arg4[%c0_85, %c0_86] : memref<288x32xbf16, #tpu.memory_space<vmem>>, vector<288x32xbf16>
    %cst_87 = arith.constant dense<0.000000e+00> : vector<256x32xf32>
    %139 = tpu.matmul %137, %138, %cst_87 {dimension_numbers = #tpu.dot_dimension_numbers<[1], [0], [0], [1], [0, 0, 1, 1], [], []>} : vector<256x288xbf16>, vector<288x32xbf16>, vector<256x32xf32> -> vector<256x32xf32>
    %c0_88 = arith.constant 0 : index
    %c0_89 = arith.constant 0 : index
    %140 = vector.load %arg5[%c0_88, %c0_89] : memref<1x32xf32, #tpu.memory_space<vmem>>, vector<1x32xf32>
    %141 = vector.broadcast %140 : vector<1x32xf32> to vector<256x32xf32>
    %142 = arith.addf %139, %141 : vector<256x32xf32>
    %cst_90 = arith.constant 0.000000e+00 : f32
    %143 = vector.broadcast %cst_90 : f32 to vector<256x32xf32>
    %144 = arith.maximumf %142, %143 : vector<256x32xf32>
    %145 = arith.truncf %144 : vector<256x32xf32> to vector<256x32xbf16>
    %c0_91 = arith.constant 0 : index
    %c0_92 = arith.constant 0 : index
    %146 = vector.load %arg6[%c0_91, %c0_92] : memref<32x128xbf16, #tpu.memory_space<vmem>>, vector<32x128xbf16>
    %cst_93 = arith.constant dense<0.000000e+00> : vector<256x128xf32>
    %147 = tpu.matmul %145, %146, %cst_93 {dimension_numbers = #tpu.dot_dimension_numbers<[1], [0], [0], [1], [0, 0, 1, 1], [], []>} : vector<256x32xbf16>, vector<32x128xbf16>, vector<256x128xf32> -> vector<256x128xf32>
    %c0_94 = arith.constant 0 : index
    %c0_95 = arith.constant 0 : index
    %148 = vector.load %arg7[%c0_94, %c0_95] : memref<1x128xf32, #tpu.memory_space<vmem>>, vector<1x128xf32>
    %149 = vector.broadcast %148 : vector<1x128xf32> to vector<256x128xf32>
    %150 = arith.addf %147, %149 : vector<256x128xf32>
    %c1_96 = arith.constant 1 : index
    %c0_97 = arith.constant 0 : index
    %c0_98 = arith.constant 0 : index
    %151 = vector.load %arg1[%c1_96, %c0_97, %c0_98] : memref<2x256x128xf32, #tpu.memory_space<vmem>>, vector<1x256x128xf32>
    %152 = vector.shape_cast %151 : vector<1x256x128xf32> to vector<256x128xf32>
    %153 = arith.addf %150, %152 : vector<256x128xf32>
    %cst_99 = arith.constant 0.000000e+00 : f32
    %154 = vector.broadcast %cst_99 : f32 to vector<256x128xf32>
    %155 = arith.maximumf %153, %154 : vector<256x128xf32>
    %c1_100 = arith.constant 1 : index
    %c0_101 = arith.constant 0 : index
    %c0_102 = arith.constant 0 : index
    %156 = vector.load %arg8[%c1_100, %c0_101, %c0_102] : memref<2x256x128xf32, #tpu.memory_space<vmem>>, vector<1x256x128xf32>
    %157 = vector.shape_cast %156 : vector<1x256x128xf32> to vector<256x128xf32>
    %158 = vector.shape_cast %155 : vector<256x128xf32> to vector<1x256x128xf32>
    tpu.vector_store %arg8[%c1_100, %c0_101, %c0_102], %158 {strides = array<i32>} : memref<2x256x128xf32, #tpu.memory_space<vmem>>, vector<1x256x128xf32>,
    return
  }
  func.func @transform_0(%arg0: i32) -> (i32, i32, i32) {
    %c0_i32 = arith.constant 0 : i32
    %c0_i32_0 = arith.constant 0 : i32
    %c0_i32_1 = arith.constant 0 : i32
    return %arg0, %c0_i32, %c0_i32_0 : i32, i32, i32
  }
  func.func @transform_1(%arg0: i32) -> (i32, i32) {
    %c0_i32 = arith.constant 0 : i32
    %c0_i32_0 = arith.constant 0 : i32
    %c0_i32_1 = arith.constant 0 : i32
    return %c0_i32, %c0_i32_0 : i32, i32
  }
  func.func @transform_2(%arg0: i32) -> (i32, i32) {
    %c0_i32 = arith.constant 0 : i32
    %c0_i32_0 = arith.constant 0 : i32
    %c0_i32_1 = arith.constant 0 : i32
    return %c0_i32, %c0_i32_0 : i32, i32
  }
  func.func @transform_3(%arg0: i32) -> (i32, i32) {
    %c0_i32 = arith.constant 0 : i32
    %c0_i32_0 = arith.constant 0 : i32
    %c0_i32_1 = arith.constant 0 : i32
    return %c0_i32, %c0_i32_0 : i32, i32
  }
  func.func @transform_4(%arg0: i32) -> (i32, i32) {
    %c0_i32 = arith.constant 0 : i32
    %c0_i32_0 = arith.constant 0 : i32
    %c0_i32_1 = arith.constant 0 : i32
    return %c0_i32, %c0_i32_0 : i32, i32
  }
  func.func @transform_5(%arg0: i32) -> (i32, i32) {
    %c0_i32 = arith.constant 0 : i32
    %c0_i32_0 = arith.constant 0 : i32
    %c0_i32_1 = arith.constant 0 : i32
    return %c0_i32, %c0_i32_0 : i32, i32
  }
  func.func @transform_6(%arg0: i32) -> (i32, i32) {
    %c0_i32 = arith.constant 0 : i32
    %c0_i32_0 = arith.constant 0 : i32
    %c0_i32_1 = arith.constant 0 : i32
    return %c0_i32, %c0_i32_0 : i32, i32
  }
  func.func @transform_7(%arg0: i32) -> (i32, i32, i32) {
    %c0_i32 = arith.constant 0 : i32
    %c0_i32_0 = arith.constant 0 : i32
    %c0_i32_1 = arith.constant 0 : i32
    return %arg0, %c0_i32, %c0_i32_0 : i32, i32, i32
  }
}

</mosaic_0001>

<bundles_post_ra>
// kernel: tpu_custom_call.1
= control target key start
LH: loop header
LB: loop body
LE: loop exit
PB: predicated region body
PF: predicated region fallthrough
CT: control target
= control target key end

     0   :  { %12 = vsyncpa [#allocation4], 0  ;;  %s9783_s0 = inlined_call_operand.hbm [shape: f32[2,256,128], index: 0, kind: input, shape index: {}]   ;;  %s9784_s1 = inlined_call_operand.vmem [shape: bf16[128,32], index: 1, kind: input, shape index: {}]   ;;  %s9785_s2 = inlined_call_operand.vmem [shape: f32[1,32], index: 2, kind: input, shape index: {}]   ;;  %s9786_s3 = inlined_call_operand.vmem [shape: bf16[288,32], index: 3, kind: input, shape index: {}]   ;;  %s9787_s4 = inlined_call_operand.vmem [shape: f32[1,32], index: 4, kind: input, shape index: {}]   ;;  %s9788_s5 = inlined_call_operand.vmem [shape: bf16[32,128], index: 5, kind: input, shape index: {}]   ;;  %s9789_s6 = inlined_call_operand.vmem [shape: f32[1,128], index: 6, kind: input, shape index: {}]   ;;  %s9790_s7 = inlined_call_operand.hbm [shape: f32[2,256,128], index: 7, kind: output, shape index: {}]  }
   0x1   :  { %13 = vsyncpa [#allocation5], 0  ;;  %s18_s26 = sshll.u32 %s9783_s0, 4  ;;  %s6892_s27 = smov [#allocation3]   ;;  %s19_s26 = int_to_ptr.hbm [resolvable:$true] %s18_s26 }
   0x2   :  { %s20_s28 = sshll.u32 %s6892_s27, 4  ;;  %s6893_s29 = smov 128   ;;  %s21_s28 = int_to_ptr.vmem [resolvable:$true] %s20_s28 }
   0x3   :  { %s6894_s30 = smov 8  }
   0x4   :  { %26 = dma.hbm_to_vmem [thread:$0]  %s19_s26, 8192, %s21_s28, [#allocation4], %s6893_s29, %s6893_s29, %s6894_s30  }
   0x5   :  { %6888 = dma.done.wait [#allocation4], 8192  }
   0x6   :  { %6889 = vsyncadd [#allocation4], 4294959104  ;;  %v5669_v0 = vld [vmem:[%s9784_s1 + $0x38] sm:$0xff]  ;;  %v5668_v1 = vld [vmem:[%s9784_s1 + $0x30] sm:$0xff]  ;;  %vm9791_vm0 = vcmask 261120   ;;  %v9792_v44 = vmov 0.0   ;;  %v44_v61 = vlaneseq }
   0x7   :  { %649 = vmatpush.bf16.msra.mxu0 %v5669_v0  ;;  %5718 = vmatpush.bf16.msra.mxu1 %v5669_v0  ;;  %v5667_v2 = vld [vmem:[%s9784_s1 + $0x28] sm:$0xff]  ;;  %v5666_v3 = vld [vmem:[%s9784_s1 + $0x20] sm:$0xff]  ;;  %v5665_v4 = vld [vmem:[%s9784_s1 + $0x18] sm:$0xff]  ;;  %529 = vst.msk [vmem:[#allocation2 + $0x118] sm:$0xff] %vm9791_vm0, %v9792_v44  ;;  %s6896_s25 = smov 32   ;;  %s6897_s26 = smov 96  }
   0x8   :  { %v5664_v5 = vld [vmem:[%s9784_s1 + $0x10] sm:$0xff]  ;;  %v5663_v6 = vld [vmem:[%s9784_s1 + $0x8] sm:$0xff]  ;;  %v5662_v7 = vld [vmem:[%s9784_s1] sm:$0xff]  ;;  %526 = vst.msk [vmem:[#allocation2] sm:$0xff] %vm9791_vm0, %v9792_v44  ;;  %v6989_v63 = vshrl.u32 %v44_v61, 7  ;;  %s6898_s27 = smov 64  }
   0x9   :  { %v533_v8 = vld [vmem:[#allocation3] sm:$0xff]  ;;  %v534_v9 = vld [vmem:[#allocation3 + $0x8] sm:$0xff]  ;;  %v535_v11 = vld [vmem:[#allocation3 + $0x10] sm:$0xff]  ;;  %527 = vst.msk [vmem:[#allocation2 + $0x8] sm:$0xff] %vm9791_vm0, %v9792_v44  ;;  %s5361_s21 = sshll.u32 %s9790_s7, 4  ;;  %s5362_s21 = int_to_ptr.hbm [resolvable:$true] %s5361_s21 }
   0xa   :  { %v565_v10 = vpack.c.bf16 %v534_v9, %v533_v8  ;;  %v536_v12 = vld [vmem:[#allocation3 + $0x18] sm:$0xff]  ;;  %v537_v14 = vld [vmem:[#allocation3 + $0x20] sm:$0xff]  ;;  %v538_v15 = vld [vmem:[#allocation3 + $0x28] sm:$0xff]  ;;  %528 = vst.msk [vmem:[#allocation2 + $0x10] sm:$0xff] %vm9791_vm0, %v9792_v44 }
   0xb   :  { %650 = vmatpush.bf16.msra.mxu0 %v5668_v1  ;;  %5719 = vmatpush.bf16.msra.mxu1 %v5668_v1  ;;  %v566_v13 = vpack.c.bf16 %v536_v12, %v535_v11  ;;  %v567_v16 = vpack.c.bf16 %v538_v15, %v537_v14  ;;  %v549_v17 = vld [vmem:[#allocation3 + $0x80] sm:$0xff]  ;;  %v550_v18 = vld [vmem:[#allocation3 + $0x88] sm:$0xff]  ;;  %v539_v20 = vld [vmem:[#allocation3 + $0x30] sm:$0xff]  ;;  %530 = vst.msk [vmem:[#allocation2 + $0x120] sm:$0xff] %vm9791_vm0, %v9792_v44  ;;  %v81_v15 = vand.u32 15, %v6989_v63 }
   0xc   :  { %v573_v19 = vpack.c.bf16 %v550_v18, %v549_v17  ;;  %v540_v21 = vld [vmem:[#allocation3 + $0x38] sm:$0xff]  ;;  %v551_v23 = vld [vmem:[#allocation3 + $0x90] sm:$0xff]  ;;  %v541_v26 = vld [vmem:[#allocation3 + $0x40] sm:$0xff] }
   0xd   :  { %v568_v22 = vpack.c.bf16 %v540_v21, %v539_v20  ;;  %v552_v24 = vld [vmem:[#allocation3 + $0x98] sm:$0xff]  ;;  %v542_v27 = vld [vmem:[#allocation3 + $0x48] sm:$0xff]  ;;  %v553_v29 = vld [vmem:[#allocation3 + $0xa0] sm:$0xff]  ;;  %vm7005_vm2 = vcmp.ge.s32.totalorder %v81_v15, 1 }
   0xe   :  { %v574_v25 = vpack.c.bf16 %v552_v24, %v551_v23  ;;  %v569_v28 = vpack.c.bf16 %v542_v27, %v541_v26  ;;  %v554_v30 = vld [vmem:[#allocation3 + $0xa8] sm:$0xff]  ;;  %v543_v32 = vld [vmem:[#allocation3 + $0x50] sm:$0xff]  ;;  %v544_v33 = vld [vmem:[#allocation3 + $0x58] sm:$0xff]  ;;  %v48_v26 = vadd.s32 24, %v6989_v63 }
   0xf   :  { %651 = vmatpush.bf16.msra.mxu0 %v5667_v2  ;;  %5720 = vmatpush.bf16.msra.mxu1 %v5667_v2  ;;  %v575_v31 = vpack.c.bf16 %v554_v30, %v553_v29  ;;  %v570_v34 = vpack.c.bf16 %v544_v33, %v543_v32  ;;  %v555_v35 = vld [vmem:[#allocation3 + $0xb0] sm:$0xff]  ;;  %v556_v36 = vld [vmem:[#allocation3 + $0xb8] sm:$0xff]  ;;  %v545_v38 = vld [vmem:[#allocation3 + $0x60] sm:$0xff] }
  0x10   :  { %v576_v37 = vpack.c.bf16 %v556_v36, %v555_v35  ;;  %v546_v39 = vld [vmem:[#allocation3 + $0x68] sm:$0xff]  ;;  %v557_v41 = vld [vmem:[#allocation3 + $0xc0] sm:$0xff]  ;;  %v547_v45 = vld [vmem:[#allocation3 + $0x70] sm:$0xff]  ;;  %v102_v32 = vand.u32 15, %v48_v26  ;;  %v47_v36 = vadd.s32 16, %v6989_v63 }
  0x11   :  { %v571_v40 = vpack.c.bf16 %v546_v39, %v545_v38  ;;  %v558_v42 = vld [vmem:[#allocation3 + $0xc8] sm:$0xff]  ;;  %v548_v46 = vld [vmem:[#allocation3 + $0x78] sm:$0xff]  ;;  %v559_v48 = vld [vmem:[#allocation3 + $0xd0] sm:$0xff] }
  0x12   :  { %v577_v43 = vpack.c.bf16 %v558_v42, %v557_v41  ;;  %v572_v47 = vpack.c.bf16 %v548_v46, %v547_v45  ;;  %v560_v49 = vld [vmem:[#allocation3 + $0xd8] sm:$0xff]  ;;  %v6983_v51 = vld [vmem:[%s9785_s2] ss:$0 sm:$0xff]  ;;  %v561_v53 = vld [vmem:[#allocation3 + $0xe0] sm:$0xff]  ;;  %vm7025_vm3 = vcmp.le.s32.totalorder %v102_v32, 14 }
  0x13   :  { %652 = vmatpush.bf16.msra.mxu0 %v5666_v3  ;;  %5721 = vmatpush.bf16.msra.mxu1 %v5666_v3  ;;  %v578_v50 = vpack.c.bf16 %v560_v49, %v559_v48  ;;  %v562_v54 = vld [vmem:[#allocation3 + $0xe8] sm:$0xff]  ;;  %v563_v0 = vld [vmem:[#allocation3 + $0xf0] sm:$0xff]  ;;  %v564_v1 = vld [vmem:[#allocation3 + $0xf8] sm:$0xff] }
  0x14   :  { %v579_v56 = vpack.c.bf16 %v562_v54, %v561_v53  ;;  %v580_v3 = vpack.c.bf16 %v564_v1, %v563_v0 }
  0x17   :  { %653 = vmatpush.bf16.msra.mxu0 %v5665_v4  ;;  %5722 = vmatpush.bf16.msra.mxu1 %v5665_v4 }
  0x1b   :  { %654 = vmatpush.bf16.msra.mxu0 %v5664_v5  ;;  %5723 = vmatpush.bf16.msra.mxu1 %v5664_v5  ;;  %v46_v5 = vadd.s32 8, %v6989_v63 }
  0x1f   :  { %655 = vmatpush.bf16.msra.mxu0 %v5663_v6  ;;  %5724 = vmatpush.bf16.msra.mxu1 %v5663_v6 }
  0x23   :  { %656 = vmatpush.bf16.msra.mxu0 %v5662_v7  ;;  %5725 = vmatpush.bf16.msra.mxu1 %v5662_v7  ;;  %v88_v7 = vand.u32 15, %v46_v5 }
  0x25   :  { %vm6995_vm1 = vcmp.le.s32.totalorder %v88_v7, 14 }
  0x26   :  { %657 = vmatmul.bf16.vlgmr.msra.gmra.mxu0 %v565_v10  ;;  %697 = vmatmul.bf16.vlgmr.msra.gmra.mxu1 %v573_v19  ;;  %v9999_v10 = vmov 0 }
  0x27   :  { %v10000_v10 = vsel %vm6995_vm1, 4294967295, %v9999_v10 }
  0x36   :  { %662 = vmatmul.bf16.gmra.mxu0 %v566_v13  ;;  %702 = vmatmul.bf16.gmra.mxu1 %v574_v25 }
  0x46   :  { %667 = vmatmul.bf16.gmra.mxu0 %v567_v16  ;;  %707 = vmatmul.bf16.gmra.mxu1 %v575_v31 }
  0x56   :  { %672 = vmatmul.bf16.gmra.mxu0 %v568_v22  ;;  %712 = vmatmul.bf16.gmra.mxu1 %v576_v37  ;;  %v10003_v37 = vmov 0 }
  0x57   :  { %v10004_v37 = vsel %vm7025_vm3, 4294967295, %v10003_v37 }
  0x58   :  { %10005 = vst [vmem:[#allocation9_spill] sm:$0xff] %v10004_v37 }
  0x66   :  { %677 = vmatmul.bf16.gmra.mxu0 %v569_v28  ;;  %717 = vmatmul.bf16.gmra.mxu1 %v577_v43  ;;  %v95_v43 = vand.u32 15, %v47_v36 }
  0x68   :  { %vm7036_vm4 = vcmp.ge.s32.totalorder %v95_v43, 1 }
  0x76   :  { %682 = vmatmul.bf16.gmra.mxu0 %v570_v34  ;;  %722 = vmatmul.bf16.gmra.mxu1 %v578_v50 }
  0x86   :  { %687 = vmatmul.bf16.gmra.mxu0 %v571_v40  ;;  %727 = vmatmul.bf16.gmra.mxu1 %v579_v56 }
  0x96   :  { %692 = vmatmul.bf16.gmra.mxu0 %v572_v47  ;;  %732 = vmatmul.bf16.gmra.mxu1 %v580_v3 }
  0xa3   :  { %v658_v52 = vpop.f32.mrf.mxu0  ;;  %v698_v17 = vpop.f32.mrf.mxu1 }
  0xa4   :  { %v659_v55 = vadd.f32 %v6983_v51, %v658_v52  ;;  %v699_v29 = vadd.f32 %v6983_v51, %v698_v17 }
  0xa6   :  { %v738_v57 = vmax.f32 %v659_v55, 0.0  ;;  %v754_v30 = vmax.f32 %v699_v29, 0.0  ;;  %v50_v55 = vadd.s32 40, %v6989_v63 }
  0xa8   :  { %770 = vst.msk [vmem:[#allocation2 + $0x18] sm:$0xff] %vm9791_vm0, %v738_v57 }
  0xa9   :  { %786 = vst.msk [vmem:[#allocation2 + $0x98] sm:$0xff] %vm9791_vm0, %v754_v30 }
  0xab   :  { %v660_v58 = vpop.f32.mrf.mxu0  ;;  %v700_v33 = vpop.f32.mrf.mxu1 }
  0xac   :  { %v661_v59 = vadd.f32 %v6983_v51, %v660_v58  ;;  %v701_v41 = vadd.f32 %v6983_v51, %v700_v33 }
  0xae   :  { %v739_v60 = vmax.f32 %v661_v59, 0.0  ;;  %v755_v45 = vmax.f32 %v701_v41, 0.0 }
  0xb0   :  { %771 = vst.msk [vmem:[#allocation2 + $0x20] sm:$0xff] %vm9791_vm0, %v739_v60  ;;  %v116_v60 = vand.u32 15, %v50_v55  ;;  %v10017_v55 = vmov 0 }
  0xb1   :  { %787 = vst.msk [vmem:[#allocation2 + $0xa0] sm:$0xff] %vm9791_vm0, %v755_v45 }
  0xb2   :  { %vm7053_vm5 = vcmp.le.s32.totalorder %v116_v60, 14  ;;  %v54_v60 = vadd.s32 72, %v6989_v63 }
  0xb3   :  { %v663_v62 = vpop.f32.mrf.mxu0  ;;  %v703_v47 = vpop.f32.mrf.mxu1 }
  0xb4   :  { %v664_v2 = vadd.f32 %v6983_v51, %v663_v62  ;;  %v704_v57 = vadd.f32 %v6983_v51, %v703_v47 }
  0xb6   :  { %v740_v4 = vmax.f32 %v664_v2, 0.0  ;;  %v756_v58 = vmax.f32 %v704_v57, 0.0  ;;  %v49_v2 = vadd.s32 32, %v6989_v63 }
  0xb7   :  { %v964_v12 = vld [vmem:[#allocation2 + $0x19] sm:$0xff] }
  0xb8   :  { %772 = vst.msk [vmem:[#allocation2 + $0x28] sm:$0xff] %vm9791_vm0, %v740_v4  ;;  %v10008_v4 = vmov 0 }
  0xb9   :  { %788 = vst.msk [vmem:[#allocation2 + $0xa8] sm:$0xff] %vm9791_vm0, %v756_v58  ;;  %v10009_v4 = vsel %vm7053_vm5, 4294967295, %v10008_v4 }
  0xba   :  { %10010 = vst [vmem:[#allocation10_spill] sm:$0xff] %v10009_v4 }
  0xbb   :  { %v665_v6 = vpop.f32.mrf.mxu0  ;;  %v705_v61 = vpop.f32.mrf.mxu1 }
  0xbc   :  { %v666_v8 = vadd.f32 %v6983_v51, %v665_v6 }
  0xbe   :  { %v741_v9 = vmax.f32 %v666_v8, 0.0 }
  0xbf   :  { %v965_v11 = vld [vmem:[#allocation2 + $0x21] sm:$0xff] }
  0xc0   :  { %773 = vst.msk [vmem:[#allocation2 + $0x30] sm:$0xff] %vm9791_vm0, %v741_v9  ;;  %v1129_v13 = vsel %vm6995_vm1, %v965_v11, 0.0  ;;  %v806_v19 = vld [vmem:[#allocation2 + $0x27] sm:$0xff]  ;;  %v706_v9 = vadd.f32 %v6983_v51, %v705_v61 }
  0xc1   :  { %v5736_v14 = vpack.i.bf16 %v1129_v13, %v964_v12  ;;  %v7009_v22 = vld [vmem:[#allocation2 + $0x28] sm:$0xff]  ;;  %v1162_v25 = vsel %vm7005_vm2, %v806_v19, 0.0  ;;  %v109_v12 = vand.u32 15, %v49_v2  ;;  %v10011_v19 = vmov 0 }
  0xc2   :  { %v757_v13 = vmax.f32 %v706_v9, 0.0 }
  0xc3   :  { %v668_v16 = vpop.f32.mrf.mxu0  ;;  %5737 = vrot.lane.b32.xlu0 %v5736_v14, %s6896_s25  ;;  %v708_v15 = vpop.f32.mrf.mxu1  ;;  %vm7067_vm6 = vcmp.ge.s32.totalorder %v109_v12, 1  ;;  %v10019_v12 = vmov 0 }
  0xc4   :  { %v669_v18 = vadd.f32 %v6983_v51, %v668_v16  ;;  %789 = vst.msk [vmem:[#allocation2 + $0xb0] sm:$0xff] %vm9791_vm0, %v757_v13  ;;  %v10012_v19 = vsel %vm7067_vm6, 4294967295, %v10011_v19  ;;  %v709_v30 = vadd.f32 %v6983_v51, %v708_v15 }
  0xc5   :  { %10013 = vst [vmem:[#allocation11_spill] sm:$0xff] %v10012_v19 }
  0xc6   :  { %v742_v20 = vmax.f32 %v669_v18, 0.0 }
  0xc7   :  { %v7011_v23 = vld [vmem:[#allocation2 + $0x30] sm:$0xff] }
  0xc8   :  { %v807_v24 = vld [vmem:[#allocation2 + $0x2f] sm:$0xff]  ;;  %774 = vst.msk [vmem:[#allocation2 + $0x38] sm:$0xff] %vm9791_vm0, %v742_v20  ;;  %v5746_v27 = vpack.i.bf16 %v7011_v23, %v7009_v22 }
  0xc9   :  { %v5741_v28 = vpack.i.bf16 %v807_v24, %v1162_v25  ;;  %v966_v39 = vld [vmem:[#allocation2 + $0x29] sm:$0xff] }
  0xca   :  { %5747 = vrot.lane.b32.xlu1 %v5746_v27, %s6897_s26  ;;  %v52_v27 = vadd.s32 56, %v6989_v63 }
  0xcb   :  { %v670_v31 = vpop.f32.mrf.mxu0  ;;  %5742 = vrot.lane.b32.xlu0 %v5741_v28, %s6898_s27 }
  0xcc   :  { %v671_v34 = vadd.f32 %v6983_v51, %v670_v31  ;;  %v758_v31 = vmax.f32 %v709_v30, 0.0  ;;  %v130_v33 = vand.u32 15, %v52_v27 }
  0xce   :  { %v743_v35 = vmax.f32 %v671_v34, 0.0  ;;  %v710_v34 = vpop.f32.mrf.mxu1  ;;  %790 = vst.msk [vmem:[#allocation2 + $0xb8] sm:$0xff] %vm9791_vm0, %v758_v31  ;;  %vm7087_vm7 = vcmp.le.s32.totalorder %v130_v33, 14  ;;  %v7159_v33 = vld [vmem:[%s9786_s3 + $0x80] sm:$0xff] }
  0xcf   :  { %v967_v38 = vld [vmem:[#allocation2 + $0x31] sm:$0xff]  ;;  %v711_v43 = vadd.f32 %v6983_v51, %v710_v34 }
  0xd0   :  { %775 = vst.msk [vmem:[#allocation2 + $0x40] sm:$0xff] %vm9791_vm0, %v743_v35  ;;  %v1131_v40 = vsel %vm7025_vm3, %v967_v38, 0.0  ;;  %v808_v49 = vld [vmem:[#allocation2 + $0x37] sm:$0xff]  ;;  %v51_v38 = vadd.s32 48, %v6989_v63 }
  0xd1   :  { %v5751_v42 = vpack.i.bf16 %v1131_v40, %v966_v39  ;;  %v1164_v54 = vsel %vm7036_vm4, %v808_v49, 0.0  ;;  %v7051_v3 = vld [vmem:[#allocation2 + $0x38] sm:$0xff]  ;;  %v10014_v39 = vmov 0  ;;  %v759_v47 = vmax.f32 %v711_v43, 0.0  ;;  %v5684_v34 = vld [vmem:[%s9786_s3 + $0x70] sm:$0xff] }
  0xd2   :  { %v10015_v39 = vsel %vm7087_vm7, 4294967295, %v10014_v39 }
  0xd3   :  { %v673_v46 = vpop.f32.mrf.mxu0  ;;  %5752 = vrot.lane.b32.xlu1 %v5751_v42, %s6896_s25  ;;  %10016 = vst [vmem:[#allocation12_spill] sm:$0xff] %v10015_v39 }
  0xd4   :  { %v674_v48 = vadd.f32 %v6983_v51, %v673_v46  ;;  %v123_v46 = vand.u32 15, %v51_v38  ;;  %791 = vst.msk [vmem:[#allocation2 + $0xc0] sm:$0xff] %vm9791_vm0, %v759_v47 }
  0xd6   :  { %v744_v50 = vmax.f32 %v674_v48, 0.0  ;;  %v713_v49 = vpop.f32.mrf.mxu1  ;;  %vm7100_vm8 = vcmp.ge.s32.totalorder %v123_v46, 1 }
  0xd7   :  { %v809_v53 = vld [vmem:[#allocation2 + $0x3f] sm:$0xff]  ;;  %v10018_v55 = vsel %vm7100_vm8, 4294967295, %v10017_v55 }
  0xd8   :  { %776 = vst.msk [vmem:[#allocation2 + $0x48] sm:$0xff] %vm9791_vm0, %v744_v50  ;;  %v5756_v56 = vpack.i.bf16 %v809_v53, %v1164_v54  ;;  %v7048_v0 = vld [vmem:[#allocation2 + $0x40] sm:$0xff] }
  0xd9   :  { %v5761_v6 = vpack.i.bf16 %v7048_v0, %v7051_v3  ;;  %v968_v7 = vld [vmem:[#allocation2 + $0x39] sm:$0xff] }
  0xda   :  { %5757 = vrot.lane.b32.xlu2 %v5756_v56, %s6898_s27 }
  0xdb   :  { %v675_v59 = vpop.f32.mrf.mxu0 }
  0xdc   :  { %v676_v62 = vadd.f32 %v6983_v51, %v675_v59 }
  0xde   :  { %v745_v1 = vmax.f32 %v676_v62, 0.0 }
  0xdf   :  { %v969_v5 = vld [vmem:[#allocation2 + $0x41] sm:$0xff] }
  0xe0   :  { %777 = vst.msk [vmem:[#allocation2 + $0x50] sm:$0xff] %vm9791_vm0, %v745_v1  ;;  %v1133_v8 = vsel %vm7053_vm5, %v969_v5, 0.0  ;;  %v810_v17 = vld [vmem:[#allocation2 + $0x47] sm:$0xff]  ;;  %v714_v1 = vadd.f32 %v6983_v51, %v713_v49 }
  0xe1   :  { %v5766_v11 = vpack.i.bf16 %v1133_v8, %v968_v7  ;;  %v7071_v20 = vld [vmem:[#allocation2 + $0x48] sm:$0xff]  ;;  %v1166_v26 = vsel %vm7067_vm6, %v810_v17, 0.0  ;;  %v715_v7 = vpop.f32.mrf.mxu1 }
  0xe2   :  { %5762 = vrot.lane.b32.xlu2 %v5761_v6, %s6897_s26  ;;  %v760_v2 = vmax.f32 %v714_v1, 0.0  ;;  %v144_v6 = vand.u32 15, %v54_v60  ;;  %v5683_v60 = vld [vmem:[%s9786_s3 + $0x68] sm:$0xff]  ;;  %v55_v1 = vadd.s32 80, %v6989_v63 }
  0xe3   :  { %v678_v14 = vpop.f32.mrf.mxu0  ;;  %5767 = vrot.lane.b32.xlu0 %v5766_v11, %s6896_s25  ;;  %v53_v11 = vadd.s32 64, %v6989_v63 }
  0xe4   :  { %v679_v16 = vadd.f32 %v6983_v51, %v678_v14  ;;  %792 = vst.msk [vmem:[#allocation2 + $0xc8] sm:$0xff] %vm9791_vm0, %v760_v2  ;;  %vm7127_vm9 = vcmp.le.s32.totalorder %v144_v6, 14  ;;  %v10026_v6 = vmov 0 }
  0xe5   :  { %v10020_v12 = vsel %vm7127_vm9, 4294967295, %v10019_v12 }
  0xe6   :  { %v746_v18 = vmax.f32 %v679_v16, 0.0  ;;  %10021 = vst [vmem:[#allocation13_spill] sm:$0xff] %v10020_v12  ;;  %v716_v16 = vadd.f32 %v6983_v51, %v715_v7 }
  0xe7   :  { %v7073_v24 = vld [vmem:[#allocation2 + $0x50] sm:$0xff] }
  0xe8   :  { %v811_v25 = vld [vmem:[#allocation2 + $0x4f] sm:$0xff]  ;;  %778 = vst.msk [vmem:[#allocation2 + $0x58] sm:$0xff] %vm9791_vm0, %v746_v18  ;;  %v5776_v28 = vpack.i.bf16 %v7073_v24, %v7071_v20  ;;  %v137_v18 = vand.u32 15, %v53_v11 }
  0xe9   :  { %v5771_v29 = vpack.i.bf16 %v811_v25, %v1166_v26  ;;  %v970_v41 = vld [vmem:[#allocation2 + $0x49] sm:$0xff]  ;;  %v761_v25 = vmax.f32 %v716_v16, 0.0 }
  0xea   :  { %5777 = vrot.lane.b32.xlu2 %v5776_v28, %s6897_s26  ;;  %v7144_v26 = vld [vmem:[%s9786_s3 + $0x88] sm:$0xff]  ;;  %v718_v28 = vpop.f32.mrf.mxu1  ;;  %vm7164_vm10 = vcmp.ge.s32.totalorder %v137_v18, 1 }
  0xeb   :  { %5772 = vrot.lane.b32.xlu1 %v5771_v29, %s6898_s27  ;;  %v680_v32 = vpop.f32.mrf.mxu0  ;;  %v5685_v29 = vld [vmem:[%s9786_s3 + $0x78] sm:$0xff]  ;;  %793 = vst.msk [vmem:[#allocation2 + $0xd0] sm:$0xff] %vm9791_vm0, %v761_v25  ;;  %5726 = vmatpush.bf16.msra.mxu3 %v7144_v26 }
  0xec   :  { %v681_v35 = vadd.f32 %v6983_v51, %v680_v32  ;;  %v719_v32 = vadd.f32 %v6983_v51, %v718_v28  ;;  %2497 = vmatpush.bf16.msra.mxu2 %v5685_v29  ;;  %v5681_v28 = vld [vmem:[%s9786_s3 + $0x58] sm:$0xff] }
  0xee   :  { %v747_v36 = vmax.f32 %v681_v35, 0.0  ;;  %v762_v38 = vmax.f32 %v719_v32, 0.0  ;;  %v10032_v32 = vmov 0 }
  0xef   :  { %v971_v40 = vld [vmem:[#allocation2 + $0x51] sm:$0xff]  ;;  %5727 = vmatpush.bf16.msra.mxu3 %v7159_v33 }
  0xf0   :  { %779 = vst.msk [vmem:[#allocation2 + $0x60] sm:$0xff] %vm9791_vm0, %v747_v36  ;;  %v1135_v42 = vsel %vm7087_vm7, %v971_v40, 0.0  ;;  %v7097_v53 = vld [vmem:[#allocation2 + $0x57] sm:$0xff]  ;;  %v10023_v36 = vmov 0  ;;  %2498 = vmatpush.bf16.msra.mxu2 %v5684_v34 }
  0xf1   :  { %v5781_v45 = vpack.i.bf16 %v1135_v42, %v970_v41  ;;  %v7104_v56 = vld [vmem:[#allocation2 + $0x58] sm:$0xff]  ;;  %v1168_v59 = vsel %vm7100_vm8, %v7097_v53, 0.0  ;;  %v10024_v36 = vsel %vm7164_vm10, 4294967295, %v10023_v36  ;;  %794 = vst.msk [vmem:[#allocation2 + $0xd8] sm:$0xff] %vm9791_vm0, %v762_v38 }
  0xf3   :  { %v683_v48 = vpop.f32.mrf.mxu0  ;;  %5782 = vrot.lane.b32.xlu0 %v5781_v45, %s6896_s25  ;;  %v56_v45 = vadd.s32 88, %v6989_v63 }
  0xf4   :  { %v684_v50 = vadd.f32 %v6983_v51, %v683_v48  ;;  %2499 = vmatpush.bf16.msra.mxu2 %v5683_v60 }
  0xf5   :  { %v158_v49 = vand.u32 15, %v56_v45  ;;  %v58_v45 = vadd.s32 104, %v6989_v63 }
  0xf6   :  { %v748_v54 = vmax.f32 %v684_v50, 0.0  ;;  %v720_v50 = vpop.f32.mrf.mxu1 }
  0xf7   :  { %v7106_v57 = vld [vmem:[#allocation2 + $0x60] sm:$0xff]  ;;  %vm7198_vm11 = vcmp.le.s32.totalorder %v158_v49, 14 }
  0xf8   :  { %v7108_v58 = vld [vmem:[#allocation2 + $0x5f] sm:$0xff]  ;;  %780 = vst.msk [vmem:[#allocation2 + $0x68] sm:$0xff] %vm9791_vm0, %v748_v54  ;;  %v7117_v61 = vpack.i.bf16 %v7106_v57, %v7104_v56  ;;  %v10027_v6 = vsel %vm7198_vm11, 4294967295, %v10026_v6 }
  0xf9   :  { %v5786_v62 = vpack.i.bf16 %v7108_v58, %v1168_v59  ;;  %v7134_v14 = vld [vmem:[#allocation2 + $0x59] sm:$0xff]  ;;  %v721_v59 = vadd.f32 %v6983_v51, %v720_v50  ;;  %10028 = vst [vmem:[#allocation16_spill] sm:$0xff] %v10027_v6 }
  0xfa   :  { %5792 = vrot.lane.b32.xlu2 %v7117_v61, %s6897_s26  ;;  %10022 = vst [vmem:[#allocation14_spill] sm:$0xff] %v7134_v14 }
  0xfb   :  { %5787 = vrot.lane.b32.xlu1 %v5786_v62, %s6898_s27  ;;  %v685_v5 = vpop.f32.mrf.mxu0  ;;  %v763_v2 = vmax.f32 %v721_v59, 0.0 }
  0xfc   :  { %v686_v8 = vadd.f32 %v6983_v51, %v685_v5  ;;  %v5682_v5 = vld [vmem:[%s9786_s3 + $0x60] sm:$0xff] }
  0xfd   :  { %795 = vst.msk [vmem:[#allocation2 + $0xe0] sm:$0xff] %vm9791_vm0, %v763_v2  ;;  %2500 = vmatpush.bf16.msra.mxu2 %v5682_v5  ;;  %v57_v5 = vadd.s32 96, %v6989_v63 }
  0xfe   :  { %v749_v9 = vmax.f32 %v686_v8, 0.0 }
  0xff   :  { %v7131_v13 = vld [vmem:[#allocation2 + $0x61] sm:$0xff] }
 0x100   :  { %781 = vst.msk [vmem:[#allocation2 + $0x70] sm:$0xff] %vm9791_vm0, %v749_v9  ;;  %v1137_v15 = vsel %vm7127_vm9, %v7131_v13, 0.0  ;;  %v7151_v31 = vld [vmem:[#allocation2 + $0x67] sm:$0xff]  ;;  %vm10100_vm9 = vcmask 785408  }
 0x101   :  { %v5796_v17 = vpack.i.bf16 %v1137_v15, %v7134_v14  ;;  %v7168_v40 = vld [vmem:[#allocation2 + $0x68] sm:$0xff]  ;;  %v1170_v43 = vsel %vm7164_vm10, %v7151_v31, 0.0  ;;  %v151_v15 = vand.u32 15, %v55_v1  ;;  %2501 = vmatpush.bf16.msra.mxu2 %v5681_v28  ;;  %vm10101_vm8 = vmmov %vm10100_vm9 }
 0x102   :  { %v5679_v1 = vld [vmem:[%s9786_s3 + $0x48] sm:$0xff] }
 0x103   :  { %v688_v27 = vpop.f32.mrf.mxu0  ;;  %5797 = vrot.lane.b32.xlu0 %v5796_v17, %s6896_s25  ;;  %v723_v17 = vpop.f32.mrf.mxu1  ;;  %vm7222_vm12 = vcmp.ge.s32.totalorder %v151_v15, 1 }
 0x104   :  { %v689_v30 = vadd.f32 %v6983_v51, %v688_v27  ;;  %v724_v27 = vadd.f32 %v6983_v51, %v723_v17  ;;  %v10033_v32 = vsel %vm7222_vm12, 4294967295, %v10032_v32 }
 0x106   :  { %v750_v35 = vmax.f32 %v689_v30, 0.0  ;;  %v764_v34 = vmax.f32 %v724_v27, 0.0  ;;  %v60_v27 = vadd.s32 120, %v6989_v63 }
 0x107   :  { %v7170_v41 = vld [vmem:[#allocation2 + $0x70] sm:$0xff] }
 0x108   :  { %v7172_v42 = vld [vmem:[#allocation2 + $0x6f] sm:$0xff]  ;;  %782 = vst.msk [vmem:[#allocation2 + $0x78] sm:$0xff] %vm9791_vm0, %v750_v35  ;;  %v7181_v46 = vpack.i.bf16 %v7170_v41, %v7168_v40 }
 0x109   :  { %v5801_v47 = vpack.i.bf16 %v7172_v42, %v1170_v43  ;;  %v7205_v8 = vld [vmem:[#allocation2 + $0x69] sm:$0xff]  ;;  %796 = vst.msk [vmem:[#allocation2 + $0xe8] sm:$0xff] %vm9791_vm0, %v764_v34  ;;  %v59_v34 = vadd.s32 112, %v6989_v63 }
 0x10a   :  { %10025 = vst [vmem:[#allocation15_spill] sm:$0xff] %v7181_v46  ;;  %5807 = vrot.lane.b32.xlu2 %v7181_v46, %s6897_s26 }
 0x10b   :  { %5802 = vrot.lane.b32.xlu1 %v5801_v47, %s6898_s27  ;;  %v690_v48 = vpop.f32.mrf.mxu0  ;;  %10030 = vst [vmem:[#allocation18_spill] sm:$0xff] %v7205_v8  ;;  %v5680_v47 = vld [vmem:[%s9786_s3 + $0x50] sm:$0xff]  ;;  %v725_v59 = vpop.f32.mrf.mxu1 }
 0x10c   :  { %v691_v54 = vadd.f32 %v6983_v51, %v690_v48  ;;  %2502 = vmatpush.bf16.msra.mxu2 %v5680_v47  ;;  %v186_v47 = vand.u32 15, %v60_v27  ;;  %v10051_v27 = vmov 0 }
 0x10e   :  { %v751_v62 = vmax.f32 %v691_v54, 0.0  ;;  %v172_v54 = vand.u32 15, %v58_v45  ;;  %vm7300_vm15 = vcmp.le.s32.totalorder %v186_v47, 14 }
 0x10f   :  { %v7202_v7 = vld [vmem:[#allocation2 + $0x71] sm:$0xff]  ;;  %v10052_v27 = vsel %vm7300_vm15, 4294967295, %v10051_v27 }
 0x110   :  { %10029 = vst [vmem:[#allocation17_spill] sm:$0xff] %v7202_v7  ;;  %v1139_v9 = vsel %vm7198_vm11, %v7202_v7, 0.0  ;;  %v7214_v25 = vld [vmem:[#allocation2 + $0x77] sm:$0xff]  ;;  %vm7253_vm13 = vcmp.le.s32.totalorder %v172_v54, 14  ;;  %2503 = vmatpush.bf16.msra.mxu2 %v5679_v1  ;;  %vm10096_vm11 = vcmask 261120   ;;  %v7449_v7 = vld [vmem:[#allocation2 + $0xc7] sm:$0xff] }
 0x111   :  { %783 = vst.msk [vmem:[#allocation2 + $0x80] sm:$0xff] %vm9791_vm0, %v751_v62  ;;  %v5811_v11 = vpack.i.bf16 %v1139_v9, %v7205_v8  ;;  %v7220_v30 = vld [vmem:[#allocation2 + $0x78] sm:$0xff]  ;;  %v1172_v43 = vsel %vm7222_vm12, %v7214_v25, 0.0  ;;  %v726_v62 = vadd.f32 %v6983_v51, %v725_v59  ;;  %v10043_v59 = vmov 0  ;;  %vm10097_vm10 = vmmov %vm10096_vm11  ;;  %v6754_v19 = vld [vmem:[#allocation2 + $0xe7] sm:$0xff] }
 0x112   :  { %10031 = vst [vmem:[#allocation19_spill] sm:$0xff] %v7214_v25  ;;  %v65_v8 = vadd.s32 160, %v6989_v63 }
 0x113   :  { %v693_v16 = vpop.f32.mrf.mxu0  ;;  %5812 = vrot.lane.b32.xlu0 %v5811_v11, %s6896_s25  ;;  %v765_v9 = vmax.f32 %v726_v62, 0.0  ;;  %v10036_v11 = vmov 0  ;;  %10053 = vst [vmem:[#allocation33_spill] sm:$0xff] %v10052_v27  ;;  %v7433_v27 = vld [vmem:[#allocation2 + $0xb9] sm:$0xff] }
 0x114   :  { %v694_v18 = vadd.f32 %v6983_v51, %v693_v16  ;;  %v10037_v11 = vsel %vm7253_vm13, 4294967295, %v10036_v11  ;;  %v5678_v16 = vld [vmem:[%s9786_s3 + $0x40] sm:$0xff]  ;;  %10095 = vst [vmem:[#allocation60_spill] sm:$0xff] %v7433_v27 }
 0x115   :  { %10038 = vst [vmem:[#allocation22_spill] sm:$0xff] %v10037_v11  ;;  %2504 = vmatpush.bf16.msra.mxu2 %v5678_v16 }
 0x116   :  { %v752_v29 = vmax.f32 %v694_v18, 0.0  ;;  %797 = vst.msk [vmem:[#allocation2 + $0xf0] sm:$0xff] %vm9791_vm0, %v765_v9  ;;  %v179_v9 = vand.u32 15, %v59_v34 }
 0x117   :  { %10098 = vst [vmem:[#allocation61_spill] sm:$0xff] %v7449_v7 }
 0x118   :  { %v7226_v35 = vld [vmem:[#allocation2 + $0x80] sm:$0xff]  ;;  %784 = vst.msk [vmem:[#allocation2 + $0x88] sm:$0xff] %vm9791_vm0, %v752_v29  ;;  %v165_v29 = vand.u32 15, %v57_v5 }
 0x119   :  { %v7228_v38 = vld [vmem:[#allocation2 + $0x7f] sm:$0xff]  ;;  %v7240_v48 = vpack.i.bf16 %v7226_v35, %v7220_v30  ;;  %2592 = vmatpush.bf16.msrb.mxu2 %v7144_v26 }
 0x11a   :  { %10034 = vst [vmem:[#allocation20_spill] sm:$0xff] %v7228_v38  ;;  %v5816_v49 = vpack.i.bf16 %v7228_v38, %v1172_v43  ;;  %v7263_v17 = vld [vmem:[#allocation2 + $0x79] sm:$0xff]  ;;  %v728_v43 = vpop.f32.mrf.mxu1  ;;  %vm7280_vm14 = vcmp.ge.s32.totalorder %v165_v29, 1 }
 0x11b   :  { %10035 = vst [vmem:[#allocation21_spill] sm:$0xff] %v7240_v48  ;;  %5822 = vrot.lane.b32.xlu2 %v7240_v48, %s6897_s26  ;;  %v695_v50 = vpop.f32.mrf.mxu0  ;;  %v10044_v59 = vsel %vm7280_vm14, 4294967295, %v10043_v59  ;;  %v7438_v38 = vld [vmem:[#allocation2 + $0x18] sm:$0xff] }
 0x11c   :  { %5817 = vrot.lane.b32.xlu1 %v5816_v49, %s6898_s27  ;;  %v696_v60 = vadd.f32 %v6983_v51, %v695_v50  ;;  %10040 = vst [vmem:[#allocation24_spill] sm:$0xff] %v7263_v17  ;;  %v62_v49 = vadd.s32 136, %v6989_v63  ;;  %v729_v50 = vadd.f32 %v6983_v51, %v728_v43 }
 0x11d   :  { %10045 = vst [vmem:[#allocation27_spill] sm:$0xff] %v10044_v59  ;;  %2593 = vmatpush.bf16.msrb.mxu2 %v7159_v33  ;;  %v7319_v33 = vld [vmem:[#allocation2 + $0xa1] sm:$0xff] }
 0x11e   :  { %v753_v2 = vmax.f32 %v696_v60, 0.0  ;;  %v766_v60 = vmax.f32 %v729_v50, 0.0  ;;  %10055 = vst [vmem:[#allocation35_spill] sm:$0xff] %v7319_v33  ;;  %v7321_v50 = vld [vmem:[#allocation2 + $0x98] sm:$0xff] }
 0x11f   :  { %v7257_v15 = vld [vmem:[#allocation2 + $0x81] sm:$0xff]  ;;  %10056 = vst [vmem:[#allocation36_spill] sm:$0xff] %v7321_v50 }
 0x120   :  { %10039 = vst [vmem:[#allocation23_spill] sm:$0xff] %v7257_v15  ;;  %v1141_v18 = vsel %vm7253_vm13, %v7257_v15, 0.0  ;;  %v7273_v45 = vld [vmem:[#allocation2 + $0x87] sm:$0xff] }
 0x121   :  { %785 = vst.msk [vmem:[#allocation2 + $0x90] sm:$0xff] %vm9791_vm0, %v753_v2  ;;  %v5826_v28 = vpack.i.bf16 %v1141_v18, %v7263_v17  ;;  %v7278_v54 = vld [vmem:[#allocation2 + $0x88] sm:$0xff]  ;;  %v1174_v2 = vsel %vm7280_vm14, %v7273_v45, 0.0  ;;  %vm10061_vm14 = vcmask 261120  }
 0x122   :  { %10041 = vst [vmem:[#allocation25_spill] sm:$0xff] %v7273_v45  ;;  %v730_v44 = vpop.f32.mrf.mxu1  ;;  %v7383_v15 = vld [vmem:[#allocation2 + $0xa9] sm:$0xff] }
 0x123   :  { %5827 = vrot.lane.b32.xlu0 %v5826_v28, %s6896_s25  ;;  %10042 = vst [vmem:[#allocation26_spill] sm:$0xff] %v7278_v54  ;;  %v200_v28 = vand.u32 15, %v62_v49 }
 0x124   :  { %798 = vst.msk [vmem:[#allocation2 + $0xf8] sm:$0xff] %vm9791_vm0, %v766_v60  ;;  %v7323_v60 = vld [vmem:[#allocation2 + $0xa0] sm:$0xff]  ;;  %vm7325_vm0 = vcmp.ge.s32.totalorder %v179_v9, 1 }
 0x125   :  { %10057 = vst [vmem:[#allocation37_spill] sm:$0xff] %v7323_v60 }
 0x126   :  { %10079 = vst [vmem:[#allocation50_spill] sm:$0xff] %v7383_v15 }
 0x128   :  { %v7284_v62 = vld [vmem:[#allocation2 + $0x90] sm:$0xff] }
 0x129   :  { %10046 = vst [vmem:[#allocation28_spill] sm:$0xff] %v7284_v62  ;;  %v7286_v1 = vld [vmem:[#allocation2 + $0x8f] sm:$0xff]  ;;  %v7295_v26 = vpack.i.bf16 %v7284_v62, %v7278_v54  ;;  %v7317_v49 = vld [vmem:[#allocation2 + $0x97] sm:$0xff]  ;;  %v1213_v62 = vsel %vm7300_vm15, %v7319_v33, 0.0 }
 0x12a   :  { %10047 = vst [vmem:[#allocation29_spill] sm:$0xff] %v7286_v1  ;;  %v7291_v5 = vld [vmem:[#allocation2 + $0x89] sm:$0xff]  ;;  %v5831_v16 = vpack.i.bf16 %v7286_v1, %v1174_v2  ;;  %v7298_v18 = vld [vmem:[#allocation2 + $0x91] sm:$0xff]  ;;  %v10058_v2 = vmov 0  ;;  %v1176_v9 = vsel %vm7325_vm0, %v7317_v49, 0.0 }
 0x12b   :  { %10048 = vst [vmem:[#allocation30_spill] sm:$0xff] %v7291_v5  ;;  %v1211_v29 = vsel %vm7253_vm13, %v7298_v18, 0.0  ;;  %v1143_v34 = vsel %vm7300_vm15, %v7298_v18, 0.0  ;;  %5837 = vrot.lane.b32.xlu2 %v7295_v26, %s6897_s26  ;;  %v10059_v2 = vsel %vm7325_vm0, 4294967295, %v10058_v2  ;;  %vm7331_vm13 = vcmp.le.s32.totalorder %v200_v28, 14  ;;  %v7395_v54 = vld [vmem:[#allocation2 + $0xb7] sm:$0xff] }
 0x12c   :  { %10049 = vst [vmem:[#allocation31_spill] sm:$0xff] %v7295_v26  ;;  %5832 = vrot.lane.b32.xlu1 %v5831_v16, %s6898_s27  ;;  %v2184_v43 = vpack.c.bf16 %v1211_v29, %v7291_v5  ;;  %v5841_v47 = vpack.i.bf16 %v1143_v34, %v7291_v5  ;;  %v10062_v16 = vmov 0  ;;  %v61_v29 = vadd.s32 128, %v6989_v63  ;;  %v7343_v26 = vld [vmem:[#allocation2 + $0x99] sm:$0xff] }
 0x12d   :  { %10050 = vst [vmem:[#allocation32_spill] sm:$0xff] %v7298_v18  ;;  %v10063_v16 = vsel %vm7331_vm13, 4294967295, %v10062_v16  ;;  %v64_v34 = vadd.s32 152, %v6989_v63  ;;  %v731_v5 = vadd.f32 %v6983_v51, %v730_v44  ;;  %v7338_v18 = vld [vmem:[#allocation2 + $0x9f] sm:$0xff]  ;;  %v1145_v28 = vsel %vm7331_vm13, %v7319_v33, 0.0 }
 0x12e   :  { %10054 = vst [vmem:[#allocation34_spill] sm:$0xff] %v7317_v49  ;;  %5484 = vmatmul.msk.bf16.vlgmr.msra.gmra.mxu3 %vm10061_vm14, %v2184_v43  ;;  %5842 = vrot.lane.b32.xlu0 %v5841_v47, %s6896_s25  ;;  %v7350_v43 = vpack.i.bf16 %v7323_v60, %v7321_v50  ;;  %v5846_v17 = vpack.i.bf16 %v7338_v18, %v1176_v9  ;;  %v193_v1 = vand.u32 15, %v61_v29  ;;  %v63_v49 = vadd.s32 144, %v6989_v63  ;;  %v7361_v60 = vld [vmem:[#allocation2 + $0xb1] sm:$0xff]  ;;  %v7364_v9 = vld [vmem:[#allocation2 + $0xa8] sm:$0xff]  ;;  %v733_v29 = vpop.f32.mrf.mxu1 }
 0x12f   :  { %10060 = vst [vmem:[#allocation38_spill] sm:$0xff] %v10059_v2  ;;  %v767_v47 = vmax.f32 %v731_v5, 0.0  ;;  %v5856_v44 = vpack.i.bf16 %v1145_v28, %v7343_v26  ;;  %v214_v45 = vand.u32 15, %v64_v34  ;;  %v7359_v2 = vld [vmem:[#allocation2 + $0xa7] sm:$0xff]  ;;  %v66_v5 = vadd.s32 168, %v6989_v63  ;;  %v7366_v28 = vld [vmem:[#allocation2 + $0xb0] sm:$0xff] }
 0x130   :  { %10064 = vst [vmem:[#allocation39_spill] sm:$0xff] %v10063_v16  ;;  %v10072_v34 = vmov 0  ;;  %v7378_v50 = vld [vmem:[#allocation2 + $0xaf] sm:$0xff]  ;;  %vm10093_vm15 = vcmask 261120  }
 0x131   :  { %10065 = vst [vmem:[#allocation40_spill] sm:$0xff] %v7338_v18  ;;  %vm7373_vm0 = vcmp.le.s32.totalorder %v214_v45, 14  ;;  %v7390_v45 = vpack.i.bf16 %v7366_v28, %v7364_v9  ;;  %v228_v48 = vand.u32 15, %v66_v5  ;;  %v10085_v5 = vmov 0 }
 0x132   :  { %10066 = vst [vmem:[#allocation41_spill] sm:$0xff] %v7343_v26 }
 0x133   :  { %10067 = vst [vmem:[#allocation42_spill] sm:$0xff] %v7350_v43  ;;  %5852 = vrot.lane.b32.xlu2 %v7350_v43, %s6897_s26 }
 0x134   :  { %799 = vst.msk [vmem:[#allocation2 + $0x100] sm:$0xff] %vm10061_vm14, %v767_v47  ;;  %5847 = vrot.lane.b32.xlu1 %v5846_v17, %s6898_s27  ;;  %vm7369_vm14 = vcmp.ge.s32.totalorder %v193_v1, 1  ;;  %v10075_v47 = vmov 0  ;;  %v734_v17 = vadd.f32 %v6983_v51, %v733_v29  ;;  %v1147_v1 = vsel %vm7373_vm0, %v7361_v60, 0.0  ;;  %v5758_v59 = vpop.permute.xlu2 %5757 }
 0x135   :  { %10068 = vst [vmem:[#allocation43_spill] sm:$0xff] %v7359_v2  ;;  %v10073_v34 = vsel %vm7369_vm14, 4294967295, %v10072_v34  ;;  %v10076_v47 = vsel %vm7373_vm0, 4294967295, %v10075_v47  ;;  %v5738_v43 = vpop.permute.xlu0 %5737  ;;  %v1178_v18 = vsel %vm7369_vm14, %v7359_v2, 0.0  ;;  %vm10082_vm14 = vcmask 261120  }
 0x136   :  { %10069 = vst [vmem:[#allocation44_spill] sm:$0xff] %v7361_v60  ;;  %5857 = vrot.lane.b32.xlu0 %v5856_v44, %s6896_s25  ;;  %v207_v44 = vand.u32 15, %v63_v49  ;;  %v768_v29 = vmax.f32 %v734_v17, 0.0  ;;  %v5861_v2 = vpack.i.bf16 %v7378_v50, %v1178_v18  ;;  %v7401_v49 = vld [vmem:[#allocation2 + $0xb8] sm:$0xff]  ;;  %v2187_v18 = vpack.c.bf16 %v1213_v62, %v7343_v26  ;;  %v735_v33 = vpop.f32.mrf.mxu1 }
 0x137   :  { %10070 = vst [vmem:[#allocation45_spill] sm:$0xff] %v7364_v9  ;;  %v7413_v17 = vld [vmem:[#allocation2 + $0xbf] sm:$0xff]  ;;  %v68_v9 = vadd.s32 184, %v6989_v63 }
 0x138   :  { %10071 = vst [vmem:[#allocation46_spill] sm:$0xff] %v7366_v28  ;;  %v7403_v28 = vld [vmem:[#allocation2 + $0xc0] sm:$0xff]  ;;  %vm7405_vm12 = vcmp.ge.s32.totalorder %v207_v44, 1 }
 0x139   :  { %10074 = vst [vmem:[#allocation47_spill] sm:$0xff] %v10073_v34  ;;  %v5871_v34 = vpack.i.bf16 %v1147_v1, %v7383_v15  ;;  %v10086_v5 = vsel %vm7405_vm12, 4294967295, %v10085_v5  ;;  %v1180_v1 = vsel %vm7405_vm12, %v7395_v54, 0.0  ;;  %v7422_v44 = vld [vmem:[#allocation2 + $0xc1] sm:$0xff]  ;;  %vm10099_vm12 = vmmov %vm10097_vm10 }
 0x13a   :  { %10077 = vst [vmem:[#allocation48_spill] sm:$0xff] %v10076_v47 }
 0x13b   :  { %10078 = vst [vmem:[#allocation49_spill] sm:$0xff] %v7378_v50  ;;  %5867 = vrot.lane.b32.xlu2 %v7390_v45, %s6897_s26  ;;  %v5740_v50 = vunpack.i.h.bf16 %v5738_v43 }
 0x13c   :  { %10080 = vst [vmem:[#allocation51_spill] sm:$0xff] %v7390_v45  ;;  %5862 = vrot.lane.b32.xlu1 %v5861_v2, %s6898_s27  ;;  %v5739_v45 = vunpack.i.l.bf16 %v5738_v43  ;;  %v5748_v62 = vpop.permute.xlu1 %5747  ;;  %v7429_v2 = vpack.i.bf16 %v7403_v28, %v7401_v49 }
 0x13d   :  { %10081 = vst [vmem:[#allocation52_spill] sm:$0xff] %v7395_v54  ;;  %v736_v54 = vadd.f32 %v6983_v51, %v735_v33  ;;  %v5743_v26 = vpop.permute.xlu0 %5742  ;;  %v5750_v51 = vunpack.i.h.bf16 %v5748_v62  ;;  %v5749_v33 = vunpack.i.l.bf16 %v5748_v62  ;;  %v7458_v62 = vld [vmem:[#allocation2 + $0xc8] sm:$0xff] }
 0x13e   :  { %800 = vst.msk [vmem:[#allocation2 + $0x108] sm:$0xff] %vm10082_vm14, %v768_v29  ;;  %vm7418_vm14 = vcmp.le.s32.totalorder %v228_v48, 14  ;;  %v10089_v29 = vmov 0  ;;  %5485 = vmatmul.msk.bf16.gmra.mxu3 %vm10093_vm15, %v2187_v18  ;;  %5872 = vrot.lane.b32.xlu0 %v5871_v34, %s6896_s25  ;;  %v221_v48 = vand.u32 15, %v65_v8  ;;  %vm9863_vm15 = vcmask 523264  }
 0x13f   :  { %10083 = vst [vmem:[#allocation53_spill] sm:$0xff] %v7401_v49  ;;  %v10090_v29 = vsel %vm7418_vm14, 4294967295, %v10089_v29  ;;  %v1149_v43 = vsel %vm7418_vm14, %v7422_v44, 0.0  ;;  %v5745_v34 = vunpack.i.h.bf16 %v5743_v26  ;;  %v5744_v18 = vunpack.i.l.bf16 %v5743_v26 }
 0x140   :  { %10084 = vst [vmem:[#allocation54_spill] sm:$0xff] %v7403_v28  ;;  %v7440_v28 = vld [vmem:[#allocation2 + $0x20] sm:$0xff]  ;;  %v242_v8 = vand.u32 15, %v68_v9  ;;  %v769_v49 = vmax.f32 %v736_v54, 0.0  ;;  %v5886_v25 = vpack.i.bf16 %v1149_v43, %v7433_v27  ;;  %v67_v9 = vadd.s32 176, %v6989_v63  ;;  %v7460_v43 = vld [vmem:[#allocation2 + $0xd0] sm:$0xff] }
 0x141   :  { %10087 = vst [vmem:[#allocation55_spill] sm:$0xff] %v10086_v5  ;;  %v5876_v5 = vpack.i.bf16 %v7413_v17, %v1180_v1  ;;  %v2068_v1 = vsel %vm10096_vm11, %v7438_v38, %v5739_v45 }
 0x142   :  { %10088 = vst [vmem:[#allocation56_spill] sm:$0xff] %v7413_v17  ;;  %v2069_v17 = vsel %vm10097_vm10, %v7440_v28, %v5740_v50  ;;  %v2100_v11 = vsel %vm9863_vm15, %v2068_v1, %v5744_v18  ;;  %vm7462_vm10 = vcmp.ge.s32.totalorder %v221_v48, 1  ;;  %vm7466_vm11 = vcmp.le.s32.totalorder %v242_v8, 14  ;;  %v7473_v18 = vld [vmem:[#allocation2 + $0xcf] sm:$0xff] }
 0x143   :  { %10091 = vst [vmem:[#allocation57_spill] sm:$0xff] %v10090_v29  ;;  %v2101_v26 = vsel %vm9863_vm15, %v2069_v17, %v5745_v34  ;;  %v2132_v54 = vsel %vm10100_vm9, %v2100_v11, %v5749_v33  ;;  %5882 = vrot.lane.b32.xlu2 %v7429_v2, %s6897_s26  ;;  %v10104_v17 = vmov 0  ;;  %v7470_v11 = vld [vmem:[#allocation2 + $0xd1] sm:$0xff]  ;;  %v70_v34 = vadd.s32 200, %v6989_v63  ;;  %v7486_v1 = vld [vmem:[#allocation2 + $0xc9] sm:$0xff]  ;;  %vm10116_vm9 = vmmov %vm10099_vm12 }
 0x144   :  { %10092 = vst [vmem:[#allocation58_spill] sm:$0xff] %v7422_v44  ;;  %v2133_v45 = vsel %vm10101_vm8, %v2101_v26, %v5750_v51  ;;  %5877 = vrot.lane.b32.xlu1 %v5876_v5, %s6898_s27  ;;  %v10105_v17 = vsel %vm7462_vm10, 4294967295, %v10104_v17  ;;  %v1182_v5 = vsel %vm7462_vm10, %v7449_v7, 0.0  ;;  %v235_v48 = vand.u32 15, %v67_v9 }
 0x145   :  { %10094 = vst [vmem:[#allocation59_spill] sm:$0xff] %v7429_v2  ;;  %v2165_v50 = vpack.c.bf16 %v2133_v45, %v2132_v54  ;;  %v5753_v51 = vpop.permute.xlu1 %5752  ;;  %v7481_v8 = vpack.i.bf16 %v7460_v43, %v7458_v62  ;;  %v1215_v33 = vsel %vm7331_vm13, %v7361_v60, 0.0  ;;  %v1151_v26 = vsel %vm7466_vm11, %v7470_v11, 0.0 }
 0x146   :  { %801 = vst.msk [vmem:[#allocation2 + $0x110] sm:$0xff] %vm10099_vm12, %v769_v49  ;;  %v10107_v49 = vmov 0  ;;  %5887 = vrot.lane.b32.xlu0 %v5886_v25, %s6896_s25  ;;  %v5755_v54 = vunpack.i.h.bf16 %v5753_v51  ;;  %v5754_v45 = vunpack.i.l.bf16 %v5753_v51  ;;  %v5891_v25 = vpack.i.bf16 %v7473_v18, %v1182_v5  ;;  %vm10117_vm12 = vmmov %vm10116_vm9 }
 0x147   :  { %10102 = vst [vmem:[#allocation62_spill] sm:$0xff] %v7458_v62  ;;  %v10108_v49 = vsel %vm7466_vm11, 4294967295, %v10107_v49  ;;  %2505 = vmatmul.bf16.vlgmr.msra.gmra.mxu2 %v2165_v50  ;;  %v256_v9 = vand.u32 15, %v70_v34  ;;  %v5901_v50 = vpack.i.bf16 %v1151_v26, %v7486_v1  ;;  %vm7493_vm8 = vcmp.ge.s32.totalorder %v235_v48, 1  ;;  %v7497_v62 = vld [vmem:[#allocation2 + $0xd7] sm:$0xff] }
 0x148   :  { %10103 = vst [vmem:[#allocation63_spill] sm:$0xff] %v7460_v43  ;;  %v10112_v43 = vmov 0  ;;  %v2190_v7 = vpack.c.bf16 %v1215_v33, %v7383_v15  ;;  %v2070_v2 = vsel %vm10116_vm9, %v7009_v22, %v5754_v45  ;;  %v2071_v60 = vsel %vm10117_vm12, %v7011_v23, %v5755_v54  ;;  %v7512_v33 = vld [vmem:[#allocation2 + $0xe1] sm:$0xff]  ;;  %v956_v26 = vld [vmem:[#allocation2 + $0xd8] sm:$0xff] }
 0x149   :  { %10106 = vst [vmem:[#allocation64_spill] sm:$0xff] %v10105_v17  ;;  %v10113_v43 = vsel %vm7493_vm8, 4294967295, %v10112_v43  ;;  %v69_v51 = vadd.s32 192, %v6989_v63  ;;  %v5760_v5 = vunpack.i.h.bf16 %v5758_v59  ;;  %v5759_v34 = vunpack.i.l.bf16 %v5758_v59  ;;  %v957_v23 = vld [vmem:[#allocation2 + $0xe0] sm:$0xff] }
 0x14a   :  { %10109 = vst [vmem:[#allocation65_spill] sm:$0xff] %v10108_v49  ;;  %vm7508_vm15 = vcmp.le.s32.totalorder %v256_v9, 14  ;;  %v10118_v48 = vmov 0  ;;  %v72_v22 = vadd.s32 216, %v6989_v63  ;;  %v7515_v54 = vld [vmem:[#allocation2 + $0xdf] sm:$0xff]  ;;  %v1184_v59 = vsel %vm7493_vm8, %v7497_v62, 0.0 }
 0x14b   :  { %10110 = vst [vmem:[#allocation66_spill] sm:$0xff] %v7473_v18  ;;  %v5763_v18 = vpop.permute.xlu2 %5762  ;;  %5897 = vrot.lane.b32.xlu2 %v7481_v8, %s6897_s26  ;;  %v10119_v48 = vsel %vm7508_vm15, 4294967295, %v10118_v48  ;;  %vm10122_vm12 = vcmask 523264   ;;  %v7524_v15 = vld [vmem:[#allocation2 + $0xd9] sm:$0xff]  ;;  %v1153_v17 = vsel %vm7508_vm15, %v7512_v33, 0.0  ;;  %v7529_v16 = vpack.i.bf16 %v957_v23, %v956_v26  ;;  %v959_v23 = vld [vmem:[#allocation2 + $0xf0] sm:$0xff] }
 0x14c   :  { %10111 = vst [vmem:[#allocation67_spill] sm:$0xff] %v7481_v8  ;;  %5892 = vrot.lane.b32.xlu1 %v5891_v25, %s6898_s27  ;;  %v2102_v45 = vsel %vm10122_vm12, %v2070_v2, %v5759_v34  ;;  %vm10123_vm10 = vmmov %vm10122_vm12  ;;  %v5765_v9 = vunpack.i.h.bf16 %v5763_v18  ;;  %v5764_v8 = vunpack.i.l.bf16 %v5763_v18  ;;  %v5916_v18 = vpack.i.bf16 %v1153_v17, %v7524_v15  ;;  %v958_v17 = vld [vmem:[#allocation2 + $0xe8] sm:$0xff]  ;;  %v10272_v29 = vld [vmem:[#allocation58_spill] sm:$0xff] }
 0x14d   :  { %10114 = vst [vmem:[#allocation68_spill] sm:$0xff] %v10113_v43  ;;  %v2103_v25 = vsel %vm10123_vm10, %v2071_v60, %v5760_v5  ;;  %v249_v43 = vand.u32 15, %v69_v51  ;;  %v71_v60 = vadd.s32 208, %v6989_v63  ;;  %v7536_v5 = vld [vmem:[#allocation2 + $0xe7] sm:$0xff]  ;;  %v74_v34 = vadd.s32 232, %v6989_v63 }
 0x14e   :  { %10115 = vst [vmem:[#allocation69_spill] sm:$0xff] %v7497_v62  ;;  %5486 = vmatmul.msk.bf16.gmra.mxu3 %vm10116_vm9, %v2190_v7  ;;  %5902 = vrot.lane.b32.xlu0 %v5901_v50, %s6896_s25  ;;  %v5906_v62 = vpack.i.bf16 %v7515_v54, %v1184_v59  ;;  %v270_v7 = vand.u32 15, %v72_v22  ;;  %vm10125_vm9 = vcmask 785408   ;;  %v10128_v51 = vmov 0  ;;  %v7550_v22 = vld [vmem:[#allocation2 + $0xf1] sm:$0xff] }
 0x14f   :  { %10120 = vst [vmem:[#allocation70_spill] sm:$0xff] %v10119_v48  ;;  %v2134_v50 = vsel %vm10125_vm9, %v2102_v45, %v5764_v8  ;;  %vm10126_vm8 = vmmov %vm10125_vm9  ;;  %vm7542_vm10 = vcmp.ge.s32.totalorder %v249_v43, 1  ;;  %v10131_v8 = vmov 0  ;;  %v7552_v59 = vld [vmem:[#allocation2 + $0xef] sm:$0xff] }
 0x150   :  { %10121 = vst [vmem:[#allocation71_spill] sm:$0xff] %v7515_v54  ;;  %v2135_v2 = vsel %vm10126_vm8, %v2103_v25, %v5765_v9  ;;  %v10129_v51 = vsel %vm7542_vm10, 4294967295, %v10128_v51  ;;  %vm7546_vm12 = vcmp.le.s32.totalorder %v270_v7, 14  ;;  %v1186_v45 = vsel %vm7542_vm10, %v7536_v5, 0.0  ;;  %v7558_v43 = vld [vmem:[#allocation2 + $0xe9] sm:$0xff] }
 0x151   :  { %10124 = vst [vmem:[#allocation72_spill] sm:$0xff] %v7529_v16  ;;  %v2168_v26 = vpack.c.bf16 %v2135_v2, %v2134_v50  ;;  %v10132_v8 = vsel %vm7546_vm12, 4294967295, %v10131_v8  ;;  %v1155_v25 = vsel %vm7546_vm12, %v7550_v22, 0.0  ;;  %v284_v9 = vand.u32 15, %v74_v34 }
 0x152   :  { %10127 = vst [vmem:[#allocation73_spill] sm:$0xff] %v7536_v5  ;;  %v7563_v7 = vpack.i.bf16 %v959_v23, %v958_v17  ;;  %v5921_v50 = vpack.i.bf16 %v7552_v59, %v1186_v45  ;;  %v1217_v2 = vsel %vm7373_vm0, %v7422_v44, 0.0  ;;  %v960_v17 = vld [vmem:[#allocation2 + $0xf8] sm:$0xff]  ;;  %v961_v23 = vld [vmem:[#allocation2 + $0x100] sm:$0xff]  ;;  %v10140_v45 = vmov 0 }
 0x153   :  { %5912 = vrot.lane.b32.xlu2 %v7529_v16, %s6897_s26  ;;  %10130 = vst [vmem:[#allocation74_spill] sm:$0xff] %v10129_v51  ;;  %v73_v16 = vadd.s32 224, %v6989_v63  ;;  %v2193_v34 = vpack.c.bf16 %v1217_v2, %v7433_v27  ;;  %vm7578_vm9 = vcmp.le.s32.totalorder %v284_v9, 14  ;;  %v76_v9 = vadd.s32 248, %v6989_v63 }
 0x154   :  { %5907 = vrot.lane.b32.xlu1 %v5906_v62, %s6898_s27  ;;  %10133 = vst [vmem:[#allocation75_spill] sm:$0xff] %v10132_v8  ;;  %v263_v62 = vand.u32 15, %v71_v60  ;;  %v10136_v60 = vmov 0  ;;  %v10141_v45 = vsel %vm7578_vm9, 4294967295, %v10140_v45  ;;  %vm10144_vm10 = vcmask 261120  }
 0x155   :  { %10134 = vst [vmem:[#allocation76_spill] sm:$0xff] %v7552_v59  ;;  %v5768_v5 = vpop.permute.xlu0 %5767  ;;  %v7582_v59 = vld [vmem:[#allocation2 + $0x101] sm:$0xff]  ;;  %v7595_v44 = vpack.i.bf16 %v961_v23, %v960_v17  ;;  %v298_v17 = vand.u32 15, %v76_v9  ;;  %vm10147_vm0 = vcmask 523264  }
 0x156   :  { %5917 = vrot.lane.b32.xlu0 %v5916_v18, %s6896_s25  ;;  %10135 = vst [vmem:[#allocation77_spill] sm:$0xff] %v7563_v7  ;;  %vm7569_vm8 = vcmp.ge.s32.totalorder %v263_v62, 1  ;;  %v7573_v18 = vld [vmem:[#allocation2 + $0xf7] sm:$0xff]  ;;  %v5778_v62 = vpop.permute.xlu2 %5777  ;;  %v5770_v54 = vunpack.i.h.bf16 %v5768_v5  ;;  %v5769_v51 = vunpack.i.l.bf16 %v5768_v5  ;;  %v1157_v5 = vsel %vm7578_vm9, %v7582_v59, 0.0  ;;  %vm10148_vm13 = vmmov %vm10147_vm0 }
 0x157   :  { %2510 = vmatmul.bf16.gmra.mxu2 %v2168_v26  ;;  %v10137_v60 = vsel %vm7569_vm8, 4294967295, %v10136_v60  ;;  %10139 = vst [vmem:[#allocation79_spill] sm:$0xff] %v7573_v18  ;;  %v5931_v26 = vpack.i.bf16 %v1155_v25, %v7558_v43  ;;  %v7587_v25 = vld [vmem:[#allocation2 + $0xff] sm:$0xff]  ;;  %v1188_v2 = vsel %vm7569_vm8, %v7573_v18, 0.0  ;;  %v5779_v14 = vunpack.i.l.bf16 %v5778_v62  ;;  %vm10146_vm8 = vmmov %vm10144_vm10 }
 0x158   :  { %10138 = vst [vmem:[#allocation78_spill] sm:$0xff] %v10137_v60  ;;  %v5936_v60 = vpack.i.bf16 %v7587_v25, %v1188_v2  ;;  %v7601_v18 = vld [vmem:[#allocation2 + $0xf9] sm:$0xff]  ;;  %vm10149_vm9 = vcmask 785408  }
 0x159   :  { %10142 = vst [vmem:[#allocation80_spill] sm:$0xff] %v10141_v45  ;;  %vm10150_vm12 = vmmov %vm10149_vm9 }
 0x15a   :  { %10143 = vst [vmem:[#allocation81_spill] sm:$0xff] %v7587_v25 }
 0x15b   :  { %5927 = vrot.lane.b32.xlu2 %v7563_v7, %s6897_s26  ;;  %10145 = vst [vmem:[#allocation82_spill] sm:$0xff] %v7595_v44  ;;  %v5780_v7 = vunpack.i.h.bf16 %v5778_v62  ;;  %v10151_v62 = vmov 0 }
 0x15c   :  { %5922 = vrot.lane.b32.xlu1 %v5921_v50, %s6898_s27  ;;  %v277_v50 = vand.u32 15, %v73_v16  ;;  %v75_v16 = vadd.s32 240, %v6989_v63  ;;  %v10155_v63 = vmov 0 }
 0x15d   :  { %v5773_v27 = vpop.permute.xlu1 %5772 }
 0x15e   :  { %5487 = vmatmul.msk.bf16.gmra.mxu3 %vm10144_vm10, %v2193_v34  ;;  %5932 = vrot.lane.b32.xlu0 %v5931_v26, %s6896_s25  ;;  %v5775_v47 = vunpack.i.h.bf16 %v5773_v27  ;;  %v5774_v46 = vunpack.i.l.bf16 %v5773_v27  ;;  %v2072_v34 = vsel %vm10144_vm10, %v7051_v3, %v5769_v51  ;;  %v2073_v26 = vsel %vm10146_vm8, %v7048_v0, %v5770_v54  ;;  %v7617_v3 = vld [vmem:[#allocation2 + $0x107] sm:$0xff]  ;;  %v7632_v54 = vld [vmem:[#allocation2 + $0x10f] sm:$0xff] }
 0x15f   :  { %v5946_v27 = vpack.i.bf16 %v1157_v5, %v7601_v18  ;;  %vm7613_vm7 = vcmp.ge.s32.totalorder %v277_v50, 1  ;;  %10154 = vst [vmem:[#allocation84_spill] sm:$0xff] %v7617_v3  ;;  %v1219_v50 = vsel %vm7418_vm14, %v7470_v11, 0.0  ;;  %vm10166_vm10 = vcmask 523264  }
 0x160   :  { %v2104_v23 = vsel %vm10147_vm0, %v2072_v34, %v5774_v46  ;;  %v2105_v45 = vsel %vm10148_vm13, %v2073_v26, %v5775_v47  ;;  %v10152_v62 = vsel %vm7613_vm7, 4294967295, %v10151_v62  ;;  %vm7622_vm0 = vcmp.le.s32.totalorder %v298_v17, 14  ;;  %v7626_v46 = vld [vmem:[#allocation2 + $0x111] sm:$0xff]  ;;  %10160 = vst [vmem:[#allocation88_spill] sm:$0xff] %v7632_v54 }
 0x161   :  { %v2136_v2 = vsel %vm10149_vm9, %v2104_v23, %v5779_v14  ;;  %v2137_v25 = vsel %vm10150_vm12, %v2105_v45, %v5780_v7  ;;  %10153 = vst [vmem:[#allocation83_spill] sm:$0xff] %v10152_v62  ;;  %v10156_v63 = vsel %vm7622_vm0, 4294967295, %v10155_v63  ;;  %v7628_v14 = vld [vmem:[#allocation2 + $0x108] sm:$0xff]  ;;  %v7630_v47 = vld [vmem:[#allocation2 + $0x110] sm:$0xff]  ;;  %v1190_v51 = vsel %vm7613_vm7, %v7617_v3, 0.0  ;;  %vm10164_vm12 = vmmov %vm10146_vm8 }
 0x162   :  { %v2171_v0 = vpack.c.bf16 %v2137_v25, %v2136_v2  ;;  %10157 = vst [vmem:[#allocation85_spill] sm:$0xff] %v10156_v63  ;;  %v291_v7 = vand.u32 15, %v75_v16  ;;  %v1159_v45 = vsel %vm7622_vm0, %v7626_v46, 0.0  ;;  %v5956_v25 = vpack.i.bf16 %v7630_v47, %v7628_v14  ;;  %v1160_v26 = vld [vmem:[#allocation2 + $0x117] sm:$0xff]  ;;  %vm10165_vm9 = vmmov %vm10146_vm8 }
 0x163   :  { %5942 = vrot.lane.b32.xlu2 %v7595_v44, %s6897_s26  ;;  %10158 = vst [vmem:[#allocation86_spill] sm:$0xff] %v7628_v14  ;;  %v5951_v9 = vpack.i.bf16 %v7632_v54, %v1190_v51  ;;  %v10161_v34 = vmov 0  ;;  %v1194_v2 = vld [vmem:[#allocation2 + $0x118] sm:$0xff]  ;;  %v5793_v54 = vpop.permute.xlu2 %5792  ;;  %v930_v44 = vld [vmem:[#allocation2 + $0x8] sm:$0xff]  ;;  %vm10168_vm0 = vcmask 785408  }
 0x164   :  { %5937 = vrot.lane.b32.xlu1 %v5936_v60, %s6898_s27  ;;  %10159 = vst [vmem:[#allocation87_spill] sm:$0xff] %v7630_v47  ;;  %v7638_v60 = vld [vmem:[#allocation2 + $0x109] sm:$0xff]  ;;  %vm7649_vm13 = vcmp.ge.s32.totalorder %v291_v7, 1  ;;  %v1161_v51 = vld [vmem:[#allocation2 + $0x11f] sm:$0xff]  ;;  %v5795_v14 = vunpack.i.h.bf16 %v5793_v54 }
 0x165   :  { %v5783_v5 = vpop.permute.xlu0 %5782  ;;  %v10162_v34 = vsel %vm7649_vm13, 4294967295, %v10161_v34  ;;  %v5961_v17 = vpack.i.bf16 %v1159_v45, %v7638_v60  ;;  %v1192_v7 = vsel %vm7649_vm13, %v1160_v26, 0.0  ;;  %vm10169_vm13 = vmmov %vm10168_vm0 }
 0x166   :  { %5947 = vrot.lane.b32.xlu0 %v5946_v27, %s6896_s25  ;;  %10163 = vst [vmem:[#allocation89_spill] sm:$0xff] %v10162_v34  ;;  %v5785_v23 = vunpack.i.h.bf16 %v5783_v5  ;;  %v5784_v16 = vunpack.i.l.bf16 %v5783_v5  ;;  %v2196_v27 = vpack.c.bf16 %v1219_v50, %v7486_v1  ;;  %v5794_v50 = vunpack.i.l.bf16 %v5793_v54  ;;  %v963_v54 = vld [vmem:[#allocation2 + $0x11] sm:$0xff] }
 0x167   :  { %2515 = vmatmul.bf16.gmra.mxu2 %v2171_v0  ;;  %v1195_v0 = vld [vmem:[#allocation2 + $0x120] sm:$0xff] }
 0x168   :  { %v5971_v3 = vpack.i.bf16 %v1195_v0, %v1194_v2  ;;  %v2074_v47 = vsel %vm10146_vm8, %v7071_v20, %v5784_v16  ;;  %v2075_v26 = vsel %vm10165_vm9, %v7073_v24, %v5785_v23  ;;  %v7672_v20 = vld [vmem:[#allocation2 + $0x17] sm:$0xff]  ;;  %v7674_v24 = vld [vmem:[#allocation2 + $0x1f] sm:$0xff]  ;;  %vm10173_vm9 = vmmov %vm10166_vm10 }
 0x16b   :  { %5957 = vrot.lane.b32.xlu2 %v5956_v25, %s6897_s26  ;;  %v5966_v25 = vpack.i.bf16 %v1161_v51, %v1192_v7 }
 0x16c   :  { %5952 = vrot.lane.b32.xlu1 %v5951_v9, %s6898_s27  ;;  %v931_v9 = vld [vmem:[#allocation2 + $0x10] sm:$0xff] }
 0x16d   :  { %v5788_v45 = vpop.permute.xlu1 %5787 }
 0x16e   :  { %5488 = vmatmul.msk.bf16.gmra.mxu3 %vm10164_vm12, %v2196_v27  ;;  %5962 = vrot.lane.b32.xlu0 %v5961_v17, %s6896_s25  ;;  %v5790_v63 = vunpack.i.h.bf16 %v5788_v45  ;;  %v5789_v5 = vunpack.i.l.bf16 %v5788_v45  ;;  %vm10167_vm12 = vmmov %vm10166_vm10  ;;  %v5976_v17 = vpack.i.bf16 %v931_v9, %v930_v44  ;;  %v1059_v44 = vsel %vm6995_vm1, %v963_v54, 0.0 }
 0x16f   :  { %v5991_v45 = vpack.i.bf16 %v7440_v28, %v7438_v38  ;;  %v7698_v28 = vld [vmem:[#allocation2 + $0x27] sm:$0xff] }
 0x170   :  { %v2106_v34 = vsel %vm10166_vm10, %v2074_v47, %v5789_v5  ;;  %v2107_v27 = vsel %vm10167_vm12, %v2075_v26, %v5790_v63  ;;  %v962_v47 = vld [vmem:[#allocation2 + $0x9] sm:$0xff]  ;;  %v5808_v63 = vpop.permute.xlu2 %5807  ;;  %v1094_v54 = vsel %vm7036_vm4, %v7698_v28, 0.0  ;;  %vm10174_vm10 = vmmov %vm10173_vm9  ;;  %vm10175_vm12 = vcmask 785408  }
 0x171   :  { %v2138_v62 = vsel %vm10168_vm0, %v2106_v34, %v5794_v50  ;;  %v2139_v2 = vsel %vm10169_vm13, %v2107_v27, %v5795_v14  ;;  %v5981_v23 = vpack.i.bf16 %v1059_v44, %v962_v47  ;;  %vm10170_vm0 = vmmov %vm10146_vm8  ;;  %v6702_v50 = vld [vmem:[#allocation2 + $0x21] sm:$0xff]  ;;  %v5810_v27 = vunpack.i.h.bf16 %v5808_v63 }
 0x172   :  { %v2174_v0 = vpack.c.bf16 %v2139_v2, %v2138_v62  ;;  %v1092_v62 = vsel %vm7005_vm2, %v7672_v20, 0.0  ;;  %v1061_v26 = vsel %vm7025_vm3, %v6702_v50, 0.0  ;;  %vm10171_vm13 = vmmov %vm10170_vm0  ;;  %vm10194_vm3 = vcmask 523264  }
 0x173   :  { %5972 = vrot.lane.b32.xlu2 %v5971_v3, %s6897_s26  ;;  %v1221_v3 = vsel %vm7466_vm11, %v7512_v33, 0.0  ;;  %v5986_v14 = vpack.i.bf16 %v7674_v24, %v1092_v62  ;;  %vm10172_vm8 = vmmov %vm10170_vm0  ;;  %v6705_v62 = vld [vmem:[#allocation2 + $0x19] sm:$0xff] }
 0x174   :  { %5967 = vrot.lane.b32.xlu1 %v5966_v25, %s6898_s27  ;;  %v2199_v7 = vpack.c.bf16 %v1221_v3, %v7524_v15  ;;  %vm10195_vm1 = vmmov %vm10194_vm3 }
 0x175   :  { %v5798_v34 = vpop.permute.xlu0 %5797 }
 0x176   :  { %5977 = vrot.lane.b32.xlu0 %v5976_v17, %s6896_s25  ;;  %v5800_v16 = vunpack.i.h.bf16 %v5798_v34  ;;  %v5799_v51 = vunpack.i.l.bf16 %v5798_v34  ;;  %v5809_v17 = vunpack.i.l.bf16 %v5808_v63  ;;  %v7705_v34 = vld [vmem:[#allocation2 + $0x2f] sm:$0xff] }
 0x177   :  { %2520 = vmatmul.bf16.gmra.mxu2 %v2174_v0  ;;  %v6001_v63 = vpack.i.bf16 %v7705_v34, %v1094_v54 }
 0x178   :  { %v2076_v2 = vsel %vm10171_vm13, %v7104_v56, %v5799_v51  ;;  %v2077_v0 = vsel %vm10172_vm8, %v7106_v57, %v5800_v16  ;;  %v5823_v38 = vpop.permute.xlu2 %5822  ;;  %v5996_v56 = vpack.i.bf16 %v1061_v26, %v6705_v62  ;;  %v6707_v16 = vld [vmem:[#allocation2 + $0x30] sm:$0xff]  ;;  %v1223_v26 = vsel %vm7508_vm15, %v7550_v22, 0.0  ;;  %v6713_v62 = vld [vmem:[#allocation2 + $0x38] sm:$0xff]  ;;  %vm10177_vm13 = vmmov %vm10172_vm8 }
 0x179   :  { %vm10178_vm8 = vnez %v10015_v39  ;;  %v10277_v39 = vld [vmem:[#allocation60_spill] sm:$0xff] }
 0x17b   :  { %5987 = vrot.lane.b32.xlu2 %v5986_v14, %s6897_s26 }
 0x17c   :  { %5982 = vrot.lane.b32.xlu1 %v5981_v23, %s6898_s27  ;;  %v6706_v23 = vld [vmem:[#allocation2 + $0x28] sm:$0xff] }
 0x17d   :  { %v5803_v5 = vpop.permute.xlu1 %5802  ;;  %v6006_v51 = vpack.i.bf16 %v6707_v16, %v6706_v23  ;;  %v7739_v23 = vld [vmem:[#allocation2 + $0x41] sm:$0xff] }
 0x17e   :  { %5489 = vmatmul.msk.bf16.gmra.mxu3 %vm10170_vm0, %v2199_v7  ;;  %5992 = vrot.lane.b32.xlu0 %v5991_v45, %s6896_s25  ;;  %v5805_v25 = vunpack.i.h.bf16 %v5803_v5  ;;  %v5804_v9 = vunpack.i.l.bf16 %v5803_v5  ;;  %vm10176_vm0 = vmmov %vm10175_vm12  ;;  %v7713_v7 = vld [vmem:[#allocation2 + $0x31] sm:$0xff]  ;;  %v1065_v16 = vsel %vm10178_vm8, %v7739_v23, 0.0 }
 0x17f   :  { %v1063_v45 = vsel %vm7053_vm5, %v7713_v7, 0.0  ;;  %vm10193_vm5 = vnez %v10033_v32 }
 0x180   :  { %v2108_v47 = vsel %vm10173_vm9, %v2076_v2, %v5804_v9  ;;  %v2109_v44 = vsel %vm10174_vm10, %v2077_v0, %v5805_v25  ;;  %v7720_v9 = vld [vmem:[#allocation2 + $0x37] sm:$0xff]  ;;  %v7731_v2 = vld [vmem:[#allocation2 + $0x29] sm:$0xff]  ;;  %vm10179_vm9 = vmmov %vm10177_vm13 }
 0x181   :  { %v2140_v3 = vsel %vm10175_vm12, %v2108_v47, %v5809_v17  ;;  %v2141_v57 = vsel %vm10176_vm0, %v2109_v44, %v5810_v27  ;;  %v1096_v50 = vsel %vm7067_vm6, %v7720_v9, 0.0  ;;  %v7728_v27 = vld [vmem:[#allocation2 + $0x3f] sm:$0xff]  ;;  %v6011_v0 = vpack.i.bf16 %v1063_v45, %v7731_v2  ;;  %vm10180_vm10 = vmmov %vm10179_vm9 }
 0x182   :  { %v2177_v14 = vpack.c.bf16 %v2141_v57, %v2140_v3  ;;  %v6016_v17 = vpack.i.bf16 %v7728_v27, %v1096_v50  ;;  %v2202_v44 = vpack.c.bf16 %v1223_v26, %v7558_v43  ;;  %v5824_v45 = vunpack.i.l.bf16 %v5823_v38  ;;  %v7748_v26 = vld [vmem:[#allocation2 + $0x47] sm:$0xff] }
 0x183   :  { %6002 = vrot.lane.b32.xlu2 %v6001_v63, %s6897_s26  ;;  %v6712_v63 = vld [vmem:[#allocation2 + $0x40] sm:$0xff]  ;;  %vm10181_vm12 = vnez %v10018_v55  ;;  %vm10182_vm0 = vcmask 523264  }
 0x184   :  { %5997 = vrot.lane.b32.xlu1 %v5996_v56, %s6898_s27  ;;  %v6021_v56 = vpack.i.bf16 %v6712_v63, %v6713_v62  ;;  %v7755_v63 = vld [vmem:[#allocation2 + $0x4f] sm:$0xff]  ;;  %v7758_v62 = vld [vmem:[#allocation2 + $0x39] sm:$0xff] }
 0x185   :  { %v7718_v5 = vpop.permute.xlu2 %5837  ;;  %v5813_v25 = vpop.permute.xlu0 %5812 }
 0x186   :  { %6007 = vrot.lane.b32.xlu0 %v6006_v51, %s6896_s25  ;;  %v5815_v54 = vunpack.i.h.bf16 %v5813_v25  ;;  %v5814_v47 = vunpack.i.l.bf16 %v5813_v25  ;;  %v5825_v51 = vunpack.i.h.bf16 %v5823_v38 }
 0x187   :  { %2525 = vmatmul.bf16.gmra.mxu2 %v2177_v14 }
 0x188   :  { %v2078_v25 = vsel %vm10179_vm9, %v7168_v40, %v5814_v47  ;;  %v2079_v50 = vsel %vm10180_vm10, %v7170_v41, %v5815_v54  ;;  %v6026_v40 = vpack.i.bf16 %v1065_v16, %v7758_v62  ;;  %vm10184_vm9 = vcmask 785408  }
 0x189   :  { %vm10185_vm10 = vmmov %vm10184_vm9 }
 0x18b   :  { %6017 = vrot.lane.b32.xlu2 %v6016_v17, %s6897_s26  ;;  %v1098_v17 = vsel %vm10181_vm12, %v7748_v26, 0.0 }
 0x18c   :  { %6012 = vrot.lane.b32.xlu1 %v6011_v0, %s6898_s27  ;;  %v6031_v38 = vpack.i.bf16 %v7755_v63, %v1098_v17 }
 0x18d   :  { %v7763_v47 = vpop.permute.xlu2 %5852 }
 0x18e   :  { %5490 = vmatmul.msk.bf16.gmra.mxu3 %vm10177_vm13, %v2202_v44  ;;  %6022 = vrot.lane.b32.xlu0 %v6021_v56, %s6896_s25  ;;  %v5818_v3 = vpop.permute.xlu1 %5817  ;;  %vm10183_vm13 = vmmov %vm10182_vm0 }
 0x18f   :  { %v5820_v57 = vunpack.i.h.bf16 %v5818_v3  ;;  %v5819_v14 = vunpack.i.l.bf16 %v5818_v3  ;;  %v6718_v3 = vld [vmem:[#allocation2 + $0x48] sm:$0xff] }
 0x191   :  { %v2110_v0 = vsel %vm10182_vm0, %v2078_v25, %v5819_v14  ;;  %v2111_v44 = vsel %vm10183_vm13, %v2079_v50, %v5820_v57  ;;  %v6719_v57 = vld [vmem:[#allocation2 + $0x50] sm:$0xff]  ;;  %vm10186_vm0 = vnez %v10020_v12  ;;  %vm10187_vm13 = vnez %v10024_v36 }
 0x192   :  { %v2142_v41 = vsel %vm10184_vm9, %v2110_v0, %v5824_v45  ;;  %v2143_v54 = vsel %vm10185_vm10, %v2111_v44, %v5825_v51  ;;  %v6036_v14 = vpack.i.bf16 %v6719_v57, %v6718_v3  ;;  %v6720_v50 = vld [vmem:[#allocation2 + $0x51] sm:$0xff]  ;;  %v1100_v51 = vsel %vm10187_vm13, %v7097_v53, 0.0  ;;  %v6721_v0 = vld [vmem:[#allocation2 + $0x49] sm:$0xff] }
 0x193   :  { %v2180_v56 = vpack.c.bf16 %v2143_v54, %v2142_v41  ;;  %6032 = vrot.lane.b32.xlu2 %v6031_v38, %s6897_s26  ;;  %v1067_v16 = vsel %vm10186_vm0, %v6720_v50, 0.0  ;;  %vm10188_vm9 = vnez %v10132_v8  ;;  %v6046_v17 = vpack.i.bf16 %v7108_v58, %v1100_v51  ;;  %v10253_v12 = vld [vmem:[#allocation41_spill] sm:$0xff] }
 0x194   :  { %6027 = vrot.lane.b32.xlu1 %v6026_v40, %s6898_s27  ;;  %v1225_v45 = vsel %vm10188_vm9, %v7582_v59, 0.0  ;;  %v6041_v44 = vpack.i.bf16 %v1067_v16, %v6721_v0  ;;  %vm10189_vm10 = vcmask 261120   ;;  %vm10190_vm0 = vnez %v10027_v6 }
 0x195   :  { %v5828_v25 = vpop.permute.xlu0 %5827  ;;  %v2205_v41 = vpack.c.bf16 %v1225_v45, %v7601_v18  ;;  %v7780_v54 = vpop.permute.xlu2 %5867  ;;  %v1069_v3 = vsel %vm10190_vm0, %v7131_v13, 0.0  ;;  %v5840_v57 = vunpack.i.h.bf16 %v7718_v5  ;;  %vm10191_vm8 = vmmov %vm10189_vm10  ;;  %vm10197_vm0 = vcmask 785408  }
 0x196   :  { %6037 = vrot.lane.b32.xlu0 %v6036_v14, %s6896_s25  ;;  %v5830_v38 = vunpack.i.h.bf16 %v5828_v25  ;;  %v5829_v40 = vunpack.i.l.bf16 %v5828_v25  ;;  %v5839_v14 = vunpack.i.l.bf16 %v7718_v5  ;;  %vm10198_vm13 = vmmov %vm10197_vm0 }
 0x197   :  { %2530 = vmatmul.bf16.gmra.mxu2 %v2180_v56 }
 0x198   :  { %v2080_v50 = vsel %vm10191_vm8, %v7220_v30, %v5829_v40  ;;  %v10200_v40 = vld [vmem:[#allocation17_spill] sm:$0xff] }
 0x19b   :  { %6047 = vrot.lane.b32.xlu2 %v6046_v17, %s6897_s26  ;;  %v10196_v17 = vld [vmem:[#allocation14_spill] sm:$0xff] }
 0x19c   :  { %6042 = vrot.lane.b32.xlu1 %v6041_v44, %s6898_s27  ;;  %v6056_v0 = vpack.i.bf16 %v1069_v3, %v10196_v17  ;;  %v10203_v3 = vld [vmem:[#allocation19_spill] sm:$0xff]  ;;  %v10209_v17 = vld [vmem:[#allocation18_spill] sm:$0xff] }
 0x19e   :  { %5491 = vmatmul.msk.bf16.gmra.mxu3 %vm10189_vm10, %v2205_v41  ;;  %6052 = vrot.lane.b32.xlu0 %v7117_v61, %s6896_s25  ;;  %v5833_v53 = vpop.permute.xlu1 %5832  ;;  %vm10192_vm10 = vmmov %vm10191_vm8  ;;  %v1102_v61 = vsel %vm10193_vm5, %v7151_v31, 0.0 }
 0x19f   :  { %v5835_v56 = vunpack.i.h.bf16 %v5833_v53  ;;  %v5834_v58 = vunpack.i.l.bf16 %v5833_v53  ;;  %v2081_v16 = vsel %vm10192_vm10, %v7226_v35, %v5830_v38  ;;  %v6061_v13 = vpack.i.bf16 %v7172_v42, %v1102_v61  ;;  %v10199_v35 = vld [vmem:[#allocation15_spill] sm:$0xff]  ;;  %v7807_v38 = vpop.permute.xlu2 %5882  ;;  %v10201_v42 = vld [vmem:[#allocation22_spill] sm:$0xff] }
 0x1a0   :  { %v5843_v25 = vpop.permute.xlu0 %5842 }
 0x1a1   :  { %v2112_v51 = vsel %vm10194_vm3, %v2080_v50, %v5834_v58  ;;  %v2113_v45 = vsel %vm10195_vm1, %v2081_v16, %v5835_v56  ;;  %vm10202_vm1 = vnez %v10201_v42  ;;  %v5845_v56 = vunpack.i.h.bf16 %v5843_v25  ;;  %v10206_v50 = vld [vmem:[#allocation80_spill] sm:$0xff] }
 0x1a2   :  { %v2144_v5 = vsel %vm10197_vm0, %v2112_v51, %v5839_v14  ;;  %v2145_v44 = vsel %vm10198_vm13, %v2113_v45, %v5840_v57  ;;  %v1071_v41 = vsel %vm10202_vm1, %v10200_v40, 0.0  ;;  %v5844_v58 = vunpack.i.l.bf16 %v5843_v25  ;;  %v10204_v57 = vld [vmem:[#allocation27_spill] sm:$0xff]  ;;  %v10208_v45 = vld [vmem:[#allocation20_spill] sm:$0xff]  ;;  %vm10211_vm0 = vmmov %vm10192_vm10 }
 0x1a3   :  { %v2183_v30 = vpack.c.bf16 %v2145_v44, %v2144_v5  ;;  %6062 = vrot.lane.b32.xlu2 %v6061_v13, %s6897_s26  ;;  %vm10205_vm3 = vnez %v10204_v57  ;;  %vm10207_vm8 = vnez %v10206_v50  ;;  %v5677_v5 = vld [vmem:[%s9786_s3 + $0x38] sm:$0xff]  ;;  %vm10213_vm13 = vmmov %vm10211_vm0  ;;  %vm10216_vm1 = vcmask 523264   ;;  %v802_v50 = vld [vmem:[#allocation2 + $0x7] sm:$0xff] }
 0x1a4   :  { %6057 = vrot.lane.b32.xlu1 %v6056_v0, %s6898_s27  ;;  %v1104_v14 = vsel %vm10205_vm3, %v10203_v3, 0.0  ;;  %v1227_v16 = vsel %vm10207_vm8, %v7626_v46, 0.0  ;;  %v6071_v0 = vpack.i.bf16 %v1071_v41, %v10209_v17  ;;  %v10210_v44 = vld [vmem:[#allocation26_spill] sm:$0xff]  ;;  %v10212_v46 = vld [vmem:[#allocation28_spill] sm:$0xff]  ;;  %2408 = vmatpush.bf16.msrb.mxu1 %v5677_v5  ;;  %vm10214_vm10 = vmmov %vm10211_vm0 }
 0x1a5   :  { %v6076_v13 = vpack.i.bf16 %v10208_v45, %v1104_v14  ;;  %v2208_v25 = vpack.c.bf16 %v1227_v16, %v7638_v60  ;;  %vm10217_vm3 = vmmov %vm10216_vm1  ;;  %v5855_v14 = vunpack.i.h.bf16 %v7763_v47  ;;  %v5854_v60 = vunpack.i.l.bf16 %v7763_v47  ;;  %v10218_v16 = vld [vmem:[#allocation23_spill] sm:$0xff]  ;;  %v10221_v17 = vld [vmem:[#allocation25_spill] sm:$0xff] }
 0x1a6   :  { %6067 = vrot.lane.b32.xlu0 %v10199_v35, %s6896_s25  ;;  %v5848_v31 = vpop.permute.xlu1 %5847  ;;  %v2083_v35 = vsel %vm10213_vm13, %v10212_v46, %v5845_v56 }
 0x1a7   :  { %2535 = vmatmul.bf16.gmra.mxu2 %v2183_v30  ;;  %v5850_v61 = vunpack.i.h.bf16 %v5848_v31  ;;  %v5849_v51 = vunpack.i.l.bf16 %v5848_v31  ;;  %v2082_v30 = vsel %vm10211_vm0, %v10210_v44, %v5844_v58  ;;  %v10215_v31 = vld [vmem:[#allocation21_spill] sm:$0xff] }
 0x1a8   :  { %v5858_v53 = vpop.permute.xlu0 %5857  ;;  %v10219_v58 = vld [vmem:[#allocation33_spill] sm:$0xff] }
 0x1a9   :  { %v2114_v41 = vsel %vm10216_vm1, %v2082_v30, %v5849_v51  ;;  %v2115_v3 = vsel %vm10217_vm3, %v2083_v35, %v5850_v61  ;;  %vm10220_vm0 = vnez %v10219_v58  ;;  %v10227_v30 = vld [vmem:[#allocation24_spill] sm:$0xff]  ;;  %v10228_v35 = vld [vmem:[#allocation31_spill] sm:$0xff] }
 0x1aa   :  { %v1073_v45 = vsel %vm10220_vm0, %v10218_v16, 0.0  ;;  %v10229_v16 = vld [vmem:[#allocation34_spill] sm:$0xff]  ;;  %vm10242_vm0 = vcmask 523264  }
 0x1ab   :  { %6077 = vrot.lane.b32.xlu2 %v6076_v13, %s6897_s26  ;;  %v7842_v13 = vpop.permute.xlu2 %5897  ;;  %v6086_v47 = vpack.i.bf16 %v1073_v45, %v10227_v30 }
 0x1ac   :  { %6072 = vrot.lane.b32.xlu1 %v6071_v0, %s6898_s27  ;;  %v10222_v0 = vld [vmem:[#allocation38_spill] sm:$0xff]  ;;  %v5899_v49 = vunpack.i.l.bf16 %v7842_v13 }
 0x1ad   :  { %vm10223_vm13 = vnez %v10222_v0 }
 0x1ae   :  { %5492 = vmatmul.msk.bf16.gmra.mxu3 %vm10214_vm10, %v2208_v25  ;;  %6082 = vrot.lane.b32.xlu0 %v10215_v31, %s6896_s25  ;;  %v5863_v40 = vpop.permute.xlu1 %5862  ;;  %v1106_v5 = vsel %vm10223_vm13, %v10221_v17, 0.0  ;;  %vm10224_vm10 = vcmask 785408   ;;  %v10226_v25 = vld [vmem:[#allocation29_spill] sm:$0xff]  ;;  %v10230_v17 = vld [vmem:[#allocation47_spill] sm:$0xff] }
 0x1af   :  { %v2146_v51 = vsel %vm10224_vm10, %v2114_v41, %v5854_v60  ;;  %vm10225_vm1 = vmmov %vm10224_vm10  ;;  %v6091_v44 = vpack.i.bf16 %v10226_v25, %v1106_v5  ;;  %vm10231_vm3 = vnez %v10230_v17  ;;  %v5860_v5 = vunpack.i.h.bf16 %v5858_v53 }
 0x1b0   :  { %v7840_v56 = vpop.permute.xlu0 %5872  ;;  %v2147_v61 = vsel %vm10225_vm1, %v2115_v3, %v5855_v14  ;;  %v1108_v41 = vsel %vm10231_vm3, %v10229_v16, 0.0  ;;  %v10232_v3 = vld [vmem:[#allocation32_spill] sm:$0xff]  ;;  %v10233_v14 = vld [vmem:[#allocation39_spill] sm:$0xff]  ;;  %v5859_v25 = vunpack.i.l.bf16 %v5858_v53  ;;  %v5697_v16 = vld [vmem:[%s9784_s1 + $0x38] sm:$0xff]  ;;  %vm10238_vm1 = vcmask 261120  }
 0x1b1   :  { %v2186_v46 = vpack.c.bf16 %v2147_v61, %v2146_v51  ;;  %vm10234_vm10 = vnez %v10233_v14  ;;  %v5864_v51 = vunpack.i.l.bf16 %v5863_v40  ;;  %v10235_v61 = vld [vmem:[#allocation40_spill] sm:$0xff]  ;;  %3125 = vmatpush.bf16.msrb.mxu0 %v5697_v16  ;;  %vm10243_vm3 = vmmov %vm10242_vm0  ;;  %v10244_v16 = vld [vmem:[#allocation43_spill] sm:$0xff] }
 0x1b2   :  { %v1075_v60 = vsel %vm10234_vm10, %v10232_v3, 0.0  ;;  %v6106_v30 = vpack.i.bf16 %v10235_v61, %v1108_v41  ;;  %v10237_v53 = vld [vmem:[#allocation36_spill] sm:$0xff]  ;;  %v10239_v41 = vld [vmem:[#allocation37_spill] sm:$0xff]  ;;  %vm10240_vm10 = vmmov %vm10238_vm1 }
 0x1b3   :  { %6092 = vrot.lane.b32.xlu2 %v6091_v44, %s6897_s26  ;;  %v5865_v44 = vunpack.i.h.bf16 %v5863_v40  ;;  %v7867_v58 = vpop.permute.xlu2 %5912  ;;  %v2084_v40 = vsel %vm10238_vm1, %v10237_v53, %v5859_v25  ;;  %v2085_v3 = vsel %vm10240_vm10, %v10239_v41, %v5860_v5  ;;  %v10241_v61 = vld [vmem:[#allocation42_spill] sm:$0xff]  ;;  %v5675_v25 = vld [vmem:[%s9786_s3 + $0x28] sm:$0xff]  ;;  %v5870_v5 = vunpack.i.h.bf16 %v7780_v54  ;;  %v10245_v53 = vld [vmem:[#allocation55_spill] sm:$0xff] }
 0x1b4   :  { %6087 = vrot.lane.b32.xlu1 %v6086_v47, %s6898_s27  ;;  %v10236_v47 = vld [vmem:[#allocation30_spill] sm:$0xff]  ;;  %vm10246_vm10 = vnez %v10245_v53  ;;  %v10247_v14 = vld [vmem:[#allocation35_spill] sm:$0xff] }
 0x1b5   :  { %v1110_v41 = vsel %vm10246_vm10, %v10244_v16, 0.0  ;;  %v5695_v16 = vld [vmem:[%s9784_s1 + $0x28] sm:$0xff] }
 0x1b6   :  { %6097 = vrot.lane.b32.xlu0 %v10228_v35, %s6896_s25  ;;  %v7855_v31 = vpop.permute.xlu1 %5877  ;;  %v6101_v35 = vpack.i.bf16 %v1075_v60, %v10236_v47  ;;  %v5696_v60 = vld [vmem:[%s9784_s1 + $0x30] sm:$0xff] }
 0x1b7   :  { %2540 = vmatmul.bf16.gmra.mxu2 %v2186_v46  ;;  %v5676_v46 = vld [vmem:[%s9786_s3 + $0x30] sm:$0xff]  ;;  %3126 = vmatpush.bf16.msrb.mxu0 %v5696_v60 }
 0x1b8   :  { %v7863_v45 = vpop.permute.xlu0 %5887  ;;  %2409 = vmatpush.bf16.msrb.mxu1 %v5676_v46  ;;  %v5869_v46 = vunpack.i.l.bf16 %v7780_v54 }
 0x1bb   :  { %6107 = vrot.lane.b32.xlu2 %v6106_v30, %s6897_s26  ;;  %v2116_v30 = vsel %vm10242_vm0, %v2084_v40, %v5864_v51  ;;  %vm10250_vm0 = vcmask 785408   ;;  %v10252_v40 = vld [vmem:[#allocation49_spill] sm:$0xff]  ;;  %3127 = vmatpush.bf16.msrb.mxu0 %v5695_v16 }
 0x1bc   :  { %6102 = vrot.lane.b32.xlu1 %v6101_v35, %s6898_s27  ;;  %v2117_v35 = vsel %vm10243_vm3, %v2085_v3, %v5865_v44  ;;  %v2148_v44 = vsel %vm10250_vm0, %v2116_v30, %v5869_v46  ;;  %vm10251_vm3 = vmmov %vm10250_vm0  ;;  %2410 = vmatpush.bf16.msrb.mxu1 %v5675_v25  ;;  %v6121_v3 = vpack.i.bf16 %v10252_v40, %v1110_v41  ;;  %v5673_v25 = vld [vmem:[%s9786_s3 + $0x18] sm:$0xff]  ;;  %v10256_v46 = vld [vmem:[#allocation64_spill] sm:$0xff] }
 0x1bd   :  { %v2149_v51 = vsel %vm10251_vm3, %v2117_v35, %v5870_v5  ;;  %v7915_v35 = vpop.permute.xlu2 %5927  ;;  %v10255_v5 = vld [vmem:[#allocation52_spill] sm:$0xff]  ;;  %vm10257_vm0 = vnez %v10256_v46  ;;  %vm10263_vm3 = vcmask 261120  }
 0x1be   :  { %6112 = vrot.lane.b32.xlu0 %v10241_v61, %s6896_s25  ;;  %v7886_v47 = vpop.permute.xlu1 %5892  ;;  %v10248_v61 = vld [vmem:[#allocation48_spill] sm:$0xff]  ;;  %v2189_v30 = vpack.c.bf16 %v2149_v51, %v2148_v44  ;;  %v1112_v41 = vsel %vm10257_vm0, %v10255_v5, 0.0 }
 0x1bf   :  { %vm10249_vm1 = vnez %v10248_v61  ;;  %v10258_v44 = vld [vmem:[#allocation44_spill] sm:$0xff]  ;;  %v10261_v61 = vld [vmem:[#allocation50_spill] sm:$0xff] }
 0x1c0   :  { %v1077_v42 = vsel %vm10249_vm1, %v10247_v14, 0.0  ;;  %v7901_v6 = vpop.permute.xlu0 %5902  ;;  %v5674_v14 = vld [vmem:[%s9786_s3 + $0x20] sm:$0xff]  ;;  %v1079_v51 = vsel %vm7418_vm14, %v10258_v44, 0.0  ;;  %v5693_v44 = vld [vmem:[%s9784_s1 + $0x18] sm:$0xff]  ;;  %vm10265_vm14 = vmmov %vm10263_vm3  ;;  %vm10267_vm1 = vcmask 523264  }
 0x1c1   :  { %v6116_v54 = vpack.i.bf16 %v1077_v42, %v10253_v12  ;;  %2411 = vmatpush.bf16.msrb.mxu1 %v5674_v14  ;;  %v5694_v12 = vld [vmem:[%s9784_s1 + $0x20] sm:$0xff]  ;;  %v5880_v14 = vunpack.i.h.bf16 %v7855_v31  ;;  %v6131_v46 = vpack.i.bf16 %v1079_v51, %v10261_v61  ;;  %v5692_v61 = vld [vmem:[%s9784_s1 + $0x10] sm:$0xff]  ;;  %vm10268_vm0 = vmmov %vm10267_vm1 }
 0x1c2   :  { %v10254_v42 = vld [vmem:[#allocation51_spill] sm:$0xff]  ;;  %3128 = vmatpush.bf16.msrb.mxu0 %v5694_v12  ;;  %v10262_v12 = vld [vmem:[#allocation45_spill] sm:$0xff] }
 0x1c3   :  { %6122 = vrot.lane.b32.xlu2 %v6121_v3, %s6897_s26  ;;  %v5875_v3 = vunpack.i.h.bf16 %v7840_v56  ;;  %v10266_v51 = vld [vmem:[#allocation59_spill] sm:$0xff] }
 0x1c4   :  { %6117 = vrot.lane.b32.xlu1 %v6116_v54, %s6898_s27  ;;  %v5874_v54 = vunpack.i.l.bf16 %v7840_v56  ;;  %v5672_v56 = vld [vmem:[%s9786_s3 + $0x10] sm:$0xff] }
 0x1c5   :  { %2412 = vmatpush.bf16.msrb.mxu1 %v5673_v25 }
 0x1c6   :  { %6127 = vrot.lane.b32.xlu0 %v10254_v42, %s6896_s25  ;;  %v7922_v60 = vpop.permute.xlu1 %5907  ;;  %v10260_v42 = vld [vmem:[#allocation56_spill] sm:$0xff]  ;;  %v2086_v25 = vsel %vm10263_vm3, %v10262_v12, %v5874_v54  ;;  %3129 = vmatpush.bf16.msrb.mxu0 %v5693_v44  ;;  %v5884_v44 = vunpack.i.l.bf16 %v7807_v38  ;;  %v10269_v12 = vld [vmem:[#allocation61_spill] sm:$0xff] }
 0x1c7   :  { %2545 = vmatmul.bf16.gmra.mxu2 %v2189_v30  ;;  %v5879_v30 = vunpack.i.l.bf16 %v7855_v31  ;;  %v6136_v5 = vpack.i.bf16 %v10260_v42, %v1112_v41  ;;  %v10264_v31 = vld [vmem:[#allocation46_spill] sm:$0xff]  ;;  %v5671_v54 = vld [vmem:[%s9786_s3 + $0x8] sm:$0xff] }
 0x1c8   :  { %v7933_v40 = vpop.permute.xlu0 %5917  ;;  %v2087_v41 = vsel %vm10265_vm14, %v10264_v31, %v5875_v3  ;;  %v5885_v3 = vunpack.i.h.bf16 %v7807_v38  ;;  %v10270_v31 = vld [vmem:[#allocation68_spill] sm:$0xff]  ;;  %v10276_v38 = vld [vmem:[#allocation66_spill] sm:$0xff] }
 0x1c9   :  { %2413 = vmatpush.bf16.msrb.mxu1 %v5672_v56  ;;  %v7969_v56 = vpop.permute.xlu2 %5942  ;;  %vm10271_vm14 = vnez %v10270_v31 }
 0x1ca   :  { %v7937_v16 = vpop.f32.mrf.mxu2  ;;  %3130 = vmatpush.bf16.msrb.mxu0 %v5692_v61  ;;  %v5690_v61 = vld [vmem:[%s9784_s1] sm:$0xff] }
 0x1cb   :  { %10259 = vst [vmem:[#allocation14_spill] sm:$0xff] %v7937_v16  ;;  %6137 = vrot.lane.b32.xlu2 %v6136_v5, %s6897_s26  ;;  %v2118_v5 = vsel %vm10267_vm1, %v2086_v25, %v5879_v30  ;;  %v1081_v30 = vsel %vm7466_vm11, %v10272_v29, 0.0  ;;  %vm10274_vm1 = vcmask 785408   ;;  %v5670_v29 = vld [vmem:[%s9786_s3] sm:$0xff] }
 0x1cc   :  { %6132 = vrot.lane.b32.xlu1 %v6131_v46, %s6898_s27  ;;  %v2119_v46 = vsel %vm10268_vm0, %v2087_v41, %v5880_v14  ;;  %v2150_v41 = vsel %vm10274_vm1, %v2118_v5, %v5884_v44  ;;  %vm10275_vm0 = vmmov %vm10274_vm1  ;;  %v6146_v17 = vpack.i.bf16 %v1081_v30, %v10277_v39  ;;  %v10278_v39 = vld [vmem:[#allocation67_spill] sm:$0xff]  ;;  %vm10285_vm1 = vcmask 261120  }
 0x1cd   :  { %v2151_v16 = vsel %vm10275_vm0, %v2119_v46, %v5885_v3  ;;  %2414 = vmatpush.bf16.msrb.mxu1 %v5671_v54  ;;  %v10279_v54 = vld [vmem:[#allocation69_spill] sm:$0xff]  ;;  %v10280_v3 = vld [vmem:[#allocation74_spill] sm:$0xff]  ;;  %vm10287_vm0 = vmmov %vm10285_vm1 }
 0x1ce   :  { %6142 = vrot.lane.b32.xlu0 %v10266_v51, %s6896_s25  ;;  %v7960_v42 = vpop.permute.xlu1 %5922  ;;  %v1114_v51 = vsel %vm10271_vm14, %v10269_v12, 0.0  ;;  %v5691_v12 = vld [vmem:[%s9784_s1 + $0x8] sm:$0xff]  ;;  %v2192_v5 = vpack.c.bf16 %v2151_v16, %v2150_v41  ;;  %vm10281_vm3 = vnez %v10280_v3  ;;  %v5890_v16 = vunpack.i.h.bf16 %v7863_v45 }
 0x1cf   :  { %v6151_v53 = vpack.i.bf16 %v10276_v38, %v1114_v51  ;;  %3131 = vmatpush.bf16.msrb.mxu0 %v5691_v12  ;;  %v1116_v44 = vsel %vm10281_vm3, %v10279_v54, 0.0  ;;  %v5889_v51 = vunpack.i.l.bf16 %v7863_v45  ;;  %v10283_v38 = vld [vmem:[#allocation71_spill] sm:$0xff]  ;;  %v5894_v54 = vunpack.i.l.bf16 %v7886_v47 }
 0x1d0   :  { %v7977_v25 = vpop.permute.xlu0 %5932  ;;  %v6166_v12 = vpack.i.bf16 %v10283_v38, %v1116_v44  ;;  %v5900_v45 = vunpack.i.h.bf16 %v7842_v13  ;;  %v10286_v44 = vld [vmem:[#allocation54_spill] sm:$0xff] }
 0x1d1   :  { %2415 = vmatpush.bf16.msrb.mxu1 %v5670_v29  ;;  %v8010_v30 = vpop.permute.xlu2 %5957  ;;  %v3009_v29 = vld [vmem:[#allocation3 + $0x100] sm:$0xff]  ;;  %v2089_v38 = vsel %vm10287_vm0, %v10286_v44, %v5890_v16  ;;  %v10297_v44 = vld [vmem:[#allocation76_spill] sm:$0xff] }
 0x1d2   :  { %v7979_v14 = vpop.f32.mrf.mxu2 }
 0x1d3   :  { %10273 = vst [vmem:[#allocation15_spill] sm:$0xff] %v7979_v14  ;;  %6152 = vrot.lane.b32.xlu2 %v6151_v53, %s6897_s26  ;;  %3132 = vmatpush.bf16.msrb.mxu0 %v5690_v61 }
 0x1d4   :  { %6147 = vrot.lane.b32.xlu1 %v6146_v17, %s6898_s27  ;;  %v1083_v17 = vsel %vm7508_vm15, %v7470_v11, 0.0  ;;  %vm10289_vm15 = vcmask 523264  }
 0x1d5   :  { %v6161_v11 = vpack.i.bf16 %v1083_v17, %v7486_v1  ;;  %vm10290_vm11 = vmmov %vm10289_vm15 }
 0x1d6   :  { %6157 = vrot.lane.b32.xlu0 %v10278_v39, %s6896_s25  ;;  %v7998_v46 = vpop.permute.xlu1 %5937  ;;  %v5895_v39 = vunpack.i.h.bf16 %v7886_v47  ;;  %v10288_v47 = vld [vmem:[#allocation72_spill] sm:$0xff] }
 0x1d7   :  { %2550 = vmatmul.bf16.gmra.mxu2 %v2192_v5  ;;  %v3010_v5 = vld [vmem:[#allocation3 + $0x108] sm:$0xff] }
 0x1d8   :  { %v8006_v53 = vpop.permute.xlu0 %5947  ;;  %v3041_v48 = vpack.c.bf16 %v3010_v5, %v3009_v29  ;;  %v10291_v29 = vld [vmem:[#allocation73_spill] sm:$0xff]  ;;  %v10292_v5 = vld [vmem:[#allocation78_spill] sm:$0xff] }
 0x1d9   :  { %vm10293_vm3 = vnez %v10292_v5 }
 0x1da   :  { %v8012_v41 = vpop.f32.mrf.mxu2  ;;  %3133 = vmatmul.bf16.vlgmr.msrb.gmra.mxu0 %v3041_v48  ;;  %v1118_v13 = vsel %vm10293_vm3, %v10291_v29, 0.0 }
 0x1db   :  { %10282 = vst [vmem:[#allocation17_spill] sm:$0xff] %v8012_v41  ;;  %6167 = vrot.lane.b32.xlu2 %v6166_v12, %s6897_s26  ;;  %v10284_v41 = vld [vmem:[#allocation53_spill] sm:$0xff]  ;;  %v2121_v12 = vsel %vm10290_vm11, %v2089_v38, %v5895_v39  ;;  %v5973_v39 = vpop.permute.xlu2 %5972 }
 0x1dc   :  { %6162 = vrot.lane.b32.xlu1 %v6161_v11, %s6898_s27  ;;  %v2088_v61 = vsel %vm10285_vm1, %v10284_v41, %v5889_v51  ;;  %v1085_v51 = vsel %vm10188_vm9, %v7512_v33, 0.0  ;;  %vm10295_vm1 = vcmask 785408   ;;  %v1087_v33 = vsel %vm10207_vm8, %v7550_v22, 0.0 }
 0x1dd   :  { %v2120_v17 = vsel %vm10289_vm15, %v2088_v61, %v5894_v54  ;;  %vm10296_vm0 = vmmov %vm10295_vm1  ;;  %v6176_v54 = vpack.i.bf16 %v1085_v51, %v7524_v15  ;;  %v10298_v61 = vld [vmem:[#allocation79_spill] sm:$0xff]  ;;  %v10300_v15 = vld [vmem:[#allocation77_spill] sm:$0xff]  ;;  %vm10303_vm15 = vcmask 261120   ;;  %vm10308_vm8 = vcmask 785408  }
 0x1de   :  { %6172 = vrot.lane.b32.xlu0 %v10288_v47, %s6896_s25  ;;  %v8028_v1 = vpop.permute.xlu1 %5952  ;;  %v2152_v48 = vsel %vm10295_vm1, %v2120_v17, %v5899_v49  ;;  %v2153_v11 = vsel %vm10296_vm0, %v2121_v12, %v5900_v45  ;;  %v6181_v47 = vpack.i.bf16 %v10297_v44, %v1118_v13  ;;  %v1120_v29 = vsel %vm7613_vm7, %v10298_v61, 0.0  ;;  %v10301_v13 = vld [vmem:[#allocation81_spill] sm:$0xff]  ;;  %vm10305_vm11 = vmmov %vm10303_vm15 }
 0x1df   :  { %v2195_v49 = vpack.c.bf16 %v2153_v11, %v2152_v48  ;;  %v5975_v45 = vunpack.i.h.bf16 %v5973_v39  ;;  %v5974_v17 = vunpack.i.l.bf16 %v5973_v39  ;;  %v6196_v51 = vpack.i.bf16 %v10301_v13, %v1120_v29  ;;  %v10302_v48 = vld [vmem:[#allocation87_spill] sm:$0xff]  ;;  %v10304_v39 = vld [vmem:[#allocation86_spill] sm:$0xff] }
 0x1e0   :  { %v5963_v41 = vpop.permute.xlu0 %5962  ;;  %v5905_v44 = vunpack.i.h.bf16 %v7901_v6  ;;  %v5909_v29 = vunpack.i.l.bf16 %v7922_v60  ;;  %vm10306_vm1 = vcmask 523264  }
 0x1e1   :  { %v5965_v8 = vunpack.i.h.bf16 %v5963_v41  ;;  %v5964_v14 = vunpack.i.l.bf16 %v5963_v41  ;;  %v6191_v41 = vpack.i.bf16 %v1087_v33, %v7558_v43  ;;  %vm10307_vm0 = vmmov %vm10306_vm1  ;;  %v3012_v33 = vld [vmem:[#allocation3 + $0x118] sm:$0xff] }
 0x1e2   :  { %v8038_v16 = vpop.f32.mrf.mxu2 }
 0x1e3   :  { %10294 = vst [vmem:[#allocation19_spill] sm:$0xff] %v8038_v16  ;;  %6182 = vrot.lane.b32.xlu2 %v6181_v47, %s6897_s26  ;;  %v5904_v47 = vunpack.i.l.bf16 %v7901_v6  ;;  %v2099_v11 = vsel %vm10303_vm15, %v10302_v48, %v5965_v8  ;;  %v3011_v6 = vld [vmem:[#allocation3 + $0x110] sm:$0xff]  ;;  %vm10309_vm15 = vmmov %vm10308_vm8  ;;  %v803_v48 = vld [vmem:[#allocation2 + $0xf] sm:$0xff] }
 0x1e4   :  { %6177 = vrot.lane.b32.xlu1 %v6176_v54, %s6898_s27  ;;  %v5910_v54 = vunpack.i.h.bf16 %v7922_v60  ;;  %v3042_v5 = vpack.c.bf16 %v3012_v33, %v3011_v6  ;;  %v898_v60 = vsel %vm7005_vm2, %v802_v50, 0.0 }
 0x1e6   :  { %6187 = vrot.lane.b32.xlu0 %v10300_v15, %s6896_s25  ;;  %v5968_v12 = vpop.permute.xlu1 %5967  ;;  %v2098_v15 = vsel %vm10305_vm11, %v10304_v39, %v5964_v14  ;;  %v10310_v39 = vld [vmem:[#allocation62_spill] sm:$0xff] }
 0x1e7   :  { %2555 = vmatmul.bf16.gmra.mxu2 %v2195_v49  ;;  %v5970_v61 = vunpack.i.h.bf16 %v5968_v12  ;;  %v5969_v22 = vunpack.i.l.bf16 %v5968_v12 }
 0x1e8   :  { %v5978_v49 = vpop.permute.xlu0 %5977 }
 0x1e9   :  { %v2130_v13 = vsel %vm10306_vm1, %v2098_v15, %v5969_v22  ;;  %v2131_v12 = vsel %vm10307_vm0, %v2099_v11, %v5970_v61  ;;  %v5980_v16 = vunpack.i.h.bf16 %v5978_v49  ;;  %v5979_v38 = vunpack.i.l.bf16 %v5978_v49  ;;  %v10312_v15 = vld [vmem:[#allocation63_spill] sm:$0xff]  ;;  %v10319_v61 = vld [vmem:[#allocation84_spill] sm:$0xff] }
 0x1ea   :  { %v8066_v43 = vpop.f32.mrf.mxu2  ;;  %v8069_v8 = vsel %vm10308_vm8, %v2130_v13, %v5974_v17  ;;  %v8072_v14 = vsel %vm10309_vm15, %v2131_v12, %v5975_v45  ;;  %v5915_v22 = vunpack.i.h.bf16 %v7867_v58  ;;  %v5914_v11 = vunpack.i.l.bf16 %v7867_v58  ;;  %v5988_v17 = vpop.permute.xlu2 %5987  ;;  %vm10311_vm8 = vmmov %vm10305_vm11  ;;  %3138 = vmatmul.bf16.gmra.mxu0 %v3042_v5  ;;  %v10322_v5 = vld [vmem:[#allocation85_spill] sm:$0xff] }
 0x1eb   :  { %6197 = vrot.lane.b32.xlu2 %v6196_v51, %s6897_s26  ;;  %v2090_v45 = vsel %vm10311_vm8, %v10310_v39, %v5904_v47  ;;  %vm10313_vm11 = vmmov %vm10311_vm8  ;;  %v10316_v51 = vld [vmem:[#allocation82_spill] sm:$0xff]  ;;  %vm10317_vm15 = vcmask 523264   ;;  %v10320_v47 = vld [vmem:[#allocation89_spill] sm:$0xff] }
 0x1ec   :  { %6192 = vrot.lane.b32.xlu1 %v6191_v41, %s6898_s27  ;;  %v2091_v49 = vsel %vm10313_vm11, %v10312_v15, %v5905_v44  ;;  %vm10314_vm1 = vmmov %vm10311_vm8  ;;  %v2122_v12 = vsel %vm10317_vm15, %v2090_v45, %v5909_v29  ;;  %vm10321_vm8 = vnez %v10320_v47  ;;  %vm10323_vm11 = vnez %v10322_v5  ;;  %v10328_v45 = vld [vmem:[#allocation88_spill] sm:$0xff] }
 0x1ed   :  { %v1970_v50 = vsel %vm10314_vm1, %v898_v60, %v5979_v38  ;;  %vm10315_vm0 = vmmov %vm10314_vm1  ;;  %v1122_v39 = vsel %vm10321_vm8, %v10319_v61, 0.0  ;;  %v1089_v38 = vsel %vm10323_vm11, %v7582_v59, 0.0  ;;  %v5990_v44 = vunpack.i.h.bf16 %v5988_v17 }
 0x1ee   :  { %v1971_v13 = vsel %vm10315_vm0, %v803_v48, %v5980_v16  ;;  %6202 = vrot.lane.b32.xlu0 %v10316_v51, %s6896_s25  ;;  %v5983_v41 = vpop.permute.xlu1 %5982  ;;  %vm10318_vm9 = vmmov %vm10317_vm15  ;;  %v5989_v16 = vunpack.i.l.bf16 %v5988_v17  ;;  %vm10326_vm15 = vcmask 785408   ;;  %v6206_v61 = vpack.i.bf16 %v1089_v38, %v7601_v18  ;;  %v3014_v38 = vld [vmem:[#allocation3 + $0x128] sm:$0xff] }
 0x1ef   :  { %v2123_v58 = vsel %vm10318_vm9, %v2091_v49, %v5910_v54  ;;  %v5985_v6 = vunpack.i.h.bf16 %v5983_v41  ;;  %v5984_v33 = vunpack.i.l.bf16 %v5983_v41  ;;  %vm10324_vm1 = vmmov %vm10318_vm9  ;;  %v2154_v54 = vsel %vm10326_vm15, %v2122_v12, %v5914_v11 }
 0x1f0   :  { %vm10325_vm0 = vmmov %vm10324_vm1  ;;  %v6211_v49 = vpack.i.bf16 %v10328_v45, %v1122_v39  ;;  %v5920_v12 = vunpack.i.h.bf16 %v7933_v40  ;;  %v5919_v18 = vunpack.i.l.bf16 %v7933_v40  ;;  %v3013_v39 = vld [vmem:[#allocation3 + $0x120] sm:$0xff]  ;;  %v5929_v40 = vunpack.i.l.bf16 %v7915_v35 }
 0x1f1   :  { %v2003_v48 = vsel %vm10324_vm1, %v1970_v50, %v5984_v33  ;;  %v2004_v60 = vsel %vm10325_vm0, %v1971_v13, %v5985_v6  ;;  %vm10327_vm9 = vmmov %vm10326_vm15  ;;  %v5993_v50 = vpop.permute.xlu0 %5992  ;;  %vm10335_vm15 = vcmask 523264  }
 0x1f2   :  { %v8100_v15 = vpop.f32.mrf.mxu2  ;;  %v2155_v29 = vsel %vm10327_vm9, %v2123_v58, %v5915_v22  ;;  %vm10329_vm8 = vmmov %vm10327_vm9  ;;  %v5995_v13 = vunpack.i.h.bf16 %v5993_v50  ;;  %v5994_v22 = vunpack.i.l.bf16 %v5993_v50 }
 0x1f3   :  { %v2036_v51 = vsel %vm10329_vm8, %v2003_v48, %v5989_v16  ;;  %vm10330_vm7 = vmmov %vm10329_vm8  ;;  %6212 = vrot.lane.b32.xlu2 %v6211_v49, %s6897_s26  ;;  %v2198_v17 = vpack.c.bf16 %v2155_v29, %v2154_v54  ;;  %v5924_v16 = vunpack.i.l.bf16 %v7960_v42  ;;  %v3043_v48 = vpack.c.bf16 %v3014_v38, %v3013_v39 }
 0x1f4   :  { %v2037_v59 = vsel %vm10330_vm7, %v2004_v60, %v5990_v44  ;;  %6207 = vrot.lane.b32.xlu1 %v6206_v61, %s6898_s27  ;;  %v5925_v44 = vunpack.i.h.bf16 %v7960_v42  ;;  %v6003_v60 = vpop.permute.xlu2 %6002  ;;  %v900_v54 = vsel %vm7036_vm4, %v7672_v20, 0.0  ;;  %v5930_v29 = vunpack.i.h.bf16 %v7915_v35  ;;  %v6722_v61 = vld [vmem:[#allocation2 + $0xe0] sm:$0xff]  ;;  %vm10336_vm9 = vmmov %vm10335_vm15 }
 0x1f5   :  { %v2164_v41 = vpack.c.bf16 %v2037_v59, %v2036_v51  ;;  %vm10331_vm7 = vcmask 261120   ;;  %v6723_v59 = vld [vmem:[#allocation2 + $0xd8] sm:$0xff]  ;;  %v6005_v20 = vunpack.i.h.bf16 %v6003_v60  ;;  %v6004_v50 = vunpack.i.l.bf16 %v6003_v60  ;;  %vm10337_vm3 = vmmov %vm10336_vm9 }
 0x1f6   :  { %v5998_v11 = vpop.permute.xlu1 %5997  ;;  %v1973_v45 = vsel %vm10331_vm7, %v7674_v24, %v5995_v13  ;;  %vm10332_vm8 = vmmov %vm10331_vm7  ;;  %v5934_v60 = vunpack.i.l.bf16 %v7977_v25 }
 0x1f7   :  { %2416 = vmatmul.bf16.vlgmr.msrb.gmra.mxu1 %v2164_v41  ;;  %2560 = vmatmul.bf16.gmra.mxu2 %v2198_v17  ;;  %v6000_v58 = vunpack.i.h.bf16 %v5998_v11  ;;  %v5999_v6 = vunpack.i.l.bf16 %v5998_v11  ;;  %v1972_v49 = vsel %vm10332_vm8, %v900_v54, %v5994_v22  ;;  %vm10333_vm1 = vmmov %vm10331_vm7  ;;  %vm10339_vm7 = vcmask 785408  }
 0x1f8   :  { %v2093_v51 = vsel %vm10333_vm1, %v6722_v61, %v5920_v12  ;;  %vm10334_vm0 = vmmov %vm10333_vm1  ;;  %v3015_v61 = vld [vmem:[#allocation3 + $0x130] sm:$0xff] }
 0x1f9   :  { %v2092_v42 = vsel %vm10334_vm0, %v6723_v59, %v5919_v18  ;;  %v2005_v41 = vsel %vm10335_vm15, %v1972_v49, %v5999_v6  ;;  %v2006_v17 = vsel %vm10336_vm9, %v1973_v45, %v6000_v58  ;;  %vm10338_vm11 = vmmov %vm10337_vm3  ;;  %v6008_v58 = vpop.permute.xlu0 %6007 }
 0x1fa   :  { %v8112_v33 = vpop.f32.mrf.mxu2  ;;  %3143 = vmatmul.bf16.gmra.mxu0 %v3043_v48  ;;  %v2124_v35 = vsel %vm10337_vm3, %v2092_v42, %v5924_v16  ;;  %v2125_v11 = vsel %vm10338_vm11, %v2093_v51, %v5925_v44  ;;  %v2038_v24 = vsel %vm10339_vm7, %v2005_v41, %v6004_v50  ;;  %vm10340_vm8 = vmmov %vm10339_vm7  ;;  %v6010_v48 = vunpack.i.h.bf16 %v6008_v58  ;;  %v3016_v51 = vld [vmem:[#allocation3 + $0x138] sm:$0xff] }
 0x1fb   :  { %v2039_v13 = vsel %vm10340_vm8, %v2006_v17, %v6005_v20  ;;  %vm10341_vm1 = vmmov %vm10339_vm7  ;;  %v6009_v16 = vunpack.i.l.bf16 %v6008_v58  ;;  %v5935_v44 = vunpack.i.h.bf16 %v7977_v25  ;;  %v902_v42 = vsel %vm7067_vm6, %v7698_v28, 0.0 }
 0x1fc   :  { %v2156_v12 = vsel %vm10341_vm1, %v2124_v35, %v5929_v40  ;;  %vm10342_vm0 = vmmov %vm10341_vm1  ;;  %v2167_v6 = vpack.c.bf16 %v2039_v13, %v2038_v24  ;;  %v5940_v40 = vunpack.i.h.bf16 %v7998_v46  ;;  %v6018_v59 = vpop.permute.xlu2 %6017  ;;  %v3044_v41 = vpack.c.bf16 %v3016_v51, %v3015_v61  ;;  %v6724_v35 = vld [vmem:[#allocation2 + $0xf0] sm:$0xff] }
 0x1fd   :  { %v2157_v18 = vsel %vm10342_vm0, %v2125_v11, %v5930_v29  ;;  %v5939_v29 = vunpack.i.l.bf16 %v7998_v46  ;;  %v5945_v17 = vunpack.i.h.bf16 %v7969_v56  ;;  %v5944_v25 = vunpack.i.l.bf16 %v7969_v56  ;;  %v6725_v11 = vld [vmem:[#allocation2 + $0xe8] sm:$0xff] }
 0x1fe   :  { %v2201_v39 = vpack.c.bf16 %v2157_v18, %v2156_v12  ;;  %v6013_v38 = vpop.permute.xlu1 %6012  ;;  %vm10343_vm3 = vcmask 261120   ;;  %vm10347_vm7 = vcmask 523264   ;;  %v6020_v12 = vunpack.i.h.bf16 %v6018_v59 }
 0x1ff   :  { %v6015_v54 = vunpack.i.h.bf16 %v6013_v38  ;;  %v6014_v45 = vunpack.i.l.bf16 %v6013_v38  ;;  %v1975_v20 = vsel %vm10343_vm3, %v7705_v34, %v6010_v48  ;;  %vm10344_vm11 = vmmov %vm10343_vm3  ;;  %v6019_v18 = vunpack.i.l.bf16 %v6018_v59 }
 0x200   :  { %v1974_v50 = vsel %vm10344_vm11, %v902_v42, %v6009_v16  ;;  %vm10345_vm15 = vmmov %vm10343_vm3  ;;  %v5949_v61 = vunpack.i.l.bf16 %v8006_v53 }
 0x201   :  { %v2095_v46 = vsel %vm10345_vm15, %v6724_v35, %v5935_v44  ;;  %vm10346_vm9 = vmmov %vm10343_vm3  ;;  %v2007_v13 = vsel %vm10347_vm7, %v1974_v50, %v6014_v45  ;;  %vm10351_vm3 = vcmask 785408   ;;  %v5950_v45 = vunpack.i.h.bf16 %v8006_v53 }
 0x202   :  { %v8132_v22 = vpop.f32.mrf.mxu2  ;;  %v2094_v24 = vsel %vm10346_vm9, %v6725_v11, %v5934_v60  ;;  %vm10348_vm8 = vmmov %vm10347_vm7  ;;  %v2040_v34 = vsel %vm10351_vm3, %v2007_v13, %v6019_v18  ;;  %v6023_v60 = vpop.permute.xlu0 %6022  ;;  %v904_v35 = vsel %vm10181_vm12, %v7720_v9, 0.0  ;;  %v5960_v11 = vunpack.i.h.bf16 %v8010_v30  ;;  %v6727_v18 = vld [vmem:[#allocation2 + $0xf8] sm:$0xff] }
 0x203   :  { %v2008_v28 = vsel %vm10348_vm8, %v1975_v20, %v6015_v54  ;;  %vm10349_vm1 = vmmov %vm10347_vm7  ;;  %v3018_v20 = vld [vmem:[#allocation3 + $0x148] sm:$0xff]  ;;  %vm10357_vm7 = vcmask 261120  }
 0x204   :  { %v2126_v56 = vsel %vm10349_vm1, %v2094_v24, %v5939_v29  ;;  %vm10350_vm0 = vmmov %vm10349_vm1  ;;  %v6025_v29 = vunpack.i.h.bf16 %v6023_v60  ;;  %v6033_v50 = vpop.permute.xlu2 %6032  ;;  %v6726_v24 = vld [vmem:[#allocation2 + $0x100] sm:$0xff] }
 0x205   :  { %vm10352_vm11 = vmmov %vm10351_vm3  ;;  %v2097_v13 = vsel %vm10357_vm7, %v6726_v24, %v5950_v45 }
 0x206   :  { %vm10354_vm15 = vmmov %vm10351_vm3  ;;  %v6028_v54 = vpop.permute.xlu1 %6027 }
 0x207   :  { %2421 = vmatmul.bf16.gmra.mxu1 %v2167_v6  ;;  %2565 = vmatmul.bf16.gmra.mxu2 %v2201_v39  ;;  %v2127_v6 = vsel %vm10350_vm0, %v2095_v46, %v5940_v40  ;;  %v2041_v39 = vsel %vm10352_vm11, %v2008_v28, %v6020_v12  ;;  %v2158_v38 = vsel %vm10354_vm15, %v2126_v56, %v5944_v25  ;;  %vm10355_vm9 = vmmov %vm10351_vm3  ;;  %v6024_v40 = vunpack.i.l.bf16 %v6023_v60  ;;  %v3017_v25 = vld [vmem:[#allocation3 + $0x140] sm:$0xff]  ;;  %v5689_v46 = vld [vmem:[%s9788_s5 + $0x8] sm:$0xff] }
 0x208   :  { %v2159_v48 = vsel %vm10355_vm9, %v2127_v6, %v5945_v17  ;;  %v2170_v16 = vpack.c.bf16 %v2041_v39, %v2040_v34  ;;  %v6030_v51 = vunpack.i.h.bf16 %v6028_v54  ;;  %v6029_v59 = vunpack.i.l.bf16 %v6028_v54  ;;  %vm10358_vm8 = vmmov %vm10357_vm7  ;;  %2797 = vmatpush.bf16.msrb.mxu3 %v5689_v46 }
 0x209   :  { %v2204_v44 = vpack.c.bf16 %v2159_v48, %v2158_v38  ;;  %v5954_v17 = vunpack.i.l.bf16 %v8028_v1  ;;  %v3045_v53 = vpack.c.bf16 %v3018_v20, %v3017_v25  ;;  %vm10359_vm1 = vmmov %vm10357_vm7  ;;  %v5959_v12 = vunpack.i.l.bf16 %v8010_v30  ;;  %v3019_v25 = vld [vmem:[#allocation3 + $0x150] sm:$0xff]  ;;  %v3020_v20 = vld [vmem:[#allocation3 + $0x158] sm:$0xff] }
 0x20a   :  { %v8138_v49 = vpop.f32.mrf.mxu2  ;;  %3148 = vmatmul.bf16.gmra.mxu0 %v3044_v41  ;;  %v5955_v41 = vunpack.i.h.bf16 %v8028_v1  ;;  %v1977_v1 = vsel %vm10358_vm8, %v7728_v27, %v6025_v29  ;;  %v1976_v28 = vsel %vm10359_vm1, %v904_v35, %v6024_v40  ;;  %vm10360_vm0 = vmmov %vm10359_vm1  ;;  %vm10361_vm3 = vcmask 523264   ;;  %v6038_v29 = vpop.permute.xlu0 %6037 }
 0x20b   :  { %v2096_v9 = vsel %vm10360_vm0, %v6727_v18, %v5949_v61  ;;  %v2009_v56 = vsel %vm10361_vm3, %v1976_v28, %v6029_v59  ;;  %vm10362_vm11 = vmmov %vm10361_vm3  ;;  %v6035_v34 = vunpack.i.h.bf16 %v6033_v50  ;;  %v6034_v39 = vunpack.i.l.bf16 %v6033_v50 }
 0x20c   :  { %v2010_v6 = vsel %vm10362_vm11, %v1977_v1, %v6030_v51  ;;  %vm10363_vm15 = vmmov %vm10361_vm3  ;;  %vm10365_vm7 = vcmask 785408   ;;  %v6040_v61 = vunpack.i.h.bf16 %v6038_v29  ;;  %v6039_v51 = vunpack.i.l.bf16 %v6038_v29  ;;  %v6048_v50 = vpop.permute.xlu2 %6047 }
 0x20d   :  { %v2128_v38 = vsel %vm10363_vm15, %v2096_v9, %v5954_v17  ;;  %vm10364_vm9 = vmmov %vm10361_vm3  ;;  %v2042_v27 = vsel %vm10365_vm7, %v2009_v56, %v6034_v39  ;;  %vm10371_vm3 = vnez %v10024_v36  ;;  %v3046_v46 = vpack.c.bf16 %v3020_v20, %v3019_v25 }
 0x20e   :  { %v2129_v48 = vsel %vm10364_vm9, %v2097_v13, %v5955_v41  ;;  %vm10366_vm8 = vmmov %vm10365_vm7  ;;  %v6043_v40 = vpop.permute.xlu1 %6042  ;;  %v906_v35 = vsel %vm10371_vm3, %v7748_v26, 0.0  ;;  %vm10372_vm11 = vcmask 261120   ;;  %v6050_v1 = vunpack.i.h.bf16 %v6048_v50 }
 0x20f   :  { %vm10368_vm1 = vmmov %vm10365_vm7  ;;  %v6045_v59 = vunpack.i.h.bf16 %v6043_v40  ;;  %v6044_v41 = vunpack.i.l.bf16 %v6043_v40  ;;  %v6049_v28 = vunpack.i.l.bf16 %v6048_v50  ;;  %v6729_v40 = vld [vmem:[#allocation2 + $0x5f] sm:$0xff]  ;;  %vm10417_vm3 = vcmask 785408  }
 0x210   :  { %vm10369_vm0 = vmmov %vm10368_vm1 }
 0x211   :  { %v2161_v60 = vsel %vm10369_vm0, %v2129_v48, %v5960_v11  ;;  %vm10373_vm15 = vmmov %vm10372_vm11 }
 0x212   :  { %v8158_v58 = vpop.f32.mrf.mxu2  ;;  %v1978_v11 = vsel %vm10373_vm15, %v906_v35, %v6039_v51  ;;  %vm10374_vm7 = vmmov %vm10364_vm9  ;;  %v6053_v56 = vpop.permute.xlu0 %6052 }
 0x213   :  { %10353 = vst [vmem:[#allocation27_spill] sm:$0xff] %v8158_v58  ;;  %v2011_v24 = vsel %vm10364_vm9, %v1978_v11, %v6044_v41  ;;  %v6054_v39 = vunpack.i.l.bf16 %v6053_v56  ;;  %vm10382_vm15 = vmmov %vm10374_vm7 }
 0x214   :  { %vm10383_vm9 = vmmov %vm10374_vm7 }
 0x217   :  { %2426 = vmatmul.bf16.gmra.mxu1 %v2170_v16  ;;  %2570 = vmatmul.bf16.gmra.mxu2 %v2204_v44  ;;  %v2043_v16 = vsel %vm10366_vm8, %v2010_v6, %v6035_v34  ;;  %v2160_v44 = vsel %vm10368_vm1, %v2128_v38, %v5959_v12  ;;  %vm10375_vm8 = vmmov %vm10369_vm0  ;;  %v6058_v6 = vpop.permute.xlu1 %6057  ;;  %v6055_v34 = vunpack.i.h.bf16 %v6053_v56  ;;  %v3024_v56 = vld [vmem:[#allocation3 + $0x178] sm:$0xff] }
 0x218   :  { %v2173_v54 = vpack.c.bf16 %v2043_v16, %v2042_v27  ;;  %v2207_v45 = vpack.c.bf16 %v2161_v60, %v2160_v44  ;;  %v2044_v12 = vsel %vm10375_vm8, %v2011_v24, %v6049_v28  ;;  %vm10376_vm1 = vmmov %vm10369_vm0  ;;  %v6060_v38 = vunpack.i.h.bf16 %v6058_v6  ;;  %v3021_v16 = vld [vmem:[#allocation3 + $0x160] sm:$0xff]  ;;  %v3022_v44 = vld [vmem:[#allocation3 + $0x168] sm:$0xff]  ;;  %v6063_v60 = vpop.permute.xlu2 %6062 }
 0x219   :  { %v6059_v48 = vunpack.i.l.bf16 %v6058_v6  ;;  %v3047_v29 = vpack.c.bf16 %v3022_v44, %v3021_v16  ;;  %vm10380_vm0 = vmmov %vm10372_vm11  ;;  %v6064_v41 = vunpack.i.l.bf16 %v6063_v60 }
 0x21a   :  { %v8164_v42 = vpop.f32.mrf.mxu2  ;;  %3153 = vmatmul.bf16.gmra.mxu0 %v3045_v53  ;;  %v1979_v53 = vsel %vm10372_vm11, %v7755_v63, %v6040_v61  ;;  %v10378_v63 = vpack.c.bf16 %v8072_v14, %v8069_v8  ;;  %v1981_v61 = vsel %vm10380_vm0, %v6729_v40, %v6055_v34  ;;  %vm10381_vm11 = vmmov %vm10380_vm0  ;;  %v6068_v11 = vpop.permute.xlu0 %6067  ;;  %v6730_v34 = vld [vmem:[#allocation2 + $0x67] sm:$0xff] }
 0x21b   :  { %10356 = vst [vmem:[#allocation20_spill] sm:$0xff] %v8164_v42  ;;  %v2012_v13 = vsel %vm10374_vm7, %v1979_v53, %v6045_v59  ;;  %v2014_v51 = vsel %vm10383_vm9, %v1981_v61, %v6060_v38  ;;  %v6065_v59 = vunpack.i.h.bf16 %v6063_v60  ;;  %vm10384_vm7 = vmmov %vm10376_vm1 }
 0x21c   :  { %v2045_v18 = vsel %vm10376_vm1, %v2012_v13, %v6050_v1  ;;  %vm10385_vm8 = vmmov %vm10376_vm1  ;;  %vm10387_vm1 = vnez %v10000_v10  ;;  %v6070_v13 = vunpack.i.h.bf16 %v6068_v11  ;;  %v6069_v1 = vunpack.i.l.bf16 %v6068_v11 }
 0x21d   :  { %v2176_v26 = vpack.c.bf16 %v2045_v18, %v2044_v12  ;;  %v2047_v20 = vsel %vm10385_vm8, %v2014_v51, %v6065_v59  ;;  %v1199_v35 = vsel %vm10387_vm1, %v7713_v7, 0.0  ;;  %vm10391_vm9 = vmmov %vm10380_vm0  ;;  %v3025_v59 = vld [vmem:[#allocation3 + $0x180] sm:$0xff] }
 0x21e   :  { %v2166_v53 = vpack.c.bf16 %v1199_v35, %v7731_v2  ;;  %v6731_v2 = vld [vmem:[#allocation2 + $0x6f] sm:$0xff] }
 0x21f   :  { %v6073_v24 = vpop.permute.xlu1 %6072 }
 0x220   :  { %v6075_v28 = vunpack.i.h.bf16 %v6073_v24  ;;  %v6074_v12 = vunpack.i.l.bf16 %v6073_v24 }
 0x222   :  { %v8187_v30 = vpop.f32.mrf.mxu2 }
 0x223   :  { %10367 = vst [vmem:[#allocation18_spill] sm:$0xff] %v8187_v30 }
 0x227   :  { %2431 = vmatmul.bf16.gmra.mxu1 %v2173_v54  ;;  %2575 = vmatmul.bf16.gmra.mxu2 %v2207_v45  ;;  %v6728_v54 = vld [vmem:[#allocation2 + $0x57] sm:$0xff]  ;;  %v6088_v51 = vpop.permute.xlu1 %6087 }
 0x228   :  { %v908_v45 = vsel %vm10193_vm5, %v6728_v54, 0.0 }
 0x229   :  { %v1980_v8 = vsel %vm10381_vm11, %v908_v45, %v6054_v39  ;;  %vm10389_vm11 = vnez %v10204_v57 }
 0x22a   :  { %v8191_v17 = vpop.f32.mrf.mxu2  ;;  %3158 = vmatmul.bf16.gmra.mxu0 %v3046_v46  ;;  %v2013_v14 = vsel %vm10382_vm15, %v1980_v8, %v6059_v48  ;;  %v910_v7 = vsel %vm10389_vm11, %v6730_v34, 0.0  ;;  %vm10390_vm15 = vmmov %vm10380_vm0  ;;  %vm10397_vm11 = vnez %v10004_v37 }
 0x22b   :  { %10370 = vst [vmem:[#allocation26_spill] sm:$0xff] %v8191_v17  ;;  %v2046_v25 = vsel %vm10384_vm7, %v2013_v14, %v6064_v41  ;;  %v1983_v39 = vsel %vm10390_vm15, %v6731_v2, %v6070_v13  ;;  %v1982_v38 = vsel %vm10391_vm9, %v910_v7, %v6069_v1  ;;  %vm10392_vm7 = vcmask 523264   ;;  %v6083_v14 = vpop.permute.xlu0 %6082  ;;  %vm10398_vm15 = vmmov %vm10391_vm9  ;;  %v3026_v41 = vld [vmem:[#allocation3 + $0x188] sm:$0xff] }
 0x22c   :  { %v2179_v46 = vpack.c.bf16 %v2047_v20, %v2046_v25  ;;  %v2015_v48 = vsel %vm10392_vm7, %v1982_v38, %v6074_v12  ;;  %vm10393_vm8 = vmmov %vm10392_vm7  ;;  %v1201_v40 = vsel %vm10397_vm11, %v7739_v23, 0.0  ;;  %v8245_v25 = vld [vmem:[%s9785_s2] ss:$0 sm:$0xff]  ;;  %v6085_v20 = vunpack.i.h.bf16 %v6083_v14  ;;  %v6732_v13 = vld [vmem:[#allocation2 + $0x77] sm:$0xff] }
 0x22d   :  { %v2016_v16 = vsel %vm10393_vm8, %v1983_v39, %v6075_v28  ;;  %v2169_v8 = vpack.c.bf16 %v1201_v40, %v7758_v62  ;;  %v6084_v35 = vunpack.i.l.bf16 %v6083_v14  ;;  %v3049_v11 = vpack.c.bf16 %v3026_v41, %v3025_v59  ;;  %v6733_v12 = vld [vmem:[#allocation2 + $0x7f] sm:$0xff]  ;;  %vm10402_vm8 = vmmov %vm10392_vm7  ;;  %v6735_v40 = vld [vmem:[#allocation2 + $0x49] sm:$0xff] }
 0x22e   :  { %v912_v1 = vsel %vm10223_vm13, %v6732_v13, 0.0  ;;  %v5688_v59 = vld [vmem:[%s9788_s5] sm:$0xff] }
 0x22f   :  { %v3027_v41 = vld [vmem:[#allocation3 + $0x190] sm:$0xff]  ;;  %2798 = vmatpush.bf16.msrb.mxu3 %v5688_v59 }
 0x232   :  { %v8203_v9 = vpop.f32.mrf.mxu2 }
 0x233   :  { %10377 = vst [vmem:[#allocation28_spill] sm:$0xff] %v8203_v9 }
 0x237   :  { %2436 = vmatmul.bf16.gmra.mxu1 %v2176_v26  ;;  %2580 = vmatmul.bf16.gmra.mxu2 %v10378_v63  ;;  %v3023_v26 = vld [vmem:[#allocation3 + $0x170] sm:$0xff]  ;;  %v6078_v63 = vpop.permute.xlu2 %6077 }
 0x238   :  { %v3048_v6 = vpack.c.bf16 %v3024_v56, %v3023_v26  ;;  %v6080_v44 = vunpack.i.h.bf16 %v6078_v63  ;;  %v6079_v60 = vunpack.i.l.bf16 %v6078_v63 }
 0x23a   :  { %v8208_v27 = vpop.f32.mrf.mxu2  ;;  %3163 = vmatmul.bf16.gmra.mxu0 %v3047_v29 }
 0x23b   :  { %10379 = vst [vmem:[#allocation21_spill] sm:$0xff] %v8208_v27  ;;  %v10456_v27 = vmov 0.0  }
 0x23f   :  { %v6093_v24 = vpop.permute.xlu2 %6092 }
 0x240   :  { %v6095_v7 = vunpack.i.h.bf16 %v6093_v24  ;;  %v6094_v2 = vunpack.i.l.bf16 %v6093_v24 }
 0x242   :  { %v8218_v50 = vpop.f32.mrf.mxu2 }
 0x243   :  { %10386 = vst [vmem:[#allocation23_spill] sm:$0xff] %v8218_v50 }
 0x247   :  { %2441 = vmatmul.bf16.gmra.mxu1 %v2179_v46  ;;  %5478 = vmatmul.msk.bf16.vlgmr.msrb.gmra.mxu2 %vm10380_vm0, %v2166_v53  ;;  %vm10394_vm0 = vcmask 785408   ;;  %v6090_v46 = vunpack.i.h.bf16 %v6088_v51  ;;  %v6089_v53 = vunpack.i.l.bf16 %v6088_v51  ;;  %v6103_v51 = vpop.permute.xlu1 %6102 }
 0x248   :  { %v2048_v54 = vsel %vm10394_vm0, %v2015_v48, %v6079_v60  ;;  %vm10395_vm5 = vmmov %vm10394_vm0 }
 0x249   :  { %v2049_v45 = vsel %vm10395_vm5, %v2016_v16, %v6080_v44  ;;  %vm10400_vm5 = vmmov %vm10391_vm9  ;;  %v6734_v16 = vld [vmem:[#allocation2 + $0x51] sm:$0xff] }
 0x24a   :  { %v8225_v18 = vpop.f32.mrf.mxu2  ;;  %3168 = vmatmul.bf16.gmra.mxu0 %v3048_v6  ;;  %v2182_v61 = vpack.c.bf16 %v2049_v45, %v2048_v54  ;;  %v1985_v26 = vsel %vm10400_vm5, %v6733_v12, %v6085_v20  ;;  %vm10401_vm9 = vmmov %vm10400_vm5  ;;  %v3028_v20 = vld [vmem:[#allocation3 + $0x198] sm:$0xff]  ;;  %v10411_v12 = vld [vmem:[#allocation47_spill] sm:$0xff] }
 0x24b   :  { %10388 = vst [vmem:[#allocation25_spill] sm:$0xff] %v8225_v18  ;;  %v1984_v56 = vsel %vm10401_vm9, %v912_v1, %v6084_v35  ;;  %v2018_v63 = vsel %vm10402_vm8, %v1985_v26, %v6090_v46  ;;  %vm10403_vm0 = vmmov %vm10400_vm5  ;;  %vm10407_vm5 = vnez %v10009_v4  ;;  %v3050_v24 = vpack.c.bf16 %v3028_v20, %v3027_v41  ;;  %v6108_v1 = vpop.permute.xlu2 %6107  ;;  %v6739_v41 = vld [vmem:[#allocation2 + $0x59] sm:$0xff] }
 0x24c   :  { %v2017_v6 = vsel %vm10392_vm7, %v1984_v56, %v6089_v53  ;;  %v1203_v44 = vsel %vm10407_vm5, %v6734_v16, 0.0  ;;  %vm10408_vm9 = vmmov %vm10403_vm0  ;;  %v6105_v53 = vunpack.i.h.bf16 %v6103_v51  ;;  %vm10412_vm7 = vnez %v10411_v12  ;;  %v3035_v4 = vld [vmem:[#allocation3 + $0x1d0] sm:$0xff] }
 0x24d   :  { %vm10413_vm8 = vmmov %vm10403_vm0  ;;  %v6109_v16 = vunpack.i.l.bf16 %v6108_v1 }
 0x252   :  { %v8235_v29 = vpop.f32.mrf.mxu2 }
 0x253   :  { %10396 = vst [vmem:[#allocation38_spill] sm:$0xff] %v8235_v29 }
 0x257   :  { %2446 = vmatmul.bf16.gmra.mxu1 %v2182_v61  ;;  %5479 = vmatmul.msk.bf16.gmra.mxu2 %vm10398_vm15, %v2169_v8  ;;  %v3134_v62 = vpop.f32.mrf.mxu0  ;;  %vm10404_vm15 = vcmask 785408   ;;  %v2172_v61 = vpack.c.bf16 %v1203_v44, %v6735_v40  ;;  %v6098_v8 = vpop.permute.xlu0 %6097  ;;  %v10420_v40 = vld [vmem:[#allocation12_spill] sm:$0xff] }
 0x258   :  { %v3135_v28 = vadd.f32 %v8245_v25, %v3134_v62  ;;  %v2050_v39 = vsel %vm10404_vm15, %v2017_v6, %v6094_v2  ;;  %vm10405_vm13 = vmmov %vm10404_vm15  ;;  %v6100_v35 = vunpack.i.h.bf16 %v6098_v8  ;;  %v6099_v46 = vunpack.i.l.bf16 %v6098_v8  ;;  %v6737_v6 = vld [vmem:[#allocation2 + $0x8f] sm:$0xff] }
 0x259   :  { %v2051_v38 = vsel %vm10405_vm13, %v2018_v63, %v6095_v7  ;;  %vm10409_vm13 = vmmov %vm10403_vm0  ;;  %vm10414_vm15 = vcmask 523264  }
 0x25a   :  { %v8247_v23 = vpop.f32.mrf.mxu2  ;;  %v3214_v34 = vmax.f32 %v3135_v28, 0.0  ;;  %3173 = vmatmul.bf16.gmra.mxu0 %v3049_v11  ;;  %v2185_v54 = vpack.c.bf16 %v2051_v38, %v2050_v39  ;;  %v6104_v11 = vunpack.i.l.bf16 %v6103_v51  ;;  %v6736_v28 = vld [vmem:[#allocation2 + $0x87] sm:$0xff]  ;;  %v1987_v63 = vsel %vm10413_vm8, %v6737_v6, %v6100_v35 }
 0x25b   :  { %10399 = vst [vmem:[#allocation29_spill] sm:$0xff] %v8247_v23  ;;  %v914_v26 = vsel %vm10412_vm7, %v6736_v28, 0.0  ;;  %v6110_v38 = vunpack.i.h.bf16 %v6108_v1  ;;  %vm10418_vm7 = vmmov %vm10417_vm3  ;;  %vm10421_vm8 = vnez %v10420_v40  ;;  %v3033_v23 = vld [vmem:[#allocation3 + $0x1c0] sm:$0xff] }
 0x25c   :  { %3246 = vst.msk [vmem:[#allocation2 + $0x18] sm:$0xff] %vm10403_vm0, %v3214_v34  ;;  %v1986_v34 = vsel %vm10403_vm0, %v914_v26, %v6099_v46 }
 0x25d   :  { %v2019_v7 = vsel %vm10414_vm15, %v1986_v34, %v6104_v11  ;;  %v3029_v11 = vld [vmem:[#allocation3 + $0x1a0] sm:$0xff] }
 0x25e   :  { %v2052_v44 = vsel %vm10417_vm3, %v2019_v7, %v6109_v16  ;;  %vm10422_vm3 = vmmov %vm10403_vm0  ;;  %v6740_v16 = vld [vmem:[#allocation2 + $0x97] sm:$0xff] }
 0x25f   :  { %v3136_v60 = vpop.f32.mrf.mxu0  ;;  %v6113_v35 = vpop.permute.xlu0 %6112 }
 0x260   :  { %v3137_v45 = vadd.f32 %v8245_v25, %v3136_v60  ;;  %v6114_v1 = vunpack.i.l.bf16 %v6113_v35 }
 0x262   :  { %v8259_v48 = vpop.f32.mrf.mxu2  ;;  %v3215_v14 = vmax.f32 %v3137_v45, 0.0  ;;  %v6738_v45 = vld [vmem:[#allocation2 + $0x61] sm:$0xff] }
 0x263   :  { %10406 = vst [vmem:[#allocation24_spill] sm:$0xff] %v8259_v48 }
 0x264   :  { %3247 = vst.msk [vmem:[#allocation2 + $0x20] sm:$0xff] %vm10409_vm13, %v3215_v14  ;;  %vm10416_vm13 = vmmov %vm10403_vm0 }
 0x267   :  { %2451 = vmatmul.bf16.gmra.mxu1 %v2185_v54  ;;  %5480 = vmatmul.msk.bf16.gmra.mxu2 %vm10408_vm9, %v2172_v61  ;;  %v3139_v13 = vpop.f32.mrf.mxu0  ;;  %vm10415_vm9 = vmmov %vm10414_vm15  ;;  %v1205_v61 = vsel %vm10421_vm8, %v6738_v45, 0.0 }
 0x268   :  { %v3140_v56 = vadd.f32 %v8245_v25, %v3139_v13  ;;  %v2020_v2 = vsel %vm10415_vm9, %v1987_v63, %v6105_v53  ;;  %v2175_v20 = vpack.c.bf16 %v1205_v61, %v6739_v41  ;;  %v6118_v53 = vpop.permute.xlu1 %6117  ;;  %v6115_v13 = vunpack.i.h.bf16 %v6113_v35  ;;  %v3342_v63 = vld [vmem:[#allocation2 + $0x8] sm:$0xff]  ;;  %v3343_v61 = vld [vmem:[#allocation2 + $0x10] sm:$0xff]  ;;  %vm10426_vm15 = vmmov %vm10403_vm0 }
 0x269   :  { %v2053_v60 = vsel %vm10418_vm7, %v2020_v2, %v6110_v38  ;;  %vm10423_vm7 = vmmov %vm10403_vm0  ;;  %v6120_v28 = vunpack.i.h.bf16 %v6118_v53  ;;  %v6119_v26 = vunpack.i.l.bf16 %v6118_v53  ;;  %v6123_v38 = vpop.permute.xlu2 %6122 }
 0x26a   :  { %v8269_v62 = vpop.f32.mrf.mxu2  ;;  %v3216_v39 = vmax.f32 %v3140_v56, 0.0  ;;  %3178 = vmatmul.bf16.gmra.mxu0 %v3050_v24  ;;  %v2188_v51 = vpack.c.bf16 %v2053_v60, %v2052_v44  ;;  %v3030_v24 = vld [vmem:[#allocation3 + $0x1a8] sm:$0xff]  ;;  %v916_v60 = vsel %vm10246_vm10, %v6740_v16, 0.0  ;;  %v10432_v16 = vld [vmem:[#allocation13_spill] sm:$0xff] }
 0x26b   :  { %10410 = vst [vmem:[#allocation31_spill] sm:$0xff] %v8269_v62  ;;  %v3051_v6 = vpack.c.bf16 %v3030_v24, %v3029_v11  ;;  %v8292_v34 = vld [vmem:[#allocation2 + $0x19] sm:$0xff]  ;;  %v1988_v41 = vsel %vm10426_vm15, %v916_v60, %v6114_v1  ;;  %v6125_v24 = vunpack.i.h.bf16 %v6123_v38  ;;  %vm10433_vm15 = vnez %v10432_v16  ;;  %v6755_v44 = vld [vmem:[#allocation2 + $0xef] sm:$0xff] }
 0x26c   :  { %3248 = vst.msk [vmem:[#allocation2 + $0x28] sm:$0xff] %vm10416_vm13, %v3216_v39  ;;  %v6216_v39 = vpack.i.bf16 %v8292_v34, %v3342_v63  ;;  %v2021_v35 = vsel %vm10415_vm9, %v1988_v41, %v6119_v26  ;;  %vm10427_vm13 = vmmov %vm10415_vm9  ;;  %v6124_v63 = vunpack.i.l.bf16 %v6123_v38  ;;  %v3375_v41 = vld [vmem:[#allocation2 + $0x11] sm:$0xff] }
 0x26e   :  { %6217 = vrot.lane.b32.xlu0 %v6216_v39, %s6896_s25  ;;  %v6742_v39 = vld [vmem:[#allocation2 + $0x71] sm:$0xff] }
 0x26f   :  { %v3141_v14 = vpop.f32.mrf.mxu0  ;;  %v1207_v26 = vsel %vm10433_vm15, %v6742_v39, 0.0 }
 0x270   :  { %v3142_v59 = vadd.f32 %v8245_v25, %v3141_v14 }
 0x272   :  { %v8281_v54 = vpop.f32.mrf.mxu2  ;;  %v3217_v46 = vmax.f32 %v3142_v59, 0.0 }
 0x273   :  { %10419 = vst [vmem:[#allocation34_spill] sm:$0xff] %v8281_v54  ;;  %v8300_v14 = vld [vmem:[#allocation2 + $0x21] sm:$0xff] }
 0x274   :  { %v8285_v8 = vpop.f32.mrf.mxu1  ;;  %3249 = vst.msk [vmem:[#allocation2 + $0x30] sm:$0xff] %vm10423_vm7, %v3217_v46  ;;  %vm10429_vm7 = vcmask 785408  }
 0x277   :  { %2456 = vmatmul.bf16.gmra.mxu1 %v2188_v51  ;;  %5481 = vmatmul.msk.bf16.gmra.mxu2 %vm10422_vm3, %v2175_v20  ;;  %v3144_v2 = vpop.f32.mrf.mxu0  ;;  %v6741_v51 = vld [vmem:[#allocation2 + $0x9f] sm:$0xff]  ;;  %v3477_v20 = vsel %vm10387_vm1, %v8300_v14, 0.0  ;;  %vm10428_vm3 = vmmov %vm10403_vm0 }
 0x278   :  { %v3145_v45 = vadd.f32 %v8245_v25, %v3144_v2  ;;  %v1989_v59 = vsel %vm10403_vm0, %v6741_v51, %v6115_v13  ;;  %v6221_v11 = vpack.i.bf16 %v3343_v61, %v3477_v20  ;;  %v2054_v13 = vsel %vm10429_vm7, %v2021_v35, %v6124_v63  ;;  %vm10430_vm0 = vmmov %vm10429_vm7  ;;  %v6128_v20 = vpop.permute.xlu0 %6127  ;;  %v6743_v35 = vld [vmem:[#allocation2 + $0x69] sm:$0xff] }
 0x279   :  { %v2022_v46 = vsel %vm10427_vm13, %v1989_v59, %v6120_v28  ;;  %v3346_v28 = vld [vmem:[#allocation2 + $0x28] sm:$0xff]  ;;  %vm10434_vm9 = vmmov %vm10428_vm3  ;;  %v6130_v39 = vunpack.i.h.bf16 %v6128_v20 }
 0x27a   :  { %v8290_v56 = vpop.f32.mrf.mxu2  ;;  %v3218_v53 = vmax.f32 %v3145_v45, 0.0  ;;  %3183 = vmatmul.bf16.gmra.mxu0 %v3051_v6  ;;  %6222 = vrot.lane.b32.xlu1 %v6221_v11, %s6896_s25  ;;  %v2055_v1 = vsel %vm10430_vm0, %v2022_v46, %v6125_v24  ;;  %v3374_v59 = vld [vmem:[#allocation2 + $0x9] sm:$0xff]  ;;  %v2178_v46 = vpack.c.bf16 %v1207_v26, %v6743_v35  ;;  %v6133_v11 = vpop.permute.xlu1 %6132  ;;  %vm10435_vm13 = vmmov %vm10428_vm3 }
 0x27b   :  { %10424 = vst [vmem:[#allocation32_spill] sm:$0xff] %v8290_v56  ;;  %v3347_v60 = vld [vmem:[#allocation2 + $0x30] sm:$0xff]  ;;  %v2191_v61 = vpack.c.bf16 %v2055_v1, %v2054_v13  ;;  %v3031_v13 = vld [vmem:[#allocation3 + $0x1b0] sm:$0xff]  ;;  %v3032_v1 = vld [vmem:[#allocation3 + $0x1b8] sm:$0xff]  ;;  %v6134_v26 = vunpack.i.l.bf16 %v6133_v11 }
 0x27c   :  { %v8294_v7 = vpop.f32.mrf.mxu1  ;;  %3250 = vst.msk [vmem:[#allocation2 + $0x38] sm:$0xff] %vm10428_vm3, %v3218_v53  ;;  %v8320_v38 = vpack.i.bf16 %v3347_v60, %v3346_v28  ;;  %v3407_v53 = vsel %vm10387_vm1, %v3375_v41, 0.0  ;;  %v6129_v28 = vunpack.i.l.bf16 %v6128_v20  ;;  %v6135_v60 = vunpack.i.h.bf16 %v6133_v11  ;;  %v6744_v41 = vld [vmem:[#allocation2 + $0xa7] sm:$0xff]  ;;  %vm10439_vm7 = vmmov %vm10434_vm9  ;;  %v8388_v48 = vld [vmem:[#allocation2 + $0x2f] sm:$0xff] }
 0x27d   :  { %v6236_v63 = vpack.i.bf16 %v3407_v53, %v3374_v59  ;;  %v3052_v35 = vpack.c.bf16 %v3032_v1, %v3031_v13  ;;  %v6745_v53 = vld [vmem:[#allocation2 + $0xaf] sm:$0xff]  ;;  %vm10440_vm0 = vmmov %vm10439_vm7 }
 0x27e   :  { %6232 = vrot.lane.b32.xlu0 %v8320_v38, %s6897_s26  ;;  %v1991_v20 = vsel %vm10439_vm7, %v6745_v53, %v6130_v39  ;;  %v8339_v56 = vld [vmem:[#allocation2 + $0x29] sm:$0xff]  ;;  %vm10444_vm7 = vmmov %vm10440_vm0 }
 0x27f   :  { %v3146_v45 = vpop.f32.mrf.mxu0 }
 0x280   :  { %v3147_v51 = vadd.f32 %v8245_v25, %v3146_v45 }
 0x282   :  { %v8314_v2 = vpop.f32.mrf.mxu2  ;;  %v3219_v24 = vmax.f32 %v3147_v51, 0.0  ;;  %6237 = vrot.lane.b32.xlu1 %v6236_v63, %s6898_s27 }
 0x283   :  { %10431 = vst [vmem:[#allocation40_spill] sm:$0xff] %v8314_v2  ;;  %v10437_v2 = vld [vmem:[#allocation64_spill] sm:$0xff]  ;;  %v8341_v11 = vld [vmem:[#allocation2 + $0x31] sm:$0xff] }
 0x284   :  { %v8318_v6 = vpop.f32.mrf.mxu1  ;;  %3251 = vst.msk [vmem:[#allocation2 + $0x40] sm:$0xff] %vm10435_vm13, %v3219_v24  ;;  %vm10438_vm3 = vnez %v10437_v2  ;;  %v8343_v13 = vld [vmem:[#allocation2 + $0x37] sm:$0xff]  ;;  %v3547_v39 = vsel %vm10387_vm1, %v8341_v11, 0.0  ;;  %vm10445_vm1 = vcmask 785408  }
 0x287   :  { %2461 = vmatmul.bf16.gmra.mxu1 %v2191_v61  ;;  %5482 = vmatmul.msk.bf16.gmra.mxu2 %vm10434_vm9, %v2178_v46  ;;  %v918_v61 = vsel %vm10438_vm3, %v6744_v41, 0.0  ;;  %v3149_v59 = vpop.f32.mrf.mxu0  ;;  %v6138_v46 = vpop.permute.xlu2 %6137  ;;  %vm10441_vm9 = vcmask 523264   ;;  %v3479_v41 = vsel %vm10397_vm11, %v8341_v11, 0.0 }
 0x288   :  { %v1990_v24 = vsel %vm10440_vm0, %v918_v61, %v6129_v28  ;;  %v3150_v63 = vadd.f32 %v8245_v25, %v3149_v59  ;;  %v3512_v28 = vsel %vm7036_vm4, %v8343_v13, 0.0  ;;  %vm10442_vm13 = vmmov %vm10441_vm9  ;;  %v6246_v53 = vpack.i.bf16 %v3479_v41, %v8339_v56 }
 0x289   :  { %v2023_v1 = vsel %vm10441_vm9, %v1990_v24, %v6134_v26  ;;  %v2024_v61 = vsel %vm10442_vm13, %v1991_v20, %v6135_v60  ;;  %v8358_v26 = vpack.c.bf16 %v3547_v39, %v8339_v56  ;;  %v6140_v24 = vunpack.i.h.bf16 %v6138_v46  ;;  %vm10446_vm0 = vmmov %vm10445_vm1  ;;  %v6746_v20 = vld [vmem:[#allocation2 + $0x81] sm:$0xff] }
 0x28a   :  { %v8330_v45 = vpop.f32.mrf.mxu2  ;;  %v3220_v59 = vmax.f32 %v3150_v63, 0.0  ;;  %3188 = vmatmul.bf16.gmra.mxu0 %v3052_v35  ;;  %6247 = vrot.lane.b32.xlu0 %v6246_v53, %s6896_s25  ;;  %v10448_v63 = vld [vmem:[#allocation16_spill] sm:$0xff]  ;;  %vm10451_vm13 = vmmov %vm10444_vm7 }
 0x28b   :  { %10436 = vst [vmem:[#allocation30_spill] sm:$0xff] %v8330_v45  ;;  %v6139_v45 = vunpack.i.l.bf16 %v6138_v46  ;;  %v8360_v54 = vld [vmem:[#allocation2 + $0x3f] sm:$0xff]  ;;  %v2057_v60 = vsel %vm10446_vm0, %v2024_v61, %v6140_v24  ;;  %vm10449_vm9 = vnez %v10448_v63  ;;  %v8384_v61 = vld [vmem:[#allocation2 + $0x27] sm:$0xff]  ;;  %v6143_v24 = vpop.permute.xlu0 %6142  ;;  %vm531_vm0 = vcmask 253952  }
 0x28c   :  { %v8334_v51 = vpop.f32.mrf.mxu1  ;;  %10443 = vst [vmem:[#allocation36_spill] sm:$0xff] %v8358_v26  ;;  %v6256_v10 = vpack.i.bf16 %v8360_v54, %v3512_v28  ;;  %v1209_v41 = vsel %vm10449_vm9, %v6746_v20, 0.0  ;;  %v8377_v26 = vld [vmem:[#allocation2 + $0x18] sm:$0xff]  ;;  %v6145_v29 = vunpack.i.h.bf16 %v6143_v24 }
 0x28d   :  { %3252 = vst.msk [vmem:[#allocation2 + $0x48] sm:$0xff] %vm10444_vm7, %v3220_v59  ;;  %v2056_v62 = vsel %vm10445_vm1, %v2023_v1, %v6139_v45  ;;  %v8374_v59 = vpop.f32.mrf.mxu3  ;;  %v8379_v45 = vld [vmem:[#allocation2 + $0x20] sm:$0xff]  ;;  %v3409_v1 = vsel %vm10397_vm11, %v8300_v14, 0.0  ;;  %vm10453_vm1 = vmmov %vm10444_vm7 }
 0x28e   :  { %6257 = vrot.lane.b32.xlu1 %v6256_v10, %s6898_s27  ;;  %10450 = vst [vmem:[#allocation42_spill] sm:$0xff] %v8374_v59  ;;  %v2194_v53 = vpack.c.bf16 %v2057_v60, %v2056_v62  ;;  %v6747_v10 = vld [vmem:[#allocation2 + $0x79] sm:$0xff]  ;;  %v3510_v62 = vsel %vm7005_vm2, %v8384_v61, 0.0  ;;  %v6148_v60 = vpop.permute.xlu1 %6147  ;;  %v6261_v37 = vpack.i.bf16 %v3409_v1, %v8292_v34 }
 0x28f   :  { %v3151_v39 = vpop.f32.mrf.mxu0  ;;  %v2181_v20 = vpack.c.bf16 %v1209_v41, %v6747_v10  ;;  %v6226_v14 = vpack.i.bf16 %v8388_v48, %v3510_v62  ;;  %v3034_v41 = vld [vmem:[#allocation3 + $0x1c8] sm:$0xff]  ;;  %v6144_v10 = vunpack.i.l.bf16 %v6143_v24  ;;  %v6149_v18 = vunpack.i.l.bf16 %v6148_v60  ;;  %532 = vst.msk [vmem:[#allocation2 + $0x128] sm:$0x1] %vm531_vm0, %v10456_v27 }
 0x290   :  { %v3152_v28 = vadd.f32 %v8245_v25, %v3151_v39  ;;  %v6150_v50 = vunpack.i.h.bf16 %v6148_v60  ;;  %v3053_v34 = vpack.c.bf16 %v3034_v41, %v3033_v23  ;;  %v8408_v24 = vld [vmem:[#allocation2 + $0x39] sm:$0xff]  ;;  %vm10459_vm0 = vcmask 785408  }
 0x291   :  { %6227 = vrot.lane.b32.xlu2 %v6226_v14, %s6898_s27  ;;  %v6764_v55 = vld [vmem:[#allocation2 + $0x3f] sm:$0xff] }
 0x292   :  { %v8367_v35 = vpop.f32.mrf.mxu2  ;;  %v3221_v39 = vmax.f32 %v3152_v28, 0.0  ;;  %v6748_v28 = vld [vmem:[#allocation2 + $0xb7] sm:$0xff] }
 0x293   :  { %10447 = vst [vmem:[#allocation37_spill] sm:$0xff] %v8367_v35  ;;  %v6251_v35 = vpack.i.bf16 %v8379_v45, %v8377_v26  ;;  %v920_v1 = vsel %vm10271_vm14, %v6748_v28, 0.0 }
 0x294   :  { %v8372_v46 = vpop.f32.mrf.mxu1  ;;  %3253 = vst.msk [vmem:[#allocation2 + $0x50] sm:$0xff] %vm10444_vm7, %v3221_v39  ;;  %v6153_v39 = vpop.permute.xlu2 %6152  ;;  %v8410_v60 = vld [vmem:[#allocation2 + $0x41] sm:$0xff]  ;;  %vm10455_vm7 = vcmask 523264  }
 0x295   :  { %6252 = vrot.lane.b32.xlu0 %v6251_v35, %s6896_s25  ;;  %v1992_v35 = vsel %vm10453_vm1, %v920_v1, %v6144_v10  ;;  %v3481_v28 = vsel %vm10407_vm5, %v8410_v60, 0.0  ;;  %v8422_v1 = vld [vmem:[#allocation2 + $0x17] sm:$0xff]  ;;  %v8427_v31 = vpop.f32.mrf.mxu3  ;;  %v6155_v59 = vunpack.i.h.bf16 %v6153_v39  ;;  %v6154_v17 = vunpack.i.l.bf16 %v6153_v39 }
 0x296   :  { %6262 = vrot.lane.b32.xlu1 %v6261_v37, %s6898_s27  ;;  %v6749_v37 = vld [vmem:[#allocation2 + $0xbf] sm:$0xff]  ;;  %v2025_v41 = vsel %vm10455_vm7, %v1992_v35, %v6149_v18  ;;  %10457 = vst [vmem:[#allocation35_spill] sm:$0xff] %v8427_v31  ;;  %v6276_v18 = vpack.i.bf16 %v3481_v28, %v8408_v24  ;;  %v3440_v35 = vsel %vm7005_vm2, %v8422_v1, 0.0 }
 0x297   :  { %2466 = vmatmul.bf16.gmra.mxu1 %v2194_v53  ;;  %5483 = vmatmul.msk.bf16.gmra.mxu2 %vm10451_vm13, %v2181_v20  ;;  %v3154_v62 = vpop.f32.mrf.mxu0  ;;  %vm10454_vm13 = vmmov %vm10453_vm1  ;;  %v1196_v28 = vld [vmem:[#allocation2 + $0x119] sm:$0xff] }
 0x298   :  { %v3155_v14 = vadd.f32 %v8245_v25, %v3154_v62  ;;  %v1993_v23 = vsel %vm10454_vm13, %v6749_v37, %v6145_v29  ;;  %v8424_v62 = vld [vmem:[#allocation2 + $0x1f] sm:$0xff]  ;;  %vm10458_vm1 = vmmov %vm10455_vm7 }
 0x299   :  { %v2026_v29 = vsel %vm10458_vm1, %v1993_v23, %v6150_v50  ;;  %v6241_v2 = vpack.i.bf16 %v8424_v62, %v3440_v35  ;;  %v2058_v50 = vsel %vm10459_vm0, %v2025_v41, %v6154_v17  ;;  %vm10460_vm7 = vmmov %vm10459_vm0  ;;  %v3411_v17 = vsel %vm10407_vm5, %v8341_v11, 0.0  ;;  %v8452_v41 = vld [vmem:[#allocation2 + $0x38] sm:$0xff]  ;;  %v3036_v11 = vld [vmem:[#allocation3 + $0x1d8] sm:$0xff] }
 0x29a   :  { %v8399_v53 = vpop.f32.mrf.mxu2  ;;  %v3222_v37 = vmax.f32 %v3155_v14, 0.0  ;;  %3193 = vmatmul.bf16.gmra.mxu0 %v3053_v34  ;;  %v2059_v34 = vsel %vm10460_vm7, %v2026_v29, %v6155_v59  ;;  %10462 = vst [vmem:[#allocation41_spill] sm:$0xff] %v8452_v41  ;;  %v8454_v59 = vld [vmem:[#allocation2 + $0x40] sm:$0xff]  ;;  %vm10464_vm1 = vnez %v10322_v5  ;;  %vm10466_vm0 = vmmov %vm10454_vm13  ;;  %vm10468_vm7 = vnez %v10280_v3 }
 0x29b   :  { %10452 = vst [vmem:[#allocation43_spill] sm:$0xff] %v8399_v53  ;;  %v8412_v53 = vld [vmem:[#allocation2 + $0x47] sm:$0xff]  ;;  %v8434_v9 = vld [vmem:[#allocation2 + $0x4f] sm:$0xff]  ;;  %6242 = vrot.lane.b32.xlu2 %v6241_v2, %s6897_s26  ;;  %v2197_v35 = vpack.c.bf16 %v2059_v34, %v2058_v50  ;;  %v6158_v2 = vpop.permute.xlu0 %6157  ;;  %v8460_v29 = vpack.i.bf16 %v8454_v59, %v8452_v41  ;;  %vm10470_vm5 = vcmask 523264   ;;  %v3442_v3 = vsel %vm7036_vm4, %v8384_v61, 0.0 }
 0x29c   :  { %v8404_v20 = vpop.f32.mrf.mxu1  ;;  %v3514_v10 = vsel %vm7067_vm6, %v8412_v53, 0.0  ;;  %3254 = vst.msk [vmem:[#allocation2 + $0x58] sm:$0xff] %vm10454_vm13, %v3222_v37  ;;  %v6160_v31 = vunpack.i.h.bf16 %v6158_v2  ;;  %v6159_v30 = vunpack.i.l.bf16 %v6158_v2  ;;  %vm10471_vm11 = vmmov %vm10470_vm5 }
 0x29d   :  { %6277 = vrot.lane.b32.xlu0 %v6276_v18, %s6896_s25  ;;  %v6286_v27 = vpack.i.bf16 %v8434_v9, %v3514_v10  ;;  %v1197_v18 = vld [vmem:[#allocation2 + $0x121] sm:$0xff]  ;;  %10463 = vst [vmem:[#allocation51_spill] sm:$0xff] %v8454_v59 }
 0x29e   :  { %v1229_v10 = vsel %vm10464_vm1, %v1197_v18, 0.0 }
 0x29f   :  { %6287 = vrot.lane.b32.xlu1 %v6286_v27, %s6898_s27  ;;  %v3156_v23 = vpop.f32.mrf.mxu0  ;;  %v6163_v27 = vpop.permute.xlu1 %6162  ;;  %v2211_v34 = vpack.c.bf16 %v1229_v10, %v1196_v28 }
 0x2a0   :  { %v3157_v37 = vadd.f32 %v8245_v25, %v3156_v23  ;;  %v6291_v23 = vpack.i.bf16 %v3411_v17, %v8339_v56  ;;  %v6165_v18 = vunpack.i.h.bf16 %v6163_v27  ;;  %v6164_v5 = vunpack.i.l.bf16 %v6163_v27  ;;  %v6168_v10 = vpop.permute.xlu2 %6167 }
 0x2a1   :  { %5493 = vmatmul.msk.bf16.gmra.mxu3 %vm10466_vm0, %v2211_v34  ;;  %v3054_v56 = vpack.c.bf16 %v3036_v11, %v3035_v4  ;;  %v8483_v4 = vld [vmem:[#allocation2 + $0x49] sm:$0xff] }
 0x2a2   :  { %v8443_v14 = vpop.f32.mrf.mxu2  ;;  %v3223_v50 = vmax.f32 %v3157_v37, 0.0 }
 0x2a3   :  { %10461 = vst [vmem:[#allocation49_spill] sm:$0xff] %v8443_v14  ;;  %v8463_v14 = vpop.f32.mrf.mxu3  ;;  %6267 = vrot.lane.b32.xlu2 %v8460_v29, %s6897_s26  ;;  %v8485_v11 = vld [vmem:[#allocation2 + $0x51] sm:$0xff] }
 0x2a4   :  { %v8446_v39 = vpop.f32.mrf.mxu1  ;;  %10465 = vst [vmem:[#allocation52_spill] sm:$0xff] %v8463_v14 }
 0x2a5   :  { %3255 = vst.msk [vmem:[#allocation2 + $0x60] sm:$0xff] %vm10454_vm13, %v3223_v50  ;;  %6282 = vrot.lane.b32.xlu0 %v8320_v38, %s6896_s25  ;;  %v6751_v50 = vld [vmem:[#allocation2 + $0xcf] sm:$0xff]  ;;  %vm10469_vm13 = vmmov %vm10466_vm0 }
 0x2a6   :  { %v1995_v38 = vsel %vm10469_vm13, %v6751_v50, %v6160_v31  ;;  %v3483_v31 = vsel %vm10421_vm8, %v8485_v11, 0.0 }
 0x2a7   :  { %2471 = vmatmul.bf16.gmra.mxu1 %v2197_v35  ;;  %6292 = vrot.lane.b32.xlu1 %v6291_v23, %s6898_s27  ;;  %v6750_v35 = vld [vmem:[#allocation2 + $0xc7] sm:$0xff]  ;;  %v3159_v2 = vpop.f32.mrf.mxu0  ;;  %v2028_v23 = vsel %vm10471_vm11, %v1995_v38, %v6165_v18  ;;  %v6170_v18 = vunpack.i.h.bf16 %v6168_v10  ;;  %vm10472_vm11 = vmmov %vm10466_vm0 }
 0x2a8   :  { %v922_v37 = vsel %vm10468_vm7, %v6750_v35, 0.0  ;;  %v3160_v34 = vadd.f32 %v8245_v25, %v3159_v2  ;;  %v8487_v35 = vld [vmem:[#allocation2 + $0x57] sm:$0xff]  ;;  %v6306_v2 = vpack.i.bf16 %v3483_v31, %v8483_v4  ;;  %v6173_v31 = vpop.permute.xlu0 %6172  ;;  %v6183_v40 = vpop.permute.xlu2 %6182 }
 0x2a9   :  { %v1994_v27 = vsel %vm10466_vm0, %v922_v37, %v6159_v30  ;;  %v6271_v30 = vpack.i.bf16 %v8388_v48, %v3442_v3  ;;  %v6169_v37 = vunpack.i.l.bf16 %v6168_v10 }
 0x2aa   :  { %v8471_v28 = vpop.f32.mrf.mxu2  ;;  %v3224_v14 = vmax.f32 %v3160_v34, 0.0  ;;  %3198 = vmatmul.bf16.gmra.mxu0 %v3054_v56 }
 0x2ab   :  { %10467 = vst [vmem:[#allocation44_spill] sm:$0xff] %v8471_v28  ;;  %v2027_v28 = vsel %vm10470_vm5, %v1994_v27, %v6164_v5  ;;  %v3516_v5 = vsel %vm10181_vm12, %v8487_v35, 0.0  ;;  %vm10473_vm5 = vcmask 785408   ;;  %6272 = vrot.lane.b32.xlu2 %v6271_v30, %s6897_s26  ;;  %v8508_v27 = vpop.f32.mrf.mxu3  ;;  %v6174_v30 = vunpack.i.l.bf16 %v6173_v31 }
 0x2ac   :  { %v8476_v17 = vpop.f32.mrf.mxu1  ;;  %v8500_v50 = vld [vmem:[#allocation2 + $0x5f] sm:$0xff]  ;;  %3256 = vst.msk [vmem:[#allocation2 + $0x68] sm:$0xff] %vm10472_vm11, %v3224_v14  ;;  %v2060_v56 = vsel %vm10473_vm5, %v2027_v28, %v6169_v37  ;;  %vm10474_vm13 = vmmov %vm10473_vm5 }
 0x2ad   :  { %v6316_v61 = vpack.i.bf16 %v8500_v50, %v3516_v5  ;;  %v2061_v38 = vsel %vm10474_vm13, %v2028_v23, %v6170_v18  ;;  %6307 = vrot.lane.b32.xlu0 %v6306_v2, %s6896_s25  ;;  %10475 = vst [vmem:[#allocation56_spill] sm:$0xff] %v8508_v27  ;;  %v6178_v23 = vpop.permute.xlu1 %6177  ;;  %v6175_v5 = vunpack.i.h.bf16 %v6173_v31  ;;  %v10481_v27 = vld [vmem:[#allocation78_spill] sm:$0xff]  ;;  %vm10483_vm5 = vmmov %vm10466_vm0 }
 0x2ae   :  { %v2200_v14 = vpack.c.bf16 %v2061_v38, %v2060_v56  ;;  %v6180_v18 = vunpack.i.h.bf16 %v6178_v23  ;;  %v6179_v37 = vunpack.i.l.bf16 %v6178_v23  ;;  %v8524_v56 = vld [vmem:[#allocation2 + $0x50] sm:$0xff]  ;;  %v5715_v23 = vld [vmem:[%s9786_s3 + $0x88] sm:$0xff]  ;;  %vm10482_vm11 = vnez %v10481_v27  ;;  %vm10484_vm13 = vmmov %vm10466_vm0 }
 0x2af   :  { %6317 = vrot.lane.b32.xlu1 %v6316_v61, %s6898_s27  ;;  %v3161_v10 = vpop.f32.mrf.mxu0  ;;  %v3413_v61 = vsel %vm10421_vm8, %v8410_v60, 0.0  ;;  %10479 = vst [vmem:[#allocation59_spill] sm:$0xff] %v8524_v56  ;;  %v3037_v38 = vld [vmem:[#allocation3 + $0x1e0] sm:$0xff]  ;;  %4938 = vmatpush.bf16.msra.mxu3 %v5715_v23  ;;  %vm10487_vm1 = vmmov %vm10483_vm5 }
 0x2b0   :  { %v3162_v34 = vadd.f32 %v8245_v25, %v3161_v10 }
 0x2b2   :  { %v8510_v3 = vpop.f32.mrf.mxu2  ;;  %v3225_v28 = vmax.f32 %v3162_v34, 0.0 }
 0x2b3   :  { %10476 = vst [vmem:[#allocation50_spill] sm:$0xff] %v8510_v3  ;;  %v8522_v3 = vld [vmem:[#allocation2 + $0x48] sm:$0xff]  ;;  %v8536_v60 = vpop.f32.mrf.mxu3 }
 0x2b4   :  { %v8513_v48 = vpop.f32.mrf.mxu1  ;;  %3257 = vst.msk [vmem:[#allocation2 + $0x70] sm:$0xff] %vm10466_vm0, %v3225_v28  ;;  %v8531_v31 = vpack.i.bf16 %v8524_v56, %v8522_v3  ;;  %v3038_v28 = vld [vmem:[#allocation3 + $0x1e8] sm:$0xff]  ;;  %vm10485_vm0 = vcmask 523264  }
 0x2b5   :  { %10478 = vst [vmem:[#allocation46_spill] sm:$0xff] %v8522_v3  ;;  %6312 = vrot.lane.b32.xlu0 %v8460_v29, %s6896_s25  ;;  %v6753_v3 = vld [vmem:[#allocation2 + $0xdf] sm:$0xff]  ;;  %vm10486_vm8 = vmmov %vm10485_vm0  ;;  %v6185_v29 = vunpack.i.h.bf16 %v6183_v40 }
 0x2b6   :  { %10480 = vst [vmem:[#allocation61_spill] sm:$0xff] %v8536_v60  ;;  %v1997_v56 = vsel %vm10483_vm5, %v6753_v3, %v6175_v5  ;;  %6297 = vrot.lane.b32.xlu2 %v8531_v31, %s6897_s26 }
 0x2b7   :  { %2476 = vmatmul.bf16.gmra.mxu1 %v2200_v14  ;;  %v6321_v14 = vpack.i.bf16 %v3413_v61, %v8408_v24  ;;  %v3164_v34 = vpop.f32.mrf.mxu0  ;;  %v3055_v61 = vpack.c.bf16 %v3038_v28, %v3037_v38 }
 0x2b8   :  { %v3165_v24 = vadd.f32 %v8245_v25, %v3164_v34  ;;  %v6184_v34 = vunpack.i.l.bf16 %v6183_v40  ;;  %v3444_v40 = vsel %vm7067_vm6, %v8343_v13, 0.0 }
 0x2b9   :  { %6322 = vrot.lane.b32.xlu1 %v6321_v14, %s6898_s27  ;;  %v6301_v28 = vpack.i.bf16 %v8360_v54, %v3444_v40 }
 0x2ba   :  { %v8517_v2 = vpop.f32.mrf.mxu2  ;;  %v3226_v27 = vmax.f32 %v3165_v24, 0.0  ;;  %3203 = vmatmul.bf16.gmra.mxu0 %v3055_v61 }
 0x2bb   :  { %10477 = vst [vmem:[#allocation45_spill] sm:$0xff] %v8517_v2  ;;  %v6752_v2 = vld [vmem:[#allocation2 + $0xd7] sm:$0xff]  ;;  %v8572_v38 = vld [vmem:[#allocation2 + $0x6f] sm:$0xff] }
 0x2bc   :  { %v8526_v10 = vpop.f32.mrf.mxu1  ;;  %v924_v42 = vsel %vm10482_vm11, %v6752_v2, 0.0  ;;  %v2030_v2 = vsel %vm10486_vm8, %v1997_v56, %v6180_v18  ;;  %3258 = vst.msk [vmem:[#allocation2 + $0x78] sm:$0xff] %vm10487_vm1, %v3226_v27  ;;  %vm10488_vm11 = vcmask 785408   ;;  %v8560_v18 = vld [vmem:[#allocation2 + $0x61] sm:$0xff]  ;;  %vm10492_vm8 = vnez %v10024_v36 }
 0x2bd   :  { %v1996_v41 = vsel %vm10484_vm13, %v924_v42, %v6174_v30  ;;  %vm10489_vm5 = vmmov %vm10488_vm11  ;;  %v5705_v30 = vld [vmem:[%s9786_s3 + $0x38] sm:$0xff]  ;;  %v3485_v27 = vsel %vm10433_vm15, %v8560_v18, 0.0  ;;  %v8570_v56 = vld [vmem:[#allocation2 + $0x67] sm:$0xff] }
 0x2be   :  { %v2029_v60 = vsel %vm10485_vm0, %v1996_v41, %v6179_v37  ;;  %v2063_v42 = vsel %vm10489_vm5, %v2030_v2, %v6185_v29  ;;  %v8558_v41 = vld [vmem:[#allocation2 + $0x59] sm:$0xff]  ;;  %4754 = vmatpush.bf16.msra.mxu1 %v5705_v30  ;;  %v3518_v13 = vsel %vm10492_vm8, %v8570_v56, 0.0  ;;  %6302 = vrot.lane.b32.xlu2 %v6301_v28, %s6897_s26  ;;  %v8582_v2 = vpop.f32.mrf.mxu3  ;;  %v6188_v29 = vpop.permute.xlu0 %6187  ;;  %v3415_v28 = vsel %vm10433_vm15, %v8485_v11, 0.0  ;;  %vm10496_vm13 = vmmov %vm10487_vm1 }
 0x2bf   :  { %v2062_v3 = vsel %vm10488_vm11, %v2029_v60, %v6184_v34  ;;  %v3166_v14 = vpop.f32.mrf.mxu0  ;;  %v6336_v60 = vpack.i.bf16 %v3485_v27, %v8558_v41  ;;  %v6346_v61 = vpack.i.bf16 %v8572_v38, %v3518_v13  ;;  %10493 = vst [vmem:[#allocation60_spill] sm:$0xff] %v8582_v2  ;;  %v6193_v34 = vpop.permute.xlu1 %6192  ;;  %v6189_v30 = vunpack.i.l.bf16 %v6188_v29  ;;  %v3039_v13 = vld [vmem:[#allocation3 + $0x1f0] sm:$0xff]  ;;  %vm10497_vm0 = vmmov %vm10487_vm1 }
 0x2c0   :  { %v2203_v23 = vpack.c.bf16 %v2063_v42, %v2062_v3  ;;  %v3167_v24 = vadd.f32 %v8245_v25, %v3166_v14  ;;  %v8588_v3 = vld [vmem:[%s9787_s4] ss:$0 sm:$0xff]  ;;  %v6190_v42 = vunpack.i.h.bf16 %v6188_v29  ;;  %v6195_v40 = vunpack.i.h.bf16 %v6193_v34  ;;  %v3040_v29 = vld [vmem:[#allocation3 + $0x1f8] sm:$0xff] }
 0x2c1   :  { %6337 = vrot.lane.b32.xlu0 %v6336_v60, %s6896_s25  ;;  %6347 = vrot.lane.b32.xlu1 %v6346_v61, %s6898_s27  ;;  %v6194_v27 = vunpack.i.l.bf16 %v6193_v34  ;;  %v3353_v60 = vld [vmem:[#allocation2 + $0x60] sm:$0xff]  ;;  %v6351_v61 = vpack.i.bf16 %v3415_v28, %v8483_v4  ;;  %v6198_v34 = vpop.permute.xlu2 %6197  ;;  %v3056_v59 = vpack.c.bf16 %v3040_v29, %v3039_v13  ;;  %v2420_v4 = vadd.f32 %v8588_v3, %v8294_v7 }
 0x2c2   :  { %v8553_v5 = vpop.f32.mrf.mxu2  ;;  %v3227_v54 = vmax.f32 %v3167_v24, 0.0  ;;  %v2418_v24 = vadd.f32 %v8588_v3, %v8285_v8  ;;  %v1999_v58 = vsel %vm10496_vm13, %v6755_v44, %v6190_v42  ;;  %vm10498_vm5 = vcmask 523264   ;;  %v10500_v44 = vld [vmem:[#allocation14_spill] sm:$0xff]  ;;  %vm10501_vm13 = vmmov %vm10497_vm0 }
 0x2c3   :  { %10490 = vst [vmem:[#allocation58_spill] sm:$0xff] %v8553_v5  ;;  %v6199_v13 = vunpack.i.l.bf16 %v6198_v34  ;;  %v8627_v29 = vld [vmem:[#allocation2 + $0x77] sm:$0xff] }
 0x2c4   :  { %v8565_v37 = vpop.f32.mrf.mxu1  ;;  %3259 = vst.msk [vmem:[#allocation2 + $0x80] sm:$0xff] %vm10487_vm1, %v3227_v54  ;;  %vm10499_vm1 = vmmov %vm10498_vm5  ;;  %v2507_v42 = vadd.f32 %v10500_v44, %v2418_v24  ;;  %v3446_v24 = vsel %vm10181_vm12, %v8412_v53, 0.0 }
 0x2c5   :  { %10491 = vst [vmem:[#allocation66_spill] sm:$0xff] %v8565_v37  ;;  %v10494_v37 = vld [vmem:[#allocation83_spill] sm:$0xff] }
 0x2c6   :  { %vm10495_vm11 = vnez %v10494_v37 }
 0x2c7   :  { %2481 = vmatmul.bf16.gmra.mxu1 %v2203_v23  ;;  %v3352_v23 = vld [vmem:[#allocation2 + $0x58] sm:$0xff]  ;;  %v3169_v54 = vpop.f32.mrf.mxu0  ;;  %v926_v16 = vsel %vm10495_vm11, %v6754_v19, 0.0 }
 0x2c8   :  { %v8600_v2 = vpack.i.bf16 %v3353_v60, %v3352_v23  ;;  %v3170_v11 = vadd.f32 %v8245_v25, %v3169_v54  ;;  %v1998_v8 = vsel %vm10497_vm0, %v926_v16, %v6189_v30  ;;  %v2032_v23 = vsel %vm10499_vm1, %v1999_v58, %v6195_v40  ;;  %v8617_v16 = vpop.f32.mrf.mxu3  ;;  %v10502_v30 = vld [vmem:[#allocation15_spill] sm:$0xff]  ;;  %v8623_v54 = vld [vmem:[#allocation2 + $0x69] sm:$0xff] }
 0x2c9   :  { %v2031_v28 = vsel %vm10498_vm5, %v1998_v8, %v6194_v27  ;;  %6342 = vrot.lane.b32.xlu0 %v8531_v31, %s6896_s25  ;;  %v6200_v60 = vunpack.i.h.bf16 %v6198_v34  ;;  %6352 = vrot.lane.b32.xlu1 %v6351_v61, %s6898_s27  ;;  %v2509_v27 = vadd.f32 %v10502_v30, %v2420_v4  ;;  %vm10503_vm0 = vcmask 785408  }
 0x2ca   :  { %v2595_v14 = vpop.f32.mrf.mxu2  ;;  %6327 = vrot.lane.b32.xlu2 %v8600_v2, %s6897_s26  ;;  %v3228_v19 = vmax.f32 %v3170_v11, 0.0  ;;  %3208 = vmatmul.bf16.gmra.mxu0 %v3056_v59  ;;  %v2064_v58 = vsel %vm10503_vm0, %v2031_v28, %v6199_v13  ;;  %vm10504_vm5 = vmmov %vm10503_vm0  ;;  %v8625_v59 = vld [vmem:[#allocation2 + $0x71] sm:$0xff]  ;;  %vm10505_vm1 = vnez %v10033_v32  ;;  %v6331_v28 = vpack.i.bf16 %v8434_v9, %v3446_v24 }
 0x2cb   :  { %v2596_v7 = vadd.f32 %v2595_v14, %v2507_v42  ;;  %v2065_v40 = vsel %vm10504_vm5, %v2032_v23, %v6200_v60  ;;  %v3487_v14 = vsel %vm10449_vm9, %v8625_v59, 0.0  ;;  %v8637_v11 = vld [vmem:[#allocation2 + $0x7f] sm:$0xff]  ;;  %v3520_v8 = vsel %vm10505_vm1, %v8627_v29, 0.0  ;;  %v6203_v42 = vpop.permute.xlu0 %6202  ;;  %vm10506_vm0 = vmmov %vm10501_vm13 }
 0x2cc   :  { %v8597_v5 = vpop.f32.mrf.mxu1  ;;  %3260 = vst.msk [vmem:[#allocation2 + $0x88] sm:$0xff] %vm10501_vm13, %v3228_v19  ;;  %v2206_v23 = vpack.c.bf16 %v2065_v40, %v2064_v58  ;;  %v6366_v19 = vpack.i.bf16 %v3487_v14, %v8623_v54  ;;  %v6376_v53 = vpack.i.bf16 %v8637_v11, %v3520_v8  ;;  %v6205_v9 = vunpack.i.h.bf16 %v6203_v42  ;;  %v3354_v8 = vld [vmem:[#allocation2 + $0x68] sm:$0xff] }
 0x2cd   :  { %v2675_v13 = vmax.f32 %v2596_v7, 0.0  ;;  %v6204_v58 = vunpack.i.l.bf16 %v6203_v42  ;;  %v3417_v14 = vsel %vm10449_vm9, %v8560_v18, 0.0  ;;  %vm10507_vm5 = vnez %v10320_v47  ;;  %v6757_v18 = vld [vmem:[#allocation2 + $0xff] sm:$0xff] }
 0x2ce   :  { %vm10509_vm9 = vcmask 523264  }
 0x2cf   :  { %v3171_v4 = vpop.f32.mrf.mxu0  ;;  %vm10510_vm15 = vmmov %vm10509_vm9 }
 0x2d0   :  { %v3172_v60 = vadd.f32 %v8245_v25, %v3171_v4  ;;  %v8651_v40 = vpop.f32.mrf.mxu3  ;;  %v3355_v4 = vld [vmem:[#allocation2 + $0x70] sm:$0xff] }
 0x2d1   :  { %6367 = vrot.lane.b32.xlu0 %v6366_v19, %s6896_s25  ;;  %6377 = vrot.lane.b32.xlu1 %v6376_v53, %s6898_s27  ;;  %v6381_v19 = vpack.i.bf16 %v3417_v14, %v8558_v41 }
 0x2d2   :  { %v2597_v31 = vpop.f32.mrf.mxu2  ;;  %6332 = vrot.lane.b32.xlu2 %v6331_v28, %s6897_s26  ;;  %v3229_v30 = vmax.f32 %v3172_v60, 0.0  ;;  %v2423_v28 = vadd.f32 %v8588_v3, %v8318_v6  ;;  %v8661_v60 = vpack.i.bf16 %v3355_v4, %v3354_v8  ;;  %v2425_v6 = vadd.f32 %v8588_v3, %v8334_v51 }
 0x2d3   :  { %v2598_v61 = vadd.f32 %v2597_v31, %v2509_v27  ;;  %v6208_v27 = vpop.permute.xlu1 %6207 }
 0x2d4   :  { %v8632_v34 = vpop.f32.mrf.mxu1  ;;  %3261 = vst.msk [vmem:[#allocation2 + $0x90] sm:$0xff] %vm10501_vm13, %v3229_v30  ;;  %v6210_v7 = vunpack.i.h.bf16 %v6208_v27  ;;  %v6209_v24 = vunpack.i.l.bf16 %v6208_v27  ;;  %vm10508_vm13 = vmmov %vm10506_vm0 }
 0x2d5   :  { %v2676_v44 = vmax.f32 %v2598_v61, 0.0  ;;  %v2001_v27 = vsel %vm10508_vm13, %v6757_v18, %v6205_v9  ;;  %vm10512_vm13 = vmmov %vm10506_vm0 }
 0x2d6   :  { %v2034_v14 = vsel %vm10510_vm15, %v2001_v27, %v6210_v7  ;;  %v8695_v27 = vld [vmem:[#allocation2 + $0x81] sm:$0xff] }
 0x2d7   :  { %2486 = vmatmul.bf16.gmra.mxu1 %v2206_v23  ;;  %v2707_v31 = vpack.c.bf16 %v2676_v44, %v2675_v13  ;;  %v3174_v53 = vpop.f32.mrf.mxu0  ;;  %v6213_v13 = vpop.permute.xlu2 %6212  ;;  %v6756_v44 = vld [vmem:[#allocation2 + $0xf7] sm:$0xff] }
 0x2d8   :  { %v928_v42 = vsel %vm10507_vm5, %v6756_v44, 0.0  ;;  %v3175_v30 = vadd.f32 %v8245_v25, %v3174_v53  ;;  %v6215_v4 = vunpack.i.h.bf16 %v6213_v13  ;;  %v6214_v53 = vunpack.i.l.bf16 %v6213_v13  ;;  %v10511_v44 = vld [vmem:[#allocation17_spill] sm:$0xff]  ;;  %v8688_v13 = vld [vmem:[#allocation2 + $0x79] sm:$0xff] }
 0x2d9   :  { %5502 = vmatmul.msk.bf16.vlgmr.msrb.gmra.mxu3 %vm10506_vm0, %v2707_v31  ;;  %v2000_v31 = vsel %vm10506_vm0, %v928_v42, %v6204_v58  ;;  %6372 = vrot.lane.b32.xlu0 %v8600_v2, %s6896_s25  ;;  %v2512_v9 = vadd.f32 %v10511_v44, %v2423_v28  ;;  %v10513_v58 = vld [vmem:[#allocation19_spill] sm:$0xff]  ;;  %vm10514_vm0 = vcmask 785408   ;;  %v5704_v2 = vld [vmem:[%s9786_s3 + $0x30] sm:$0xff]  ;;  %v5713_v28 = vld [vmem:[%s9786_s3 + $0x78] sm:$0xff] }
 0x2da   :  { %v2600_v61 = vpop.f32.mrf.mxu2  ;;  %6357 = vrot.lane.b32.xlu2 %v8661_v60, %s6897_s26  ;;  %v2033_v41 = vsel %vm10509_vm9, %v2000_v31, %v6209_v24  ;;  %v3230_v8 = vmax.f32 %v3175_v30, 0.0  ;;  %6382 = vrot.lane.b32.xlu1 %v6381_v19, %s6898_s27  ;;  %v2514_v42 = vadd.f32 %v10513_v58, %v2425_v6  ;;  %vm10515_vm9 = vmmov %vm10514_vm0  ;;  %v8697_v31 = vld [vmem:[#allocation2 + $0x87] sm:$0xff]  ;;  %v8712_v58 = vpop.f32.mrf.mxu3 }
 0x2db   :  { %v2601_v51 = vadd.f32 %v2600_v61, %v2512_v9  ;;  %v2066_v18 = vsel %vm10514_vm0, %v2033_v41, %v6214_v53  ;;  %v2067_v24 = vsel %vm10515_vm9, %v2034_v14, %v6215_v4  ;;  %v3448_v61 = vsel %vm10492_vm8, %v8487_v35, 0.0  ;;  %v8699_v6 = vld [vmem:[#allocation2 + $0x8f] sm:$0xff]  ;;  %4755 = vmatpush.bf16.msra.mxu1 %v5704_v2  ;;  %4843 = vmatpush.bf16.msra.mxu2 %v5713_v28  ;;  %v10516_v4 = vld [vmem:[#allocation22_spill] sm:$0xff] }
 0x2dc   :  { %v8658_v23 = vpop.f32.mrf.mxu1  ;;  %3262 = vst.msk [vmem:[#allocation2 + $0x98] sm:$0xff] %vm10512_vm13, %v3230_v8  ;;  %v6361_v14 = vpack.i.bf16 %v8500_v50, %v3448_v61  ;;  %v2209_v8 = vpack.c.bf16 %v2067_v24, %v2066_v18  ;;  %vm10517_vm15 = vnez %v10516_v4  ;;  %vm10518_vm13 = vnez %v10204_v57  ;;  %v5712_v9 = vld [vmem:[%s9786_s3 + $0x70] sm:$0xff]  ;;  %v3356_v61 = vld [vmem:[#allocation2 + $0x78] sm:$0xff] }
 0x2dd   :  { %v3489_v53 = vsel %vm10517_vm15, %v8695_v27, 0.0  ;;  %v3522_v35 = vsel %vm10518_vm13, %v8697_v31, 0.0  ;;  %10519 = vst [vmem:[#allocation67_spill] sm:$0xff] %v8712_v58  ;;  %v2677_v50 = vmax.f32 %v2601_v51, 0.0  ;;  %vm10520_vm0 = vcmask 261120   ;;  %v5711_v51 = vld [vmem:[%s9786_s3 + $0x68] sm:$0xff] }
 0x2de   :  { %v6396_v18 = vpack.i.bf16 %v3489_v53, %v8688_v13  ;;  %v6406_v24 = vpack.i.bf16 %v8699_v6, %v3522_v35  ;;  %vm10521_vm9 = vmmov %vm10520_vm0  ;;  %v3419_v28 = vsel %vm10517_vm15, %v8625_v59, 0.0  ;;  %v8740_v59 = vld [vmem:[%s9785_s2] ss:$0 sm:$0xff]  ;;  %vm10526_vm15 = vcmask 261120  }
 0x2df   :  { %v3176_v41 = vpop.f32.mrf.mxu0  ;;  %4844 = vmatpush.bf16.msra.mxu2 %v5712_v9  ;;  %vm10527_vm5 = vmmov %vm10526_vm15 }
 0x2e0   :  { %v3177_v44 = vadd.f32 %v8245_v25, %v3176_v41  ;;  %v2428_v41 = vadd.f32 %v8588_v3, %v8372_v46  ;;  %v5710_v46 = vld [vmem:[%s9786_s3 + $0x60] sm:$0xff]  ;;  %vm10528_vm11 = vmmov %vm10527_vm5 }
 0x2e1   :  { %6397 = vrot.lane.b32.xlu0 %v6396_v18, %s6896_s25 }
 0x2e2   :  { %v2602_v7 = vpop.f32.mrf.mxu2  ;;  %6362 = vrot.lane.b32.xlu2 %v6361_v14, %s6897_s26  ;;  %6407 = vrot.lane.b32.xlu1 %v6406_v24, %s6898_s27  ;;  %v2517_v18 = vadd.f32 %v8066_v43, %v2428_v41  ;;  %v5709_v43 = vld [vmem:[%s9786_s3 + $0x58] sm:$0xff] }
 0x2e3   :  { %v2603_v19 = vadd.f32 %v2602_v7, %v2514_v42  ;;  %v3231_v7 = vmax.f32 %v3177_v44, 0.0  ;;  %v5703_v44 = vld [vmem:[%s9786_s3 + $0x28] sm:$0xff]  ;;  %4845 = vmatpush.bf16.msra.mxu2 %v5711_v51  ;;  %v8776_v41 = vld [vmem:[#allocation2 + $0x97] sm:$0xff] }
 0x2e4   :  { %v8693_v30 = vpop.f32.mrf.mxu1  ;;  %4756 = vmatpush.bf16.msra.mxu1 %v5703_v44  ;;  %v8764_v51 = vld [vmem:[#allocation2 + $0x89] sm:$0xff] }
 0x2e5   :  { %v2678_v42 = vmax.f32 %v2603_v19, 0.0  ;;  %3263 = vst.msk [vmem:[#allocation2 + $0xa0] sm:$0xff] %vm10520_vm0, %v3231_v7  ;;  %v3357_v19 = vld [vmem:[#allocation2 + $0x80] sm:$0xff]  ;;  %v10523_v44 = vld [vmem:[#allocation33_spill] sm:$0xff] }
 0x2e6   :  { %v8732_v35 = vpack.i.bf16 %v3357_v19, %v3356_v61 }
 0x2e7   :  { %2491 = vmatmul.bf16.gmra.mxu1 %v2209_v8  ;;  %v2708_v2 = vpack.c.bf16 %v2678_v42, %v2677_v50  ;;  %v6411_v8 = vpack.i.bf16 %v3419_v28, %v8623_v54  ;;  %v3179_v53 = vpop.f32.mrf.mxu0  ;;  %v2430_v54 = vadd.f32 %v8588_v3, %v8404_v20  ;;  %v8750_v42 = vpop.f32.mrf.mxu3  ;;  %4846 = vmatpush.bf16.msra.mxu2 %v5710_v46  ;;  %v3450_v28 = vsel %vm10505_vm1, %v8570_v56, 0.0 }
 0x2e8   :  { %v3180_v9 = vadd.f32 %v8740_v59, %v3179_v53  ;;  %10522 = vst [vmem:[#allocation69_spill] sm:$0xff] %v8750_v42  ;;  %v6391_v53 = vpack.i.bf16 %v8572_v38, %v3450_v28  ;;  %vm10529_vm1 = vcmask 523264  }
 0x2e9   :  { %5503 = vmatmul.msk.bf16.gmra.mxu3 %vm10521_vm9, %v2708_v2  ;;  %6402 = vrot.lane.b32.xlu0 %v8661_v60, %s6896_s25  ;;  %v2519_v20 = vadd.f32 %v8100_v15, %v2430_v54  ;;  %v5702_v2 = vld [vmem:[%s9786_s3 + $0x20] sm:$0xff]  ;;  %v8766_v60 = vpop.permute.xlu0 %6217  ;;  %v8773_v15 = vld [vmem:[#allocation2 + $0x91] sm:$0xff]  ;;  %vm10524_vm9 = vnez %v10523_v44  ;;  %vm10530_vm7 = vmmov %vm10529_vm1 }
 0x2ea   :  { %v2605_v25 = vpop.f32.mrf.mxu2  ;;  %6387 = vrot.lane.b32.xlu2 %v8732_v35, %s6897_s26  ;;  %v3232_v50 = vmax.f32 %v3180_v9, 0.0  ;;  %6412 = vrot.lane.b32.xlu1 %v6411_v8, %s6898_s27  ;;  %v6220_v19 = vunpack.i.h.bf16 %v8766_v60  ;;  %v3491_v9 = vsel %vm10524_vm9, %v8773_v15, 0.0  ;;  %v5701_v54 = vld [vmem:[%s9786_s3 + $0x18] sm:$0xff]  ;;  %v3421_v21 = vsel %vm10524_vm9, %v8695_v27, 0.0  ;;  %v5699_v27 = vld [vmem:[%s9786_s3 + $0x8] sm:$0xff] }
 0x2eb   :  { %v2606_v24 = vadd.f32 %v2605_v25, %v2517_v18  ;;  %4757 = vmatpush.bf16.msra.mxu1 %v5702_v2  ;;  %4847 = vmatpush.bf16.msra.mxu2 %v5709_v43  ;;  %v6228_v18 = vpop.permute.xlu2 %6227  ;;  %v5708_v2 = vld [vmem:[%s9786_s3 + $0x50] sm:$0xff]  ;;  %vm10546_vm9 = vcmask 523264  }
 0x2ec   :  { %v8729_v14 = vpop.f32.mrf.mxu1  ;;  %3264 = vst.msk [vmem:[#allocation2 + $0xa8] sm:$0xff] %vm10520_vm0, %v3232_v50  ;;  %v8782_v46 = vld [vmem:[#allocation2 + $0x9f] sm:$0xff]  ;;  %vm10525_vm0 = vnez %v10222_v0  ;;  %v6223_v50 = vpop.permute.xlu1 %6222  ;;  %v4414_v43 = vsel %vm10526_vm15, %v8377_v26, %v6220_v19  ;;  %v6230_v47 = vunpack.i.h.bf16 %v6228_v18  ;;  %v2433_v26 = vadd.f32 %v8588_v3, %v8446_v39  ;;  %v5707_v39 = vld [vmem:[%s9786_s3 + $0x48] sm:$0xff] }
 0x2ed   :  { %v3524_v56 = vsel %vm10525_vm0, %v8776_v41, 0.0  ;;  %v6225_v42 = vunpack.i.h.bf16 %v6223_v50  ;;  %v6219_v19 = vunpack.i.l.bf16 %v8766_v60  ;;  %v2883_v0 = vld [vmem:[#allocation3 + $0x18] sm:$0xff] }
 0x2ee   :  { %v6436_v28 = vpack.i.bf16 %v8782_v46, %v3524_v56 }
 0x2ef   :  { %v3181_v8 = vpop.f32.mrf.mxu0  ;;  %4758 = vmatpush.bf16.msra.mxu1 %v5701_v54  ;;  %v8801_v58 = vpop.f32.mrf.mxu3  ;;  %4848 = vmatpush.bf16.msra.mxu2 %v5708_v2 }
 0x2f0   :  { %v3182_v4 = vadd.f32 %v8740_v59, %v3181_v8  ;;  %v3279_v8 = vld [vmem:[#allocation2 + $0xf] sm:$0xff] }
 0x2f1   :  { %v6233_v60 = vpop.permute.xlu0 %6232 }
 0x2f2   :  { %v2607_v7 = vpop.f32.mrf.mxu2  ;;  %6392 = vrot.lane.b32.xlu2 %v6391_v53, %s6897_s26  ;;  %6437 = vrot.lane.b32.xlu1 %v6436_v28, %s6898_s27  ;;  %v3233_v53 = vmax.f32 %v3182_v4, 0.0 }
 0x2f3   :  { %v2608_v25 = vadd.f32 %v2607_v7, %v2519_v20  ;;  %v2679_v20 = vmax.f32 %v2606_v24, 0.0  ;;  %v6426_v7 = vpack.i.bf16 %v3491_v9, %v8764_v51  ;;  %v3278_v24 = vld [vmem:[#allocation2 + $0x7] sm:$0xff]  ;;  %v6229_v9 = vunpack.i.l.bf16 %v6228_v18  ;;  %4849 = vmatpush.bf16.msra.mxu2 %v5707_v39 }
 0x2f4   :  { %v8771_v61 = vpop.f32.mrf.mxu1  ;;  %v3310_v4 = vsel %vm7005_vm2, %v3278_v24, 0.0  ;;  %3265 = vst.msk [vmem:[#allocation2 + $0xb0] sm:$0xff] %vm10528_vm11, %v3233_v53  ;;  %vm10531_vm2 = vmmov %vm10527_vm5  ;;  %v6441_v24 = vpack.i.bf16 %v3421_v21, %v8688_v13  ;;  %vm10533_vm11 = vcmask 785408   ;;  %v5706_v13 = vld [vmem:[%s9786_s3 + $0x40] sm:$0xff] }
 0x2f5   :  { %v2680_v38 = vmax.f32 %v2608_v25, 0.0  ;;  %6427 = vrot.lane.b32.xlu0 %v6426_v7, %s6896_s25  ;;  %v6224_v25 = vunpack.i.l.bf16 %v6223_v50  ;;  %v4446_v54 = vsel %vm10529_vm1, %v4414_v43, %v6229_v9  ;;  %v6234_v7 = vunpack.i.l.bf16 %v6233_v60  ;;  %v3359_v43 = vld [vmem:[#allocation2 + $0x90] sm:$0xff]  ;;  %v6243_v53 = vpop.permute.xlu2 %6242  ;;  %vm10534_vm1 = vmmov %vm10533_vm11 }
 0x2f6   :  { %v4319_v28 = vsel %vm10531_vm2, %v3279_v8, %v6225_v42 }
 0x2f7   :  { %v2709_v63 = vpack.c.bf16 %v2680_v38, %v2679_v20  ;;  %v4415_v56 = vsel %vm10527_vm5, %v8379_v45, %v6224_v25  ;;  %v3358_v45 = vld [vmem:[#allocation2 + $0x88] sm:$0xff]  ;;  %v2435_v20 = vadd.f32 %v8588_v3, %v8476_v17  ;;  %v3184_v2 = vpop.f32.mrf.mxu0  ;;  %v6238_v17 = vpop.permute.xlu1 %6237  ;;  %v4478_v42 = vsel %vm10534_vm1, %v4446_v54, %v6234_v7  ;;  %4850 = vmatpush.bf16.msra.mxu2 %v5706_v13 }
 0x2f8   :  { %v4447_v50 = vsel %vm10530_vm7, %v4415_v56, %v6230_v47  ;;  %v6235_v47 = vunpack.i.h.bf16 %v6233_v60  ;;  %v3185_v25 = vadd.f32 %v8740_v59, %v3184_v2  ;;  %v8830_v9 = vpack.i.bf16 %v3359_v43, %v3358_v45  ;;  %vm10532_vm7 = vmmov %vm10531_vm2  ;;  %v5698_v43 = vld [vmem:[%s9786_s3] sm:$0xff] }
 0x2f9   :  { %5504 = vmatmul.msk.bf16.gmra.mxu3 %vm10526_vm15, %v2709_v63  ;;  %v5700_v63 = vld [vmem:[%s9786_s3 + $0x10] sm:$0xff]  ;;  %v4318_v56 = vsel %vm10532_vm7, %v3310_v4, %v6219_v19  ;;  %v6240_v8 = vunpack.i.h.bf16 %v6238_v17  ;;  %v6239_v21 = vunpack.i.l.bf16 %v6238_v17  ;;  %v2522_v45 = vadd.f32 %v8112_v33, %v2433_v26  ;;  %vm10536_vm15 = vmmov %vm10531_vm2 }
 0x2fa   :  { %v2610_v18 = vpop.f32.mrf.mxu2  ;;  %4759 = vmatpush.bf16.msra.mxu1 %v5700_v63  ;;  %v4479_v60 = vsel %vm10533_vm11, %v4447_v50, %v6235_v47  ;;  %v3234_v63 = vmax.f32 %v3185_v25, 0.0  ;;  %6417 = vrot.lane.b32.xlu2 %v8830_v9, %s6897_s26  ;;  %vm10535_vm5 = vcmask 523264   ;;  %v6245_v4 = vunpack.i.h.bf16 %v6243_v53  ;;  %vm10538_vm7 = vmmov %vm10534_vm1 }
 0x2fb   :  { %v4351_v19 = vsel %vm10535_vm5, %v4319_v28, %v6240_v8  ;;  %v6244_v50 = vunpack.i.l.bf16 %v6243_v53  ;;  %v4511_v54 = vpack.c.bf16 %v4479_v60, %v4478_v42  ;;  %6442 = vrot.lane.b32.xlu1 %v6441_v24, %s6898_s27  ;;  %vm10537_vm2 = vmmov %vm10535_vm5  ;;  %v2611_v47 = vadd.f32 %v2610_v18, %v2522_v45  ;;  %v8856_v28 = vld [vmem:[#allocation2 + $0x99] sm:$0xff]  ;;  %v8858_v24 = vld [vmem:[#allocation2 + $0xa1] sm:$0xff] }
 0x2fc   :  { %v8825_v38 = vpop.f32.mrf.mxu1  ;;  %3266 = vst.msk [vmem:[#allocation2 + $0xb8] sm:$0xff] %vm10536_vm15, %v3234_v63  ;;  %v4350_v39 = vsel %vm10537_vm2, %v4318_v56, %v6239_v21  ;;  %v2524_v7 = vadd.f32 %v8132_v22, %v2435_v20  ;;  %vm10539_vm11 = vmmov %vm10534_vm1  ;;  %v3452_v18 = vsel %vm10518_vm13, %v8627_v29, 0.0  ;;  %v6248_v22 = vpop.permute.xlu0 %6247  ;;  %v8868_v53 = vld [vmem:[#allocation2 + $0xa7] sm:$0xff]  ;;  %v8870_v56 = vld [vmem:[#allocation2 + $0xaf] sm:$0xff]  ;;  %vm10542_vm5 = vnez %v10411_v12 }
 0x2fd   :  { %6432 = vrot.lane.b32.xlu0 %v8732_v35, %s6896_s25  ;;  %v4382_v33 = vsel %vm10538_vm7, %v4350_v39, %v6244_v50  ;;  %v4383_v35 = vsel %vm10539_vm11, %v4351_v19, %v6245_v4  ;;  %v6421_v42 = vpack.i.bf16 %v8637_v11, %v3452_v18  ;;  %v6250_v13 = vunpack.i.h.bf16 %v6248_v22  ;;  %4851 = vmatmul.bf16.vlgmr.msra.gmra.mxu2 %v4511_v54  ;;  %v6268_v45 = vpop.permute.xlu2 %6267  ;;  %v8878_v19 = vpop.f32.mrf.mxu3  ;;  %v6760_v18 = vld [vmem:[#allocation2 + $0x28] sm:$0xff]  ;;  %vm10543_vm2 = vmmov %vm10536_vm15 }
 0x2fe   :  { %4760 = vmatpush.bf16.msra.mxu1 %v5699_v27  ;;  %v4510_v2 = vpack.c.bf16 %v4383_v35, %v4382_v33  ;;  %v10540_v27 = vld [vmem:[#allocation39_spill] sm:$0xff]  ;;  %v3526_v8 = vsel %vm10542_vm5, %v8868_v53, 0.0  ;;  %v2681_v4 = vmax.f32 %v2611_v47, 0.0  ;;  %v6249_v11 = vunpack.i.l.bf16 %v6248_v22  ;;  %vm10544_vm7 = vmmov %vm10543_vm2 }
 0x2ff   :  { %vm10541_vm1 = vnez %v10540_v27  ;;  %v3186_v60 = vpop.f32.mrf.mxu0  ;;  %v6466_v39 = vpack.i.bf16 %v8870_v56, %v3526_v8  ;;  %v6269_v47 = vunpack.i.l.bf16 %v6268_v45  ;;  %vm10545_vm11 = vmmov %vm10543_vm2  ;;  %v3360_v8 = vld [vmem:[#allocation2 + $0x98] sm:$0xff]  ;;  %v2448_v27 = vadd.f32 %v8588_v3, %v8632_v34  ;;  %v10585_v34 = vld [vmem:[#allocation28_spill] sm:$0xff] }
 0x300   :  { %v3493_v17 = vsel %vm10541_vm1, %v8858_v24, 0.0  ;;  %v3187_v63 = vadd.f32 %v8740_v59, %v3186_v60  ;;  %v6258_v21 = vpop.permute.xlu1 %6257  ;;  %v2438_v60 = vadd.f32 %v8588_v3, %v8513_v48 }
 0x301   :  { %v6456_v29 = vpack.i.bf16 %v3493_v17, %v8856_v28  ;;  %v6260_v54 = vunpack.i.h.bf16 %v6258_v21  ;;  %v6259_v33 = vunpack.i.l.bf16 %v6258_v21  ;;  %v4416_v17 = vsel %vm10543_vm2, %v6760_v18, %v6249_v11 }
 0x302   :  { %v2612_v26 = vpop.f32.mrf.mxu2  ;;  %4761 = vmatpush.bf16.msra.mxu1 %v5698_v43  ;;  %6422 = vrot.lane.b32.xlu2 %v6421_v42, %s6897_s26  ;;  %v3312_v42 = vsel %vm7036_vm4, %v8422_v1, 0.0  ;;  %vm10548_vm4 = vcmask 785408  }
 0x303   :  { %v2613_v20 = vadd.f32 %v2612_v26, %v2524_v7  ;;  %v3235_v7 = vmax.f32 %v3187_v63, 0.0  ;;  %v6759_v26 = vld [vmem:[#allocation2 + $0x30] sm:$0xff]  ;;  %6467 = vrot.lane.b32.xlu1 %v6466_v39, %s6898_s27  ;;  %v4448_v22 = vsel %vm10546_vm9, %v4416_v17, %v6259_v33  ;;  %v3361_v63 = vld [vmem:[#allocation2 + $0xa0] sm:$0xff] }
 0x304   :  { %v8863_v25 = vpop.f32.mrf.mxu1  ;;  %v4417_v43 = vsel %vm10536_vm15, %v6759_v26, %v6250_v13  ;;  %vm10547_vm15 = vmmov %vm10546_vm9 }
 0x305   :  { %v2682_v50 = vmax.f32 %v2613_v20, 0.0  ;;  %6457 = vrot.lane.b32.xlu0 %v6456_v29, %s6896_s25  ;;  %4762 = vmatmul.bf16.vlgmr.msra.gmra.mxu1 %v4510_v2  ;;  %3267 = vst.msk [vmem:[#allocation2 + $0xc0] sm:$0xff] %vm10544_vm7, %v3235_v7  ;;  %v6270_v20 = vunpack.i.h.bf16 %v6268_v45  ;;  %v4449_v2 = vsel %vm10547_vm15, %v4417_v43, %v6260_v54  ;;  %v3423_v29 = vsel %vm10541_vm1, %v8773_v15, 0.0  ;;  %v6273_v54 = vpop.permute.xlu2 %6272  ;;  %vm10549_vm9 = vmmov %vm10543_vm2 }
 0x306   :  { %v2440_v45 = vadd.f32 %v8588_v3, %v8526_v10  ;;  %v6471_v1 = vpack.i.bf16 %v3423_v29, %v8764_v51  ;;  %v4480_v15 = vsel %vm10548_vm4, %v4448_v22, %v6269_v47  ;;  %vm10550_vm2 = vmmov %vm10548_vm4  ;;  %v2527_v43 = vadd.f32 %v8138_v49, %v2438_v60  ;;  %v8914_v29 = vpop.f32.mrf.mxu3  ;;  %v10554_v60 = vld [vmem:[#allocation27_spill] sm:$0xff] }
 0x307   :  { %v2710_v35 = vpack.c.bf16 %v2682_v50, %v2681_v4  ;;  %v6253_v21 = vpop.permute.xlu0 %6252  ;;  %v3189_v48 = vpop.f32.mrf.mxu0  ;;  %v8902_v50 = vpack.i.bf16 %v3361_v63, %v3360_v8  ;;  %v4481_v26 = vsel %vm10550_vm2, %v4449_v2, %v6270_v20  ;;  %v6275_v17 = vunpack.i.h.bf16 %v6273_v54  ;;  %vm10553_vm4 = vmmov %vm10544_vm7  ;;  %v8923_v8 = vld [vmem:[#allocation2 + $0xa9] sm:$0xff]  ;;  %v8925_v63 = vld [vmem:[#allocation2 + $0xb1] sm:$0xff] }
 0x308   :  { %v6255_v52 = vunpack.i.h.bf16 %v6253_v21  ;;  %v3190_v39 = vadd.f32 %v8740_v59, %v3189_v48  ;;  %v6254_v11 = vunpack.i.l.bf16 %v6253_v21  ;;  %v6263_v7 = vpop.permute.xlu1 %6262  ;;  %v6274_v22 = vunpack.i.l.bf16 %v6273_v54  ;;  %v8927_v21 = vld [vmem:[#allocation2 + $0xb7] sm:$0xff] }
 0x309   :  { %5505 = vmatmul.msk.bf16.gmra.mxu3 %vm10545_vm11, %v2710_v35  ;;  %v6265_v35 = vunpack.i.h.bf16 %v6263_v7  ;;  %v6264_v10 = vunpack.i.l.bf16 %v6263_v7  ;;  %vm10551_vm11 = vmmov %vm10547_vm15  ;;  %v4514_v49 = vpack.c.bf16 %v4481_v26, %v4480_v15  ;;  %v2529_v2 = vadd.f32 %v10554_v60, %v2440_v45  ;;  %v10556_v45 = vld [vmem:[#allocation48_spill] sm:$0xff] }
 0x30a   :  { %v2615_v13 = vpop.f32.mrf.mxu2  ;;  %v4321_v33 = vsel %vm10549_vm9, %v8424_v62, %v6255_v52  ;;  %v3236_v18 = vmax.f32 %v3190_v39, 0.0  ;;  %6447 = vrot.lane.b32.xlu2 %v8902_v50, %s6897_s26  ;;  %v4320_v51 = vsel %vm10544_vm7, %v3312_v42, %v6254_v11  ;;  %vm10552_vm15 = vmmov %vm10551_vm11  ;;  %vm10557_vm7 = vnez %v10556_v45  ;;  %v10570_v45 = vld [vmem:[#allocation20_spill] sm:$0xff] }
 0x30b   :  { %v4352_v62 = vsel %vm10551_vm11, %v4320_v51, %v6264_v10  ;;  %v4353_v47 = vsel %vm10552_vm15, %v4321_v33, %v6265_v35  ;;  %v2616_v20 = vadd.f32 %v2615_v13, %v2527_v43  ;;  %6472 = vrot.lane.b32.xlu1 %v6471_v1, %s6898_s27  ;;  %vm10555_vm9 = vmmov %vm10550_vm2  ;;  %v3495_v11 = vsel %vm10557_vm7, %v8925_v63, 0.0 }
 0x30c   :  { %v8900_v4 = vpop.f32.mrf.mxu1  ;;  %3268 = vst.msk [vmem:[#allocation2 + $0xc8] sm:$0xff] %vm10553_vm4, %v3236_v18  ;;  %v4384_v13 = vsel %vm10555_vm9, %v4352_v62, %v6274_v22  ;;  %v4385_v52 = vsel %vm10550_vm2, %v4353_v47, %v6275_v17  ;;  %v8939_v7 = vld [vmem:[#allocation2 + $0xbf] sm:$0xff]  ;;  %v3528_v15 = vsel %vm10246_vm10, %v8927_v21, 0.0  ;;  %v6486_v10 = vpack.i.bf16 %v3495_v11, %v8923_v8  ;;  %vm10560_vm11 = vmmov %vm10553_vm4 }
 0x30d   :  { %6462 = vrot.lane.b32.xlu0 %v8830_v9, %s6896_s25  ;;  %v3454_v9 = vsel %vm10525_vm0, %v8697_v31, 0.0  ;;  %v2683_v35 = vmax.f32 %v2616_v20, 0.0  ;;  %4856 = vmatmul.bf16.gmra.mxu2 %v4514_v49  ;;  %v6496_v26 = vpack.i.bf16 %v8939_v7, %v3528_v15  ;;  %v4513_v47 = vpack.c.bf16 %v4385_v52, %v4384_v13  ;;  %v10561_v49 = vld [vmem:[#allocation41_spill] sm:$0xff]  ;;  %vm10562_vm15 = vmmov %vm10553_vm4  ;;  %v10563_v13 = vld [vmem:[#allocation66_spill] sm:$0xff] }
 0x30e   :  { %v6451_v31 = vpack.i.bf16 %v8699_v6, %v3454_v9  ;;  %v10559_v6 = vld [vmem:[#allocation51_spill] sm:$0xff]  ;;  %v2443_v52 = vadd.f32 %v8588_v3, %v10563_v13  ;;  %vm10564_vm9 = vmmov %vm10553_vm4  ;;  %vm10565_vm2 = vcmask 523264  }
 0x30f   :  { %v6278_v48 = vpop.permute.xlu0 %6277  ;;  %v3191_v33 = vpop.f32.mrf.mxu0 }
 0x310   :  { %v3192_v43 = vadd.f32 %v8740_v59, %v3191_v33  ;;  %v6280_v17 = vunpack.i.h.bf16 %v6278_v48  ;;  %v6279_v62 = vunpack.i.l.bf16 %v6278_v48  ;;  %v6298_v11 = vpop.permute.xlu2 %6297  ;;  %v8956_v48 = vpop.f32.mrf.mxu3 }
 0x311   :  { %v6288_v18 = vpop.permute.xlu1 %6287 }
 0x312   :  { %v2617_v42 = vpop.f32.mrf.mxu2  ;;  %v3237_v22 = vmax.f32 %v3192_v43, 0.0  ;;  %6452 = vrot.lane.b32.xlu2 %v6451_v31, %s6897_s26  ;;  %v6290_v60 = vunpack.i.h.bf16 %v6288_v18  ;;  %v4419_v20 = vsel %vm10560_vm11, %v10559_v6, %v6280_v17  ;;  %v4418_v9 = vsel %vm10562_vm15, %v10561_v49, %v6279_v62  ;;  %vm10566_vm11 = vmmov %vm10565_vm2  ;;  %v3363_v43 = vld [vmem:[#allocation2 + $0xb0] sm:$0xff] }
 0x313   :  { %v2618_v1 = vadd.f32 %v2617_v42, %v2529_v2  ;;  %v6289_v2 = vunpack.i.l.bf16 %v6288_v18  ;;  %6497 = vrot.lane.b32.xlu1 %v6496_v26, %s6898_s27  ;;  %v3362_v26 = vld [vmem:[#allocation2 + $0xa8] sm:$0xff]  ;;  %vm10568_vm15 = vmmov %vm10553_vm4 }
 0x314   :  { %v8934_v39 = vpop.f32.mrf.mxu1  ;;  %3269 = vst.msk [vmem:[#allocation2 + $0xd0] sm:$0xff] %vm10553_vm4, %v3237_v22  ;;  %v4451_v31 = vsel %vm10566_vm11, %v4419_v20, %v6290_v60  ;;  %v8968_v62 = vpack.i.bf16 %v3363_v43, %v3362_v26  ;;  %v2445_v60 = vadd.f32 %v8588_v3, %v8597_v5  ;;  %vm10569_vm4 = vcmask 785408   ;;  %vm10573_vm11 = vmmov %vm10565_vm2 }
 0x315   :  { %v2684_v51 = vmax.f32 %v2618_v1, 0.0  ;;  %6487 = vrot.lane.b32.xlu0 %v6486_v10, %s6896_s25  ;;  %4767 = vmatmul.bf16.gmra.mxu1 %v4513_v47  ;;  %v6299_v1 = vunpack.i.l.bf16 %v6298_v11  ;;  %v4450_v33 = vsel %vm10565_vm2, %v4418_v9, %v6289_v2  ;;  %v3425_v10 = vsel %vm10557_vm7, %v8858_v24, 0.0  ;;  %v6761_v47 = vld [vmem:[#allocation2 + $0x27] sm:$0xff]  ;;  %v6762_v9 = vld [vmem:[#allocation2 + $0x2f] sm:$0xff] }
 0x316   :  { %v6501_v6 = vpack.i.bf16 %v3425_v10, %v8856_v28  ;;  %v2532_v22 = vadd.f32 %v10570_v45, %v2443_v52 }
 0x317   :  { %v2711_v42 = vpack.c.bf16 %v2684_v51, %v2683_v35  ;;  %v6300_v35 = vunpack.i.h.bf16 %v6298_v11  ;;  %v6283_v18 = vpop.permute.xlu0 %6282  ;;  %v3194_v17 = vpop.f32.mrf.mxu0  ;;  %v4482_v43 = vsel %vm10569_vm4, %v4450_v33, %v6299_v1  ;;  %v10575_v33 = vld [vmem:[#allocation18_spill] sm:$0xff] }
 0x318   :  { %v6285_v2 = vunpack.i.h.bf16 %v6283_v18  ;;  %v3195_v24 = vadd.f32 %v8740_v59, %v3194_v17  ;;  %v6284_v20 = vunpack.i.l.bf16 %v6283_v18  ;;  %v6303_v17 = vpop.permute.xlu2 %6302 }
 0x319   :  { %5506 = vmatmul.msk.bf16.gmra.mxu3 %vm10564_vm9, %v2711_v42  ;;  %v3314_v42 = vsel %vm7067_vm6, %v6761_v47, 0.0  ;;  %v6293_v49 = vpop.permute.xlu1 %6292  ;;  %vm10571_vm6 = vmmov %vm10564_vm9  ;;  %v6305_v45 = vunpack.i.h.bf16 %v6303_v17  ;;  %v6304_v52 = vunpack.i.l.bf16 %v6303_v17 }
 0x31a   :  { %v2620_v15 = vpop.f32.mrf.mxu2  ;;  %v4323_v11 = vsel %vm10568_vm15, %v6762_v9, %v6285_v2  ;;  %v6295_v13 = vunpack.i.h.bf16 %v6293_v49  ;;  %v6294_v26 = vunpack.i.l.bf16 %v6293_v49  ;;  %v3238_v47 = vmax.f32 %v3195_v24, 0.0  ;;  %6477 = vrot.lane.b32.xlu2 %v8968_v62, %s6897_s26  ;;  %vm10572_vm9 = vmmov %vm10569_vm4  ;;  %v8994_v24 = vld [vmem:[#allocation2 + $0xc1] sm:$0xff] }
 0x31b   :  { %v4322_v5 = vsel %vm10571_vm6, %v3314_v42, %v6284_v20  ;;  %v4483_v28 = vsel %vm10572_vm9, %v4451_v31, %v6300_v35  ;;  %v2621_v2 = vadd.f32 %v2620_v15, %v2532_v22  ;;  %6502 = vrot.lane.b32.xlu1 %v6501_v6, %s6898_s27  ;;  %vm10574_vm15 = vmmov %vm10571_vm6  ;;  %v2534_v42 = vadd.f32 %v10575_v33, %v2445_v60  ;;  %v8996_v20 = vld [vmem:[#allocation2 + $0xc7] sm:$0xff] }
 0x31c   :  { %v8966_v51 = vpop.f32.mrf.mxu1  ;;  %v4354_v10 = vsel %vm10565_vm2, %v4322_v5, %v6294_v26  ;;  %v4355_v18 = vsel %vm10573_vm11, %v4323_v11, %v6295_v13  ;;  %3270 = vst.msk [vmem:[#allocation2 + $0xd8] sm:$0xff] %vm10574_vm15, %v3238_v47  ;;  %v4517_v1 = vpack.c.bf16 %v4483_v28, %v4482_v43  ;;  %v2450_v31 = vadd.f32 %v8588_v3, %v8658_v23  ;;  %vm10576_vm6 = vmmov %vm10569_vm4  ;;  %v10577_v23 = vld [vmem:[#allocation57_spill] sm:$0xff]  ;;  %v9014_v47 = vpop.f32.mrf.mxu3  ;;  %v10626_v26 = vld [vmem:[#allocation38_spill] sm:$0xff] }
 0x31d   :  { %6492 = vrot.lane.b32.xlu0 %v8902_v50, %s6896_s25  ;;  %v8992_v50 = vld [vmem:[#allocation2 + $0xb9] sm:$0xff]  ;;  %v3456_v15 = vsel %vm10542_vm5, %v8776_v41, 0.0  ;;  %v4386_v6 = vsel %vm10569_vm4, %v4354_v10, %v6304_v52  ;;  %v4387_v49 = vsel %vm10576_vm6, %v4355_v18, %v6305_v45  ;;  %vm10578_vm9 = vnez %v10577_v23  ;;  %v9008_v13 = vld [vmem:[#allocation2 + $0xcf] sm:$0xff]  ;;  %vm10581_vm2 = vmmov %vm10574_vm15 }
 0x31e   :  { %v3497_v11 = vsel %vm10578_vm9, %v8994_v24, 0.0  ;;  %v3530_v43 = vsel %vm10438_vm3, %v8996_v20, 0.0  ;;  %v6481_v41 = vpack.i.bf16 %v8782_v46, %v3456_v15  ;;  %v2685_v5 = vmax.f32 %v2621_v2, 0.0  ;;  %4861 = vmatmul.bf16.gmra.mxu2 %v4517_v1  ;;  %vm10583_vm11 = vmmov %vm10581_vm2 }
 0x31f   :  { %v3196_v22 = vpop.f32.mrf.mxu0  ;;  %v6516_v28 = vpack.i.bf16 %v3497_v11, %v8992_v50  ;;  %v6526_v10 = vpack.i.bf16 %v9008_v13, %v3530_v43  ;;  %v6308_v17 = vpop.permute.xlu0 %6307  ;;  %v10580_v11 = vld [vmem:[#allocation59_spill] sm:$0xff]  ;;  %vm10584_vm15 = vmmov %vm10581_vm2  ;;  %vm10587_vm6 = vcmask 523264  }
 0x320   :  { %v3197_v18 = vadd.f32 %v8740_v59, %v3196_v22  ;;  %v6310_v52 = vunpack.i.h.bf16 %v6308_v17  ;;  %v6309_v33 = vunpack.i.l.bf16 %v6308_v17  ;;  %v10582_v22 = vld [vmem:[#allocation46_spill] sm:$0xff]  ;;  %vm10586_vm4 = vmmov %vm10581_vm2  ;;  %v3427_v17 = vsel %vm10578_vm9, %v8925_v63, 0.0 }
 0x321   :  { %vm10588_vm7 = vmmov %vm10587_vm6 }
 0x322   :  { %v2622_v35 = vpop.f32.mrf.mxu2  ;;  %v3239_v46 = vmax.f32 %v3197_v18, 0.0  ;;  %6482 = vrot.lane.b32.xlu2 %v6481_v41, %s6897_s26  ;;  %v4421_v43 = vsel %vm10581_vm2, %v10580_v11, %v6310_v52  ;;  %v3365_v52 = vld [vmem:[#allocation2 + $0xc0] sm:$0xff] }
 0x323   :  { %v2623_v9 = vadd.f32 %v2622_v35, %v2534_v42  ;;  %v4516_v42 = vpack.c.bf16 %v4387_v49, %v4386_v6  ;;  %v6318_v35 = vpop.permute.xlu1 %6317  ;;  %6527 = vrot.lane.b32.xlu1 %v6526_v10, %s6898_s27  ;;  %v2539_v49 = vadd.f32 %v10585_v34, %v2450_v31  ;;  %v6531_v31 = vpack.i.bf16 %v3427_v17, %v8923_v8  ;;  %v10593_v8 = vld [vmem:[#allocation42_spill] sm:$0xff] }
 0x324   :  { %v9003_v60 = vpop.f32.mrf.mxu1  ;;  %v6320_v2 = vunpack.i.h.bf16 %v6318_v35  ;;  %v6319_v1 = vunpack.i.l.bf16 %v6318_v35  ;;  %v6328_v6 = vpop.permute.xlu2 %6327  ;;  %3271 = vst.msk [vmem:[#allocation2 + $0xe0] sm:$0xff] %vm10584_vm15, %v3239_v46  ;;  %vm10596_vm15 = vmmov %vm10586_vm4 }
 0x325   :  { %v2686_v45 = vmax.f32 %v2623_v9, 0.0  ;;  %6517 = vrot.lane.b32.xlu0 %v6516_v28, %s6896_s25  ;;  %v4420_v9 = vsel %vm10583_vm11, %v10582_v22, %v6309_v33  ;;  %4772 = vmatmul.bf16.gmra.mxu1 %v4516_v42  ;;  %v6330_v41 = vunpack.i.h.bf16 %v6328_v6  ;;  %v10589_v33 = vld [vmem:[#allocation26_spill] sm:$0xff]  ;;  %v9046_v63 = vpop.f32.mrf.mxu3  ;;  %vm10594_vm11 = vmmov %vm10586_vm4 }
 0x326   :  { %v4452_v28 = vsel %vm10587_vm6, %v4420_v9, %v6319_v1  ;;  %v4453_v18 = vsel %vm10588_vm7, %v4421_v43, %v6320_v2  ;;  %v2537_v10 = vadd.f32 %v10589_v33, %v2448_v27  ;;  %vm10591_vm7 = vcmask 785408   ;;  %v6763_v27 = vld [vmem:[#allocation2 + $0x37] sm:$0xff] }
 0x327   :  { %v2712_v15 = vpack.c.bf16 %v2686_v45, %v2685_v5  ;;  %v6329_v5 = vunpack.i.l.bf16 %v6328_v6  ;;  %v3364_v45 = vld [vmem:[#allocation2 + $0xb8] sm:$0xff]  ;;  %v3199_v46 = vpop.f32.mrf.mxu0  ;;  %vm10592_vm2 = vmmov %vm10591_vm7  ;;  %v3316_v22 = vsel %vm10181_vm12, %v6763_v27, 0.0  ;;  %v6313_v9 = vpop.permute.xlu0 %6312  ;;  %v9063_v27 = vld [vmem:[#allocation2 + $0xc9] sm:$0xff] }
 0x328   :  { %v9039_v35 = vpack.i.bf16 %v3365_v52, %v3364_v45  ;;  %v3200_v1 = vadd.f32 %v8740_v59, %v3199_v46  ;;  %v4485_v43 = vsel %vm10592_vm2, %v4453_v18, %v6330_v41  ;;  %v2626_v6 = vadd.f32 %v10593_v8, %v2537_v10  ;;  %vm10595_vm12 = vmmov %vm10586_vm4 }
 0x329   :  { %5507 = vmatmul.msk.bf16.gmra.mxu3 %vm10586_vm4, %v2712_v15  ;;  %v10590_v15 = vld [vmem:[#allocation35_spill] sm:$0xff]  ;;  %v4484_v2 = vsel %vm10591_vm7, %v4452_v28, %v6329_v5  ;;  %v6314_v5 = vunpack.i.l.bf16 %v6313_v9  ;;  %vm10597_vm4 = vmmov %vm10587_vm6 }
 0x32a   :  { %v2628_v11 = vadd.f32 %v10590_v15, %v2539_v49  ;;  %6507 = vrot.lane.b32.xlu2 %v9039_v35, %s6897_s26  ;;  %v3240_v34 = vmax.f32 %v3200_v1, 0.0  ;;  %v6315_v49 = vunpack.i.h.bf16 %v6313_v9  ;;  %v4520_v52 = vpack.c.bf16 %v4485_v43, %v4484_v2  ;;  %vm10598_vm6 = vmmov %vm10597_vm4  ;;  %v9065_v9 = vld [vmem:[#allocation2 + $0xd1] sm:$0xff] }
 0x32b   :  { %v6323_v28 = vpop.permute.xlu1 %6322  ;;  %6532 = vrot.lane.b32.xlu1 %v6531_v31, %s6898_s27  ;;  %v4324_v46 = vsel %vm10596_vm15, %v3316_v22, %v6314_v5  ;;  %v2453_v15 = vadd.f32 %v8588_v3, %v8693_v30  ;;  %v3458_v2 = vsel %vm10246_vm10, %v8868_v53, 0.0  ;;  %v10599_v22 = vld [vmem:[#allocation65_spill] sm:$0xff]  ;;  %v9077_v30 = vld [vmem:[#allocation2 + $0xdf] sm:$0xff]  ;;  %vm10606_vm15 = vmmov %vm10595_vm12 }
 0x32c   :  { %v9037_v42 = vpop.f32.mrf.mxu1  ;;  %v6333_v41 = vpop.permute.xlu2 %6332  ;;  %v6325_v18 = vunpack.i.h.bf16 %v6323_v28  ;;  %v6324_v17 = vunpack.i.l.bf16 %v6323_v28  ;;  %v2688_v33 = vmax.f32 %v2628_v11, 0.0  ;;  %3272 = vst.msk [vmem:[#allocation2 + $0xe8] sm:$0xff] %vm10594_vm11, %v3240_v34  ;;  %v4325_v10 = vsel %vm10595_vm12, %v6764_v55, %v6315_v49  ;;  %v9067_v11 = vld [vmem:[#allocation2 + $0xd7] sm:$0xff]  ;;  %v9087_v53 = vld [vmem:[%s9787_s4] ss:$0 sm:$0xff]  ;;  %vm10602_vm11 = vmmov %vm10592_vm2 }
 0x32d   :  { %6522 = vrot.lane.b32.xlu0 %v8968_v62, %s6896_s25  ;;  %v6335_v45 = vunpack.i.h.bf16 %v6333_v41  ;;  %v6334_v62 = vunpack.i.l.bf16 %v6333_v41  ;;  %vm10600_vm7 = vnez %v10599_v22  ;;  %v3532_v34 = vsel %vm10271_vm14, %v9067_v11, 0.0 }
 0x32e   :  { %v4356_v1 = vsel %vm10597_vm4, %v4324_v46, %v6324_v17  ;;  %v4357_v31 = vsel %vm10598_vm6, %v4325_v10, %v6325_v18  ;;  %v3499_v3 = vsel %vm10600_vm7, %v9065_v9, 0.0  ;;  %v6511_v49 = vpack.i.bf16 %v8870_v56, %v3458_v2  ;;  %4866 = vmatmul.bf16.gmra.mxu2 %v4520_v52  ;;  %v9097_v52 = vpop.f32.mrf.mxu3  ;;  %v10604_v2 = vld [vmem:[#allocation21_spill] sm:$0xff]  ;;  %vm10607_vm4 = vmmov %vm10595_vm12 }
 0x32f   :  { %v4388_v5 = vsel %vm10592_vm2, %v4356_v1, %v6334_v62  ;;  %v2455_v28 = vadd.f32 %v9087_v53, %v8729_v14  ;;  %v6546_v41 = vpack.i.bf16 %v3499_v3, %v9063_v27  ;;  %v6556_v18 = vpack.i.bf16 %v9077_v30, %v3532_v34  ;;  %v3201_v17 = vpop.f32.mrf.mxu0  ;;  %10603 = vst [vmem:[#allocation71_spill] sm:$0xff] %v9097_v52  ;;  %v10605_v34 = vld [vmem:[#allocation23_spill] sm:$0xff]  ;;  %vm10608_vm6 = vmmov %vm10607_vm4 }
 0x330   :  { %v4389_v55 = vsel %vm10602_vm11, %v4357_v31, %v6335_v45  ;;  %v2687_v10 = vmax.f32 %v2626_v6, 0.0  ;;  %v3202_v56 = vadd.f32 %v8740_v59, %v3201_v17  ;;  %v2542_v3 = vadd.f32 %v10604_v2, %v2453_v15  ;;  %v5714_v15 = vld [vmem:[%s9786_s3 + $0x80] sm:$0xff]  ;;  %v10609_v2 = vld [vmem:[#allocation52_spill] sm:$0xff] }
 0x331   :  { %v4519_v46 = vpack.c.bf16 %v4389_v55, %v4388_v5  ;;  %v2544_v23 = vadd.f32 %v10605_v34, %v2455_v28  ;;  %v3366_v55 = vld [vmem:[#allocation2 + $0xc8] sm:$0xff]  ;;  %vm10610_vm2 = vcmask 523264   ;;  %4939 = vmatpush.bf16.msra.mxu3 %v5714_v15 }
 0x332   :  { %6512 = vrot.lane.b32.xlu2 %v6511_v49, %s6897_s26  ;;  %v2713_v62 = vpack.c.bf16 %v2688_v33, %v2687_v10  ;;  %v3241_v1 = vmax.f32 %v3202_v56, 0.0  ;;  %v3367_v10 = vld [vmem:[#allocation2 + $0xd0] sm:$0xff]  ;;  %v2631_v34 = vadd.f32 %v10609_v2, %v2542_v3  ;;  %vm10611_vm11 = vmmov %vm10610_vm2 }
 0x333   :  { %6557 = vrot.lane.b32.xlu1 %v6556_v18, %s6898_s27  ;;  %v6338_v6 = vpop.permute.xlu0 %6337  ;;  %v6348_v31 = vpop.permute.xlu1 %6347  ;;  %v6766_v18 = vld [vmem:[#allocation2 + $0x60] sm:$0xff] }
 0x334   :  { %v9072_v43 = vpop.f32.mrf.mxu1  ;;  %v6358_v14 = vpop.permute.xlu2 %6357  ;;  %3273 = vst.msk [vmem:[#allocation2 + $0xf0] sm:$0xff] %vm10606_vm15, %v3241_v1  ;;  %v6340_v45 = vunpack.i.h.bf16 %v6338_v6  ;;  %v6339_v33 = vunpack.i.l.bf16 %v6338_v6  ;;  %v6349_v17 = vunpack.i.l.bf16 %v6348_v31  ;;  %v3429_v1 = vsel %vm10600_vm7, %v8994_v24, 0.0  ;;  %v9138_v36 = vld [vmem:[#allocation2 + $0xe1] sm:$0xff] }
 0x335   :  { %6547 = vrot.lane.b32.xlu0 %v6546_v41, %s6896_s25  ;;  %4777 = vmatmul.bf16.gmra.mxu1 %v4519_v46  ;;  %v6360_v49 = vunpack.i.h.bf16 %v6358_v14  ;;  %v6359_v5 = vunpack.i.l.bf16 %v6358_v14  ;;  %v6350_v41 = vunpack.i.h.bf16 %v6348_v31  ;;  %v6767_v46 = vld [vmem:[#allocation2 + $0x58] sm:$0xff]  ;;  %v9114_v14 = vpack.i.bf16 %v3367_v10, %v3366_v55 }
 0x336   :  { %v4423_v56 = vsel %vm10607_vm4, %v6766_v18, %v6340_v45  ;;  %v6561_v44 = vpack.i.bf16 %v3429_v1, %v8992_v50  ;;  %v10612_v45 = vld [vmem:[#allocation56_spill] sm:$0xff]  ;;  %vm10668_vm7 = vcmask 785408  }
 0x337   :  { %v4455_v31 = vsel %vm10611_vm11, %v4423_v56, %v6350_v41  ;;  %v3204_v52 = vpop.f32.mrf.mxu0  ;;  %v2633_v18 = vadd.f32 %v10612_v45, %v2544_v23  ;;  %v6768_v50 = vld [vmem:[#allocation2 + $0x47] sm:$0xff] }
 0x338   :  { %v3318_v23 = vsel %vm10492_vm8, %v6768_v50, 0.0  ;;  %vm10616_vm8 = vmmov %vm10607_vm4 }
 0x339   :  { %5508 = vmatmul.msk.bf16.gmra.mxu3 %vm10595_vm12, %v2713_v62  ;;  %v4422_v62 = vsel %vm10608_vm6, %v6767_v46, %v6339_v33  ;;  %v3205_v33 = vadd.f32 %v8740_v59, %v3204_v52  ;;  %vm10613_vm12 = vcmask 785408   ;;  %vm10617_vm6 = vmmov %vm10607_vm4 }
 0x33a   :  { %v4454_v6 = vsel %vm10610_vm2, %v4422_v62, %v6349_v17  ;;  %vm10614_vm15 = vmmov %vm10613_vm12  ;;  %6537 = vrot.lane.b32.xlu2 %v9114_v14, %s6897_s26  ;;  %v2689_v17 = vmax.f32 %v2631_v34, 0.0  ;;  %v9132_v62 = vpop.f32.mrf.mxu3  ;;  %v9136_v34 = vld [vmem:[#allocation2 + $0xd9] sm:$0xff] }
 0x33b   :  { %v4486_v46 = vsel %vm10613_vm12, %v4454_v6, %v6359_v5  ;;  %v4487_v24 = vsel %vm10614_vm15, %v4455_v31, %v6360_v49  ;;  %v3242_v3 = vmax.f32 %v3205_v33, 0.0  ;;  %6562 = vrot.lane.b32.xlu1 %v6561_v44, %s6898_s27  ;;  %v6343_v52 = vpop.permute.xlu0 %6342  ;;  %v2690_v5 = vmax.f32 %v2633_v18, 0.0  ;;  %v6353_v15 = vpop.permute.xlu1 %6352  ;;  %10615 = vst [vmem:[#allocation53_spill] sm:$0xff] %v9132_v62  ;;  %v6769_v31 = vld [vmem:[#allocation2 + $0x4f] sm:$0xff]  ;;  %v10618_v33 = vld [vmem:[#allocation70_spill] sm:$0xff]  ;;  %vm10620_vm12 = vmmov %vm10611_vm11 }
 0x33c   :  { %v9107_v28 = vpop.f32.mrf.mxu1  ;;  %v6363_v41 = vpop.permute.xlu2 %6362  ;;  %v4523_v55 = vpack.c.bf16 %v4487_v24, %v4486_v46  ;;  %v6345_v49 = vunpack.i.h.bf16 %v6343_v52  ;;  %v6344_v10 = vunpack.i.l.bf16 %v6343_v52  ;;  %v6355_v1 = vunpack.i.h.bf16 %v6353_v15  ;;  %v9147_v24 = vld [vmem:[#allocation2 + $0xe7] sm:$0xff]  ;;  %v10624_v62 = vld [vmem:[#allocation25_spill] sm:$0xff] }
 0x33d   :  { %6552 = vrot.lane.b32.xlu0 %v9039_v35, %s6896_s25  ;;  %3274 = vst.msk [vmem:[#allocation2 + $0xf8] sm:$0xff] %vm10607_vm4, %v3242_v3  ;;  %v6364_v56 = vunpack.i.l.bf16 %v6363_v41  ;;  %v2458_v35 = vadd.f32 %v9087_v53, %v8771_v61  ;;  %v6354_v44 = vunpack.i.l.bf16 %v6353_v15  ;;  %v6365_v2 = vunpack.i.h.bf16 %v6363_v41  ;;  %v9149_v61 = vld [vmem:[#allocation2 + $0xef] sm:$0xff] }
 0x33e   :  { %v4327_v45 = vsel %vm10616_vm8, %v6769_v31, %v6345_v49  ;;  %v4326_v18 = vsel %vm10617_vm6, %v3318_v23, %v6344_v10  ;;  %vm10619_vm2 = vnez %v10618_v33  ;;  %v3460_v3 = vsel %vm10438_vm3, %v8927_v21, 0.0  ;;  %4871 = vmatmul.bf16.gmra.mxu2 %v4523_v55  ;;  %v10621_v10 = vld [vmem:[#allocation74_spill] sm:$0xff] }
 0x33f   :  { %v3501_v46 = vsel %vm10619_vm2, %v9138_v36, 0.0  ;;  %v2460_v41 = vadd.f32 %v9087_v53, %v8825_v38  ;;  %v4358_v50 = vsel %vm10611_vm11, %v4326_v18, %v6354_v44  ;;  %v4359_v52 = vsel %vm10620_vm12, %v4327_v45, %v6355_v1  ;;  %v3206_v49 = vpop.f32.mrf.mxu0  ;;  %vm10627_vm11 = vmmov %vm10617_vm6 }
 0x340   :  { %v6576_v23 = vpack.i.bf16 %v3501_v46, %v9136_v34  ;;  %vm10622_vm15 = vnez %v10621_v10  ;;  %v3207_v31 = vadd.f32 %v8740_v59, %v3206_v49  ;;  %v6541_v22 = vpack.i.bf16 %v8939_v7, %v3460_v3  ;;  %vm10629_vm12 = vmmov %vm10617_vm6 }
 0x341   :  { %v3534_v15 = vsel %vm10622_vm15, %v9147_v24, 0.0  ;;  %vm10623_vm4 = vcmask 785408   ;;  %v2547_v38 = vadd.f32 %v10624_v62, %v2458_v35  ;;  %v2714_v55 = vpack.c.bf16 %v2690_v5, %v2689_v17 }
 0x342   :  { %v4390_v21 = vsel %vm10623_vm4, %v4358_v50, %v6364_v56  ;;  %v6586_v44 = vpack.i.bf16 %v9149_v61, %v3534_v15  ;;  %vm10625_vm8 = vmmov %vm10623_vm4  ;;  %v3243_v45 = vmax.f32 %v3207_v31, 0.0  ;;  %6542 = vrot.lane.b32.xlu2 %v6541_v22, %s6897_s26  ;;  %v2549_v49 = vadd.f32 %v10626_v26, %v2460_v41  ;;  %v9177_v22 = vpop.f32.mrf.mxu3  ;;  %v6771_v15 = vld [vmem:[#allocation2 + $0x68] sm:$0xff] }
 0x343   :  { %v4391_v1 = vsel %vm10625_vm8, %v4359_v52, %v6365_v2  ;;  %v6368_v7 = vpop.permute.xlu0 %6367  ;;  %v6378_v17 = vpop.permute.xlu1 %6377  ;;  %v10628_v2 = vld [vmem:[#allocation61_spill] sm:$0xff]  ;;  %vm10630_vm4 = vmmov %vm10617_vm6  ;;  %vm10632_vm8 = vcmask 523264   ;;  %v3464_v57 = vsel %vm10622_vm15, %v9067_v11, 0.0 }
 0x344   :  { %v9140_v6 = vpop.f32.mrf.mxu1  ;;  %v4522_v18 = vpack.c.bf16 %v4391_v1, %v4390_v21  ;;  %v6388_v46 = vpop.permute.xlu2 %6387  ;;  %6587 = vrot.lane.b32.xlu1 %v6586_v44, %s6898_s27  ;;  %3275 = vst.msk [vmem:[#allocation2 + $0x100] sm:$0xff] %vm10627_vm11, %v3243_v45  ;;  %v6370_v56 = vunpack.i.h.bf16 %v6368_v7  ;;  %v6369_v62 = vunpack.i.l.bf16 %v6368_v7  ;;  %v9175_v3 = vadd.f32 %v10628_v2, %v2547_v38  ;;  %v6770_v52 = vld [vmem:[#allocation2 + $0x70] sm:$0xff]  ;;  %v3368_v44 = vld [vmem:[#allocation2 + $0xd8] sm:$0xff]  ;;  %v3369_v1 = vld [vmem:[#allocation2 + $0xe0] sm:$0xff] }
 0x345   :  { %6577 = vrot.lane.b32.xlu0 %v6576_v23, %s6896_s25  ;;  %v6390_v5 = vunpack.i.h.bf16 %v6388_v46  ;;  %v6389_v35 = vunpack.i.l.bf16 %v6388_v46  ;;  %v6380_v50 = vunpack.i.h.bf16 %v6378_v17  ;;  %v6379_v26 = vunpack.i.l.bf16 %v6378_v17  ;;  %v10631_v38 = vld [vmem:[#allocation60_spill] sm:$0xff] }
 0x346   :  { %4782 = vmatmul.bf16.gmra.mxu1 %v4522_v18  ;;  %v4425_v23 = vsel %vm10629_vm12, %v6770_v52, %v6370_v56  ;;  %v4424_v31 = vsel %vm10630_vm4, %v6771_v15, %v6369_v62  ;;  %v3431_v21 = vsel %vm10619_vm2, %v9065_v9, 0.0  ;;  %v9191_v17 = vpack.i.bf16 %v3369_v1, %v3368_v44  ;;  %v9211_v1 = vld [vmem:[#allocation2 + $0xe9] sm:$0xff] }
 0x347   :  { %v4456_v45 = vsel %vm10632_vm8, %v4424_v31, %v6379_v26  ;;  %v6591_v46 = vpack.i.bf16 %v3431_v21, %v9063_v27  ;;  %v3209_v7 = vpop.f32.mrf.mxu0  ;;  %vm10634_vm11 = vcmask 785408   ;;  %v2463_v27 = vadd.f32 %v9087_v53, %v8863_v25 }
 0x348   :  { %v3210_v56 = vadd.f32 %v8740_v59, %v3209_v7  ;;  %v4488_v62 = vsel %vm10634_vm11, %v4456_v45, %v6389_v35  ;;  %vm10635_vm12 = vmmov %vm10634_vm11  ;;  %v6772_v59 = vld [vmem:[#allocation2 + $0x57] sm:$0xff]  ;;  %vm10636_vm4 = vnez %v10033_v32  ;;  %v5717_v32 = vld [vmem:[%s9788_s5 + $0x8] sm:$0xff]  ;;  %vm10658_vm2 = vcmask 785408  }
 0x349   :  { %5509 = vmatmul.msk.bf16.gmra.mxu3 %vm10617_vm6, %v2714_v55  ;;  %v2638_v55 = vadd.f32 %v10631_v38, %v2549_v49  ;;  %vm10633_vm6 = vmmov %vm10632_vm8  ;;  %v3320_v35 = vsel %vm10636_vm4, %v6772_v59, 0.0  ;;  %vm10637_vm8 = vcmask 261120   ;;  %v9213_v38 = vld [vmem:[#allocation2 + $0xf1] sm:$0xff]  ;;  %vm10643_vm4 = vcmask 523264   ;;  %5143 = vmatpush.bf16.msra.mxu0 %v5717_v32  ;;  %v10649_v32 = vld [vmem:[#allocation24_spill] sm:$0xff] }
 0x34a   :  { %v4457_v18 = vsel %vm10633_vm6, %v4425_v23, %v6380_v50  ;;  %v3244_v9 = vmax.f32 %v3210_v56, 0.0  ;;  %6567 = vrot.lane.b32.xlu2 %v9191_v17, %s6897_s26  ;;  %v2691_v50 = vmax.f32 %v9175_v3, 0.0  ;;  %vm10638_vm6 = vmmov %vm10637_vm8  ;;  %v9222_v56 = vld [vmem:[#allocation2 + $0xf7] sm:$0xff]  ;;  %v9230_v59 = vpop.f32.mrf.mxu3 }
 0x34b   :  { %v4489_v2 = vsel %vm10635_vm12, %v4457_v18, %v6390_v5  ;;  %v6373_v5 = vpop.permute.xlu0 %6372  ;;  %v2692_v52 = vmax.f32 %v2638_v55, 0.0  ;;  %vm10639_vm11 = vmmov %vm10638_vm6 }
 0x34c   :  { %v9179_v41 = vpop.f32.mrf.mxu1  ;;  %v6393_v49 = vpop.permute.xlu2 %6392  ;;  %6592 = vrot.lane.b32.xlu1 %v6591_v46, %s6898_s27  ;;  %v4526_v26 = vpack.c.bf16 %v4489_v2, %v4488_v62  ;;  %3276 = vst.msk [vmem:[#allocation2 + $0x108] sm:$0xff] %vm10637_vm8, %v3244_v9  ;;  %v6375_v23 = vunpack.i.h.bf16 %v6373_v5  ;;  %v6374_v15 = vunpack.i.l.bf16 %v6373_v5  ;;  %v10640_v46 = vld [vmem:[#allocation75_spill] sm:$0xff]  ;;  %v3462_v2 = vsel %vm10271_vm14, %v8996_v20, 0.0  ;;  %v10642_v9 = vld [vmem:[#allocation29_spill] sm:$0xff]  ;;  %vm10644_vm8 = vmmov %vm10643_vm4 }
 0x34d   :  { %6582 = vrot.lane.b32.xlu0 %v9114_v14, %s6896_s25  ;;  %v2465_v14 = vadd.f32 %v9087_v53, %v8900_v4  ;;  %v6383_v3 = vpop.permute.xlu1 %6382  ;;  %v6395_v25 = vunpack.i.h.bf16 %v6393_v49  ;;  %v6394_v44 = vunpack.i.l.bf16 %v6393_v49  ;;  %v6773_v4 = vld [vmem:[#allocation2 + $0x5f] sm:$0xff]  ;;  %vm10641_vm12 = vnez %v10640_v46 }
 0x34e   :  { %v6385_v31 = vunpack.i.h.bf16 %v6383_v3  ;;  %v6384_v21 = vunpack.i.l.bf16 %v6383_v3  ;;  %v4329_v45 = vsel %vm10638_vm6, %v6773_v4, %v6375_v23  ;;  %v4328_v18 = vsel %vm10639_vm11, %v3320_v35, %v6374_v15  ;;  %v9224_v62 = vld [vmem:[#allocation2 + $0xff] sm:$0xff]  ;;  %4876 = vmatmul.bf16.gmra.mxu2 %v4526_v26 }
 0x34f   :  { %v3503_v7 = vsel %vm10641_vm12, %v9213_v38, 0.0  ;;  %v2552_v49 = vadd.f32 %v10642_v9, %v2463_v27  ;;  %v10645_v23 = vld [vmem:[#allocation78_spill] sm:$0xff]  ;;  %v3211_v3 = vpop.f32.mrf.mxu0  ;;  %v6774_v20 = vld [vmem:[%s9785_s2] ss:$0 sm:$0xff]  ;;  %vm10647_vm11 = vcmask 785408  }
 0x350   :  { %v4360_v5 = vsel %vm10643_vm4, %v4328_v18, %v6384_v21  ;;  %v4361_v35 = vsel %vm10644_vm8, %v4329_v45, %v6385_v31  ;;  %vm10646_vm6 = vnez %v10645_v23  ;;  %v6606_v4 = vpack.i.bf16 %v3503_v7, %v9211_v1  ;;  %vm10648_vm4 = vmmov %vm10647_vm11  ;;  %v9585_v23 = vld [vmem:[%s9789_s6] ss:$0 sm:$0xff] }
 0x351   :  { %v3536_v15 = vsel %vm10646_vm6, %v9222_v56, 0.0  ;;  %v3212_v27 = vadd.f32 %v6774_v20, %v3211_v3  ;;  %v6571_v21 = vpack.i.bf16 %v9008_v13, %v3462_v2  ;;  %v4392_v31 = vsel %vm10647_vm11, %v4360_v5, %v6394_v44  ;;  %v9256_v13 = vld [vmem:[%s9789_s6] ss:$0 sm:$0xff]  ;;  %v9269_v20 = vld [vmem:[#allocation2 + $0xf0] sm:$0xff] }
 0x352   :  { %v6616_v33 = vpack.i.bf16 %v9224_v62, %v3536_v15  ;;  %v4393_v26 = vsel %vm10648_vm4, %v4361_v35, %v6395_v25  ;;  %v2554_v45 = vadd.f32 %v10649_v32, %v2465_v14  ;;  %v2715_v18 = vpack.c.bf16 %v2692_v52, %v2691_v50  ;;  %10653 = vst [vmem:[#allocation72_spill] sm:$0xff] %v9269_v20  ;;  %v6776_v32 = vld [vmem:[#allocation2 + $0x78] sm:$0xff] }
 0x353   :  { %v3245_v9 = vmax.f32 %v3212_v27, 0.0  ;;  %6572 = vrot.lane.b32.xlu2 %v6571_v21, %s6897_s26  ;;  %v4525_v7 = vpack.c.bf16 %v4393_v26, %v4392_v31  ;;  %v9250_v3 = vadd.f32 %v8617_v16, %v2552_v49  ;;  %vm10650_vm8 = vcmask 261120   ;;  %v6398_v50 = vpop.permute.xlu0 %6397  ;;  %v2880_v31 = vld [vmem:[#allocation3] sm:$0xff]  ;;  %v6775_v26 = vld [vmem:[#allocation2 + $0x80] sm:$0xff] }
 0x354   :  { %v9215_v55 = vpop.f32.mrf.mxu1  ;;  %6617 = vrot.lane.b32.xlu1 %v6616_v33, %s6898_s27  ;;  %v6418_v15 = vpop.permute.xlu2 %6417  ;;  %vm10651_vm11 = vmmov %vm10650_vm8  ;;  %v6400_v25 = vunpack.i.h.bf16 %v6398_v50  ;;  %v6399_v44 = vunpack.i.l.bf16 %v6398_v50  ;;  %v9260_v16 = vadd.f32 %v8651_v40, %v2554_v45  ;;  %v3433_v35 = vsel %vm10641_vm12, %v9138_v36, 0.0 }
 0x355   :  { %6607 = vrot.lane.b32.xlu0 %v6606_v4, %s6896_s25  ;;  %3277 = vst.msk [vmem:[#allocation2 + $0x110] sm:$0xff] %vm10651_vm11, %v3245_v9  ;;  %v6408_v52 = vpop.permute.xlu1 %6407  ;;  %v6420_v14 = vunpack.i.h.bf16 %v6418_v15  ;;  %v6419_v2 = vunpack.i.l.bf16 %v6418_v15  ;;  %v9267_v4 = vld [vmem:[#allocation2 + $0xe8] sm:$0xff]  ;;  %v2468_v27 = vadd.f32 %v9087_v53, %v8934_v39  ;;  %vm10654_vm4 = vmmov %vm10650_vm8  ;;  %vm10656_vm11 = vcmask 523264  }
 0x356   :  { %4787 = vmatmul.bf16.gmra.mxu1 %v4525_v7  ;;  %v6410_v33 = vunpack.i.h.bf16 %v6408_v52  ;;  %v6409_v5 = vunpack.i.l.bf16 %v6408_v52  ;;  %10652 = vst [vmem:[#allocation54_spill] sm:$0xff] %v9267_v4  ;;  %v4427_v40 = vsel %vm10654_vm4, %v6775_v26, %v6400_v25  ;;  %vm10657_vm12 = vmmov %vm10656_vm11  ;;  %v9281_v15 = vpack.i.bf16 %v9269_v20, %v9267_v4  ;;  %v9283_v39 = vld [vmem:[#allocation2 + $0x101] sm:$0xff] }
 0x357   :  { %v2470_v25 = vadd.f32 %v9087_v53, %v8966_v51  ;;  %v6777_v26 = vld [vmem:[#allocation2 + $0x67] sm:$0xff]  ;;  %v6601_v20 = vpack.i.bf16 %v9077_v30, %v3464_v57  ;;  %v10672_v30 = vld [vmem:[#allocation69_spill] sm:$0xff] }
 0x358   :  { %v4459_v7 = vsel %vm10657_vm12, %v4427_v40, %v6410_v33  ;;  %v2694_v33 = vmax.f32 %v9260_v16, 0.0  ;;  %v3322_v40 = vsel %vm10518_vm13, %v6777_v26, 0.0 }
 0x359   :  { %5510 = vmatmul.msk.bf16.gmra.mxu3 %vm10650_vm8, %v2715_v18  ;;  %vm10655_vm8 = vmmov %vm10654_vm4  ;;  %v6621_v18 = vpack.i.bf16 %v3433_v35, %v9136_v34  ;;  %v9296_v35 = vld [vmem:[#allocation2 + $0xf9] sm:$0xff] }
 0x35a   :  { %v4426_v45 = vsel %vm10655_vm8, %v6776_v32, %v6399_v44  ;;  %vm10659_vm4 = vmmov %vm10658_vm2  ;;  %v2693_v44 = vmax.f32 %v9250_v3, 0.0 }
 0x35b   :  { %v4458_v36 = vsel %vm10656_vm11, %v4426_v45, %v6409_v5  ;;  %v4491_v52 = vsel %vm10659_vm4, %v4459_v7, %v6420_v14  ;;  %6597 = vrot.lane.b32.xlu2 %v9281_v15, %s6897_s26  ;;  %v10660_v14 = vld [vmem:[#allocation80_spill] sm:$0xff]  ;;  %v6403_v3 = vpop.permute.xlu0 %6402  ;;  %v10663_v7 = vld [vmem:[#allocation34_spill] sm:$0xff]  ;;  %vm10664_vm13 = vmmov %vm10655_vm8 }
 0x35c   :  { %v9262_v49 = vpop.f32.mrf.mxu1  ;;  %v2800_v21 = vpop.f32.mrf.mxu3  ;;  %v4490_v50 = vsel %vm10658_vm2, %v4458_v36, %v6419_v2  ;;  %6622 = vrot.lane.b32.xlu1 %v6621_v18, %s6898_s27  ;;  %vm10661_vm2 = vnez %v10660_v14  ;;  %v6405_v45 = vunpack.i.h.bf16 %v6403_v3  ;;  %v6404_v18 = vunpack.i.l.bf16 %v6403_v3  ;;  %v2881_v3 = vld [vmem:[#allocation3 + $0x8] sm:$0xff]  ;;  %vm10665_vm12 = vmmov %vm10655_vm8 }
 0x35d   :  { %v2801_v9 = vadd.f32 %v9256_v13, %v2800_v21  ;;  %6612 = vrot.lane.b32.xlu0 %v9191_v17, %s6896_s25  ;;  %v6423_v5 = vpop.permute.xlu2 %6422  ;;  %v4529_v2 = vpack.c.bf16 %v4491_v52, %v4490_v50  ;;  %v3505_v51 = vsel %vm10661_vm2, %v9283_v39, 0.0  ;;  %v10662_v21 = vld [vmem:[#allocation31_spill] sm:$0xff]  ;;  %v6413_v32 = vpop.permute.xlu1 %6412  ;;  %v2559_v50 = vadd.f32 %v10663_v7, %v2470_v25  ;;  %vm10667_vm4 = vmmov %vm10656_vm11 }
 0x35e   :  { %v6425_v16 = vunpack.i.h.bf16 %v6423_v5  ;;  %v6424_v36 = vunpack.i.l.bf16 %v6423_v5  ;;  %v6414_v46 = vunpack.i.l.bf16 %v6413_v32  ;;  %v6636_v4 = vpack.i.bf16 %v3505_v51, %v9296_v35  ;;  %v6778_v5 = vld [vmem:[#allocation2 + $0x6f] sm:$0xff] }
 0x35f   :  { %v2912_v34 = vadd.f32 %v2880_v31, %v2801_v9  ;;  %v2557_v31 = vadd.f32 %v10662_v21, %v2468_v27  ;;  %v6415_v9 = vunpack.i.h.bf16 %v6413_v32  ;;  %v9306_v27 = vld [vmem:[#allocation2 + $0x107] sm:$0xff]  ;;  %v4331_v25 = vsel %vm10664_vm13, %v6778_v5, %v6405_v45  ;;  %4881 = vmatmul.bf16.gmra.mxu2 %v4529_v2  ;;  %vm10669_vm13 = vmmov %vm10668_vm7 }
 0x360   :  { %vm10666_vm8 = vnez %v10494_v37  ;;  %v2716_v5 = vpack.c.bf16 %v2694_v33, %v2693_v44  ;;  %v9334_v57 = vadd.f32 %v10672_v30, %v2559_v50  ;;  %v3435_v50 = vsel %vm10661_vm2, %v9213_v38, 0.0 }
 0x361   :  { %v2944_v17 = vmax.f32 %v2912_v34, 0.0  ;;  %v9308_v34 = vld [vmem:[#allocation2 + $0x10f] sm:$0xff]  ;;  %v3538_v51 = vsel %vm10666_vm8, %v9306_v27, 0.0  ;;  %v4363_v11 = vsel %vm10667_vm4, %v4331_v25, %v6415_v9  ;;  %v10671_v9 = vld [vmem:[#allocation67_spill] sm:$0xff]  ;;  %vm10688_vm2 = vcmask 785408  }
 0x362   :  { %v4395_v45 = vsel %vm10669_vm13, %v4363_v11, %v6425_v16  ;;  %v6779_v11 = vld [vmem:[#allocation2 + $0x90] sm:$0xff]  ;;  %vm10676_vm13 = vmmov %vm10667_vm4  ;;  %v3468_v12 = vsel %vm10666_vm8, %v9222_v56, 0.0 }
 0x363   :  { %2976 = vst [vmem:[#allocation6] sm:$0xff] %v2944_v17  ;;  %v4330_v17 = vsel %vm10665_vm12, %v3322_v40, %v6404_v18  ;;  %v10670_v40 = vld [vmem:[#allocation45_spill] sm:$0xff]  ;;  %6602 = vrot.lane.b32.xlu2 %v6601_v20, %s6897_s26  ;;  %vm10689_vm9 = vmmov %vm10688_vm2 }
 0x364   :  { %v2492_v52 = vpop.f32.mrf.mxu1  ;;  %v2802_v26 = vpop.f32.mrf.mxu3  ;;  %v4362_v7 = vsel %vm10656_vm11, %v4330_v17, %v6414_v46  ;;  %v9343_v17 = vld [vmem:[#allocation2 + $0xf8] sm:$0xff] }
 0x365   :  { %v2493_v21 = vadd.f32 %v9087_v53, %v2492_v52  ;;  %v2803_v32 = vadd.f32 %v9256_v13, %v2802_v26  ;;  %v6646_v52 = vpack.i.bf16 %v9308_v34, %v3538_v51  ;;  %v4394_v10 = vsel %vm10668_vm7, %v4362_v7, %v6424_v36  ;;  %6637 = vrot.lane.b32.xlu0 %v6636_v4, %s6896_s25  ;;  %v6448_v46 = vpop.permute.xlu2 %6447  ;;  %vm10673_vm7 = vmmov %vm10665_vm12  ;;  %v6438_v4 = vpop.permute.xlu1 %6437  ;;  %v9345_v51 = vld [vmem:[#allocation2 + $0x100] sm:$0xff] }
 0x366   :  { %v4528_v8 = vpack.c.bf16 %v4395_v45, %v4394_v10  ;;  %v9331_v26 = vadd.f32 %v10671_v9, %v2557_v31  ;;  %v6450_v10 = vunpack.i.h.bf16 %v6448_v46  ;;  %v6440_v31 = vunpack.i.h.bf16 %v6438_v4  ;;  %v2882_v7 = vld [vmem:[#allocation3 + $0x10] sm:$0xff]  ;;  %vm10674_vm12 = vmmov %vm10673_vm7  ;;  %v10677_v9 = vld [vmem:[#allocation58_spill] sm:$0xff] }
 0x367   :  { %v2582_v2 = vadd.f32 %v10670_v40, %v2493_v21  ;;  %v2913_v18 = vadd.f32 %v2881_v3, %v2803_v32  ;;  %6647 = vrot.lane.b32.xlu1 %v6646_v52, %s6898_s27  ;;  %v6428_v16 = vpop.permute.xlu0 %6427  ;;  %v6449_v21 = vunpack.i.l.bf16 %v6448_v46  ;;  %v6439_v25 = vunpack.i.l.bf16 %v6438_v4  ;;  %v6780_v52 = vld [vmem:[#allocation2 + $0x88] sm:$0xff]  ;;  %vm10675_vm11 = vmmov %vm10673_vm7  ;;  %v3475_v46 = vld [vmem:[#allocation2 + $0x111] sm:$0xff] }
 0x368   :  { %4792 = vmatmul.bf16.gmra.mxu1 %v4528_v8  ;;  %v6430_v44 = vunpack.i.h.bf16 %v6428_v16  ;;  %v6429_v33 = vunpack.i.l.bf16 %v6428_v16  ;;  %v6651_v40 = vpack.i.bf16 %v3435_v50, %v9211_v1  ;;  %v2696_v1 = vmax.f32 %v9334_v57, 0.0  ;;  %v3474_v57 = vld [vmem:[#allocation2 + $0x109] sm:$0xff] }
 0x369   :  { %v2945_v36 = vmax.f32 %v2913_v18, 0.0  ;;  %5511 = vmatmul.msk.bf16.gmra.mxu3 %vm10673_vm7, %v2716_v5  ;;  %v9338_v3 = vadd.f32 %v9177_v22, %v2582_v2  ;;  %v9356_v5 = vpack.i.bf16 %v9345_v51, %v9343_v17  ;;  %vm10678_vm7 = vcmask 785408  }
 0x36a   :  { %v4429_v22 = vsel %vm10674_vm12, %v6779_v11, %v6430_v44  ;;  %v4428_v45 = vsel %vm10675_vm11, %v6780_v52, %v6429_v33  ;;  %vm10679_vm12 = vmmov %vm10678_vm7  ;;  %v2695_v44 = vmax.f32 %v9331_v26, 0.0  ;;  %v2473_v33 = vadd.f32 %v9087_v53, %v9003_v60 }
 0x36b   :  { %2977 = vst [vmem:[#allocation6 + $0x8] sm:$0xff] %v2945_v36  ;;  %v4460_v38 = vsel %vm10667_vm4, %v4428_v45, %v6439_v25  ;;  %v4461_v18 = vsel %vm10676_vm13, %v4429_v22, %v6440_v31  ;;  %6627 = vrot.lane.b32.xlu2 %v9356_v5, %s6897_s26  ;;  %v2705_v25 = vmax.f32 %v9338_v3, 0.0  ;;  %v3466_v3 = vsel %vm10646_vm6, %v9147_v24, 0.0 }
 0x36c   :  { %v2494_v20 = vpop.f32.mrf.mxu1  ;;  %v2805_v32 = vpop.f32.mrf.mxu3  ;;  %v4492_v36 = vsel %vm10678_vm7, %v4460_v38, %v6449_v21  ;;  %v4493_v16 = vsel %vm10679_vm12, %v4461_v18, %v6450_v10  ;;  %v10680_v21 = vld [vmem:[#allocation85_spill] sm:$0xff]  ;;  %v3509_v18 = vld [vmem:[#allocation2 + $0x11f] sm:$0xff]  ;;  %vm10686_vm7 = vcmask 523264  }
 0x36d   :  { %v2495_v8 = vadd.f32 %v9087_v53, %v2494_v20  ;;  %v2806_v2 = vadd.f32 %v9256_v13, %v2805_v32  ;;  %6642 = vrot.lane.b32.xlu0 %v9281_v15, %s6896_s25  ;;  %v2475_v20 = vadd.f32 %v9087_v53, %v9037_v42  ;;  %v6453_v26 = vpop.permute.xlu2 %6452  ;;  %v4532_v10 = vpack.c.bf16 %v4493_v16, %v4492_v36  ;;  %v6781_v15 = vld [vmem:[#allocation2 + $0x77] sm:$0xff]  ;;  %v6443_v22 = vpop.permute.xlu1 %6442  ;;  %vm10687_vm12 = vmmov %vm10686_vm7 }
 0x36e   :  { %vm10681_vm11 = vnez %v10680_v21  ;;  %v3324_v42 = vsel %vm10525_vm0, %v6781_v15, 0.0  ;;  %v6454_v52 = vunpack.i.l.bf16 %v6453_v26  ;;  %v6445_v45 = vunpack.i.h.bf16 %v6443_v22  ;;  %v3508_v38 = vld [vmem:[#allocation2 + $0x117] sm:$0xff] }
 0x36f   :  { %v2584_v30 = vadd.f32 %v10677_v9, %v2495_v8  ;;  %v2914_v4 = vadd.f32 %v2882_v7, %v2806_v2  ;;  %6652 = vrot.lane.b32.xlu1 %v6651_v40, %s6898_s27  ;;  %v3507_v60 = vsel %vm10681_vm11, %v3475_v46, 0.0  ;;  %v6433_v8 = vpop.permute.xlu0 %6432  ;;  %v6444_v40 = vunpack.i.l.bf16 %v6443_v22  ;;  %v6782_v9 = vld [vmem:[#allocation2 + $0x7f] sm:$0xff]  ;;  %4886 = vmatmul.bf16.gmra.mxu2 %v4532_v10  ;;  %v10684_v16 = vld [vmem:[#allocation89_spill] sm:$0xff] }
 0x370   :  { %v6435_v7 = vunpack.i.h.bf16 %v6433_v8  ;;  %v6434_v11 = vunpack.i.l.bf16 %v6433_v8  ;;  %v6671_v2 = vpack.i.bf16 %v3507_v60, %v3474_v57  ;;  %vm10682_vm0 = vcmask 261120  }
 0x371   :  { %v2673_v31 = vadd.f32 %v9230_v59, %v2584_v30  ;;  %v2946_v50 = vmax.f32 %v2914_v4, 0.0  ;;  %v6455_v59 = vunpack.i.h.bf16 %v6453_v26  ;;  %vm10683_vm4 = vmmov %vm10682_vm0  ;;  %vm10685_vm13 = vnez %v10684_v16 }
 0x372   :  { %v4333_v30 = vsel %vm10682_vm0, %v6782_v9, %v6435_v7  ;;  %v4332_v36 = vsel %vm10683_vm4, %v3324_v42, %v6434_v11  ;;  %v3540_v4 = vsel %vm10685_vm13, %v3508_v38, 0.0  ;;  %v2717_v10 = vpack.c.bf16 %v2696_v1, %v2695_v44  ;;  %v10690_v11 = vld [vmem:[#allocation32_spill] sm:$0xff]  ;;  %v6783_v9 = vld [vmem:[#allocation2 + $0xa0] sm:$0xff]  ;;  %vm10694_vm4 = vmmov %vm10686_vm7 }
 0x373   :  { %v2706_v32 = vmax.f32 %v2673_v31, 0.0  ;;  %2978 = vst [vmem:[#allocation6 + $0x10] sm:$0xff] %v2946_v50  ;;  %v6631_v31 = vpack.i.bf16 %v9149_v61, %v3466_v3  ;;  %v4364_v57 = vsel %vm10686_vm7, %v4332_v36, %v6444_v40  ;;  %v4365_v60 = vsel %vm10687_vm12, %v4333_v30, %v6445_v45  ;;  %v10691_v45 = vld [vmem:[#allocation40_spill] sm:$0xff]  ;;  %v6784_v36 = vld [vmem:[#allocation2 + $0x98] sm:$0xff]  ;;  %vm10695_vm7 = vmmov %vm10694_vm4 }
 0x374   :  { %v2807_v46 = vpop.f32.mrf.mxu3  ;;  %v6676_v24 = vpack.i.bf16 %v3509_v18, %v3540_v4  ;;  %v4396_v50 = vsel %vm10688_vm2, %v4364_v57, %v6454_v52  ;;  %v4397_v15 = vsel %vm10689_vm9, %v4365_v60, %v6455_v59  ;;  %v2562_v22 = vadd.f32 %v10690_v11, %v2473_v33  ;;  %vm10692_vm2 = vmmov %vm10682_vm0  ;;  %v9402_v33 = vld [vmem:[#allocation2 + $0x108] sm:$0xff] }
 0x375   :  { %v2808_v26 = vadd.f32 %v9256_v13, %v2807_v46  ;;  %v9391_v8 = vpack.c.bf16 %v2706_v32, %v2705_v25  ;;  %6672 = vrot.lane.b32.xlu0 %v6671_v2, %s6896_s25  ;;  %v4531_v7 = vpack.c.bf16 %v4397_v15, %v4396_v50  ;;  %6632 = vrot.lane.b32.xlu2 %v6631_v31, %s6897_s26  ;;  %v6478_v61 = vpop.permute.xlu2 %6477  ;;  %v6468_v44 = vpop.permute.xlu1 %6467  ;;  %v3437_v3 = vsel %vm10681_vm11, %v9283_v39, 0.0  ;;  %vm10693_vm9 = vmmov %vm10682_vm0  ;;  %v6785_v11 = vld [vmem:[#allocation2 + $0x87] sm:$0xff] }
 0x376   :  { %v2564_v40 = vadd.f32 %v10691_v45, %v2475_v20  ;;  %v6480_v1 = vunpack.i.h.bf16 %v6478_v61  ;;  %v6479_v52 = vunpack.i.l.bf16 %v6478_v61  ;;  %v6470_v2 = vunpack.i.h.bf16 %v6468_v44  ;;  %v9404_v20 = vld [vmem:[#allocation2 + $0x110] sm:$0xff] }
 0x377   :  { %v2915_v42 = vadd.f32 %v2883_v0, %v2808_v26  ;;  %6677 = vrot.lane.b32.xlu1 %v6676_v24, %s6898_s27  ;;  %v6458_v59 = vpop.permute.xlu0 %6457  ;;  %v6469_v18 = vunpack.i.l.bf16 %v6468_v44  ;;  %v2884_v0 = vld [vmem:[#allocation3 + $0x20] sm:$0xff]  ;;  %v6686_v31 = vpack.i.bf16 %v3437_v3, %v9296_v35  ;;  %v6656_v26 = vpack.i.bf16 %v9404_v20, %v9402_v33  ;;  %v9427_v44 = vld [vmem:[%s9787_s4] ss:$0 sm:$0xff] }
 0x378   :  { %4797 = vmatmul.bf16.gmra.mxu1 %v4531_v7  ;;  %v6460_v25 = vunpack.i.h.bf16 %v6458_v59  ;;  %v6459_v32 = vunpack.i.l.bf16 %v6458_v59  ;;  %vm10696_vm12 = vcmask 785408   ;;  %v2653_v15 = vadd.f32 %v8878_v19, %v2564_v40 }
 0x379   :  { %v2947_v38 = vmax.f32 %v2915_v42, 0.0  ;;  %5512 = vmatmul.msk.bf16.gmra.mxu3 %vm10692_vm2, %v2717_v10  ;;  %vm10697_vm2 = vmmov %vm10696_vm12  ;;  %v2651_v35 = vadd.f32 %v8801_v58, %v2562_v22  ;;  %v3326_v45 = vsel %vm10542_vm5, %v6785_v11, 0.0 }
 0x37a   :  { %v4431_v30 = vsel %vm10693_vm9, %v6783_v9, %v6460_v25  ;;  %v4430_v4 = vsel %vm10682_vm0, %v6784_v36, %v6459_v32  ;;  %vm10698_vm5 = vmmov %vm10682_vm0  ;;  %v6661_v9 = vpack.i.bf16 %v9224_v62, %v3468_v12  ;;  %v2478_v62 = vadd.f32 %v9087_v53, %v9072_v43  ;;  %v6787_v12 = vld [vmem:[#allocation2 + $0xb0] sm:$0xff] }
 0x37b   :  { %2979 = vst [vmem:[#allocation6 + $0x18] sm:$0xff] %v2947_v38  ;;  %v4462_v39 = vsel %vm10694_vm4, %v4430_v4, %v6469_v18  ;;  %v4463_v60 = vsel %vm10695_vm7, %v4431_v30, %v6470_v2  ;;  %v2885_v2 = vld [vmem:[#allocation3 + $0x28] sm:$0xff]  ;;  %v6786_v18 = vld [vmem:[#allocation2 + $0x8f] sm:$0xff]  ;;  %vm10699_vm9 = vmmov %vm10682_vm0 }
 0x37c   :  { %v2810_v46 = vpop.f32.mrf.mxu3  ;;  %v4494_v24 = vsel %vm10696_vm12, %v4462_v39, %v6479_v52  ;;  %v4495_v50 = vsel %vm10697_vm2, %v4463_v60, %v6480_v1  ;;  %v2697_v1 = vmax.f32 %v2651_v35, 0.0  ;;  %vm10700_vm0 = vmmov %vm10694_vm4 }
 0x37d   :  { %v2811_v57 = vadd.f32 %v9256_v13, %v2810_v46  ;;  %6682 = vrot.lane.b32.xlu0 %v9356_v5, %s6896_s25  ;;  %6657 = vrot.lane.b32.xlu2 %v6656_v26, %s6897_s26  ;;  %v6483_v10 = vpop.permute.xlu2 %6482  ;;  %v4535_v7 = vpack.c.bf16 %v4495_v50, %v4494_v24  ;;  %v6473_v40 = vpop.permute.xlu1 %6472  ;;  %v2698_v5 = vmax.f32 %v2653_v15, 0.0  ;;  %vm10701_vm4 = vmmov %vm10700_vm0 }
 0x37e   :  { %v6485_v25 = vunpack.i.h.bf16 %v6483_v10  ;;  %v6484_v32 = vunpack.i.l.bf16 %v6483_v10  ;;  %v6475_v58 = vunpack.i.h.bf16 %v6473_v40  ;;  %v6474_v22 = vunpack.i.l.bf16 %v6473_v40  ;;  %vm10702_vm7 = vmmov %vm10697_vm2  ;;  %v3542_v40 = vld [vmem:[#allocation2 + $0x118] sm:$0xff] }
 0x37f   :  { %v2916_v42 = vadd.f32 %v2884_v0, %v2811_v57  ;;  %6687 = vrot.lane.b32.xlu1 %v6686_v31, %s6898_s27  ;;  %v6463_v38 = vpop.permute.xlu0 %6462  ;;  %4891 = vmatmul.bf16.gmra.mxu2 %v4535_v7  ;;  %vm10703_vm12 = vmmov %vm10697_vm2  ;;  %v2480_v57 = vadd.f32 %v9087_v53, %v9107_v28  ;;  %v2718_v60 = vpack.c.bf16 %v2698_v5, %v2697_v1 }
 0x380   :  { %v6465_v59 = vunpack.i.h.bf16 %v6463_v38  ;;  %v6464_v19 = vunpack.i.l.bf16 %v6463_v38  ;;  %v4852_v24 = vpop.f32.mrf.mxu2  ;;  %vm10704_vm2 = vmmov %vm10698_vm5  ;;  %v10705_v38 = vld [vmem:[#allocation37_spill] sm:$0xff] }
 0x381   :  { %v2948_v61 = vmax.f32 %v2916_v42, 0.0 }
 0x382   :  { %v4335_v3 = vsel %vm10698_vm5, %v6786_v18, %v6465_v59  ;;  %v4334_v46 = vsel %vm10699_vm9, %v3326_v45, %v6464_v19  ;;  %v4763_v0 = vpop.f32.mrf.mxu1  ;;  %v2569_v59 = vadd.f32 %v10705_v38, %v2480_v57  ;;  %vm10707_vm5 = vmmov %vm10704_vm2  ;;  %v3470_v38 = vsel %vm10685_vm13, %v9306_v27, 0.0 }
 0x383   :  { %2980 = vst [vmem:[#allocation6 + $0x20] sm:$0xff] %v2948_v61  ;;  %v4366_v36 = vsel %vm10700_vm0, %v4334_v46, %v6474_v22  ;;  %v4367_v4 = vsel %vm10701_vm4, %v4335_v3, %v6475_v58  ;;  %v4764_v56 = vadd.f32 %v9427_v44, %v4763_v0  ;;  %v2886_v22 = vld [vmem:[#allocation3 + $0x30] sm:$0xff]  ;;  %vm10708_vm9 = vmmov %vm10704_vm2 }
 0x384   :  { %v2812_v52 = vpop.f32.mrf.mxu3  ;;  %v4398_v31 = vsel %vm10702_vm7, %v4366_v36, %v6484_v32  ;;  %v4399_v26 = vsel %vm10703_vm12, %v4367_v4, %v6485_v25  ;;  %v3543_v25 = vld [vmem:[#allocation2 + $0x120] sm:$0xff]  ;;  %v10706_v32 = vld [vmem:[#allocation30_spill] sm:$0xff]  ;;  %vm10709_vm4 = vmmov %vm10700_vm0 }
 0x385   :  { %v2813_v30 = vadd.f32 %v9256_v13, %v2812_v52  ;;  %v4534_v50 = vpack.c.bf16 %v4399_v26, %v4398_v31  ;;  %v9445_v15 = vadd.f32 %v4852_v24, %v4764_v56  ;;  %6662 = vrot.lane.b32.xlu2 %v6661_v9, %s6897_s26  ;;  %v6508_v42 = vpop.permute.xlu2 %6507  ;;  %v6498_v28 = vpop.permute.xlu1 %6497  ;;  %v2567_v5 = vadd.f32 %v10706_v32, %v2478_v62  ;;  %v6788_v52 = vld [vmem:[#allocation2 + $0xa8] sm:$0xff]  ;;  %vm10710_vm12 = vmmov %vm10702_vm7  ;;  %v6789_v62 = vld [vmem:[#allocation2 + $0x97] sm:$0xff] }
 0x386   :  { %v6510_v11 = vunpack.i.h.bf16 %v6508_v42  ;;  %v6509_v45 = vunpack.i.l.bf16 %v6508_v42  ;;  %v6500_v19 = vunpack.i.h.bf16 %v6498_v28  ;;  %v6499_v43 = vunpack.i.l.bf16 %v6498_v28 }
 0x387   :  { %v2917_v39 = vadd.f32 %v2885_v2, %v2813_v30  ;;  %v6488_v10 = vpop.permute.xlu0 %6487  ;;  %v6666_v3 = vpack.i.bf16 %v3543_v25, %v3542_v40  ;;  %v2658_v56 = vadd.f32 %v8956_v48, %v2569_v59  ;;  %v2656_v57 = vadd.f32 %v8914_v29, %v2567_v5  ;;  %v6790_v40 = vld [vmem:[#allocation2 + $0x9f] sm:$0xff] }
 0x388   :  { %4802 = vmatmul.bf16.gmra.mxu1 %v4534_v50  ;;  %v6490_v7 = vunpack.i.h.bf16 %v6488_v10  ;;  %v6489_v61 = vunpack.i.l.bf16 %v6488_v10  ;;  %v4854_v26 = vpop.f32.mrf.mxu2  ;;  %v3328_v42 = vsel %vm10246_vm10, %v6789_v62, 0.0  ;;  %vm10711_vm10 = vmmov %vm10704_vm2  ;;  %v6691_v5 = vpack.i.bf16 %v9308_v34, %v3470_v38 }
 0x389   :  { %v2949_v35 = vmax.f32 %v2917_v39, 0.0  ;;  %5513 = vmatmul.msk.bf16.gmra.mxu3 %vm10704_vm2, %v2718_v60  ;;  %v2699_v59 = vmax.f32 %v2656_v57, 0.0  ;;  %v2483_v34 = vadd.f32 %v9087_v53, %v9140_v6  ;;  %v10718_v6 = vld [vmem:[#allocation43_spill] sm:$0xff] }
 0x38a   :  { %v4433_v1 = vsel %vm10707_vm5, %v6787_v12, %v6490_v7  ;;  %v4432_v2 = vsel %vm10708_vm9, %v6788_v52, %v6489_v61  ;;  %v4765_v18 = vpop.f32.mrf.mxu1  ;;  %vm10712_vm5 = vmmov %vm10700_vm0 }
 0x38b   :  { %2981 = vst [vmem:[#allocation6 + $0x28] sm:$0xff] %v2949_v35  ;;  %v4464_v0 = vsel %vm10700_vm0, %v4432_v2, %v6499_v43  ;;  %v4465_v9 = vsel %vm10709_vm4, %v4433_v1, %v6500_v19  ;;  %v4766_v30 = vadd.f32 %v9427_v44, %v4765_v18  ;;  %v2887_v43 = vld [vmem:[#allocation3 + $0x38] sm:$0xff]  ;;  %vm10713_vm9 = vmmov %vm10700_vm0  ;;  %v2485_v2 = vadd.f32 %v9087_v53, %v9179_v41 }
 0x38c   :  { %v2815_v58 = vpop.f32.mrf.mxu3  ;;  %v4496_v36 = vsel %vm10702_vm7, %v4464_v0, %v6509_v45  ;;  %v4497_v4 = vsel %vm10710_vm12, %v4465_v9, %v6510_v11  ;;  %v2700_v11 = vmax.f32 %v2658_v56, 0.0  ;;  %vm10714_vm0 = vmmov %vm10702_vm7  ;;  %v2572_v62 = vadd.f32 %v10718_v6, %v2483_v34 }
 0x38d   :  { %v2816_v46 = vadd.f32 %v9256_v13, %v2815_v58  ;;  %v9461_v39 = vadd.f32 %v4854_v26, %v4766_v30  ;;  %6667 = vrot.lane.b32.xlu2 %v6666_v3, %s6897_s26  ;;  %v6513_v60 = vpop.permute.xlu2 %6512  ;;  %v4538_v24 = vpack.c.bf16 %v4497_v4, %v4496_v36  ;;  %v6503_v61 = vpop.permute.xlu1 %6502  ;;  %vm10715_vm4 = vmmov %vm10714_vm0 }
 0x38e   :  { %v6515_v48 = vunpack.i.h.bf16 %v6513_v60  ;;  %v6514_v28 = vunpack.i.l.bf16 %v6513_v60  ;;  %v6505_v29 = vunpack.i.h.bf16 %v6503_v61  ;;  %v6504_v45 = vunpack.i.l.bf16 %v6503_v61  ;;  %vm10716_vm7 = vmmov %vm10704_vm2  ;;  %v10717_v60 = vld [vmem:[#allocation49_spill] sm:$0xff]  ;;  %v6792_v61 = vld [vmem:[#allocation2 + $0xb8] sm:$0xff] }
 0x38f   :  { %v2918_v31 = vadd.f32 %v2886_v22, %v2816_v46  ;;  %v6493_v35 = vpop.permute.xlu0 %6492  ;;  %4896 = vmatmul.bf16.gmra.mxu2 %v4538_v24  ;;  %v2719_v3 = vpack.c.bf16 %v2700_v11, %v2699_v59  ;;  %v2574_v24 = vadd.f32 %v10717_v60, %v2485_v2  ;;  %vm10719_vm12 = vmmov %vm10704_vm2 }
 0x390   :  { %v6495_v10 = vunpack.i.h.bf16 %v6493_v35  ;;  %v6494_v7 = vunpack.i.l.bf16 %v6493_v35  ;;  %v4857_v46 = vpop.f32.mrf.mxu2  ;;  %v2888_v35 = vld [vmem:[#allocation3 + $0x40] sm:$0xff] }
 0x391   :  { %v2950_v50 = vmax.f32 %v2918_v31, 0.0 }
 0x392   :  { %v4337_v54 = vsel %vm10704_vm2, %v6790_v40, %v6495_v10  ;;  %v4336_v25 = vsel %vm10711_vm10, %v3328_v42, %v6494_v7  ;;  %v4768_v32 = vpop.f32.mrf.mxu1  ;;  %v6791_v10 = vld [vmem:[#allocation2 + $0xc0] sm:$0xff]  ;;  %vm10720_vm10 = vmmov %vm10712_vm5 }
 0x393   :  { %2982 = vst [vmem:[#allocation6 + $0x30] sm:$0xff] %v2950_v50  ;;  %v4368_v22 = vsel %vm10712_vm5, %v4336_v25, %v6504_v45  ;;  %v4369_v12 = vsel %vm10713_vm9, %v4337_v54, %v6505_v29  ;;  %v4769_v27 = vadd.f32 %v9427_v44, %v4768_v32  ;;  %vm10721_vm9 = vmmov %vm10714_vm0  ;;  %v2661_v25 = vadd.f32 %v9014_v47, %v2572_v62  ;;  %v6795_v62 = vld [vmem:[%s9787_s4] ss:$0 sm:$0xff] }
 0x394   :  { %v2817_v19 = vpop.f32.mrf.mxu3  ;;  %v4400_v1 = vsel %vm10714_vm0, %v4368_v22, %v6514_v28  ;;  %v4401_v52 = vsel %vm10715_vm4, %v4369_v12, %v6515_v48  ;;  %v6793_v22 = vld [vmem:[#allocation2 + $0xa7] sm:$0xff]  ;;  %vm10723_vm4 = vmmov %vm10704_vm2 }
 0x395   :  { %v2818_v58 = vadd.f32 %v9256_v13, %v2817_v19  ;;  %v4537_v0 = vpack.c.bf16 %v4401_v52, %v4400_v1  ;;  %v9482_v9 = vadd.f32 %v4857_v46, %v4769_v27  ;;  %6692 = vrot.lane.b32.xlu2 %v6691_v5, %s6897_s26  ;;  %v6538_v30 = vpop.permute.xlu2 %6537  ;;  %v6528_v41 = vpop.permute.xlu1 %6527  ;;  %v3330_v27 = vsel %vm10438_vm3, %v6793_v22, 0.0  ;;  %vm10725_vm3 = vmmov %vm10712_vm5  ;;  %v2890_v12 = vld [vmem:[#allocation3 + $0x50] sm:$0xff] }
 0x396   :  { %v6540_v26 = vunpack.i.h.bf16 %v6538_v30  ;;  %v6539_v57 = vunpack.i.l.bf16 %v6538_v30  ;;  %v6530_v50 = vunpack.i.h.bf16 %v6528_v41  ;;  %v6529_v53 = vunpack.i.l.bf16 %v6528_v41 }
 0x397   :  { %v2919_v18 = vadd.f32 %v2887_v43, %v2818_v58  ;;  %v6518_v4 = vpop.permute.xlu0 %6517  ;;  %v2663_v43 = vadd.f32 %v9046_v63, %v2574_v24  ;;  %v2701_v47 = vmax.f32 %v2661_v25, 0.0 }
 0x398   :  { %4807 = vmatmul.bf16.gmra.mxu1 %v4537_v0  ;;  %v6520_v56 = vunpack.i.h.bf16 %v6518_v4  ;;  %v6519_v31 = vunpack.i.l.bf16 %v6518_v4  ;;  %v4859_v54 = vpop.f32.mrf.mxu2  ;;  %v2889_v4 = vld [vmem:[#allocation3 + $0x48] sm:$0xff] }
 0x399   :  { %v2951_v36 = vmax.f32 %v2919_v18, 0.0  ;;  %5514 = vmatmul.msk.bf16.gmra.mxu3 %vm10716_vm7, %v2719_v3  ;;  %v2702_v63 = vmax.f32 %v2663_v43, 0.0  ;;  %vm10724_vm7 = vmmov %vm10704_vm2 }
 0x39a   :  { %v4435_v7 = vsel %vm10719_vm12, %v6791_v10, %v6520_v56  ;;  %v4434_v48 = vsel %vm10704_vm2, %v6792_v61, %v6519_v31  ;;  %v4770_v28 = vpop.f32.mrf.mxu1  ;;  %v6794_v56 = vld [vmem:[#allocation2 + $0xaf] sm:$0xff]  ;;  %vm10726_vm12 = vmmov %vm10725_vm3 }
 0x39b   :  { %2983 = vst [vmem:[#allocation6 + $0x38] sm:$0xff] %v2951_v36  ;;  %v4466_v29 = vsel %vm10720_vm10, %v4434_v48, %v6529_v53  ;;  %v4467_v45 = vsel %vm10712_vm5, %v4435_v7, %v6530_v50  ;;  %v4771_v38 = vadd.f32 %v9427_v44, %v4770_v28  ;;  %vm10727_vm2 = vmmov %vm10714_vm0  ;;  %v2720_v10 = vpack.c.bf16 %v2702_v63, %v2701_v47  ;;  %v10738_v47 = vld [vmem:[#allocation53_spill] sm:$0xff] }
 0x39c   :  { %v2820_v42 = vpop.f32.mrf.mxu3  ;;  %v4498_v59 = vsel %vm10721_vm9, %v4466_v29, %v6539_v57  ;;  %v4499_v19 = vsel %vm10714_vm0, %v4467_v45, %v6540_v26  ;;  %vm10728_vm10 = vmmov %vm10714_vm0  ;;  %v2488_v48 = vadd.f32 %v6795_v62, %v9215_v55 }
 0x39d   :  { %v2821_v11 = vadd.f32 %v9256_v13, %v2820_v42  ;;  %v9498_v32 = vadd.f32 %v4859_v54, %v4771_v38  ;;  %v4541_v5 = vpack.c.bf16 %v4499_v19, %v4498_v59  ;;  %v6543_v52 = vpop.permute.xlu2 %6542  ;;  %v6533_v3 = vpop.permute.xlu1 %6532  ;;  %v2490_v42 = vadd.f32 %v6795_v62, %v9262_v49  ;;  %vm10729_vm5 = vmmov %vm10723_vm4  ;;  %v10730_v49 = vld [vmem:[#allocation50_spill] sm:$0xff] }
 0x39e   :  { %v6545_v46 = vunpack.i.h.bf16 %v6543_v52  ;;  %v6544_v0 = vunpack.i.l.bf16 %v6543_v52  ;;  %v6535_v34 = vunpack.i.h.bf16 %v6533_v3  ;;  %v6534_v30 = vunpack.i.l.bf16 %v6533_v3  ;;  %vm10732_vm9 = vmmov %vm10723_vm4  ;;  %v6797_v52 = vld [vmem:[#allocation2 + $0xc8] sm:$0xff] }
 0x39f   :  { %v2920_v40 = vadd.f32 %v2888_v35, %v2821_v11  ;;  %v6523_v1 = vpop.permute.xlu0 %6522  ;;  %4901 = vmatmul.bf16.gmra.mxu2 %v4541_v5  ;;  %v2579_v54 = vadd.f32 %v10730_v49, %v2490_v42  ;;  %vm10733_vm0 = vmmov %vm10723_vm4 }
 0x3a0   :  { %v6525_v2 = vunpack.i.h.bf16 %v6523_v1  ;;  %v6524_v18 = vunpack.i.l.bf16 %v6523_v1 }
 0x3a1   :  { %v2952_v58 = vmax.f32 %v2920_v40, 0.0  ;;  %v4862_v7 = vpop.f32.mrf.mxu2 }
 0x3a2   :  { %v4339_v31 = vsel %vm10723_vm4, %v6794_v56, %v6525_v2  ;;  %v4338_v41 = vsel %vm10724_vm7, %v3330_v27, %v6524_v18  ;;  %v4773_v26 = vpop.f32.mrf.mxu1  ;;  %v6796_v27 = vld [vmem:[#allocation2 + $0xd0] sm:$0xff]  ;;  %vm10734_vm4 = vmmov %vm10725_vm3 }
 0x3a3   :  { %2984 = vst [vmem:[#allocation6 + $0x40] sm:$0xff] %v2952_v58  ;;  %v4370_v60 = vsel %vm10725_vm3, %v4338_v41, %v6534_v30  ;;  %v4371_v24 = vsel %vm10726_vm12, %v4339_v31, %v6535_v34  ;;  %v4774_v50 = vadd.f32 %v9427_v44, %v4773_v26  ;;  %v10731_v58 = vld [vmem:[#allocation44_spill] sm:$0xff]  ;;  %vm10735_vm7 = vmmov %vm10725_vm3  ;;  %v10739_v31 = vld [vmem:[#allocation71_spill] sm:$0xff] }
 0x3a4   :  { %v2822_v36 = vpop.f32.mrf.mxu3  ;;  %v4402_v53 = vsel %vm10727_vm2, %v4370_v60, %v6544_v0  ;;  %v4403_v6 = vsel %vm10728_vm10, %v4371_v24, %v6545_v46  ;;  %v2577_v55 = vadd.f32 %v10731_v58, %v2488_v48  ;;  %vm10736_vm3 = vmmov %vm10727_vm2  ;;  %v6798_v24 = vld [vmem:[#allocation2 + $0xb7] sm:$0xff] }
 0x3a5   :  { %v2823_v57 = vadd.f32 %v9256_v13, %v2822_v36  ;;  %v4540_v61 = vpack.c.bf16 %v4403_v6, %v4402_v53  ;;  %v9515_v28 = vadd.f32 %v4862_v7, %v4774_v50  ;;  %v6568_v45 = vpop.permute.xlu2 %6567  ;;  %v6558_v19 = vpop.permute.xlu1 %6557  ;;  %vm10737_vm12 = vmmov %vm10727_vm2  ;;  %v2668_v36 = vadd.f32 %v10738_v47, %v2579_v54 }
 0x3a6   :  { %v6570_v43 = vunpack.i.h.bf16 %v6568_v45  ;;  %v6569_v40 = vunpack.i.l.bf16 %v6568_v45  ;;  %v6560_v25 = vunpack.i.h.bf16 %v6558_v19  ;;  %v6559_v5 = vunpack.i.l.bf16 %v6558_v19  ;;  %v6799_v19 = vld [vmem:[#allocation2 + $0xbf] sm:$0xff]  ;;  %vm10741_vm2 = vmmov %vm10733_vm0 }
 0x3a7   :  { %v2921_v35 = vadd.f32 %v2889_v4, %v2823_v57  ;;  %v6548_v29 = vpop.permute.xlu0 %6547  ;;  %v2666_v41 = vadd.f32 %v10739_v31, %v2577_v55  ;;  %v3332_v53 = vsel %vm10271_vm14, %v6798_v24, 0.0  ;;  %v2704_v48 = vmax.f32 %v2668_v36, 0.0  ;;  %vm10742_vm10 = vmmov %vm10733_vm0  ;;  %v2892_v31 = vld [vmem:[#allocation3 + $0x60] sm:$0xff] }
 0x3a8   :  { %4812 = vmatmul.bf16.gmra.mxu1 %v4540_v61  ;;  %v6550_v38 = vunpack.i.h.bf16 %v6548_v29  ;;  %v6549_v59 = vunpack.i.l.bf16 %v6548_v29  ;;  %vm10743_vm14 = vmmov %vm10734_vm4 }
 0x3a9   :  { %v2953_v11 = vmax.f32 %v2921_v35, 0.0  ;;  %5515 = vmatmul.msk.bf16.gmra.mxu3 %vm10729_vm5, %v2720_v10  ;;  %v4864_v56 = vpop.f32.mrf.mxu2  ;;  %v2703_v45 = vmax.f32 %v2666_v41, 0.0  ;;  %vm10744_vm5 = vmmov %vm10734_vm4  ;;  %v6800_v41 = vld [vmem:[#allocation2 + $0xe0] sm:$0xff] }
 0x3aa   :  { %v4437_v1 = vsel %vm10732_vm9, %v6796_v27, %v6550_v38  ;;  %v4436_v2 = vsel %vm10733_vm0, %v6797_v52, %v6549_v59  ;;  %v4775_v18 = vpop.f32.mrf.mxu1  ;;  %v2891_v59 = vld [vmem:[#allocation3 + $0x58] sm:$0xff]  ;;  %vm10745_vm9 = vmmov %vm10736_vm3 }
 0x3ab   :  { %2985 = vst [vmem:[#allocation6 + $0x48] sm:$0xff] %v2953_v11  ;;  %v4468_v46 = vsel %vm10734_vm4, %v4436_v2, %v6559_v5  ;;  %v4469_v0 = vsel %vm10735_vm7, %v4437_v1, %v6560_v25  ;;  %v4776_v63 = vadd.f32 %v9427_v44, %v4775_v18  ;;  %vm10746_vm0 = vmmov %vm10736_vm3  ;;  %v2721_v27 = vpack.c.bf16 %v2704_v48, %v2703_v45  ;;  %v6802_v45 = vld [vmem:[#allocation2 + $0xc7] sm:$0xff] }
 0x3ac   :  { %v2825_v22 = vpop.f32.mrf.mxu3  ;;  %v4500_v34 = vsel %vm10736_vm3, %v4468_v46, %v6569_v40  ;;  %v4501_v30 = vsel %vm10737_vm12, %v4469_v0, %v6570_v43  ;;  %vm10747_vm4 = vmmov %vm10741_vm2 }
 0x3ad   :  { %v2826_v3 = vadd.f32 %v9256_v13, %v2825_v22  ;;  %v9530_v26 = vadd.f32 %v4864_v56, %v4776_v63  ;;  %v4544_v57 = vpack.c.bf16 %v4501_v30, %v4500_v34  ;;  %v6573_v62 = vpop.permute.xlu2 %6572  ;;  %v6563_v10 = vpop.permute.xlu1 %6562  ;;  %vm10748_vm7 = vmmov %vm10741_vm2 }
 0x3ae   :  { %v6575_v7 = vunpack.i.h.bf16 %v6573_v62  ;;  %v6574_v61 = vunpack.i.l.bf16 %v6573_v62  ;;  %v6565_v11 = vunpack.i.h.bf16 %v6563_v10  ;;  %v6564_v29 = vunpack.i.l.bf16 %v6563_v10  ;;  %vm10749_vm3 = vmmov %vm10741_vm2 }
 0x3af   :  { %v2922_v4 = vadd.f32 %v2890_v12, %v2826_v3  ;;  %v6553_v6 = vpop.permute.xlu0 %6552  ;;  %4906 = vmatmul.bf16.gmra.mxu2 %v4544_v57  ;;  %vm10750_vm12 = vmmov %vm10744_vm5 }
 0x3b0   :  { %v6555_v42 = vunpack.i.h.bf16 %v6553_v6  ;;  %v6554_v35 = vunpack.i.l.bf16 %v6553_v6 }
 0x3b1   :  { %v2954_v60 = vmax.f32 %v2922_v4, 0.0  ;;  %v4867_v1 = vpop.f32.mrf.mxu2 }
 0x3b2   :  { %v4341_v43 = vsel %vm10741_vm2, %v6799_v19, %v6555_v42  ;;  %v4340_v40 = vsel %vm10742_vm10, %v3332_v53, %v6554_v35  ;;  %v4778_v49 = vpop.f32.mrf.mxu1  ;;  %vm10751_vm2 = vmmov %vm10744_vm5 }
 0x3b3   :  { %2986 = vst [vmem:[#allocation6 + $0x50] sm:$0xff] %v2954_v60  ;;  %v4372_v25 = vsel %vm10743_vm14, %v4340_v40, %v6564_v29  ;;  %v4373_v5 = vsel %vm10744_vm5, %v4341_v43, %v6565_v11  ;;  %v4779_v58 = vadd.f32 %v9427_v44, %v4778_v49  ;;  %v6801_v60 = vld [vmem:[#allocation2 + $0xd8] sm:$0xff]  ;;  %vm10752_vm10 = vmmov %vm10746_vm0 }
 0x3b4   :  { %v2827_v38 = vpop.f32.mrf.mxu3  ;;  %v4404_v55 = vsel %vm10745_vm9, %v4372_v25, %v6574_v61  ;;  %v4405_v22 = vsel %vm10746_vm0, %v4373_v5, %v6575_v7  ;;  %vm10753_vm14 = vmmov %vm10746_vm0 }
 0x3b5   :  { %v2828_v54 = vadd.f32 %v9256_v13, %v2827_v38  ;;  %v4543_v52 = vpack.c.bf16 %v4405_v22, %v4404_v55  ;;  %v9542_v2 = vadd.f32 %v4867_v1, %v4779_v58  ;;  %v6598_v46 = vpop.permute.xlu2 %6597  ;;  %v2893_v22 = vld [vmem:[#allocation3 + $0x68] sm:$0xff]  ;;  %vm10755_vm5 = vmmov %vm10749_vm3 }
 0x3b6   :  { %v6588_v34 = vpop.permute.xlu1 %6587  ;;  %v6600_v30 = vunpack.i.h.bf16 %v6598_v46  ;;  %v6599_v47 = vunpack.i.l.bf16 %v6598_v46  ;;  %vm10756_vm9 = vmmov %vm10749_vm3 }
 0x3b7   :  { %v2923_v12 = vadd.f32 %v2891_v59, %v2828_v54  ;;  %v6578_v3 = vpop.permute.xlu0 %6577  ;;  %v6590_v36 = vunpack.i.h.bf16 %v6588_v34  ;;  %v6589_v4 = vunpack.i.l.bf16 %v6588_v34  ;;  %v3334_v59 = vsel %vm10622_vm15, %v6802_v45, 0.0  ;;  %vm10757_vm15 = vmmov %vm10751_vm2 }
 0x3b8   :  { %4817 = vmatmul.bf16.gmra.mxu1 %v4543_v52  ;;  %v6580_v0 = vunpack.i.h.bf16 %v6578_v3  ;;  %v6579_v63 = vunpack.i.l.bf16 %v6578_v3  ;;  %vm10758_vm0 = vmmov %vm10751_vm2 }
 0x3b9   :  { %v2955_v18 = vmax.f32 %v2923_v12, 0.0  ;;  %5516 = vmatmul.msk.bf16.gmra.mxu3 %vm10747_vm4, %v2721_v27  ;;  %v4869_v61 = vpop.f32.mrf.mxu2  ;;  %v6803_v12 = vld [vmem:[#allocation2 + $0xcf] sm:$0xff]  ;;  %vm10759_vm4 = vmmov %vm10752_vm10 }
 0x3ba   :  { %v4439_v57 = vsel %vm10748_vm7, %v6800_v41, %v6580_v0  ;;  %v4438_v24 = vsel %vm10749_vm3, %v6801_v60, %v6579_v63  ;;  %v4780_v50 = vpop.f32.mrf.mxu1  ;;  %vm10760_vm7 = vmmov %vm10759_vm4 }
 0x3bb   :  { %2987 = vst [vmem:[#allocation6 + $0x58] sm:$0xff] %v2955_v18  ;;  %v4470_v6 = vsel %vm10750_vm12, %v4438_v24, %v6589_v4  ;;  %v4471_v62 = vsel %vm10751_vm2, %v4439_v57, %v6590_v36  ;;  %v4781_v42 = vadd.f32 %v9427_v44, %v4780_v50  ;;  %v5716_v50 = vld [vmem:[%s9788_s5] sm:$0xff]  ;;  %vm10762_vm12 = vmmov %vm10749_vm3 }
 0x3bc   :  { %v2830_v56 = vpop.f32.mrf.mxu3  ;;  %v4502_v35 = vsel %vm10752_vm10, %v4470_v6, %v6599_v47  ;;  %v4503_v10 = vsel %vm10753_vm14, %v4471_v62, %v6600_v30  ;;  %v2894_v6 = vld [vmem:[#allocation3 + $0x70] sm:$0xff]  ;;  %v10761_v62 = vld [vmem:[#allocation72_spill] sm:$0xff]  ;;  %vm10764_vm2 = vmmov %vm10749_vm3  ;;  %5144 = vmatpush.bf16.msra.mxu0 %v5716_v50 }
 0x3bd   :  { %v2831_v53 = vadd.f32 %v9256_v13, %v2830_v56  ;;  %v9553_v48 = vadd.f32 %v4869_v61, %v4781_v42  ;;  %v4547_v11 = vpack.c.bf16 %v4503_v10, %v4502_v35  ;;  %v6603_v54 = vpop.permute.xlu2 %6602  ;;  %v10763_v42 = vld [vmem:[#allocation54_spill] sm:$0xff]  ;;  %vm10765_vm10 = vmmov %vm10758_vm0 }
 0x3be   :  { %v6593_v49 = vpop.permute.xlu1 %6592  ;;  %v6605_v5 = vunpack.i.h.bf16 %v6603_v54  ;;  %v6604_v58 = vunpack.i.l.bf16 %v6603_v54  ;;  %vm10766_vm14 = vmmov %vm10758_vm0 }
 0x3bf   :  { %v2924_v7 = vadd.f32 %v2892_v31, %v2831_v53  ;;  %v6583_v19 = vpop.permute.xlu0 %6582  ;;  %v6595_v44 = vunpack.i.h.bf16 %v6593_v49  ;;  %v6594_v25 = vunpack.i.l.bf16 %v6593_v49  ;;  %4911 = vmatmul.bf16.gmra.mxu2 %v4547_v11 }
 0x3c0   :  { %v6585_v43 = vunpack.i.h.bf16 %v6583_v19  ;;  %v6584_v40 = vunpack.i.l.bf16 %v6583_v19  ;;  %v6804_v19 = vld [vmem:[#allocation2 + $0xd7] sm:$0xff] }
 0x3c1   :  { %v2956_v29 = vmax.f32 %v2924_v7, 0.0 }
 0x3c2   :  { %v4343_v27 = vsel %vm10755_vm5, %v6803_v12, %v6585_v43  ;;  %v4342_v1 = vsel %vm10756_vm9, %v3334_v59, %v6584_v40  ;;  %vm10767_vm5 = vmmov %vm10759_vm4  ;;  %v3336_v43 = vsel %vm10646_vm6, %v6804_v19, 0.0  ;;  %v2895_v12 = vld [vmem:[#allocation3 + $0x78] sm:$0xff] }
 0x3c3   :  { %2988 = vst [vmem:[#allocation6 + $0x60] sm:$0xff] %v2956_v29  ;;  %v4374_v18 = vsel %vm10757_vm15, %v4342_v1, %v6594_v25  ;;  %v4375_v3 = vsel %vm10758_vm0, %v4343_v27, %v6595_v44  ;;  %vm10768_vm9 = vmmov %vm10759_vm4  ;;  %v6805_v27 = vld [vmem:[#allocation2 + $0xdf] sm:$0xff] }
 0x3c4   :  { %v2832_v55 = vpop.f32.mrf.mxu3  ;;  %v4406_v46 = vsel %vm10759_vm4, %v4374_v18, %v6604_v58  ;;  %v4407_v0 = vsel %vm10760_vm7, %v4375_v3, %v6605_v5  ;;  %vm10769_vm15 = vmmov %vm10764_vm2 }
 0x3c5   :  { %v2833_v52 = vadd.f32 %v9256_v13, %v2832_v55  ;;  %v4546_v34 = vpack.c.bf16 %v4407_v0, %v4406_v46  ;;  %v6628_v31 = vpop.permute.xlu2 %6627  ;;  %vm10770_vm0 = vmmov %vm10764_vm2 }
 0x3c6   :  { %v6618_v56 = vpop.permute.xlu1 %6617  ;;  %v6630_v60 = vunpack.i.h.bf16 %v6628_v31  ;;  %v6629_v24 = vunpack.i.l.bf16 %v6628_v31  ;;  %vm10771_vm6 = vmmov %vm10765_vm10 }
 0x3c7   :  { %v2925_v63 = vadd.f32 %v2893_v22, %v2833_v52  ;;  %v6608_v47 = vpop.permute.xlu0 %6607  ;;  %v6620_v41 = vunpack.i.h.bf16 %v6618_v56  ;;  %v6619_v57 = vunpack.i.l.bf16 %v6618_v56  ;;  %vm10772_vm4 = vmmov %vm10771_vm6 }
 0x3c8   :  { %4822 = vmatmul.bf16.gmra.mxu1 %v4546_v34  ;;  %v6610_v36 = vunpack.i.h.bf16 %v6608_v47  ;;  %v6609_v4 = vunpack.i.l.bf16 %v6608_v47  ;;  %vm10773_vm7 = vmmov %vm10767_vm5 }
 0x3c9   :  { %v2957_v30 = vmax.f32 %v2925_v63, 0.0  ;;  %5517 = vmatmul.msk.bf16.gmra.mxu3 %vm10749_vm3, %v9391_v8  ;;  %vm10774_vm3 = vmmov %vm10767_vm5 }
 0x3ca   :  { %v4441_v8 = vsel %vm10762_vm12, %v10761_v62, %v6610_v36  ;;  %v4440_v35 = vsel %vm10764_vm2, %v10763_v42, %v6609_v4  ;;  %v10775_v36 = vld [vmem:[#allocation36_spill] sm:$0xff]  ;;  %vm10776_vm12 = vmmov %vm10770_vm0  ;;  %v2896_v62 = vld [vmem:[#allocation3 + $0x80] sm:$0xff] }
 0x3cb   :  { %2989 = vst [vmem:[#allocation6 + $0x68] sm:$0xff] %v2957_v30  ;;  %v4472_v7 = vsel %vm10765_vm10, %v4440_v35, %v6619_v57  ;;  %v4473_v61 = vsel %vm10766_vm14, %v4441_v8, %v6620_v41  ;;  %vm10777_vm2 = vmmov %vm10770_vm0 }
 0x3cc   :  { %v2835_v53 = vpop.f32.mrf.mxu3  ;;  %v4504_v11 = vsel %vm10767_vm5, %v4472_v7, %v6629_v24  ;;  %v4505_v29 = vsel %vm10768_vm9, %v4473_v61, %v6630_v60  ;;  %vm10778_vm10 = vmmov %vm10770_vm0 }
 0x3cd   :  { %v2836_v10 = vadd.f32 %v9256_v13, %v2835_v53  ;;  %v4550_v38 = vpack.c.bf16 %v4505_v29, %v4504_v11  ;;  %vm10779_vm14 = vmmov %vm10772_vm4 }
 0x3ce   :  { %v6623_v13 = vpop.permute.xlu1 %6622  ;;  %vm10780_vm5 = vmmov %vm10772_vm4 }
 0x3cf   :  { %v2926_v45 = vadd.f32 %v2894_v6, %v2836_v10  ;;  %v6613_v40 = vpop.permute.xlu0 %6612  ;;  %v6633_v44 = vpop.permute.xlu2 %6632  ;;  %v6625_v25 = vunpack.i.h.bf16 %v6623_v13  ;;  %v6624_v5 = vunpack.i.l.bf16 %v6623_v13  ;;  %4916 = vmatmul.bf16.gmra.mxu2 %v4550_v38  ;;  %vm10781_vm9 = vmmov %vm10774_vm3 }
 0x3d0   :  { %v6615_v49 = vunpack.i.h.bf16 %v6613_v40  ;;  %v6614_v54 = vunpack.i.l.bf16 %v6613_v40  ;;  %v6635_v58 = vunpack.i.h.bf16 %v6633_v44  ;;  %v6634_v55 = vunpack.i.l.bf16 %v6633_v44 }
 0x3d1   :  { %v2958_v59 = vmax.f32 %v2926_v45, 0.0 }
 0x3d2   :  { %v4345_v1 = vsel %vm10769_vm15, %v6805_v27, %v6615_v49  ;;  %v4344_v52 = vsel %vm10770_vm0, %v3336_v43, %v6614_v54  ;;  %vm10782_vm15 = vmmov %vm10774_vm3  ;;  %v6809_v27 = vld [vmem:[#allocation2 + $0xef] sm:$0xff] }
 0x3d3   :  { %2990 = vst [vmem:[#allocation6 + $0x70] sm:$0xff] %v2958_v59  ;;  %v4376_v3 = vsel %vm10771_vm6, %v4344_v52, %v6624_v5  ;;  %v4377_v46 = vsel %vm10772_vm4, %v4345_v1, %v6625_v25  ;;  %v6807_v59 = vld [vmem:[#allocation2 + $0xe7] sm:$0xff]  ;;  %vm10785_vm6 = vmmov %vm10777_vm2 }
 0x3d4   :  { %v2837_v22 = vpop.f32.mrf.mxu3  ;;  %v4408_v0 = vsel %vm10773_vm7, %v4376_v3, %v6634_v55  ;;  %v4409_v63 = vsel %vm10774_vm3, %v4377_v46, %v6635_v58  ;;  %v2897_v58 = vld [vmem:[#allocation3 + $0x88] sm:$0xff]  ;;  %v6808_v55 = vld [vmem:[#allocation2 + $0x41] sm:$0xff]  ;;  %vm10787_vm7 = vmmov %vm10772_vm4 }
 0x3d5   :  { %v2838_v18 = vadd.f32 %v9585_v23, %v2837_v22  ;;  %v4549_v30 = vpack.c.bf16 %v4409_v63, %v4408_v0  ;;  %v10783_v22 = vld [vmem:[#allocation9_spill] sm:$0xff] }
 0x3d6   :  { %vm10784_vm0 = vnez %v10783_v22  ;;  %v6813_v22 = vld [vmem:[#allocation2 + $0xff] sm:$0xff] }
 0x3d7   :  { %v2927_v34 = vadd.f32 %v2895_v12, %v2838_v18  ;;  %v6638_v4 = vpop.permute.xlu0 %6637  ;;  %v6658_v57 = vpop.permute.xlu2 %6657  ;;  %v3549_v12 = vsel %vm10784_vm0, %v6808_v55, 0.0  ;;  %vm10794_vm0 = vmmov %vm10774_vm3 }
 0x3d8   :  { %4827 = vmatmul.bf16.gmra.mxu1 %v4549_v30  ;;  %v6640_v56 = vunpack.i.h.bf16 %v6638_v4  ;;  %v6639_v31 = vunpack.i.l.bf16 %v6638_v4  ;;  %v6660_v50 = vunpack.i.h.bf16 %v6658_v57  ;;  %v6659_v53 = vunpack.i.l.bf16 %v6658_v57 }
 0x3d9   :  { %v2959_v47 = vmax.f32 %v2927_v34, 0.0  ;;  %5622 = vmatmul.msk.bf16.vlgmr.msra.gmra.mxu3 %vm10776_vm12, %v10775_v36  ;;  %v6648_v41 = vpop.permute.xlu1 %6647  ;;  %vm10788_vm12 = vmmov %vm10774_vm3  ;;  %v6810_v34 = vld [vmem:[#allocation2 + $0x39] sm:$0xff] }
 0x3da   :  { %v6650_v60 = vunpack.i.h.bf16 %v6648_v41  ;;  %v6649_v24 = vunpack.i.l.bf16 %v6648_v41  ;;  %v4443_v8 = vsel %vm10777_vm2, %v9345_v51, %v6640_v56  ;;  %v4442_v42 = vsel %vm10778_vm10, %v9343_v17, %v6639_v31  ;;  %vm10789_vm10 = vmmov %vm10777_vm2 }
 0x3db   :  { %2991 = vst [vmem:[#allocation6 + $0x78] sm:$0xff] %v2959_v47  ;;  %v3338_v51 = vsel %vm10666_vm8, %v6807_v59, 0.0  ;;  %vm10786_vm8 = vmmov %vm10777_vm2  ;;  %v4515_v30 = vpack.c.bf16 %v3549_v12, %v6810_v34  ;;  %v6811_v59 = vld [vmem:[#allocation2 + $0xf7] sm:$0xff] }
 0x3dc   :  { %v2840_v6 = vpop.f32.mrf.mxu3  ;;  %v4474_v10 = vsel %vm10779_vm14, %v4442_v42, %v6649_v24  ;;  %v4475_v7 = vsel %vm10780_vm5, %v4443_v8, %v6650_v60  ;;  %vm10790_vm14 = vmmov %vm10777_vm2 }
 0x3dd   :  { %v2841_v35 = vadd.f32 %v9585_v23, %v2840_v6  ;;  %v4506_v61 = vsel %vm10781_vm9, %v4474_v10, %v6659_v53  ;;  %v4507_v11 = vsel %vm10782_vm15, %v4475_v7, %v6660_v50  ;;  %vm10791_vm5 = vmmov %vm10772_vm4 }
 0x3de   :  { %v4553_v45 = vpack.c.bf16 %v4507_v11, %v4506_v61  ;;  %vm10792_vm9 = vmmov %vm10772_vm4 }
 0x3df   :  { %v2928_v29 = vadd.f32 %v2896_v62, %v2841_v35  ;;  %v6643_v19 = vpop.permute.xlu0 %6642  ;;  %v6663_v49 = vpop.permute.xlu2 %6662  ;;  %v2898_v62 = vld [vmem:[#allocation3 + $0x90] sm:$0xff]  ;;  %vm10793_vm15 = vmmov %vm10774_vm3 }
 0x3e0   :  { %v6645_v43 = vunpack.i.h.bf16 %v6643_v19  ;;  %v6644_v17 = vunpack.i.l.bf16 %v6643_v19  ;;  %v6665_v44 = vunpack.i.h.bf16 %v6663_v49  ;;  %v6664_v25 = vunpack.i.l.bf16 %v6663_v49  ;;  %4921 = vmatmul.bf16.gmra.mxu2 %v4553_v45 }
 0x3e1   :  { %v2960_v38 = vmax.f32 %v2928_v29, 0.0  ;;  %v6653_v40 = vpop.permute.xlu1 %6652 }
 0x3e2   :  { %v6655_v54 = vunpack.i.h.bf16 %v6653_v40  ;;  %v6654_v13 = vunpack.i.l.bf16 %v6653_v40  ;;  %v4347_v37 = vsel %vm10785_vm6, %v6809_v27, %v6645_v43  ;;  %v4346_v1 = vsel %vm10786_vm8, %v3338_v51, %v6644_v17  ;;  %vm10797_vm8 = vmmov %vm10777_vm2 }
 0x3e3   :  { %2992 = vst [vmem:[#allocation6 + $0x80] sm:$0xff] %v2960_v38 }
 0x3e4   :  { %v2842_v5 = vpop.f32.mrf.mxu3  ;;  %v4378_v18 = vsel %vm10772_vm4, %v4346_v1, %v6654_v13  ;;  %v4379_v3 = vsel %vm10787_vm7, %v4347_v37, %v6655_v54  ;;  %vm10799_vm7 = vmmov %vm10772_vm4 }
 0x3e5   :  { %v2843_v52 = vadd.f32 %v9585_v23, %v2842_v5  ;;  %v4410_v46 = vsel %vm10774_vm3, %v4378_v18, %v6664_v25  ;;  %v4411_v0 = vsel %vm10788_vm12, %v4379_v3, %v6665_v44  ;;  %v2899_v25 = vld [vmem:[#allocation3 + $0x98] sm:$0xff]  ;;  %v6812_v5 = vld [vmem:[#allocation2 + $0x51] sm:$0xff]  ;;  %vm10800_vm3 = vmmov %vm10794_vm0 }
 0x3e6   :  { %v4552_v47 = vpack.c.bf16 %v4411_v0, %v4410_v46  ;;  %vm10801_vm12 = vmmov %vm10794_vm0  ;;  %v6814_v46 = vld [vmem:[#allocation2 + $0x49] sm:$0xff] }
 0x3e7   :  { %v2929_v63 = vadd.f32 %v2897_v58, %v2843_v52  ;;  %v6673_v4 = vpop.permute.xlu0 %6672  ;;  %v6668_v57 = vpop.permute.xlu2 %6667  ;;  %v10795_v58 = vld [vmem:[#allocation10_spill] sm:$0xff] }
 0x3e8   :  { %4832 = vmatmul.bf16.gmra.mxu1 %v4552_v47  ;;  %v6675_v56 = vunpack.i.h.bf16 %v6673_v4  ;;  %v6674_v31 = vunpack.i.l.bf16 %v6673_v4  ;;  %v6670_v50 = vunpack.i.h.bf16 %v6668_v57  ;;  %v6669_v53 = vunpack.i.l.bf16 %v6668_v57  ;;  %v2900_v47 = vld [vmem:[#allocation3 + $0xa0] sm:$0xff]  ;;  %v6815_v57 = vld [vmem:[#allocation2 + $0x61] sm:$0xff] }
 0x3e9   :  { %v2961_v36 = vmax.f32 %v2929_v63, 0.0  ;;  %5623 = vmatmul.msk.bf16.gmra.mxu3 %vm10777_vm2, %v4515_v30  ;;  %v6678_v41 = vpop.permute.xlu1 %6677  ;;  %vm10796_vm6 = vnez %v10795_v58  ;;  %v10808_v58 = vld [vmem:[#allocation16_spill] sm:$0xff] }
 0x3ea   :  { %v6680_v60 = vunpack.i.h.bf16 %v6678_v41  ;;  %v6679_v24 = vunpack.i.l.bf16 %v6678_v41  ;;  %v4445_v8 = vsel %vm10789_vm10, %v9404_v20, %v6675_v56  ;;  %v4444_v42 = vsel %vm10790_vm14, %v9402_v33, %v6674_v31  ;;  %v2901_v41 = vld [vmem:[#allocation3 + $0xa8] sm:$0xff]  ;;  %vm10804_vm14 = vmmov %vm10777_vm2 }
 0x3eb   :  { %2993 = vst [vmem:[#allocation6 + $0x88] sm:$0xff] %v2961_v36  ;;  %v3340_v20 = vsel %vm10685_vm13, %v6811_v59, 0.0  ;;  %v3551_v55 = vsel %vm10796_vm6, %v6812_v5, 0.0  ;;  %vm10798_vm13 = vmmov %vm10777_vm2  ;;  %v6819_v5 = vld [vmem:[#allocation2 + $0x81] sm:$0xff] }
 0x3ec   :  { %v2845_v6 = vpop.f32.mrf.mxu3  ;;  %v4476_v10 = vsel %vm10791_vm5, %v4444_v42, %v6679_v24  ;;  %v4477_v7 = vsel %vm10792_vm9, %v4445_v8, %v6680_v60  ;;  %v4518_v0 = vpack.c.bf16 %v3551_v55, %v6814_v46  ;;  %v10802_v60 = vld [vmem:[#allocation12_spill] sm:$0xff]  ;;  %vm10807_vm9 = vmmov %vm10777_vm2 }
 0x3ed   :  { %v2846_v35 = vadd.f32 %v9585_v23, %v2845_v6  ;;  %v4508_v61 = vsel %vm10793_vm15, %v4476_v10, %v6669_v53  ;;  %v4509_v11 = vsel %vm10794_vm0, %v4477_v7, %v6670_v50  ;;  %vm10803_vm10 = vnez %v10802_v60  ;;  %v6816_v6 = vld [vmem:[#allocation2 + $0x59] sm:$0xff]  ;;  %vm10810_vm0 = vmmov %vm10777_vm2  ;;  %v2908_v60 = vld [vmem:[#allocation3 + $0xe0] sm:$0xff] }
 0x3ee   :  { %v4556_v45 = vpack.c.bf16 %v4509_v11, %v4508_v61  ;;  %v3553_v24 = vsel %vm10803_vm10, %v6815_v57, 0.0  ;;  %vm10809_vm15 = vnez %v10808_v58  ;;  %vm10825_vm10 = vmmov %vm10810_vm0 }
 0x3ef   :  { %v2930_v29 = vadd.f32 %v2898_v62, %v2846_v35  ;;  %v6683_v51 = vpop.permute.xlu0 %6682  ;;  %v6693_v17 = vpop.permute.xlu2 %6692  ;;  %v4521_v62 = vpack.c.bf16 %v3553_v24, %v6816_v6  ;;  %v2902_v35 = vld [vmem:[#allocation3 + $0xb0] sm:$0xff]  ;;  %v3557_v55 = vsel %vm10809_vm15, %v6819_v5, 0.0  ;;  %vm10830_vm15 = vmmov %vm10810_vm0 }
 0x3f0   :  { %v6685_v19 = vunpack.i.h.bf16 %v6683_v51  ;;  %v6684_v33 = vunpack.i.l.bf16 %v6683_v51  ;;  %v6695_v54 = vunpack.i.h.bf16 %v6693_v17  ;;  %v6694_v13 = vunpack.i.l.bf16 %v6693_v17  ;;  %4926 = vmatmul.bf16.gmra.mxu2 %v4556_v45  ;;  %v6817_v45 = vld [vmem:[#allocation2 + $0x71] sm:$0xff] }
 0x3f1   :  { %v2962_v38 = vmax.f32 %v2930_v29, 0.0  ;;  %v6688_v43 = vpop.permute.xlu1 %6687  ;;  %v2903_v29 = vld [vmem:[#allocation3 + $0xb8] sm:$0xff] }
 0x3f2   :  { %v6690_v40 = vunpack.i.h.bf16 %v6688_v43  ;;  %v6689_v49 = vunpack.i.l.bf16 %v6688_v43  ;;  %v4349_v16 = vsel %vm10797_vm8, %v6813_v22, %v6685_v19  ;;  %v4348_v12 = vsel %vm10798_vm13, %v3340_v20, %v6684_v33  ;;  %v6818_v19 = vld [vmem:[#allocation2 + $0x69] sm:$0xff]  ;;  %vm10813_vm8 = vmmov %vm10810_vm0 }
 0x3f3   :  { %2994 = vst [vmem:[#allocation6 + $0x90] sm:$0xff] %v2962_v38  ;;  %v10805_v38 = vld [vmem:[#allocation13_spill] sm:$0xff] }
 0x3f4   :  { %v2847_v44 = vpop.f32.mrf.mxu3  ;;  %v4380_v37 = vsel %vm10772_vm4, %v4348_v12, %v6689_v49  ;;  %v4381_v1 = vsel %vm10799_vm7, %v4349_v16, %v6690_v40  ;;  %vm10806_vm5 = vnez %v10805_v38  ;;  %v2904_v40 = vld [vmem:[#allocation3 + $0xc0] sm:$0xff]  ;;  %v6820_v12 = vld [vmem:[#allocation2 + $0x79] sm:$0xff]  ;;  %vm10816_vm4 = vmmov %vm10810_vm0 }
 0x3f5   :  { %v2848_v27 = vadd.f32 %v9585_v23, %v2847_v44  ;;  %v4412_v52 = vsel %vm10800_vm3, %v4380_v37, %v6694_v13  ;;  %v4413_v18 = vsel %vm10801_vm12, %v4381_v1, %v6695_v54  ;;  %v3555_v59 = vsel %vm10806_vm5, %v6817_v45, 0.0  ;;  %v2910_v38 = vld [vmem:[#allocation3 + $0xf0] sm:$0xff]  ;;  %vm10818_vm7 = vmmov %vm10810_vm0 }
 0x3f6   :  { %v4555_v63 = vpack.c.bf16 %v4413_v18, %v4412_v52  ;;  %v4524_v33 = vpack.c.bf16 %v3555_v59, %v6818_v19  ;;  %v2906_v52 = vld [vmem:[#allocation3 + $0xd0] sm:$0xff]  ;;  %vm10822_vm12 = vmmov %vm10810_vm0 }
 0x3f7   :  { %v2931_v3 = vadd.f32 %v2899_v25, %v2848_v27  ;;  %v2905_v25 = vld [vmem:[#allocation3 + $0xc8] sm:$0xff]  ;;  %v4527_v27 = vpack.c.bf16 %v3557_v55, %v6820_v12 }
 0x3f8   :  { %4837 = vmatmul.bf16.gmra.mxu1 %v4555_v63  ;;  %v2907_v63 = vld [vmem:[#allocation3 + $0xd8] sm:$0xff] }
 0x3f9   :  { %v2963_v34 = vmax.f32 %v2931_v3, 0.0  ;;  %5624 = vmatmul.msk.bf16.gmra.mxu3 %vm10777_vm2, %v4518_v0 }
 0x3fb   :  { %2995 = vst [vmem:[#allocation6 + $0x98] sm:$0xff] %v2963_v34  ;;  %v6821_v34 = vld [vmem:[#allocation2 + $0x91] sm:$0xff] }
 0x3fc   :  { %v2850_v30 = vpop.f32.mrf.mxu3 }
 0x3fd   :  { %v2851_v36 = vadd.f32 %v9585_v23, %v2850_v30  ;;  %v10811_v30 = vld [vmem:[#allocation22_spill] sm:$0xff] }
 0x3fe   :  { %vm10812_vm6 = vnez %v10811_v30 }
 0x3ff   :  { %v2932_v4 = vadd.f32 %v2900_v47, %v2851_v36  ;;  %v3559_v47 = vsel %vm10812_vm6, %v6821_v34, 0.0 }
 0x401   :  { %v2964_v56 = vmax.f32 %v2932_v4, 0.0 }
 0x403   :  { %2996 = vst [vmem:[#allocation6 + $0xa0] sm:$0xff] %v2964_v56  ;;  %v6822_v56 = vld [vmem:[#allocation2 + $0x89] sm:$0xff] }
 0x404   :  { %v2852_v31 = vpop.f32.mrf.mxu3 }
 0x405   :  { %v2853_v50 = vadd.f32 %v9585_v23, %v2852_v31  ;;  %v4530_v31 = vpack.c.bf16 %v3559_v47, %v6822_v56  ;;  %v6829_v47 = vld [vmem:[#allocation2 + $0xd1] sm:$0xff] }
 0x407   :  { %v2933_v53 = vadd.f32 %v2901_v41, %v2853_v50 }
 0x409   :  { %v2965_v8 = vmax.f32 %v2933_v53, 0.0  ;;  %5625 = vmatmul.msk.bf16.gmra.mxu3 %vm10804_vm14, %v4521_v62  ;;  %v2909_v62 = vld [vmem:[#allocation3 + $0xe8] sm:$0xff]  ;;  %vm10826_vm14 = vmmov %vm10810_vm0 }
 0x40b   :  { %2997 = vst [vmem:[#allocation6 + $0xa8] sm:$0xff] %v2965_v8  ;;  %v6823_v8 = vld [vmem:[#allocation2 + $0xa1] sm:$0xff] }
 0x40c   :  { %v2855_v42 = vpop.f32.mrf.mxu3 }
 0x40d   :  { %v2856_v10 = vadd.f32 %v9585_v23, %v2855_v42  ;;  %v10814_v42 = vld [vmem:[#allocation33_spill] sm:$0xff] }
 0x40e   :  { %vm10815_vm13 = vnez %v10814_v42  ;;  %v10827_v42 = vld [vmem:[#allocation65_spill] sm:$0xff] }
 0x40f   :  { %v2934_v7 = vadd.f32 %v2902_v35, %v2856_v10  ;;  %v3561_v35 = vsel %vm10815_vm13, %v6823_v8, 0.0  ;;  %v6831_v8 = vld [vmem:[#allocation2 + $0xe1] sm:$0xff]  ;;  %vm10828_vm5 = vnez %v10827_v42  ;;  %v6839_v42 = vld [vmem:[#allocation2 + $0x109] sm:$0xff] }
 0x411   :  { %v2966_v61 = vmax.f32 %v2934_v7, 0.0 }
 0x413   :  { %2998 = vst [vmem:[#allocation6 + $0xb0] sm:$0xff] %v2966_v61  ;;  %v6824_v61 = vld [vmem:[#allocation2 + $0x99] sm:$0xff] }
 0x414   :  { %v2857_v11 = vpop.f32.mrf.mxu3 }
 0x415   :  { %v2858_v20 = vadd.f32 %v9585_v23, %v2857_v11  ;;  %v4533_v11 = vpack.c.bf16 %v3561_v35, %v6824_v61  ;;  %v6832_v61 = vld [vmem:[#allocation2 + $0xd9] sm:$0xff] }
 0x417   :  { %v2935_v51 = vadd.f32 %v2903_v29, %v2858_v20 }
 0x419   :  { %v2967_v43 = vmax.f32 %v2935_v51, 0.0  ;;  %5626 = vmatmul.msk.bf16.gmra.mxu3 %vm10807_vm9, %v4524_v33  ;;  %v2911_v33 = vld [vmem:[#allocation3 + $0xf8] sm:$0xff]  ;;  %vm10829_vm9 = vmmov %vm10810_vm0 }
 0x41b   :  { %2999 = vst [vmem:[#allocation6 + $0xb8] sm:$0xff] %v2967_v43  ;;  %v6825_v43 = vld [vmem:[#allocation2 + $0xb1] sm:$0xff] }
 0x41c   :  { %v2860_v17 = vpop.f32.mrf.mxu3 }
 0x41d   :  { %v2861_v49 = vadd.f32 %v9585_v23, %v2860_v17 }
 0x41f   :  { %v2936_v54 = vadd.f32 %v2904_v40, %v2861_v49  ;;  %v3563_v40 = vsel %vm10541_vm1, %v6825_v43, 0.0  ;;  %vm10821_vm1 = vmmov %vm10810_vm0 }
 0x420   :  { %vm10833_vm6 = vmmov %vm10821_vm1 }
 0x421   :  { %v2968_v13 = vmax.f32 %v2936_v54, 0.0 }
 0x423   :  { %3000 = vst [vmem:[#allocation6 + $0xc0] sm:$0xff] %v2968_v13  ;;  %v6826_v13 = vld [vmem:[#allocation2 + $0xa9] sm:$0xff] }
 0x424   :  { %v2862_v44 = vpop.f32.mrf.mxu3 }
 0x425   :  { %v2863_v22 = vadd.f32 %v9585_v23, %v2862_v44  ;;  %v4536_v44 = vpack.c.bf16 %v3563_v40, %v6826_v13 }
 0x427   :  { %v2937_v16 = vadd.f32 %v2905_v25, %v2863_v22  ;;  %v6827_v22 = vld [vmem:[#allocation2 + $0xc1] sm:$0xff] }
 0x429   :  { %v2969_v37 = vmax.f32 %v2937_v16, 0.0  ;;  %5627 = vmatmul.msk.bf16.gmra.mxu3 %vm10810_vm0, %v4527_v27  ;;  %v10819_v16 = vld [vmem:[#allocation48_spill] sm:$0xff] }
 0x42a   :  { %vm10820_vm3 = vnez %v10819_v16 }
 0x42b   :  { %3001 = vst [vmem:[#allocation6 + $0xc8] sm:$0xff] %v2969_v37  ;;  %v3565_v12 = vsel %vm10820_vm3, %v6827_v22, 0.0  ;;  %v4783_v37 = vpop.f32.mrf.mxu1  ;;  %vm10839_vm3 = vnez %v10660_v14 }
 0x42c   :  { %v2865_v1 = vpop.f32.mrf.mxu3 }
 0x42d   :  { %v2866_v18 = vadd.f32 %v9585_v23, %v2865_v1 }
 0x42f   :  { %v2938_v3 = vadd.f32 %v2906_v52, %v2866_v18  ;;  %v6828_v52 = vld [vmem:[#allocation2 + $0xb9] sm:$0xff] }
 0x430   :  { %v4539_v18 = vpack.c.bf16 %v3565_v12, %v6828_v52 }
 0x431   :  { %v2970_v46 = vmax.f32 %v2938_v3, 0.0 }
 0x433   :  { %3002 = vst [vmem:[#allocation6 + $0xd0] sm:$0xff] %v2970_v46  ;;  %v4872_v46 = vpop.f32.mrf.mxu2 }
 0x434   :  { %v2867_v0 = vpop.f32.mrf.mxu3 }
 0x435   :  { %v2868_v36 = vadd.f32 %v9585_v23, %v2867_v0 }
 0x437   :  { %v2939_v4 = vadd.f32 %v2907_v63, %v2868_v36  ;;  %v10823_v36 = vld [vmem:[#allocation57_spill] sm:$0xff] }
 0x438   :  { %vm10824_vm2 = vnez %v10823_v36 }
 0x439   :  { %v2971_v41 = vmax.f32 %v2939_v4, 0.0  ;;  %5628 = vmatmul.msk.bf16.gmra.mxu3 %vm10813_vm8, %v4530_v31  ;;  %vm10834_vm8 = vmmov %vm10821_vm1 }
 0x43b   :  { %3003 = vst [vmem:[#allocation6 + $0xd8] sm:$0xff] %v2971_v41  ;;  %v4874_v34 = vpop.f32.mrf.mxu2  ;;  %v6830_v41 = vld [vmem:[#allocation2 + $0xc9] sm:$0xff] }
 0x43c   :  { %v2870_v57 = vpop.f32.mrf.mxu3 }
 0x43d   :  { %v2871_v24 = vadd.f32 %v9585_v23, %v2870_v57 }
 0x43f   :  { %v2940_v50 = vadd.f32 %v2908_v60, %v2871_v24 }
 0x441   :  { %v2972_v53 = vmax.f32 %v2940_v50, 0.0 }
 0x443   :  { %3004 = vst [vmem:[#allocation6 + $0xe0] sm:$0xff] %v2972_v53 }
 0x444   :  { %v2872_v6 = vpop.f32.mrf.mxu3 }
 0x445   :  { %v2873_v10 = vadd.f32 %v9585_v23, %v2872_v6 }
 0x447   :  { %v2941_v7 = vadd.f32 %v2909_v62, %v2873_v10 }
 0x449   :  { %v2973_v29 = vmax.f32 %v2941_v7, 0.0  ;;  %5629 = vmatmul.msk.bf16.gmra.mxu3 %vm10816_vm4, %v4533_v11  ;;  %vm10837_vm4 = vmmov %vm10821_vm1 }
 0x44b   :  { %3005 = vst [vmem:[#allocation6 + $0xe8] sm:$0xff] %v2973_v29 }
 0x44c   :  { %v2875_v45 = vpop.f32.mrf.mxu3 }
 0x44d   :  { %v2876_v59 = vadd.f32 %v9585_v23, %v2875_v45 }
 0x44f   :  { %v2942_v20 = vadd.f32 %v2910_v38, %v2876_v59 }
 0x451   :  { %v2974_v51 = vmax.f32 %v2942_v20, 0.0 }
 0x453   :  { %3006 = vst [vmem:[#allocation6 + $0xf0] sm:$0xff] %v2974_v51 }
 0x454   :  { %v2877_v19 = vpop.f32.mrf.mxu3 }
 0x455   :  { %v2878_v49 = vadd.f32 %v9585_v23, %v2877_v19  ;;  %v6833_v19 = vld [vmem:[#allocation2 + $0xf1] sm:$0xff] }
 0x457   :  { %v2943_v54 = vadd.f32 %v2911_v33, %v2878_v49  ;;  %v10831_v33 = vld [vmem:[#allocation70_spill] sm:$0xff]  ;;  %v6834_v49 = vld [vmem:[#allocation2 + $0xe9] sm:$0xff] }
 0x458   :  { %vm10832_vm0 = vnez %v10831_v33 }
 0x459   :  { %v2975_v25 = vmax.f32 %v2943_v54, 0.0  ;;  %5630 = vmatmul.msk.bf16.gmra.mxu3 %vm10818_vm7, %v4536_v44  ;;  %vm10838_vm7 = vmmov %vm10821_vm1 }
 0x45b   :  { %3007 = vst [vmem:[#allocation6 + $0xf8] sm:$0xff] %v2975_v25 }
 0x45c   :  { %v4941_v5 = vpop.f32.mrf.mxu3 }
 0x45d   :  { %v4942_v58 = vadd.f32 %v4941_v5, %v9445_v15  ;;  %v4785_v15 = vpop.f32.mrf.mxu1 }
 0x45f   :  { %v5021_v1 = vmax.f32 %v4942_v58, 0.0 }
 0x464   :  { %v4943_v55 = vpop.f32.mrf.mxu3 }
 0x465   :  { %v4944_v27 = vadd.f32 %v4943_v55, %v9461_v39  ;;  %v3567_v39 = vsel %vm10824_vm2, %v6829_v47, 0.0  ;;  %v4788_v24 = vpop.f32.mrf.mxu1  ;;  %vm10841_vm2 = vmmov %vm10821_vm1 }
 0x466   :  { %v4542_v57 = vpack.c.bf16 %v3567_v39, %v6830_v41 }
 0x467   :  { %v5022_v23 = vmax.f32 %v4944_v27, 0.0 }
 0x469   :  { %v5053_v3 = vpack.c.bf16 %v5022_v23, %v5021_v1  ;;  %5631 = vmatmul.msk.bf16.gmra.mxu3 %vm10821_vm1, %v4539_v18  ;;  %v6836_v1 = vld [vmem:[#allocation2 + $0x101] sm:$0xff] }
 0x46a   :  { %v10835_v23 = vld [vmem:[#allocation75_spill] sm:$0xff] }
 0x46b   :  { %5646 = vmatmul.msk.bf16.vlgmr.msra.gmra.mxu0 %vm10822_vm12, %v5053_v3  ;;  %vm10836_vm13 = vnez %v10835_v23  ;;  %vm10840_vm12 = vmmov %vm10821_vm1 }
 0x46c   :  { %v4946_v0 = vpop.f32.mrf.mxu3  ;;  %v3573_v52 = vsel %vm10836_vm13, %v6836_v1, 0.0 }
 0x46d   :  { %v4947_v63 = vadd.f32 %v4946_v0, %v9482_v9  ;;  %v4877_v9 = vpop.f32.mrf.mxu2  ;;  %v4790_v6 = vpop.f32.mrf.mxu1 }
 0x46f   :  { %v5023_v56 = vmax.f32 %v4947_v63, 0.0 }
 0x474   :  { %v4948_v30 = vpop.f32.mrf.mxu3 }
 0x475   :  { %v4949_v4 = vadd.f32 %v4948_v30, %v9498_v32  ;;  %v3569_v32 = vsel %vm10828_vm5, %v6831_v8, 0.0  ;;  %v4879_v29 = vpop.f32.mrf.mxu2  ;;  %v6837_v30 = vld [vmem:[#allocation2 + $0xf9] sm:$0xff]  ;;  %vm10845_vm5 = vmmov %vm10821_vm1 }
 0x476   :  { %v4545_v11 = vpack.c.bf16 %v3569_v32, %v6832_v61  ;;  %v4551_v47 = vpack.c.bf16 %v3573_v52, %v6837_v30 }
 0x477   :  { %v5024_v31 = vmax.f32 %v4949_v4, 0.0 }
 0x479   :  { %v5054_v60 = vpack.c.bf16 %v5024_v31, %v5023_v56  ;;  %5632 = vmatmul.msk.bf16.gmra.mxu3 %vm10825_vm10, %v4542_v57  ;;  %v6838_v57 = vld [vmem:[#allocation2 + $0x111] sm:$0xff]  ;;  %vm10842_vm10 = vmmov %vm10821_vm1 }
 0x47b   :  { %5647 = vmatmul.msk.bf16.gmra.mxu0 %vm10826_vm14, %v5054_v60  ;;  %v3575_v60 = vsel %vm10839_vm3, %v6838_v57, 0.0  ;;  %vm10844_vm14 = vmmov %vm10821_vm1 }
 0x47c   :  { %v4951_v50 = vpop.f32.mrf.mxu3  ;;  %v4554_v32 = vpack.c.bf16 %v3575_v60, %v6839_v42 }
 0x47d   :  { %v4952_v53 = vadd.f32 %v4951_v50, %v9515_v28  ;;  %v4793_v28 = vpop.f32.mrf.mxu1  ;;  %v4882_v59 = vpop.f32.mrf.mxu2 }
 0x47f   :  { %v5025_v10 = vmax.f32 %v4952_v53, 0.0 }
 0x484   :  { %v4953_v62 = vpop.f32.mrf.mxu3 }
 0x485   :  { %v4954_v35 = vadd.f32 %v4953_v62, %v9530_v26  ;;  %v3571_v26 = vsel %vm10832_vm0, %v6833_v19, 0.0  ;;  %v4795_v13 = vpop.f32.mrf.mxu1  ;;  %v4884_v25 = vpop.f32.mrf.mxu2  ;;  %vm10848_vm0 = vmmov %vm10821_vm1 }
 0x486   :  { %v4548_v54 = vpack.c.bf16 %v3571_v26, %v6834_v49  ;;  %vm10851_vm13 = vmmov %vm10848_vm0 }
 0x487   :  { %v5026_v7 = vmax.f32 %v4954_v35, 0.0 }
 0x489   :  { %v5055_v45 = vpack.c.bf16 %v5026_v7, %v5025_v10  ;;  %5633 = vmatmul.msk.bf16.gmra.mxu3 %vm10829_vm9, %v4545_v11  ;;  %v3545_v7 = vld [vmem:[#allocation2 + $0x121] sm:$0xff]  ;;  %v3544_v11 = vld [vmem:[#allocation2 + $0x119] sm:$0xff]  ;;  %vm10846_vm9 = vmmov %vm10821_vm1 }
 0x48b   :  { %5648 = vmatmul.msk.bf16.gmra.mxu0 %vm10830_vm15, %v5055_v45  ;;  %vm10847_vm15 = vmmov %vm10821_vm1 }
 0x48c   :  { %v4956_v38 = vpop.f32.mrf.mxu3 }
 0x48d   :  { %v4957_v20 = vadd.f32 %v4956_v38, %v9542_v2  ;;  %v9693_v2 = vld [vmem:[%s9787_s4] ss:$0 sm:$0xff]  ;;  %v4798_v22 = vpop.f32.mrf.mxu1  ;;  %v4887_v3 = vpop.f32.mrf.mxu2 }
 0x48e   :  { %v4784_v58 = vadd.f32 %v9693_v2, %v4783_v37  ;;  %v4796_v10 = vadd.f32 %v9693_v2, %v4795_v13 }
 0x48f   :  { %v5027_v17 = vmax.f32 %v4957_v20, 0.0 }
 0x490   :  { %v4873_v55 = vadd.f32 %v4872_v46, %v4784_v58  ;;  %v4885_v45 = vadd.f32 %v4884_v25, %v4796_v10 }
 0x494   :  { %v4958_v51 = vpop.f32.mrf.mxu3 }
 0x495   :  { %v4959_v43 = vadd.f32 %v4958_v51, %v9553_v48  ;;  %v4786_v48 = vadd.f32 %v9693_v2, %v4785_v15  ;;  %v4800_v37 = vpop.f32.mrf.mxu1  ;;  %v4789_v15 = vadd.f32 %v9693_v2, %v4788_v24  ;;  %v4889_v39 = vpop.f32.mrf.mxu2 }
 0x496   :  { %v4801_v21 = vadd.f32 %v9693_v2, %v4800_v37 }
 0x497   :  { %v5028_v40 = vmax.f32 %v4959_v43, 0.0  ;;  %v4875_v16 = vadd.f32 %v4874_v34, %v4786_v48  ;;  %v4791_v34 = vadd.f32 %v9693_v2, %v4790_v6  ;;  %v4878_v4 = vadd.f32 %v4877_v9, %v4789_v15 }
 0x498   :  { %v4794_v6 = vadd.f32 %v9693_v2, %v4793_v28  ;;  %v4890_v13 = vadd.f32 %v4889_v39, %v4801_v21 }
 0x499   :  { %v5056_v44 = vpack.c.bf16 %v5028_v40, %v5027_v17  ;;  %5634 = vmatmul.msk.bf16.gmra.mxu3 %vm10833_vm6, %v4548_v54  ;;  %v4880_v56 = vadd.f32 %v4879_v29, %v4791_v34  ;;  %v3577_v29 = vsel %vm10681_vm11, %v3545_v7, 0.0  ;;  %vm10843_vm11 = vmmov %vm10821_vm1  ;;  %v5226_v34 = vld [vmem:[#allocation3 + $0x100] sm:$0xff] }
 0x49a   :  { %v4883_v61 = vadd.f32 %v4882_v59, %v4794_v6  ;;  %v4557_v33 = vpack.c.bf16 %v3577_v29, %v3544_v11  ;;  %v4799_v59 = vadd.f32 %v9693_v2, %v4798_v22  ;;  %vm10849_vm6 = vmmov %vm10848_vm0 }
 0x49b   :  { %5649 = vmatmul.msk.bf16.gmra.mxu0 %vm10834_vm8, %v5056_v44  ;;  %vm10850_vm8 = vmmov %vm10848_vm0 }
 0x49c   :  { %v4961_v5 = vpop.f32.mrf.mxu3  ;;  %v4888_v54 = vadd.f32 %v4887_v3, %v4799_v59  ;;  %v5229_v59 = vld [vmem:[#allocation3 + $0x118] sm:$0xff] }
 0x49d   :  { %v4962_v12 = vadd.f32 %v4961_v5, %v4873_v55  ;;  %v4803_v53 = vpop.f32.mrf.mxu1  ;;  %v4892_v24 = vpop.f32.mrf.mxu2 }
 0x49e   :  { %v4804_v1 = vadd.f32 %v9693_v2, %v4803_v53 }
 0x49f   :  { %v5029_v0 = vmax.f32 %v4962_v12, 0.0 }
 0x4a0   :  { %v4893_v52 = vadd.f32 %v4892_v24, %v4804_v1 }
 0x4a4   :  { %v4963_v27 = vpop.f32.mrf.mxu3 }
 0x4a5   :  { %v4964_v18 = vadd.f32 %v4963_v27, %v4875_v16  ;;  %v4805_v14 = vpop.f32.mrf.mxu1  ;;  %v4894_v20 = vpop.f32.mrf.mxu2 }
 0x4a6   :  { %v4806_v22 = vadd.f32 %v9693_v2, %v4805_v14 }
 0x4a7   :  { %v5030_v63 = vmax.f32 %v4964_v18, 0.0 }
 0x4a8   :  { %v4895_v3 = vadd.f32 %v4894_v20, %v4806_v22 }
 0x4a9   :  { %v5057_v36 = vpack.c.bf16 %v5030_v63, %v5029_v0  ;;  %5635 = vmatmul.msk.bf16.gmra.mxu3 %vm10837_vm4, %v4551_v47  ;;  %v9721_v47 = vld [vmem:[%s9789_s6] ss:$0 sm:$0xff]  ;;  %s6899_s6 = smov [#allocation6]  }
 0x4aa   :  { %s5359_s19 = sshll.u32 %s6899_s6, 4  ;;  %s5360_s19 = int_to_ptr.vmem [resolvable:$true] %s5359_s19 }
 0x4ab   :  { %5650 = vmatmul.msk.bf16.gmra.mxu0 %vm10838_vm7, %v5057_v36 }
 0x4ac   :  { %v4966_v46 = vpop.f32.mrf.mxu3 }
 0x4ad   :  { %v4967_v31 = vadd.f32 %v4966_v46, %v4878_v4  ;;  %v4808_v28 = vpop.f32.mrf.mxu1  ;;  %v4897_v49 = vpop.f32.mrf.mxu2 }
 0x4ae   :  { %v4809_v57 = vadd.f32 %v9693_v2, %v4808_v28 }
 0x4af   :  { %v5031_v62 = vmax.f32 %v4967_v31, 0.0 }
 0x4b4   :  { %v4968_v41 = vpop.f32.mrf.mxu3 }
 0x4b5   :  { %v4969_v50 = vadd.f32 %v4968_v41, %v4880_v56  ;;  %v4810_v25 = vpop.f32.mrf.mxu1  ;;  %v4899_v16 = vpop.f32.mrf.mxu2 }
 0x4b7   :  { %v5032_v8 = vmax.f32 %v4969_v50, 0.0  ;;  %v4811_v50 = vadd.f32 %v9693_v2, %v4810_v25 }
 0x4b9   :  { %v5058_v35 = vpack.c.bf16 %v5032_v8, %v5031_v62  ;;  %5636 = vmatmul.msk.bf16.gmra.mxu3 %vm10821_vm1, %v4554_v32  ;;  %v5227_v62 = vld [vmem:[#allocation3 + $0x108] sm:$0xff]  ;;  %v4898_v8 = vadd.f32 %v4897_v49, %v4809_v57 }
 0x4bb   :  { %5651 = vmatmul.msk.bf16.gmra.mxu0 %vm10840_vm12, %v5058_v35  ;;  %v4900_v35 = vadd.f32 %v4899_v16, %v4811_v50 }
 0x4bc   :  { %v4971_v9 = vpop.f32.mrf.mxu3 }
 0x4bd   :  { %v4972_v38 = vadd.f32 %v4971_v9, %v4883_v61  ;;  %v4813_v23 = vpop.f32.mrf.mxu1  ;;  %v4902_v18 = vpop.f32.mrf.mxu2 }
 0x4bf   :  { %v5033_v26 = vmax.f32 %v4972_v38, 0.0 }
 0x4c4   :  { %v4973_v51 = vpop.f32.mrf.mxu3 }
 0x4c5   :  { %v4974_v19 = vadd.f32 %v4973_v51, %v4885_v45  ;;  %v4815_v46 = vpop.f32.mrf.mxu1  ;;  %v4904_v31 = vpop.f32.mrf.mxu2  ;;  %v5228_v45 = vld [vmem:[#allocation3 + $0x110] sm:$0xff] }
 0x4c7   :  { %v5034_v43 = vmax.f32 %v4974_v19, 0.0 }
 0x4c9   :  { %v5059_v17 = vpack.c.bf16 %v5034_v43, %v5033_v26  ;;  %5637 = vmatmul.msk.bf16.gmra.mxu3 %vm10841_vm2, %v4557_v33  ;;  %v4814_v26 = vadd.f32 %v9693_v2, %v4813_v23 }
 0x4cb   :  { %5652 = vmatmul.msk.bf16.gmra.mxu0 %vm10842_vm10, %v5059_v17  ;;  %v4816_v17 = vadd.f32 %v9693_v2, %v4815_v46  ;;  %v4903_v49 = vadd.f32 %v4902_v18, %v4814_v26 }
 0x4cc   :  { %v4976_v40 = vpop.f32.mrf.mxu3 }
 0x4cd   :  { %v4977_v44 = vadd.f32 %v4976_v40, %v4888_v54  ;;  %v4818_v32 = vpop.f32.mrf.mxu1  ;;  %v4907_v14 = vpop.f32.mrf.mxu2  ;;  %v4905_v54 = vadd.f32 %v4904_v31, %v4816_v17 }
 0x4cf   :  { %v5035_v48 = vmax.f32 %v4977_v44, 0.0 }
 0x4d4   :  { %v4978_v5 = vpop.f32.mrf.mxu3 }
 0x4d5   :  { %v4979_v58 = vadd.f32 %v4978_v5, %v4890_v13  ;;  %v4820_v19 = vpop.f32.mrf.mxu1  ;;  %v4909_v28 = vpop.f32.mrf.mxu2 }
 0x4d7   :  { %v5036_v55 = vmax.f32 %v4979_v58, 0.0 }
 0x4d9   :  { %v5060_v12 = vpack.c.bf16 %v5036_v55, %v5035_v48 }
 0x4db   :  { %5653 = vmatmul.msk.bf16.gmra.mxu0 %vm10843_vm11, %v5060_v12 }
 0x4dc   :  { %v4981_v27 = vpop.f32.mrf.mxu3 }
 0x4dd   :  { %v4982_v0 = vadd.f32 %v4981_v27, %v4893_v52  ;;  %v4823_v48 = vpop.f32.mrf.mxu1  ;;  %v5230_v27 = vld [vmem:[#allocation3 + $0x120] sm:$0xff]  ;;  %v4912_v22 = vpop.f32.mrf.mxu2 }
 0x4df   :  { %v5037_v36 = vmax.f32 %v4982_v0, 0.0 }
 0x4e4   :  { %v4983_v63 = vpop.f32.mrf.mxu3 }
 0x4e5   :  { %v4984_v30 = vadd.f32 %v4983_v63, %v4895_v3  ;;  %v4819_v3 = vadd.f32 %v9693_v2, %v4818_v32  ;;  %v4821_v63 = vadd.f32 %v9693_v2, %v4820_v19 }
 0x4e7   :  { %v5038_v37 = vmax.f32 %v4984_v30, 0.0  ;;  %v4825_v30 = vpop.f32.mrf.mxu1  ;;  %v4908_v46 = vadd.f32 %v4907_v14, %v4819_v3 }
 0x4e8   :  { %v5146_v15 = vpop.f32.mrf.mxu0 }
 0x4e9   :  { %v5061_v39 = vpack.c.bf16 %v5038_v37, %v5037_v36  ;;  %v5147_v4 = vadd.f32 %v9721_v47, %v5146_v15  ;;  %v5231_v37 = vld [vmem:[#allocation3 + $0x128] sm:$0xff] }
 0x4eb   :  { %v5258_v56 = vadd.f32 %v5226_v34, %v5147_v4  ;;  %5654 = vmatmul.msk.bf16.gmra.mxu0 %vm10844_vm14, %v5061_v39  ;;  %v4910_v34 = vadd.f32 %v4909_v28, %v4821_v63 }
 0x4ec   :  { %v4986_v41 = vpop.f32.mrf.mxu3 }
 0x4ed   :  { %v5290_v60 = vmax.f32 %v5258_v56, 0.0  ;;  %v4987_v24 = vadd.f32 %v4986_v41, %v4898_v8  ;;  %v4914_v56 = vpop.f32.mrf.mxu2 }
 0x4ef   :  { %5323 = vst [vmem:[#allocation6 + $0x100] sm:$0xff] %v5290_v60  ;;  %v5039_v61 = vmax.f32 %v4987_v24, 0.0  ;;  %v4828_v32 = vpop.f32.mrf.mxu1 }
 0x4f0   :  { %v5148_v53 = vpop.f32.mrf.mxu0 }
 0x4f1   :  { %v5149_v42 = vadd.f32 %v9721_v47, %v5148_v53 }
 0x4f3   :  { %v5259_v9 = vadd.f32 %v5227_v62, %v5149_v42  ;;  %v5232_v62 = vld [vmem:[#allocation3 + $0x130] sm:$0xff] }
 0x4f4   :  { %v4988_v6 = vpop.f32.mrf.mxu3 }
 0x4f5   :  { %v5291_v10 = vmax.f32 %v5259_v9, 0.0  ;;  %v4989_v7 = vadd.f32 %v4988_v6, %v4900_v35  ;;  %v4824_v9 = vadd.f32 %v9693_v2, %v4823_v48 }
 0x4f7   :  { %5324 = vst [vmem:[#allocation6 + $0x108] sm:$0xff] %v5291_v10  ;;  %v5040_v11 = vmax.f32 %v4989_v7, 0.0  ;;  %v4917_v10 = vpop.f32.mrf.mxu2  ;;  %v4826_v7 = vadd.f32 %v9693_v2, %v4825_v30 }
 0x4f8   :  { %v5151_v29 = vpop.f32.mrf.mxu0 }
 0x4f9   :  { %v5062_v38 = vpack.c.bf16 %v5040_v11, %v5039_v61  ;;  %v5152_v20 = vadd.f32 %v9721_v47, %v5151_v29  ;;  %v5233_v61 = vld [vmem:[#allocation3 + $0x138] sm:$0xff]  ;;  %v4913_v11 = vadd.f32 %v4912_v22, %v4824_v9 }
 0x4fb   :  { %v5260_v51 = vadd.f32 %v5228_v45, %v5152_v20  ;;  %5655 = vmatmul.msk.bf16.gmra.mxu0 %vm10845_vm5, %v5062_v38  ;;  %v4915_v45 = vadd.f32 %v4914_v56, %v4826_v7 }
 0x4fc   :  { %v4991_v33 = vpop.f32.mrf.mxu3 }
 0x4fd   :  { %v5292_v43 = vmax.f32 %v5260_v51, 0.0  ;;  %v4992_v13 = vadd.f32 %v4991_v33, %v4903_v49  ;;  %v4830_v51 = vpop.f32.mrf.mxu1 }
 0x4ff   :  { %5325 = vst [vmem:[#allocation6 + $0x110] sm:$0xff] %v5292_v43  ;;  %v5041_v55 = vmax.f32 %v4992_v13, 0.0  ;;  %v4919_v28 = vpop.f32.mrf.mxu2 }
 0x500   :  { %v5153_v40 = vpop.f32.mrf.mxu0 }
 0x501   :  { %v5154_v21 = vadd.f32 %v9721_v47, %v5153_v40 }
 0x503   :  { %v5261_v44 = vadd.f32 %v5229_v59, %v5154_v21  ;;  %v5234_v59 = vld [vmem:[#allocation3 + $0x140] sm:$0xff] }
 0x504   :  { %v4993_v25 = vpop.f32.mrf.mxu3 }
 0x505   :  { %v5293_v5 = vmax.f32 %v5261_v44, 0.0  ;;  %v4994_v58 = vadd.f32 %v4993_v25, %v4905_v54  ;;  %v4829_v44 = vadd.f32 %v9693_v2, %v4828_v32 }
 0x507   :  { %5326 = vst [vmem:[#allocation6 + $0x118] sm:$0xff] %v5293_v5  ;;  %v5042_v16 = vmax.f32 %v4994_v58, 0.0  ;;  %v4833_v5 = vpop.f32.mrf.mxu1  ;;  %v4831_v58 = vadd.f32 %v9693_v2, %v4830_v51 }
 0x508   :  { %v5156_v12 = vpop.f32.mrf.mxu0  ;;  %v4834_v56 = vadd.f32 %v9693_v2, %v4833_v5 }
 0x509   :  { %v5063_v1 = vpack.c.bf16 %v5042_v16, %v5041_v55  ;;  %v5157_v23 = vadd.f32 %v9721_v47, %v5156_v12  ;;  %v5235_v55 = vld [vmem:[#allocation3 + $0x148] sm:$0xff]  ;;  %v4918_v16 = vadd.f32 %v4917_v10, %v4829_v44 }
 0x50b   :  { %v5262_v52 = vadd.f32 %v5230_v27, %v5157_v23  ;;  %5656 = vmatmul.msk.bf16.gmra.mxu0 %vm10846_vm9, %v5063_v1  ;;  %v4922_v27 = vpop.f32.mrf.mxu2  ;;  %v4920_v1 = vadd.f32 %v4919_v28, %v4831_v58 }
 0x50c   :  { %v4996_v18 = vpop.f32.mrf.mxu3 }
 0x50d   :  { %v5294_v0 = vmax.f32 %v5262_v52, 0.0  ;;  %v4997_v39 = vadd.f32 %v4996_v18, %v4908_v46 }
 0x50f   :  { %5327 = vst [vmem:[#allocation6 + $0x120] sm:$0xff] %v5294_v0  ;;  %v5043_v60 = vmax.f32 %v4997_v39, 0.0  ;;  %v4835_v30 = vpop.f32.mrf.mxu1 }
 0x510   :  { %v5158_v36 = vpop.f32.mrf.mxu0 }
 0x511   :  { %v5159_v15 = vadd.f32 %v9721_v47, %v5158_v36 }
 0x513   :  { %v5263_v4 = vadd.f32 %v5231_v37, %v5159_v15  ;;  %v5236_v37 = vld [vmem:[#allocation3 + $0x150] sm:$0xff]  ;;  %v4924_v39 = vpop.f32.mrf.mxu2 }
 0x514   :  { %v4998_v31 = vpop.f32.mrf.mxu3 }
 0x515   :  { %v5295_v41 = vmax.f32 %v5263_v4, 0.0  ;;  %v4999_v57 = vadd.f32 %v4998_v31, %v4910_v34 }
 0x517   :  { %5328 = vst [vmem:[#allocation6 + $0x128] sm:$0xff] %v5295_v41  ;;  %v5044_v50 = vmax.f32 %v4999_v57, 0.0  ;;  %v4836_v41 = vadd.f32 %v9693_v2, %v4835_v30 }
 0x518   :  { %v5161_v53 = vpop.f32.mrf.mxu0 }
 0x519   :  { %v5064_v8 = vpack.c.bf16 %v5044_v50, %v5043_v60  ;;  %v5162_v42 = vadd.f32 %v9721_v47, %v5161_v53  ;;  %v5237_v60 = vld [vmem:[#allocation3 + $0x158] sm:$0xff]  ;;  %v4923_v50 = vadd.f32 %v4922_v27, %v4834_v56 }
 0x51b   :  { %v5264_v35 = vadd.f32 %v5232_v62, %v5162_v42  ;;  %5657 = vmatmul.msk.bf16.gmra.mxu0 %vm10847_vm15, %v5064_v8  ;;  %v4838_v62 = vpop.f32.mrf.mxu1  ;;  %v4925_v8 = vadd.f32 %v4924_v39, %v4836_v41 }
 0x51c   :  { %v5001_v24 = vpop.f32.mrf.mxu3  ;;  %v4839_v51 = vadd.f32 %v9693_v2, %v4838_v62 }
 0x51d   :  { %v5296_v6 = vmax.f32 %v5264_v35, 0.0  ;;  %v5002_v38 = vadd.f32 %v5001_v24, %v4913_v11 }
 0x51f   :  { %5329 = vst [vmem:[#allocation6 + $0x130] sm:$0xff] %v5296_v6  ;;  %v5045_v43 = vmax.f32 %v5002_v38, 0.0  ;;  %v4927_v6 = vpop.f32.mrf.mxu2 }
 0x520   :  { %v5163_v14 = vpop.f32.mrf.mxu0  ;;  %v4928_v28 = vadd.f32 %v4927_v6, %v4839_v51  ;;  %v5247_v6 = vld [vmem:[#allocation3 + $0x1a8] sm:$0xff]  ;;  %v5249_v51 = vld [vmem:[#allocation3 + $0x1b8] sm:$0xff] }
 0x521   :  { %v5164_v29 = vadd.f32 %v9721_v47, %v5163_v14 }
 0x523   :  { %v5265_v20 = vadd.f32 %v5233_v61, %v5164_v29  ;;  %v5238_v61 = vld [vmem:[#allocation3 + $0x160] sm:$0xff]  ;;  %v4840_v38 = vpop.f32.mrf.mxu1 }
 0x524   :  { %v5003_v19 = vpop.f32.mrf.mxu3 }
 0x525   :  { %v5297_v33 = vmax.f32 %v5265_v20, 0.0  ;;  %v5004_v26 = vadd.f32 %v5003_v19, %v4915_v45 }
 0x527   :  { %5330 = vst [vmem:[#allocation6 + $0x138] sm:$0xff] %v5297_v33  ;;  %v5046_v17 = vmax.f32 %v5004_v26, 0.0  ;;  %v4841_v33 = vadd.f32 %v9693_v2, %v4840_v38  ;;  %v4929_v26 = vpop.f32.mrf.mxu2 }
 0x528   :  { %v5166_v40 = vpop.f32.mrf.mxu0 }
 0x529   :  { %v5065_v49 = vpack.c.bf16 %v5046_v17, %v5045_v43  ;;  %v5167_v21 = vadd.f32 %v9721_v47, %v5166_v40  ;;  %v5239_v17 = vld [vmem:[#allocation3 + $0x168] sm:$0xff] }
 0x52b   :  { %v5266_v54 = vadd.f32 %v5234_v59, %v5167_v21  ;;  %5658 = vmatmul.msk.bf16.gmra.mxu0 %vm10848_vm0, %v5065_v49  ;;  %v4930_v59 = vadd.f32 %v4929_v26, %v4841_v33 }
 0x52c   :  { %v5006_v13 = vpop.f32.mrf.mxu3 }
 0x52d   :  { %v5298_v25 = vmax.f32 %v5266_v54, 0.0  ;;  %v5007_v23 = vadd.f32 %v5006_v13, %v4918_v16 }
 0x52f   :  { %5331 = vst [vmem:[#allocation6 + $0x140] sm:$0xff] %v5298_v25  ;;  %v5047_v0 = vmax.f32 %v5007_v23, 0.0 }
 0x530   :  { %v5168_v48 = vpop.f32.mrf.mxu0 }
 0x531   :  { %v5169_v12 = vadd.f32 %v9721_v47, %v5168_v48  ;;  %v5240_v48 = vld [vmem:[#allocation3 + $0x170] sm:$0xff] }
 0x533   :  { %v5267_v22 = vadd.f32 %v5235_v55, %v5169_v12 }
 0x534   :  { %v5008_v52 = vpop.f32.mrf.mxu3 }
 0x535   :  { %v5299_v18 = vmax.f32 %v5267_v22, 0.0  ;;  %v5009_v3 = vadd.f32 %v5008_v52, %v4920_v1  ;;  %v5241_v1 = vld [vmem:[#allocation3 + $0x178] sm:$0xff] }
 0x537   :  { %5332 = vst [vmem:[#allocation6 + $0x148] sm:$0xff] %v5299_v18  ;;  %v5048_v63 = vmax.f32 %v5009_v3, 0.0  ;;  %v5242_v3 = vld [vmem:[#allocation3 + $0x180] sm:$0xff] }
 0x538   :  { %v5171_v36 = vpop.f32.mrf.mxu0 }
 0x539   :  { %v5066_v46 = vpack.c.bf16 %v5048_v63, %v5047_v0  ;;  %v5172_v15 = vadd.f32 %v9721_v47, %v5171_v36 }
 0x53b   :  { %v5268_v34 = vadd.f32 %v5236_v37, %v5172_v15  ;;  %5659 = vmatmul.msk.bf16.gmra.mxu0 %vm10849_vm6, %v5066_v46  ;;  %v5243_v37 = vld [vmem:[#allocation3 + $0x188] sm:$0xff] }
 0x53c   :  { %v5011_v4 = vpop.f32.mrf.mxu3 }
 0x53d   :  { %v5300_v31 = vmax.f32 %v5268_v34, 0.0  ;;  %v5012_v42 = vadd.f32 %v5011_v4, %v4923_v50  ;;  %v5244_v4 = vld [vmem:[#allocation3 + $0x190] sm:$0xff] }
 0x53f   :  { %5333 = vst [vmem:[#allocation6 + $0x150] sm:$0xff] %v5300_v31  ;;  %v5049_v10 = vmax.f32 %v5012_v42, 0.0  ;;  %v5246_v42 = vld [vmem:[#allocation3 + $0x1a0] sm:$0xff] }
 0x540   :  { %v5173_v57 = vpop.f32.mrf.mxu0 }
 0x541   :  { %v5174_v53 = vadd.f32 %v9721_v47, %v5173_v57 }
 0x543   :  { %v5269_v32 = vadd.f32 %v5237_v60, %v5174_v53  ;;  %v5245_v60 = vld [vmem:[#allocation3 + $0x198] sm:$0xff] }
 0x544   :  { %v5013_v35 = vpop.f32.mrf.mxu3 }
 0x545   :  { %v5301_v24 = vmax.f32 %v5269_v32, 0.0  ;;  %v5014_v9 = vadd.f32 %v5013_v35, %v4925_v8 }
 0x547   :  { %5334 = vst [vmem:[#allocation6 + $0x158] sm:$0xff] %v5301_v24  ;;  %v5050_v7 = vmax.f32 %v5014_v9, 0.0 }
 0x548   :  { %v5176_v14 = vpop.f32.mrf.mxu0 }
 0x549   :  { %v5067_v11 = vpack.c.bf16 %v5050_v7, %v5049_v10  ;;  %v5177_v29 = vadd.f32 %v9721_v47, %v5176_v14 }
 0x54b   :  { %v5270_v45 = vadd.f32 %v5238_v61, %v5177_v29  ;;  %5660 = vmatmul.msk.bf16.gmra.mxu0 %vm10850_vm8, %v5067_v11  ;;  %v5248_v11 = vld [vmem:[#allocation3 + $0x1b0] sm:$0xff] }
 0x54c   :  { %v5016_v20 = vpop.f32.mrf.mxu3 }
 0x54d   :  { %v5302_v19 = vmax.f32 %v5270_v45, 0.0  ;;  %v5017_v49 = vadd.f32 %v5016_v20, %v4928_v28 }
 0x54f   :  { %5335 = vst [vmem:[#allocation6 + $0x160] sm:$0xff] %v5302_v19  ;;  %v5051_v25 = vmax.f32 %v5017_v49, 0.0 }
 0x550   :  { %v5178_v43 = vpop.f32.mrf.mxu0 }
 0x551   :  { %v5179_v40 = vadd.f32 %v9721_v47, %v5178_v43 }
 0x553   :  { %v5271_v21 = vadd.f32 %v5239_v17, %v5179_v40  ;;  %v5250_v17 = vld [vmem:[#allocation3 + $0x1c0] sm:$0xff] }
 0x554   :  { %v5018_v54 = vpop.f32.mrf.mxu3 }
 0x555   :  { %v5303_v13 = vmax.f32 %v5271_v21, 0.0  ;;  %v5019_v44 = vadd.f32 %v5018_v54, %v4930_v59  ;;  %v5251_v21 = vld [vmem:[#allocation3 + $0x1c8] sm:$0xff] }
 0x557   :  { %5336 = vst [vmem:[#allocation6 + $0x168] sm:$0xff] %v5303_v13  ;;  %v5052_v5 = vmax.f32 %v5019_v44, 0.0 }
 0x558   :  { %v5181_v58 = vpop.f32.mrf.mxu0 }
 0x559   :  { %v5068_v55 = vpack.c.bf16 %v5052_v5, %v5051_v25  ;;  %v5182_v2 = vadd.f32 %v9721_v47, %v5181_v58  ;;  %v5252_v5 = vld [vmem:[#allocation3 + $0x1d0] sm:$0xff] }
 0x55b   :  { %v5272_v16 = vadd.f32 %v5240_v48, %v5182_v2  ;;  %5661 = vmatmul.msk.bf16.gmra.mxu0 %vm10851_vm13, %v5068_v55 }
 0x55d   :  { %v5304_v12 = vmax.f32 %v5272_v16, 0.0  ;;  %v5253_v16 = vld [vmem:[#allocation3 + $0x1d8] sm:$0xff] }
 0x55f   :  { %5337 = vst [vmem:[#allocation6 + $0x170] sm:$0xff] %v5304_v12 }
 0x560   :  { %v5183_v27 = vpop.f32.mrf.mxu0 }
 0x561   :  { %v5184_v23 = vadd.f32 %v9721_v47, %v5183_v27 }
 0x563   :  { %v5273_v22 = vadd.f32 %v5241_v1, %v5184_v23 }
 0x565   :  { %v5305_v52 = vmax.f32 %v5273_v22, 0.0  ;;  %v5254_v22 = vld [vmem:[#allocation3 + $0x1e0] sm:$0xff] }
 0x567   :  { %5338 = vst [vmem:[#allocation6 + $0x178] sm:$0xff] %v5305_v52 }
 0x568   :  { %v5186_v18 = vpop.f32.mrf.mxu0 }
 0x569   :  { %v5187_v0 = vadd.f32 %v9721_v47, %v5186_v18 }
 0x56b   :  { %v5274_v63 = vadd.f32 %v5242_v3, %v5187_v0 }
 0x56d   :  { %v5306_v30 = vmax.f32 %v5274_v63, 0.0  ;;  %v5255_v63 = vld [vmem:[#allocation3 + $0x1e8] sm:$0xff] }
 0x56f   :  { %5339 = vst [vmem:[#allocation6 + $0x180] sm:$0xff] %v5306_v30 }
 0x570   :  { %v5188_v36 = vpop.f32.mrf.mxu0 }
 0x571   :  { %v5189_v46 = vadd.f32 %v9721_v47, %v5188_v36 }
 0x573   :  { %v5275_v15 = vadd.f32 %v5243_v37, %v5189_v46 }
 0x575   :  { %v5307_v34 = vmax.f32 %v5275_v15, 0.0  ;;  %v5256_v15 = vld [vmem:[#allocation3 + $0x1f0] sm:$0xff] }
 0x577   :  { %5340 = vst [vmem:[#allocation6 + $0x188] sm:$0xff] %v5307_v34 }
 0x578   :  { %v5191_v39 = vpop.f32.mrf.mxu0 }
 0x579   :  { %v5192_v56 = vadd.f32 %v9721_v47, %v5191_v39 }
 0x57b   :  { %v5276_v31 = vadd.f32 %v5244_v4, %v5192_v56 }
 0x57d   :  { %v5308_v41 = vmax.f32 %v5276_v31, 0.0  ;;  %v5257_v31 = vld [vmem:[#allocation3 + $0x1f8] sm:$0xff] }
 0x57f   :  { %5341 = vst [vmem:[#allocation6 + $0x190] sm:$0xff] %v5308_v41 }
 0x580   :  { %v5193_v57 = vpop.f32.mrf.mxu0 }
 0x581   :  { %v5194_v50 = vadd.f32 %v9721_v47, %v5193_v57 }
 0x583   :  { %v5277_v53 = vadd.f32 %v5245_v60, %v5194_v50 }
 0x585   :  { %v5309_v62 = vmax.f32 %v5277_v53, 0.0 }
 0x587   :  { %5342 = vst [vmem:[#allocation6 + $0x198] sm:$0xff] %v5309_v62 }
 0x588   :  { %v5196_v8 = vpop.f32.mrf.mxu0 }
 0x589   :  { %v5197_v32 = vadd.f32 %v9721_v47, %v5196_v8 }
 0x58b   :  { %v5278_v35 = vadd.f32 %v5246_v42, %v5197_v32 }
 0x58d   :  { %v5310_v24 = vmax.f32 %v5278_v35, 0.0 }
 0x58f   :  { %5343 = vst [vmem:[#allocation6 + $0x1a0] sm:$0xff] %v5310_v24 }
 0x590   :  { %v5198_v9 = vpop.f32.mrf.mxu0 }
 0x591   :  { %v5199_v10 = vadd.f32 %v9721_v47, %v5198_v9 }
 0x593   :  { %v5279_v7 = vadd.f32 %v5247_v6, %v5199_v10 }
 0x595   :  { %v5311_v14 = vmax.f32 %v5279_v7, 0.0 }
 0x597   :  { %5344 = vst [vmem:[#allocation6 + $0x1a8] sm:$0xff] %v5311_v14 }
 0x598   :  { %v5201_v61 = vpop.f32.mrf.mxu0 }
 0x599   :  { %v5202_v29 = vadd.f32 %v9721_v47, %v5201_v61 }
 0x59b   :  { %v5280_v45 = vadd.f32 %v5248_v11, %v5202_v29 }
 0x59d   :  { %v5312_v38 = vmax.f32 %v5280_v45, 0.0 }
 0x59f   :  { %5345 = vst [vmem:[#allocation6 + $0x1b0] sm:$0xff] %v5312_v38 }
 0x5a0   :  { %v5203_v20 = vpop.f32.mrf.mxu0 }
 0x5a1   :  { %v5204_v19 = vadd.f32 %v9721_v47, %v5203_v20 }
 0x5a3   :  { %v5281_v33 = vadd.f32 %v5249_v51, %v5204_v19 }
 0x5a5   :  { %v5313_v26 = vmax.f32 %v5281_v33, 0.0 }
 0x5a7   :  { %5346 = vst [vmem:[#allocation6 + $0x1b8] sm:$0xff] %v5313_v26 }
 0x5a8   :  { %v5206_v43 = vpop.f32.mrf.mxu0 }
 0x5a9   :  { %v5207_v28 = vadd.f32 %v9721_v47, %v5206_v43 }
 0x5ab   :  { %v5282_v40 = vadd.f32 %v5250_v17, %v5207_v28 }
 0x5ad   :  { %v5314_v59 = vmax.f32 %v5282_v40, 0.0 }
 0x5af   :  { %5347 = vst [vmem:[#allocation6 + $0x1c0] sm:$0xff] %v5314_v59 }
 0x5b0   :  { %v5208_v49 = vpop.f32.mrf.mxu0 }
 0x5b1   :  { %v5209_v54 = vadd.f32 %v9721_v47, %v5208_v49 }
 0x5b3   :  { %v5283_v13 = vadd.f32 %v5251_v21, %v5209_v54 }
 0x5b5   :  { %v5315_v44 = vmax.f32 %v5283_v13, 0.0 }
 0x5b7   :  { %5348 = vst [vmem:[#allocation6 + $0x1c8] sm:$0xff] %v5315_v44 }
 0x5b8   :  { %v5211_v25 = vpop.f32.mrf.mxu0 }
 0x5b9   :  { %v5212_v58 = vadd.f32 %v9721_v47, %v5211_v25 }
 0x5bb   :  { %v5284_v48 = vadd.f32 %v5252_v5, %v5212_v58 }
 0x5bd   :  { %v5316_v55 = vmax.f32 %v5284_v48, 0.0 }
 0x5bf   :  { %5349 = vst [vmem:[#allocation6 + $0x1d0] sm:$0xff] %v5316_v55 }
 0x5c0   :  { %v5213_v2 = vpop.f32.mrf.mxu0 }
 0x5c1   :  { %v5214_v12 = vadd.f32 %v9721_v47, %v5213_v2 }
 0x5c3   :  { %v5285_v27 = vadd.f32 %v5253_v16, %v5214_v12 }
 0x5c5   :  { %v5317_v1 = vmax.f32 %v5285_v27, 0.0 }
 0x5c7   :  { %5350 = vst [vmem:[#allocation6 + $0x1d8] sm:$0xff] %v5317_v1 }
 0x5c8   :  { %v5216_v23 = vpop.f32.mrf.mxu0 }
 0x5c9   :  { %v5217_v52 = vadd.f32 %v9721_v47, %v5216_v23 }
 0x5cb   :  { %v5286_v18 = vadd.f32 %v5254_v22, %v5217_v52 }
 0x5cd   :  { %v5318_v3 = vmax.f32 %v5286_v18, 0.0 }
 0x5cf   :  { %5351 = vst [vmem:[#allocation6 + $0x1e0] sm:$0xff] %v5318_v3 }
 0x5d0   :  { %v5218_v0 = vpop.f32.mrf.mxu0 }
 0x5d1   :  { %v5219_v30 = vadd.f32 %v9721_v47, %v5218_v0 }
 0x5d3   :  { %v5287_v36 = vadd.f32 %v5255_v63, %v5219_v30 }
 0x5d5   :  { %v5319_v37 = vmax.f32 %v5287_v36, 0.0 }
 0x5d7   :  { %5352 = vst [vmem:[#allocation6 + $0x1e8] sm:$0xff] %v5319_v37 }
 0x5d8   :  { %v5221_v46 = vpop.f32.mrf.mxu0 }
 0x5d9   :  { %v5222_v34 = vadd.f32 %v9721_v47, %v5221_v46 }
 0x5db   :  { %v5288_v39 = vadd.f32 %v5256_v15, %v5222_v34 }
 0x5dd   :  { %v5320_v4 = vmax.f32 %v5288_v39, 0.0 }
 0x5df   :  { %5353 = vst [vmem:[#allocation6 + $0x1f0] sm:$0xff] %v5320_v4 }
 0x5e0   :  { %v5223_v56 = vpop.f32.mrf.mxu0 }
 0x5e1   :  { %v5224_v41 = vadd.f32 %v9721_v47, %v5223_v56 }
 0x5e3   :  { %v5289_v57 = vadd.f32 %v5257_v31, %v5224_v41 }
 0x5e5   :  { %v5321_v60 = vmax.f32 %v5289_v57, 0.0 }
 0x5e7   :  { %5354 = vst [vmem:[#allocation6 + $0x1f8] sm:$0xff] %v5321_v60 }
 0x5e8   :  { %5367 = dma.vmem_to_hbm [thread:$0]  %s5360_s19, 8192, %s5362_s21, [#allocation5], %s6893_s29, %s6893_s29, %s6894_s30  }
 0x5e9   :  { %6890 = dma.done.wait [#allocation5], 8192  }
 0x5ea   :  { %6891 = vsyncadd [#allocation5], 4294959104 }
 0x5eb   :  { %5372 = vsyncpa [#allocation4], 1 }
 0x5ec   :  { %5373 = vsyncpa [#allocation5], 1 }

</bundles_post_ra>
